<compile_context>
chip_gen: v7x
topology: tpu7x:2x2x1
jax: 0.10.0
libtpu: 0.0.40
codegen_flags: <defaults>
</compile_context>

<pallas_src>
import math

import numpy as np
import jax
import jax.numpy as jnp
from jax.experimental import pallas as pl
from jax.experimental.pallas import tpu as pltpu

EPS = 1e-5
LEAKY = 0.1
G2 = math.sqrt(2.0)


# ----------------------------------------------------------------------------
# In-kernel helpers
# ----------------------------------------------------------------------------
def _leaky(y):
    return jnp.where(y >= 0.0, y, LEAKY * y)


def _res_identity(x, w1, w2, sh1, sh2):
    """out = LeakyReLU(BN(conv2(BN(conv1(x))))) + x   (1x1 convs, BN folded)."""
    xb = x.astype(jnp.bfloat16)
    y1 = jnp.dot(xb, w1, preferred_element_type=jnp.float32) + sh1
    y2 = jnp.dot(y1.astype(jnp.bfloat16), w2, preferred_element_type=jnp.float32) + sh2
    return _leaky(y2) + x


def _res_down(x, w1s, w2, sh1s, sh2, cout):
    """Down ResBlock.  w1s = [w1 | ws] (main conv1 and shortcut conv fused into
    one dot).  Both branches are computed at pre-pool resolution, pooled by a
    max over four contiguous row quarters (slab-major layout), activated and
    added — exactly residual(x) + shortcut(x) of the reference."""
    xb = x.astype(jnp.bfloat16)
    yc = jnp.dot(xb, w1s, preferred_element_type=jnp.float32) + sh1s     # (M, 2*cout)
    y1 = yc[:, :cout]                                                    # main branch
    ys = yc[:, cout:]                                                    # shortcut branch
    y2 = jnp.dot(y1.astype(jnp.bfloat16), w2, preferred_element_type=jnp.float32) + sh2

    m = x.shape[0] // 4                                                  # pooled rows

    def pool(a):                                                         # 2x2 maxpool
        return jnp.maximum(jnp.maximum(a[0 * m:1 * m], a[1 * m:2 * m]),
                           jnp.maximum(a[2 * m:3 * m], a[3 * m:4 * m]))

    # maxpool commutes with the (monotone) LeakyReLU, so pool first.
    return _leaky(pool(y2)) + _leaky(pool(ys))


def _trunk_kernel(x_ref,
                  stw_ref, stsh_ref,
                  w1a_ref, w2a_ref, sh1a_ref, sh2a_ref,      # rb1 (identity)
                  w1b_ref, w2b_ref, sh1b_ref, sh2b_ref,      # rb2 (down, w1=[w1|ws])
                  w1c_ref, w2c_ref, sh1c_ref, sh2c_ref,      # rb3 (identity)
                  w1d_ref, w2d_ref, sh1d_ref, sh2d_ref,      # rb4 (down, w1=[w1|ws])
                  o_ref):
    """Whole conv trunk for ONE image per grid step; everything stays in VMEM."""
    # Stem: conv3x3 (block-diag over the four 2x2 pool offsets) + folded BN +
    # 2x2 maxpool + LeakyReLU.  Scale is folded into the weight, so the max
    # over the four 128-lane slices commutes with the (+shift, LeakyReLU) tail.
    y = jnp.dot(x_ref[...], stw_ref[...], preferred_element_type=jnp.float32)   # (256,512)
    y = jnp.maximum(jnp.maximum(y[:, 0:128], y[:, 128:256]),
                    jnp.maximum(y[:, 256:384], y[:, 384:512]))
    x = _leaky(y + stsh_ref[...])                                                # (256,128)

    x = _res_identity(x, w1a_ref[...], w2a_ref[...], sh1a_ref[...], sh2a_ref[...])
    x = _res_down(x, w1b_ref[...], w2b_ref[...], sh1b_ref[...], sh2b_ref[...], 128)  # (64,128)
    x = _res_identity(x, w1c_ref[...], w2c_ref[...], sh1c_ref[...], sh2c_ref[...])
    x = _res_down(x, w1d_ref[...], w2d_ref[...], sh1d_ref[...], sh2d_ref[...], 256)  # (16,256)

    o_ref[...] = x.astype(o_ref.dtype)


def _head_kernel(x_ref, w1_ref, sh1_ref, w2_ref, sh2_ref, o_ref):
    """fc1 + folded BN1d + LeakyReLU + fc2, fused; fc1 weight is VMEM-resident."""
    h = jnp.dot(x_ref[...], w1_ref[...], preferred_element_type=jnp.float32) + sh1_ref[...]
    h = _leaky(h)
    o = jnp.dot(h.astype(jnp.bfloat16), w2_ref[...],
                preferred_element_type=jnp.float32) + sh2_ref[...]
    o_ref[...] = o


# ----------------------------------------------------------------------------
# pallas_call wrappers
# ----------------------------------------------------------------------------
def conv_trunk(patches, p):
    """patches: (6N*256, 36) bf16 -> (6N*16, 256) bf16 (per-image 4x4x256 features)."""
    m, kdim = patches.shape
    b6 = m // 256

    wargs = [p["st_w"], p["st_sh"]]
    for name in ("rb1", "rb2", "rb3", "rb4"):
        rb = p[name]
        wargs += [rb["w1"], rb["w2"], rb["sh1"], rb["sh2"]]

    in_specs = [pl.BlockSpec((256, kdim), lambda i: (i, 0))]
    in_specs += [pl.BlockSpec(a.shape, lambda i: (0, 0)) for a in wargs]

    return pl.pallas_call(
        _trunk_kernel,
        out_shape=jax.ShapeDtypeStruct((b6 * 16, 256), jnp.bfloat16),
        grid_spec=pltpu.PrefetchScalarGridSpec(
            num_scalar_prefetch=0,
            grid=(b6,),
            in_specs=in_specs,
            out_specs=pl.BlockSpec((16, 256), lambda i: (i, 0)),
        ),
        # NOTE: on v7x, pltpu.CORE_PARALLEL would split this axis across the
        # two TensorCores; "parallel" is kept here for portability.
        compiler_params=pltpu.CompilerParams(
            dimension_semantics=("parallel",),
            vmem_limit_bytes=32 << 20),
    )(patches, *wargs)


def fc_head(x, w1, sh1, w2, sh2):
    n, k = x.shape
    if n % 8 == 0 and n > 64:
        bm = 64
        while n % bm:
            bm //= 2
    else:
        bm = n                       # small / odd batch: single full-extent block
    steps = n // bm
    return pl.pallas_call(
        _head_kernel,
        out_shape=jax.ShapeDtypeStruct((n, w2.shape[1]), jnp.float32),
        grid_spec=pltpu.PrefetchScalarGridSpec(
            num_scalar_prefetch=0,
            grid=(steps,),
            in_specs=[
                pl.BlockSpec((bm, k), lambda i: (i, 0)),
                pl.BlockSpec(w1.shape, lambda i: (0, 0)),
                pl.BlockSpec(sh1.shape, lambda i: (0, 0)),
                pl.BlockSpec(w2.shape, lambda i: (0, 0)),
                pl.BlockSpec(sh2.shape, lambda i: (0, 0)),
            ],
            out_specs=pl.BlockSpec((bm, w2.shape[1]), lambda i: (i, 0)),
        ),
        compiler_params=pltpu.CompilerParams(
            dimension_semantics=("parallel",),
            vmem_limit_bytes=40 << 20),
    )(x, w1, sh1, w2, sh2)


# ----------------------------------------------------------------------------
# Static layout tables (hierarchical "pool-friendly" row order)
#   idx256(h16,w16) = hb0*128 + wb0*64 + hb1*32 + wb1*16 + h4*4 + w4
# so every 2x2 pooling step is a max over four contiguous row quarters.
# ----------------------------------------------------------------------------
def build_stem_patches(x_imgs):
    """x_imgs: (B6, 32, 32) f32 -> (B6*256, 36) bf16 im2col patches.

    Row p of an image = pooled 16x16 position in the hierarchical order above;
    the 36 columns are [stem 2x2 pool-offset s (4)] x [3x3 tap t (9)]."""
    b6 = x_imgs.shape[0]
    xpad = jnp.pad(x_imgs, ((0, 0), (1, 1), (1, 1)))                     # (B6,34,34)
    # views[oh][ow][:, h16, w16] = xpad[:, 2*h16+oh, 2*w16+ow]
    views = [[xpad[:, oh:oh + 31:2, ow:ow + 31:2] for ow in range(4)] for oh in range(4)]
    cols = []
    for s in range(4):                       # stem pool-window offset
        dh, dw = s // 2, s % 2
        for t in range(9):                   # 3x3 tap
            th, tw = t // 3, t % 3
            cols.append(views[dh + th][dw + tw])
    pr = jnp.stack(cols, axis=-1)                                         # (B6,16,16,36)
    # reorder 16x16 raster -> hierarchical order (pure reshape/transpose)
    pr = pr.reshape(b6, 4, 2, 2, 4, 2, 2, 36)          # (b6,h4,hb1,hb0,w4,wb1,wb0,36)
    pr = pr.transpose(0, 3, 6, 2, 5, 1, 4, 7)          # (b6,hb0,wb0,hb1,wb1,h4,w4,36)
    return pr.reshape(b6 * 256, 36).astype(jnp.bfloat16)


def _build_fc_perm():
    """fc1 row permutation folding both static flatten reorders:
    new row k = path*4096 + i16*256 + c  <-  PyTorch row path*4096 + c*16 + i16."""
    perm = np.zeros(6 * 4096, np.int64)
    for path in range(6):
        for i16 in range(16):
            for c in range(256):
                perm[path * 4096 + i16 * 256 + c] = path * 4096 + c * 16 + i16
    return perm


# ----------------------------------------------------------------------------
# Parameter construction (deterministic, synthetic; BN folded, bf16, padded)
# ----------------------------------------------------------------------------
def _xavier(key, shape, gain=1.0):
    fan_in, fan_out = shape
    a = gain * math.sqrt(6.0 / (fan_in + fan_out))
    return jax.random.uniform(key, shape, jnp.float32, -a, a)


def _pad2(w, rpad, cpad):
    r, c = w.shape
    return jnp.pad(w, ((0, rpad - r), (0, cpad - c)))


def _rb_params(key, cin, cout, down, cin_pad, cout_pad):
    """Folded-BN ResBlock params.  For down blocks, w1/sh1 are the fused
    [conv1 | shortcut-conv] weight / shift (one N=2*cout dot in the kernel)."""
    k1, k2, k3 = jax.random.split(key, 3)
    s = 1.0 / math.sqrt(1.0 + EPS)                      # eval-mode BN fold
    w1 = _pad2(_xavier(k1, (cin, cout), G2) * s, cin_pad, cout_pad)
    w2 = _pad2(_xavier(k2, (cout, cout), G2) * s, cout_pad, cout_pad)
    p = {"w2": w2.astype(jnp.bfloat16),
         "sh2": jnp.zeros((1, cout_pad), jnp.float32)}
    if cin != cout or down:
        ws = _pad2(_xavier(k3, (cin, cout), 1.0) * s, cin_pad, cout_pad)
        p["w1"] = jnp.concatenate([w1, ws], axis=1).astype(jnp.bfloat16)
        p["sh1"] = jnp.zeros((1, 2 * cout_pad), jnp.float32)
    else:
        p["w1"] = w1.astype(jnp.bfloat16)
        p["sh1"] = jnp.zeros((1, cout_pad), jnp.float32)
    return p


def init_params(key):
    ks = jax.random.split(key, 8)
    s = 1.0 / math.sqrt(1.0 + EPS)
    p = {}

    # Stem conv1_1: Conv2d(1,64,3,p=1)+BN+LeakyReLU+MaxPool2 (shared by all 6 paths).
    w_st = _xavier(ks[0], (9, 64), 1.0) * s
    w_st = jnp.pad(w_st, ((0, 0), (0, 64)))                       # cout 64 -> 128
    blk = jnp.zeros((36, 512), jnp.float32)
    for q in range(4):                                            # block-diag over offsets
        blk = blk.at[q * 9:(q + 1) * 9, q * 128:(q + 1) * 128].set(w_st)
    p["st_w"] = blk.astype(jnp.bfloat16)
    p["st_sh"] = jnp.zeros((1, 128), jnp.float32)

    p["rb1"] = _rb_params(ks[1], 64, 64, False, 128, 128)
    p["rb2"] = _rb_params(ks[2], 64, 128, True, 128, 128)
    p["rb3"] = _rb_params(ks[3], 128, 128, False, 128, 128)
    p["rb4"] = _rb_params(ks[4], 128, 256, True, 128, 256)

    # fc head: Linear(24576,120)+BN1d(120)+LeakyReLU+Linear(120,2), BN folded,
    # flatten permutations folded into fc1 rows, 120 padded to 128 lanes.
    fc1 = _xavier(ks[5], (256 * 4 * 4 * 6, 120), 1.0) * s
    fc1 = fc1[_build_fc_perm(), :]
    p["fc1_w"] = jnp.pad(fc1, ((0, 0), (0, 8))).astype(jnp.bfloat16)      # (24576,128)
    p["fc1_sh"] = jnp.zeros((1, 128), jnp.float32)
    fc2 = _xavier(ks[6], (120, 2), 1.0)
    p["fc2_w"] = jnp.pad(fc2, ((0, 8), (0, 0))).astype(jnp.bfloat16)      # (128,2)
    p["fc2_sh"] = jnp.zeros((1, 2), jnp.float32)
    return p


# ----------------------------------------------------------------------------
# Model forward
# ----------------------------------------------------------------------------
@jax.jit
def forward(params, x, y, z, p4, p5, p6):
    n = x.shape[0]
    assert x.shape[1:] == (1, 32, 32), x.shape
    # Sample-major interleave (img = n*6 + path) so the trunk output reshapes
    # into per-sample fc rows for free (permutation folded into fc1_w).
    xb = jnp.stack([x, y, z, p4, p5, p6], axis=1).reshape(n * 6, 32, 32)
    xb = xb.astype(jnp.float32)

    patches = build_stem_patches(xb)                      # (6N*256, 36) bf16
    feats = conv_trunk(patches, params)                   # (6N*16, 256) bf16
    feats = feats.reshape(n, 6 * 16 * 256)                # (N, 24576), free reshape

    return fc_head(feats, params["fc1_w"], params["fc1_sh"],
                   params["fc2_w"], params["fc2_sh"])     # (N, 2) f32


# ----------------------------------------------------------------------------
if __name__ == "__main__":
    key = jax.random.PRNGKey(0)
    pkey, *ikeys = jax.random.split(key, 7)
    params = init_params(pkey)

    # Input shapes (NCHW, PyTorch convention): (batch=2, 1, 32, 32);
    # 32x32 yields the 256*4*4 per-path feature that the fc head expects.
    ins = [jax.random.normal(k, (2, 1, 32, 32), jnp.float32) for k in ikeys]

    out = forward(params, *ins)
    out = jax.block_until_ready(out)
    assert out.shape == (2, 2), out.shape
    assert bool(jnp.all(jnp.isfinite(out)))
    print("KERNEL_OK")
</pallas_src>

<mosaic_0001>
module attributes {stable_mosaic.version = 11 : i64} {
  func.func @_trunk_kernel(%arg0: i32, %arg1: memref<256x36xbf16, #tpu.memory_space<vmem>>, %arg2: memref<36x512xbf16, #tpu.memory_space<vmem>>, %arg3: memref<1x128xf32, #tpu.memory_space<vmem>>, %arg4: memref<128x128xbf16, #tpu.memory_space<vmem>>, %arg5: memref<128x128xbf16, #tpu.memory_space<vmem>>, %arg6: memref<1x128xf32, #tpu.memory_space<vmem>>, %arg7: memref<1x128xf32, #tpu.memory_space<vmem>>, %arg8: memref<128x256xbf16, #tpu.memory_space<vmem>>, %arg9: memref<128x128xbf16, #tpu.memory_space<vmem>>, %arg10: memref<1x256xf32, #tpu.memory_space<vmem>>, %arg11: memref<1x128xf32, #tpu.memory_space<vmem>>, %arg12: memref<128x128xbf16, #tpu.memory_space<vmem>>, %arg13: memref<128x128xbf16, #tpu.memory_space<vmem>>, %arg14: memref<1x128xf32, #tpu.memory_space<vmem>>, %arg15: memref<1x128xf32, #tpu.memory_space<vmem>>, %arg16: memref<128x512xbf16, #tpu.memory_space<vmem>>, %arg17: memref<256x256xbf16, #tpu.memory_space<vmem>>, %arg18: memref<1x512xf32, #tpu.memory_space<vmem>>, %arg19: memref<1x256xf32, #tpu.memory_space<vmem>>, %arg20: memref<16x256xbf16, #tpu.memory_space<vmem>>) attributes {dimension_semantics = [#tpu.dimension_semantics<parallel>], iteration_bounds = array<i64: 12>, scalar_prefetch = 0 : i64, scratch_operands = 0 : i64, tpu.core_type = #tpu.core_type<tc>, window_params = [{transform_indices = @transform_0, window_bounds = array<i64: 256, 36>}, {pipeline_mode = #tpu.pipeline_mode<synchronous>, transform_indices = @transform_1, window_bounds = array<i64: 36, 512>}, {pipeline_mode = #tpu.pipeline_mode<synchronous>, transform_indices = @transform_2, window_bounds = array<i64: 1, 128>}, {pipeline_mode = #tpu.pipeline_mode<synchronous>, transform_indices = @transform_3, window_bounds = array<i64: 128, 128>}, {pipeline_mode = #tpu.pipeline_mode<synchronous>, transform_indices = @transform_4, window_bounds = array<i64: 128, 128>}, {pipeline_mode = #tpu.pipeline_mode<synchronous>, transform_indices = @transform_5, window_bounds = array<i64: 1, 128>}, {pipeline_mode = #tpu.pipeline_mode<synchronous>, transform_indices = @transform_6, window_bounds = array<i64: 1, 128>}, {pipeline_mode = #tpu.pipeline_mode<synchronous>, transform_indices = @transform_7, window_bounds = array<i64: 128, 256>}, {pipeline_mode = #tpu.pipeline_mode<synchronous>, transform_indices = @transform_8, window_bounds = array<i64: 128, 128>}, {pipeline_mode = #tpu.pipeline_mode<synchronous>, transform_indices = @transform_9, window_bounds = array<i64: 1, 256>}, {pipeline_mode = #tpu.pipeline_mode<synchronous>, transform_indices = @transform_10, window_bounds = array<i64: 1, 128>}, {pipeline_mode = #tpu.pipeline_mode<synchronous>, transform_indices = @transform_11, window_bounds = array<i64: 128, 128>}, {pipeline_mode = #tpu.pipeline_mode<synchronous>, transform_indices = @transform_12, window_bounds = array<i64: 128, 128>}, {pipeline_mode = #tpu.pipeline_mode<synchronous>, transform_indices = @transform_13, window_bounds = array<i64: 1, 128>}, {pipeline_mode = #tpu.pipeline_mode<synchronous>, transform_indices = @transform_14, window_bounds = array<i64: 1, 128>}, {pipeline_mode = #tpu.pipeline_mode<synchronous>, transform_indices = @transform_15, window_bounds = array<i64: 128, 512>}, {pipeline_mode = #tpu.pipeline_mode<synchronous>, transform_indices = @transform_16, window_bounds = array<i64: 256, 256>}, {pipeline_mode = #tpu.pipeline_mode<synchronous>, transform_indices = @transform_17, window_bounds = array<i64: 1, 512>}, {pipeline_mode = #tpu.pipeline_mode<synchronous>, transform_indices = @transform_18, window_bounds = array<i64: 1, 256>}, {transform_indices = @transform_19, window_bounds = array<i64: 16, 256>}]} {
    %c0 = arith.constant 0 : index
    %c0_0 = arith.constant 0 : index
    %0 = vector.load %arg1[%c0, %c0_0] : memref<256x36xbf16, #tpu.memory_space<vmem>>, vector<256x36xbf16>
    %c0_1 = arith.constant 0 : index
    %c0_2 = arith.constant 0 : index
    %1 = vector.load %arg2[%c0_1, %c0_2] : memref<36x512xbf16, #tpu.memory_space<vmem>>, vector<36x512xbf16>
    %cst = arith.constant dense<0.000000e+00> : vector<256x512xf32>
    %2 = tpu.matmul %0, %1, %cst {dimension_numbers = #tpu.dot_dimension_numbers<[1], [0], [0], [1], [0, 0, 1, 1], [], []>} : vector<256x36xbf16>, vector<36x512xbf16>, vector<256x512xf32> -> vector<256x512xf32>
    %3 = vector.extract_strided_slice %2 {offsets = [0, 0], sizes = [256, 128], strides = [1, 1]} : vector<256x512xf32> to vector<256x128xf32>
    %4 = vector.extract_strided_slice %2 {offsets = [0, 128], sizes = [256, 128], strides = [1, 1]} : vector<256x512xf32> to vector<256x128xf32>
    %5 = arith.maximumf %3, %4 : vector<256x128xf32>
    %6 = vector.extract_strided_slice %2 {offsets = [0, 256], sizes = [256, 128], strides = [1, 1]} : vector<256x512xf32> to vector<256x128xf32>
    %7 = vector.extract_strided_slice %2 {offsets = [0, 384], sizes = [256, 128], strides = [1, 1]} : vector<256x512xf32> to vector<256x128xf32>
    %8 = arith.maximumf %6, %7 : vector<256x128xf32>
    %9 = arith.maximumf %5, %8 : vector<256x128xf32>
    %c0_3 = arith.constant 0 : index
    %c0_4 = arith.constant 0 : index
    %10 = vector.load %arg3[%c0_3, %c0_4] : memref<1x128xf32, #tpu.memory_space<vmem>>, vector<1x128xf32>
    %11 = vector.broadcast %10 : vector<1x128xf32> to vector<256x128xf32>
    %12 = arith.addf %9, %11 : vector<256x128xf32>
    %cst_5 = arith.constant 0.000000e+00 : f32
    %13 = vector.broadcast %cst_5 : f32 to vector<256x128xf32>
    %14 = arith.cmpf oge, %12, %13 : vector<256x128xf32>
    %cst_6 = arith.constant 1.000000e-01 : f32
    %15 = vector.broadcast %cst_6 : f32 to vector<256x128xf32>
    %16 = arith.mulf %15, %12 : vector<256x128xf32>
    %17 = arith.select %14, %12, %16 : vector<256x128xi1>, vector<256x128xf32>
    %c0_7 = arith.constant 0 : index
    %c0_8 = arith.constant 0 : index
    %18 = vector.load %arg4[%c0_7, %c0_8] : memref<128x128xbf16, #tpu.memory_space<vmem>>, vector<128x128xbf16>
    %c0_9 = arith.constant 0 : index
    %c0_10 = arith.constant 0 : index
    %19 = vector.load %arg5[%c0_9, %c0_10] : memref<128x128xbf16, #tpu.memory_space<vmem>>, vector<128x128xbf16>
    %c0_11 = arith.constant 0 : index
    %c0_12 = arith.constant 0 : index
    %20 = vector.load %arg6[%c0_11, %c0_12] : memref<1x128xf32, #tpu.memory_space<vmem>>, vector<1x128xf32>
    %c0_13 = arith.constant 0 : index
    %c0_14 = arith.constant 0 : index
    %21 = vector.load %arg7[%c0_13, %c0_14] : memref<1x128xf32, #tpu.memory_space<vmem>>, vector<1x128xf32>
    %22 = arith.truncf %17 : vector<256x128xf32> to vector<256x128xbf16>
    %cst_15 = arith.constant dense<0.000000e+00> : vector<256x128xf32>
    %23 = tpu.matmul %22, %18, %cst_15 {dimension_numbers = #tpu.dot_dimension_numbers<[1], [0], [0], [1], [0, 0, 1, 1], [], []>} : vector<256x128xbf16>, vector<128x128xbf16>, vector<256x128xf32> -> vector<256x128xf32>
    %24 = vector.broadcast %20 : vector<1x128xf32> to vector<256x128xf32>
    %25 = arith.addf %23, %24 : vector<256x128xf32>
    %26 = arith.truncf %25 : vector<256x128xf32> to vector<256x128xbf16>
    %cst_16 = arith.constant dense<0.000000e+00> : vector<256x128xf32>
    %27 = tpu.matmul %26, %19, %cst_16 {dimension_numbers = #tpu.dot_dimension_numbers<[1], [0], [0], [1], [0, 0, 1, 1], [], []>} : vector<256x128xbf16>, vector<128x128xbf16>, vector<256x128xf32> -> vector<256x128xf32>
    %28 = vector.broadcast %21 : vector<1x128xf32> to vector<256x128xf32>
    %29 = arith.addf %27, %28 : vector<256x128xf32>
    %cst_17 = arith.constant 0.000000e+00 : f32
    %30 = vector.broadcast %cst_17 : f32 to vector<256x128xf32>
    %31 = arith.cmpf oge, %29, %30 : vector<256x128xf32>
    %cst_18 = arith.constant 1.000000e-01 : f32
    %32 = vector.broadcast %cst_18 : f32 to vector<256x128xf32>
    %33 = arith.mulf %32, %29 : vector<256x128xf32>
    %34 = arith.select %31, %29, %33 : vector<256x128xi1>, vector<256x128xf32>
    %35 = arith.addf %34, %17 : vector<256x128xf32>
    %c0_19 = arith.constant 0 : index
    %c0_20 = arith.constant 0 : index
    %36 = vector.load %arg8[%c0_19, %c0_20] : memref<128x256xbf16, #tpu.memory_space<vmem>>, vector<128x256xbf16>
    %c0_21 = arith.constant 0 : index
    %c0_22 = arith.constant 0 : index
    %37 = vector.load %arg9[%c0_21, %c0_22] : memref<128x128xbf16, #tpu.memory_space<vmem>>, vector<128x128xbf16>
    %c0_23 = arith.constant 0 : index
    %c0_24 = arith.constant 0 : index
    %38 = vector.load %arg10[%c0_23, %c0_24] : memref<1x256xf32, #tpu.memory_space<vmem>>, vector<1x256xf32>
    %c0_25 = arith.constant 0 : index
    %c0_26 = arith.constant 0 : index
    %39 = vector.load %arg11[%c0_25, %c0_26] : memref<1x128xf32, #tpu.memory_space<vmem>>, vector<1x128xf32>
    %40 = arith.truncf %35 : vector<256x128xf32> to vector<256x128xbf16>
    %cst_27 = arith.constant dense<0.000000e+00> : vector<256x256xf32>
    %41 = tpu.matmul %40, %36, %cst_27 {dimension_numbers = #tpu.dot_dimension_numbers<[1], [0], [0], [1], [0, 0, 1, 1], [], []>} : vector<256x128xbf16>, vector<128x256xbf16>, vector<256x256xf32> -> vector<256x256xf32>
    %42 = vector.broadcast %38 : vector<1x256xf32> to vector<256x256xf32>
    %43 = arith.addf %41, %42 : vector<256x256xf32>
    %44 = vector.extract_strided_slice %43 {offsets = [0, 0], sizes = [256, 128], strides = [1, 1]} : vector<256x256xf32> to vector<256x128xf32>
    %45 = vector.extract_strided_slice %43 {offsets = [0, 128], sizes = [256, 128], strides = [1, 1]} : vector<256x256xf32> to vector<256x128xf32>
    %46 = arith.truncf %44 : vector<256x128xf32> to vector<256x128xbf16>
    %cst_28 = arith.constant dense<0.000000e+00> : vector<256x128xf32>
    %47 = tpu.matmul %46, %37, %cst_28 {dimension_numbers = #tpu.dot_dimension_numbers<[1], [0], [0], [1], [0, 0, 1, 1], [], []>} : vector<256x128xbf16>, vector<128x128xbf16>, vector<256x128xf32> -> vector<256x128xf32>
    %48 = vector.broadcast %39 : vector<1x128xf32> to vector<256x128xf32>
    %49 = arith.addf %47, %48 : vector<256x128xf32>
    %50 = vector.extract_strided_slice %49 {offsets = [0, 0], sizes = [64, 128], strides = [1, 1]} : vector<256x128xf32> to vector<64x128xf32>
    %51 = vector.extract_strided_slice %49 {offsets = [64, 0], sizes = [64, 128], strides = [1, 1]} : vector<256x128xf32> to vector<64x128xf32>
    %52 = arith.maximumf %50, %51 : vector<64x128xf32>
    %53 = vector.extract_strided_slice %49 {offsets = [128, 0], sizes = [64, 128], strides = [1, 1]} : vector<256x128xf32> to vector<64x128xf32>
    %54 = vector.extract_strided_slice %49 {offsets = [192, 0], sizes = [64, 128], strides = [1, 1]} : vector<256x128xf32> to vector<64x128xf32>
    %55 = arith.maximumf %53, %54 : vector<64x128xf32>
    %56 = arith.maximumf %52, %55 : vector<64x128xf32>
    %cst_29 = arith.constant 0.000000e+00 : f32
    %57 = vector.broadcast %cst_29 : f32 to vector<64x128xf32>
    %58 = arith.cmpf oge, %56, %57 : vector<64x128xf32>
    %cst_30 = arith.constant 1.000000e-01 : f32
    %59 = vector.broadcast %cst_30 : f32 to vector<64x128xf32>
    %60 = arith.mulf %59, %56 : vector<64x128xf32>
    %61 = arith.select %58, %56, %60 : vector<64x128xi1>, vector<64x128xf32>
    %62 = vector.extract_strided_slice %45 {offsets = [0, 0], sizes = [64, 128], strides = [1, 1]} : vector<256x128xf32> to vector<64x128xf32>
    %63 = vector.extract_strided_slice %45 {offsets = [64, 0], sizes = [64, 128], strides = [1, 1]} : vector<256x128xf32> to vector<64x128xf32>
    %64 = arith.maximumf %62, %63 : vector<64x128xf32>
    %65 = vector.extract_strided_slice %45 {offsets = [128, 0], sizes = [64, 128], strides = [1, 1]} : vector<256x128xf32> to vector<64x128xf32>
    %66 = vector.extract_strided_slice %45 {offsets = [192, 0], sizes = [64, 128], strides = [1, 1]} : vector<256x128xf32> to vector<64x128xf32>
    %67 = arith.maximumf %65, %66 : vector<64x128xf32>
    %68 = arith.maximumf %64, %67 : vector<64x128xf32>
    %cst_31 = arith.constant 0.000000e+00 : f32
    %69 = vector.broadcast %cst_31 : f32 to vector<64x128xf32>
    %70 = arith.cmpf oge, %68, %69 : vector<64x128xf32>
    %cst_32 = arith.constant 1.000000e-01 : f32
    %71 = vector.broadcast %cst_32 : f32 to vector<64x128xf32>
    %72 = arith.mulf %71, %68 : vector<64x128xf32>
    %73 = arith.select %70, %68, %72 : vector<64x128xi1>, vector<64x128xf32>
    %74 = arith.addf %61, %73 : vector<64x128xf32>
    %c0_33 = arith.constant 0 : index
    %c0_34 = arith.constant 0 : index
    %75 = vector.load %arg12[%c0_33, %c0_34] : memref<128x128xbf16, #tpu.memory_space<vmem>>, vector<128x128xbf16>
    %c0_35 = arith.constant 0 : index
    %c0_36 = arith.constant 0 : index
    %76 = vector.load %arg13[%c0_35, %c0_36] : memref<128x128xbf16, #tpu.memory_space<vmem>>, vector<128x128xbf16>
    %c0_37 = arith.constant 0 : index
    %c0_38 = arith.constant 0 : index
    %77 = vector.load %arg14[%c0_37, %c0_38] : memref<1x128xf32, #tpu.memory_space<vmem>>, vector<1x128xf32>
    %c0_39 = arith.constant 0 : index
    %c0_40 = arith.constant 0 : index
    %78 = vector.load %arg15[%c0_39, %c0_40] : memref<1x128xf32, #tpu.memory_space<vmem>>, vector<1x128xf32>
    %79 = arith.truncf %74 : vector<64x128xf32> to vector<64x128xbf16>
    %cst_41 = arith.constant dense<0.000000e+00> : vector<64x128xf32>
    %80 = tpu.matmul %79, %75, %cst_41 {dimension_numbers = #tpu.dot_dimension_numbers<[1], [0], [0], [1], [0, 0, 1, 1], [], []>} : vector<64x128xbf16>, vector<128x128xbf16>, vector<64x128xf32> -> vector<64x128xf32>
    %81 = vector.broadcast %77 : vector<1x128xf32> to vector<64x128xf32>
    %82 = arith.addf %80, %81 : vector<64x128xf32>
    %83 = arith.truncf %82 : vector<64x128xf32> to vector<64x128xbf16>
    %cst_42 = arith.constant dense<0.000000e+00> : vector<64x128xf32>
    %84 = tpu.matmul %83, %76, %cst_42 {dimension_numbers = #tpu.dot_dimension_numbers<[1], [0], [0], [1], [0, 0, 1, 1], [], []>} : vector<64x128xbf16>, vector<128x128xbf16>, vector<64x128xf32> -> vector<64x128xf32>
    %85 = vector.broadcast %78 : vector<1x128xf32> to vector<64x128xf32>
    %86 = arith.addf %84, %85 : vector<64x128xf32>
    %cst_43 = arith.constant 0.000000e+00 : f32
    %87 = vector.broadcast %cst_43 : f32 to vector<64x128xf32>
    %88 = arith.cmpf oge, %86, %87 : vector<64x128xf32>
    %cst_44 = arith.constant 1.000000e-01 : f32
    %89 = vector.broadcast %cst_44 : f32 to vector<64x128xf32>
    %90 = arith.mulf %89, %86 : vector<64x128xf32>
    %91 = arith.select %88, %86, %90 : vector<64x128xi1>, vector<64x128xf32>
    %92 = arith.addf %91, %74 : vector<64x128xf32>
    %c0_45 = arith.constant 0 : index
    %c0_46 = arith.constant 0 : index
    %93 = vector.load %arg16[%c0_45, %c0_46] : memref<128x512xbf16, #tpu.memory_space<vmem>>, vector<128x512xbf16>
    %c0_47 = arith.constant 0 : index
    %c0_48 = arith.constant 0 : index
    %94 = vector.load %arg17[%c0_47, %c0_48] : memref<256x256xbf16, #tpu.memory_space<vmem>>, vector<256x256xbf16>
    %c0_49 = arith.constant 0 : index
    %c0_50 = arith.constant 0 : index
    %95 = vector.load %arg18[%c0_49, %c0_50] : memref<1x512xf32, #tpu.memory_space<vmem>>, vector<1x512xf32>
    %c0_51 = arith.constant 0 : index
    %c0_52 = arith.constant 0 : index
    %96 = vector.load %arg19[%c0_51, %c0_52] : memref<1x256xf32, #tpu.memory_space<vmem>>, vector<1x256xf32>
    %97 = arith.truncf %92 : vector<64x128xf32> to vector<64x128xbf16>
    %cst_53 = arith.constant dense<0.000000e+00> : vector<64x512xf32>
    %98 = tpu.matmul %97, %93, %cst_53 {dimension_numbers = #tpu.dot_dimension_numbers<[1], [0], [0], [1], [0, 0, 1, 1], [], []>} : vector<64x128xbf16>, vector<128x512xbf16>, vector<64x512xf32> -> vector<64x512xf32>
    %99 = vector.broadcast %95 : vector<1x512xf32> to vector<64x512xf32>
    %100 = arith.addf %98, %99 : vector<64x512xf32>
    %101 = vector.extract_strided_slice %100 {offsets = [0, 0], sizes = [64, 256], strides = [1, 1]} : vector<64x512xf32> to vector<64x256xf32>
    %102 = vector.extract_strided_slice %100 {offsets = [0, 256], sizes = [64, 256], strides = [1, 1]} : vector<64x512xf32> to vector<64x256xf32>
    %103 = arith.truncf %101 : vector<64x256xf32> to vector<64x256xbf16>
    %cst_54 = arith.constant dense<0.000000e+00> : vector<64x256xf32>
    %104 = tpu.matmul %103, %94, %cst_54 {dimension_numbers = #tpu.dot_dimension_numbers<[1], [0], [0], [1], [0, 0, 1, 1], [], []>} : vector<64x256xbf16>, vector<256x256xbf16>, vector<64x256xf32> -> vector<64x256xf32>
    %105 = vector.broadcast %96 : vector<1x256xf32> to vector<64x256xf32>
    %106 = arith.addf %104, %105 : vector<64x256xf32>
    %107 = vector.extract_strided_slice %106 {offsets = [0, 0], sizes = [16, 256], strides = [1, 1]} : vector<64x256xf32> to vector<16x256xf32>
    %108 = vector.extract_strided_slice %106 {offsets = [16, 0], sizes = [16, 256], strides = [1, 1]} : vector<64x256xf32> to vector<16x256xf32>
    %109 = arith.maximumf %107, %108 : vector<16x256xf32>
    %110 = vector.extract_strided_slice %106 {offsets = [32, 0], sizes = [16, 256], strides = [1, 1]} : vector<64x256xf32> to vector<16x256xf32>
    %111 = vector.extract_strided_slice %106 {offsets = [48, 0], sizes = [16, 256], strides = [1, 1]} : vector<64x256xf32> to vector<16x256xf32>
    %112 = arith.maximumf %110, %111 : vector<16x256xf32>
    %113 = arith.maximumf %109, %112 : vector<16x256xf32>
    %cst_55 = arith.constant 0.000000e+00 : f32
    %114 = vector.broadcast %cst_55 : f32 to vector<16x256xf32>
    %115 = arith.cmpf oge, %113, %114 : vector<16x256xf32>
    %cst_56 = arith.constant 1.000000e-01 : f32
    %116 = vector.broadcast %cst_56 : f32 to vector<16x256xf32>
    %117 = arith.mulf %116, %113 : vector<16x256xf32>
    %118 = arith.select %115, %113, %117 : vector<16x256xi1>, vector<16x256xf32>
    %119 = vector.extract_strided_slice %102 {offsets = [0, 0], sizes = [16, 256], strides = [1, 1]} : vector<64x256xf32> to vector<16x256xf32>
    %120 = vector.extract_strided_slice %102 {offsets = [16, 0], sizes = [16, 256], strides = [1, 1]} : vector<64x256xf32> to vector<16x256xf32>
    %121 = arith.maximumf %119, %120 : vector<16x256xf32>
    %122 = vector.extract_strided_slice %102 {offsets = [32, 0], sizes = [16, 256], strides = [1, 1]} : vector<64x256xf32> to vector<16x256xf32>
    %123 = vector.extract_strided_slice %102 {offsets = [48, 0], sizes = [16, 256], strides = [1, 1]} : vector<64x256xf32> to vector<16x256xf32>
    %124 = arith.maximumf %122, %123 : vector<16x256xf32>
    %125 = arith.maximumf %121, %124 : vector<16x256xf32>
    %cst_57 = arith.constant 0.000000e+00 : f32
    %126 = vector.broadcast %cst_57 : f32 to vector<16x256xf32>
    %127 = arith.cmpf oge, %125, %126 : vector<16x256xf32>
    %cst_58 = arith.constant 1.000000e-01 : f32
    %128 = vector.broadcast %cst_58 : f32 to vector<16x256xf32>
    %129 = arith.mulf %128, %125 : vector<16x256xf32>
    %130 = arith.select %127, %125, %129 : vector<16x256xi1>, vector<16x256xf32>
    %131 = arith.addf %118, %130 : vector<16x256xf32>
    %132 = arith.truncf %131 : vector<16x256xf32> to vector<16x256xbf16>
    %c0_59 = arith.constant 0 : index
    %c0_60 = arith.constant 0 : index
    %133 = vector.load %arg20[%c0_59, %c0_60] : memref<16x256xbf16, #tpu.memory_space<vmem>>, vector<16x256xbf16>
    tpu.vector_store %arg20[%c0_59, %c0_60], %132 {strides = array<i32>} : memref<16x256xbf16, #tpu.memory_space<vmem>>, vector<16x256xbf16>,
    return
  }
  func.func @transform_0(%arg0: i32) -> (i32, i32) {
    %c0_i32 = arith.constant 0 : i32
    %c0_i32_0 = arith.constant 0 : i32
    return %arg0, %c0_i32 : i32, i32
  }
  func.func @transform_1(%arg0: i32) -> (i32, i32) {
    %c0_i32 = arith.constant 0 : i32
    %c0_i32_0 = arith.constant 0 : i32
    %c0_i32_1 = arith.constant 0 : i32
    return %c0_i32, %c0_i32_0 : i32, i32
  }
  func.func @transform_2(%arg0: i32) -> (i32, i32) {
    %c0_i32 = arith.constant 0 : i32
    %c0_i32_0 = arith.constant 0 : i32
    %c0_i32_1 = arith.constant 0 : i32
    return %c0_i32, %c0_i32_0 : i32, i32
  }
  func.func @transform_3(%arg0: i32) -> (i32, i32) {
    %c0_i32 = arith.constant 0 : i32
    %c0_i32_0 = arith.constant 0 : i32
    %c0_i32_1 = arith.constant 0 : i32
    return %c0_i32, %c0_i32_0 : i32, i32
  }
  func.func @transform_4(%arg0: i32) -> (i32, i32) {
    %c0_i32 = arith.constant 0 : i32
    %c0_i32_0 = arith.constant 0 : i32
    %c0_i32_1 = arith.constant 0 : i32
    return %c0_i32, %c0_i32_0 : i32, i32
  }
  func.func @transform_5(%arg0: i32) -> (i32, i32) {
    %c0_i32 = arith.constant 0 : i32
    %c0_i32_0 = arith.constant 0 : i32
    %c0_i32_1 = arith.constant 0 : i32
    return %c0_i32, %c0_i32_0 : i32, i32
  }
  func.func @transform_6(%arg0: i32) -> (i32, i32) {
    %c0_i32 = arith.constant 0 : i32
    %c0_i32_0 = arith.constant 0 : i32
    %c0_i32_1 = arith.constant 0 : i32
    return %c0_i32, %c0_i32_0 : i32, i32
  }
  func.func @transform_7(%arg0: i32) -> (i32, i32) {
    %c0_i32 = arith.constant 0 : i32
    %c0_i32_0 = arith.constant 0 : i32
    %c0_i32_1 = arith.constant 0 : i32
    return %c0_i32, %c0_i32_0 : i32, i32
  }
  func.func @transform_8(%arg0: i32) -> (i32, i32) {
    %c0_i32 = arith.constant 0 : i32
    %c0_i32_0 = arith.constant 0 : i32
    %c0_i32_1 = arith.constant 0 : i32
    return %c0_i32, %c0_i32_0 : i32, i32
  }
  func.func @transform_9(%arg0: i32) -> (i32, i32) {
    %c0_i32 = arith.constant 0 : i32
    %c0_i32_0 = arith.constant 0 : i32
    %c0_i32_1 = arith.constant 0 : i32
    return %c0_i32, %c0_i32_0 : i32, i32
  }
  func.func @transform_10(%arg0: i32) -> (i32, i32) {
    %c0_i32 = arith.constant 0 : i32
    %c0_i32_0 = arith.constant 0 : i32
    %c0_i32_1 = arith.constant 0 : i32
    return %c0_i32, %c0_i32_0 : i32, i32
  }
  func.func @transform_11(%arg0: i32) -> (i32, i32) {
    %c0_i32 = arith.constant 0 : i32
    %c0_i32_0 = arith.constant 0 : i32
    %c0_i32_1 = arith.constant 0 : i32
    return %c0_i32, %c0_i32_0 : i32, i32
  }
  func.func @transform_12(%arg0: i32) -> (i32, i32) {
    %c0_i32 = arith.constant 0 : i32
    %c0_i32_0 = arith.constant 0 : i32
    %c0_i32_1 = arith.constant 0 : i32
    return %c0_i32, %c0_i32_0 : i32, i32
  }
  func.func @transform_13(%arg0: i32) -> (i32, i32) {
    %c0_i32 = arith.constant 0 : i32
    %c0_i32_0 = arith.constant 0 : i32
    %c0_i32_1 = arith.constant 0 : i32
    return %c0_i32, %c0_i32_0 : i32, i32
  }
  func.func @transform_14(%arg0: i32) -> (i32, i32) {
    %c0_i32 = arith.constant 0 : i32
    %c0_i32_0 = arith.constant 0 : i32
    %c0_i32_1 = arith.constant 0 : i32
    return %c0_i32, %c0_i32_0 : i32, i32
  }
  func.func @transform_15(%arg0: i32) -> (i32, i32) {
    %c0_i32 = arith.constant 0 : i32
    %c0_i32_0 = arith.constant 0 : i32
    %c0_i32_1 = arith.constant 0 : i32
    return %c0_i32, %c0_i32_0 : i32, i32
  }
  func.func @transform_16(%arg0: i32) -> (i32, i32) {
    %c0_i32 = arith.constant 0 : i32
    %c0_i32_0 = arith.constant 0 : i32
    %c0_i32_1 = arith.constant 0 : i32
    return %c0_i32, %c0_i32_0 : i32, i32
  }
  func.func @transform_17(%arg0: i32) -> (i32, i32) {
    %c0_i32 = arith.constant 0 : i32
    %c0_i32_0 = arith.constant 0 : i32
    %c0_i32_1 = arith.constant 0 : i32
    return %c0_i32, %c0_i32_0 : i32, i32
  }
  func.func @transform_18(%arg0: i32) -> (i32, i32) {
    %c0_i32 = arith.constant 0 : i32
    %c0_i32_0 = arith.constant 0 : i32
    %c0_i32_1 = arith.constant 0 : i32
    return %c0_i32, %c0_i32_0 : i32, i32
  }
  func.func @transform_19(%arg0: i32) -> (i32, i32) {
    %c0_i32 = arith.constant 0 : i32
    %c0_i32_0 = arith.constant 0 : i32
    return %arg0, %c0_i32 : i32, i32
  }
}

module attributes {stable_mosaic.version = 11 : i64} {
  func.func @_head_kernel(%arg0: i32, %arg1: memref<2x24576xbf16, #tpu.memory_space<vmem>>, %arg2: memref<24576x128xbf16, #tpu.memory_space<vmem>>, %arg3: memref<1x128xf32, #tpu.memory_space<vmem>>, %arg4: memref<128x2xbf16, #tpu.memory_space<vmem>>, %arg5: memref<1x2xf32, #tpu.memory_space<vmem>>, %arg6: memref<2x2xf32, #tpu.memory_space<vmem>>) attributes {dimension_semantics = [#tpu.dimension_semantics<parallel>], iteration_bounds = array<i64: 1>, scalar_prefetch = 0 : i64, scratch_operands = 0 : i64, tpu.core_type = #tpu.core_type<tc>, window_params = [{transform_indices = @transform_0, window_bounds = array<i64: 2, 24576>}, {pipeline_mode = #tpu.pipeline_mode<synchronous>, transform_indices = @transform_1, window_bounds = array<i64: 24576, 128>}, {pipeline_mode = #tpu.pipeline_mode<synchronous>, transform_indices = @transform_2, window_bounds = array<i64: 1, 128>}, {pipeline_mode = #tpu.pipeline_mode<synchronous>, transform_indices = @transform_3, window_bounds = array<i64: 128, 2>}, {pipeline_mode = #tpu.pipeline_mode<synchronous>, transform_indices = @transform_4, window_bounds = array<i64: 1, 2>}, {transform_indices = @transform_5, window_bounds = array<i64: 2, 2>}]} {
    %c0 = arith.constant 0 : index
    %c0_0 = arith.constant 0 : index
    %0 = vector.load %arg1[%c0, %c0_0] : memref<2x24576xbf16, #tpu.memory_space<vmem>>, vector<2x24576xbf16>
    %c0_1 = arith.constant 0 : index
    %c0_2 = arith.constant 0 : index
    %1 = vector.load %arg2[%c0_1, %c0_2] : memref<24576x128xbf16, #tpu.memory_space<vmem>>, vector<24576x128xbf16>
    %cst = arith.constant dense<0.000000e+00> : vector<2x128xf32>
    %2 = tpu.matmul %0, %1, %cst {dimension_numbers = #tpu.dot_dimension_numbers<[1], [0], [0], [1], [0, 0, 1, 1], [], []>} : vector<2x24576xbf16>, vector<24576x128xbf16>, vector<2x128xf32> -> vector<2x128xf32>
    %c0_3 = arith.constant 0 : index
    %c0_4 = arith.constant 0 : index
    %3 = vector.load %arg3[%c0_3, %c0_4] : memref<1x128xf32, #tpu.memory_space<vmem>>, vector<1x128xf32>
    %4 = vector.broadcast %3 : vector<1x128xf32> to vector<2x128xf32>
    %5 = arith.addf %2, %4 : vector<2x128xf32>
    %cst_5 = arith.constant 0.000000e+00 : f32
    %6 = vector.broadcast %cst_5 : f32 to vector<2x128xf32>
    %7 = arith.cmpf oge, %5, %6 : vector<2x128xf32>
    %cst_6 = arith.constant 1.000000e-01 : f32
    %8 = vector.broadcast %cst_6 : f32 to vector<2x128xf32>
    %9 = arith.mulf %8, %5 : vector<2x128xf32>
    %10 = arith.select %7, %5, %9 : vector<2x128xi1>, vector<2x128xf32>
    %11 = arith.truncf %10 : vector<2x128xf32> to vector<2x128xbf16>
    %c0_7 = arith.constant 0 : index
    %c0_8 = arith.constant 0 : index
    %12 = vector.load %arg4[%c0_7, %c0_8] : memref<128x2xbf16, #tpu.memory_space<vmem>>, vector<128x2xbf16>
    %cst_9 = arith.constant dense<0.000000e+00> : vector<2x2xf32>
    %13 = tpu.matmul %11, %12, %cst_9 {dimension_numbers = #tpu.dot_dimension_numbers<[1], [0], [0], [1], [0, 0, 1, 1], [], []>} : vector<2x128xbf16>, vector<128x2xbf16>, vector<2x2xf32> -> vector<2x2xf32>
    %c0_10 = arith.constant 0 : index
    %c0_11 = arith.constant 0 : index
    %14 = vector.load %arg5[%c0_10, %c0_11] : memref<1x2xf32, #tpu.memory_space<vmem>>, vector<1x2xf32>
    %15 = vector.broadcast %14 : vector<1x2xf32> to vector<2x2xf32>
    %16 = arith.addf %13, %15 : vector<2x2xf32>
    %c0_12 = arith.constant 0 : index
    %c0_13 = arith.constant 0 : index
    %17 = vector.load %arg6[%c0_12, %c0_13] : memref<2x2xf32, #tpu.memory_space<vmem>>, vector<2x2xf32>
    tpu.vector_store %arg6[%c0_12, %c0_13], %16 {strides = array<i32>} : memref<2x2xf32, #tpu.memory_space<vmem>>, vector<2x2xf32>,
    return
  }
  func.func @transform_0(%arg0: i32) -> (i32, i32) {
    %c0_i32 = arith.constant 0 : i32
    %c0_i32_0 = arith.constant 0 : i32
    return %arg0, %c0_i32 : i32, i32
  }
  func.func @transform_1(%arg0: i32) -> (i32, i32) {
    %c0_i32 = arith.constant 0 : i32
    %c0_i32_0 = arith.constant 0 : i32
    %c0_i32_1 = arith.constant 0 : i32
    return %c0_i32, %c0_i32_0 : i32, i32
  }
  func.func @transform_2(%arg0: i32) -> (i32, i32) {
    %c0_i32 = arith.constant 0 : i32
    %c0_i32_0 = arith.constant 0 : i32
    %c0_i32_1 = arith.constant 0 : i32
    return %c0_i32, %c0_i32_0 : i32, i32
  }
  func.func @transform_3(%arg0: i32) -> (i32, i32) {
    %c0_i32 = arith.constant 0 : i32
    %c0_i32_0 = arith.constant 0 : i32
    %c0_i32_1 = arith.constant 0 : i32
    return %c0_i32, %c0_i32_0 : i32, i32
  }
  func.func @transform_4(%arg0: i32) -> (i32, i32) {
    %c0_i32 = arith.constant 0 : i32
    %c0_i32_0 = arith.constant 0 : i32
    %c0_i32_1 = arith.constant 0 : i32
    return %c0_i32, %c0_i32_0 : i32, i32
  }
  func.func @transform_5(%arg0: i32) -> (i32, i32) {
    %c0_i32 = arith.constant 0 : i32
    %c0_i32_0 = arith.constant 0 : i32
    return %arg0, %c0_i32 : i32, i32
  }
}

</mosaic_0001>

<bundles_post_ra>
// kernel: forward.2
= control target key start
LH: loop header
LB: loop body
LE: loop exit
PB: predicated region body
PF: predicated region fallthrough
CT: control target
= control target key end

     0   :  { %s6105_s0 = inlined_call_operand.vmem [shape: bf16[3072,36], index: 0, kind: input, shape index: {}]   ;;  %s6106_s1 = inlined_call_operand.vmem [shape: bf16[36,512], index: 1, kind: input, shape index: {}]   ;;  %s6107_s2 = inlined_call_operand.vmem [shape: f32[1,128], index: 2, kind: input, shape index: {}]   ;;  %s6108_s3 = inlined_call_operand.vmem [shape: bf16[128,128], index: 3, kind: input, shape index: {}]   ;;  %s6109_s4 = inlined_call_operand.vmem [shape: bf16[128,128], index: 4, kind: input, shape index: {}]   ;;  %s6110_s5 = inlined_call_operand.vmem [shape: f32[1,128], index: 5, kind: input, shape index: {}]   ;;  %s6111_s6 = inlined_call_operand.vmem [shape: f32[1,128], index: 6, kind: input, shape index: {}]   ;;  %s6112_s7 = inlined_call_operand.vmem [shape: bf16[128,256], index: 7, kind: input, shape index: {}]   ;;  %s6113_s8 = inlined_call_operand.vmem [shape: bf16[128,128], index: 8, kind: input, shape index: {}]   ;;  %s6114_s9 = inlined_call_operand.vmem [shape: f32[1,256], index: 9, kind: input, shape index: {}]   ;;  %s6115_s10 = inlined_call_operand.vmem [shape: f32[1,128], index: 10, kind: input, shape index: {}]   ;;  %s6116_s11 = inlined_call_operand.vmem [shape: bf16[128,128], index: 11, kind: input, shape index: {}]   ;;  %s6117_s12 = inlined_call_operand.vmem [shape: bf16[128,128], index: 12, kind: input, shape index: {}]   ;;  %s6118_s13 = inlined_call_operand.vmem [shape: f32[1,128], index: 13, kind: input, shape index: {}]   ;;  %s6119_s14 = inlined_call_operand.vmem [shape: f32[1,128], index: 14, kind: input, shape index: {}]   ;;  %s6120_s15 = inlined_call_operand.vmem [shape: bf16[128,512], index: 15, kind: input, shape index: {}]   ;;  %s6121_s16 = inlined_call_operand.vmem [shape: bf16[256,256], index: 16, kind: input, shape index: {}]   ;;  %s6122_s17 = inlined_call_operand.vmem [shape: f32[1,512], index: 17, kind: input, shape index: {}]   ;;  %s6123_s18 = inlined_call_operand.vmem [shape: f32[1,256], index: 18, kind: input, shape index: {}]   ;;  %s6124_s19 = inlined_call_operand.vmem [shape: bf16[192,256], index: 19, kind: output, shape index: {}]  }
   0x1   :  { %6130 = sst [smem:[#allocation3_spill]] %s6105_s0  ;;  %s4647_s0 = smov 0  }
   0x2   :  { %6131 = sst [smem:[#allocation4_spill]] %s6106_s1 }
   0x3   :  { %6132 = sst [smem:[#allocation5_spill]] %s6107_s2 }
   0x4   :  { %6133 = sst [smem:[#allocation6_spill]] %s6108_s3 }
   0x5 LB: > { %s3838_s30 = sadd.s32 4294967295, %s4544_s0   ;;  %p3842_p0 = scmp.ge.s32.totalorder %s4544_s0, 1  ;;  %s4544_s0 = sphi %s4647_s0, %s29_s0  }
   0x6   : > { %p538_p1 = scmp.lt.s32.totalorder %s4544_s0, 13 }
   0x8   : > { %p539_p2 = pnand %p3842_p0, %p538_p1 }
   0xa   : > { %542 = sbr.rel (%p539_p2) target bundleno = 2214 (0x8a6), region = 96 }
  0x11   : > { %s6134_s1 = sld [smem:[#allocation4_spill]]  ;;  %v6127_v2 = vmov 0   ;;  %s3843_s23 = sshll.u32 %s3838_s30, 5  ;;  %vm830_vm0 = vcmask 1041408   ;;  %vm781_vm1 = vcmask 293888  }
  0x12   : > { %995 = vmatprep.mubr.bf16.mxu1 %v6127_v2  ;;  %875 = vmatprep.mubr.bf16.mxu0 %v6127_v2  ;;  %p596_p3 = scmp.lt.s32.totalorder %s3843_s23, 383  ;;  %s6135_s24 = sld [smem:[#allocation3_spill]] }
  0x13   : > { %s6137_s2 = sld [smem:[#allocation5_spill]]  ;;  %s3845_s28 = sshll.u32 %s3838_s30, 1 }
  0x14   : > { %s6159_s23 = smov (!%p596_p3, %s3843_s23), 383  ;;  %p602_p4 = scmp.lt.s32.totalorder %s3845_s28, 23 }
  0x15   : > { %s3844_s21 = sshll.u32 %s6159_s23, 2 }
  0x16   : > { %s6161_s28 = smov (!%p602_p4, %s3845_s28), 23 }
  0x17   : > { %v4346_v0 = vld [vmem:[%s6134_s1 + $0x4] ss:$16 sps:$4 sm:$0xff]   ;;  %v4348_v1 = vld [vmem:[%s6134_s1] ss:$16 sps:$4 sm:$0xff]   ;;  %v4357_v9 = vld [vmem:[%s6134_s1 + $0xc] ss:$16 sps:$4 sm:$0xff]  }
  0x18   : > { %4331 = vmatprep.subr.bf16.mxu1 %v4346_v0  ;;  %v4349_v3 = vld [vmem:[%s6134_s1 + $0x24] ss:$16 sps:$4 sm:$0xff]   ;;  %843 = vmatprep.subr.bf16.mxu0 %v4346_v0  ;;  %v4351_v5 = vld [vmem:[%s6134_s1 + $0x20] ss:$16 sps:$4 sm:$0xff]   ;;  %s4682_s25 = scalar_lea.vmem %s6135_s24, %s3844_s21  ;;  %v4355_v10 = vld [vmem:[%s6134_s1 + $0x8] ss:$16 sps:$4 sm:$0xff]  }
  0x19   : > { %v649_v4 = vld [vmem:[%s6134_s1 + $0x40] sm:$0x33]  ;;  %4334 = vmatpush1.bf16.msra.mxu1 %v4348_v1  ;;  %844 = vmatpush1.bf16.msra.mxu0 %v4348_v1  ;;  %v4361_v12 = vld [vmem:[%s6134_s1 + $0x2c] ss:$16 sps:$4 sm:$0xff]   ;;  %v4359_v15 = vld [vmem:[%s6134_s1 + $0x28] ss:$16 sps:$4 sm:$0xff]  }
  0x1a   : > { %v3872_v6 = vcombine.low %v649_v4, %v649_v4  ;;  %4332 = vmatprep.subr.bf16.mxu1 %v4349_v3  ;;  %v3873_v7 = vcombine.high %v649_v4, %v649_v4  ;;  %845 = vmatprep.subr.bf16.mxu0 %v4349_v3  ;;  %v4689_v11 = vld [vmem:[%s4682_s25 + $0x60] sm:$0xff]   ;;  %v650_v13 = vld [vmem:[%s6134_s1 + $0x48] sm:$0x33]  ;;  %v4716_v21 = vld [vmem:[%s4682_s25 + $0x70] sm:$0xff]   ;;  %s6136_s24 = sld [smem:[#allocation6_spill]]  ;;  %s4040_s30 = sshll.u32 %s6161_s28, 3 }
  0x1b   : > { %v4366_v14 = vld [vmem:[%s4682_s25] sm:$0xff]   ;;  %v3875_v16 = vcombine.high %v650_v13, %v650_v13  ;;  %v3874_v17 = vcombine.low %v650_v13, %v650_v13  ;;  %v4707_v18 = vld [vmem:[%s4682_s25 + $0x68] sm:$0xff]   ;;  %v4368_v22 = vld [vmem:[%s4682_s25 + $0x10] sm:$0xff]   ;;  %s606_s21 = scalar_lea.vmem %s6124_s19, %s4040_s30 }
  0x1c   : > { %v832_v8 = vsel %vm830_vm0, %v3872_v6, 0  ;;  %v4367_v20 = vld [vmem:[%s4682_s25 + $0x8] sm:$0xff]   ;;  %v4725_v23 = vld [vmem:[%s4682_s25 + $0x78] sm:$0xff]   ;;  %v4370_v28 = vld [vmem:[%s4682_s25 + $0x20] sm:$0xff]  }
  0x1d   : > { %4335 = vmatpush1.bf16.msra.mxu1 %v4351_v5  ;;  %846 = vmatpush1.bf16.msra.mxu0 %v4351_v5  ;;  %v838_v19 = vsel %vm830_vm0, %v3874_v17, 0  ;;  %v4369_v24 = vld [vmem:[%s4682_s25 + $0x18] sm:$0xff]   ;;  %v4371_v30 = vld [vmem:[%s4682_s25 + $0x28] sm:$0xff]   ;;  %v4372_v31 = vld [vmem:[%s4682_s25 + $0x30] sm:$0xff]  }
  0x1e   : > { %4333 = vmatprep.subr.msk.bf16.mxu1 %vm830_vm0, %v3873_v7  ;;  %3876 = vmatprep.subr.msk.bf16.mxu0 %vm830_vm0, %v3873_v7  ;;  %v4373_v32 = vld [vmem:[%s4682_s25 + $0x38] sm:$0xff]   ;;  %v4374_v33 = vld [vmem:[%s4682_s25 + $0x40] sm:$0xff]   ;;  %v4375_v34 = vld [vmem:[%s4682_s25 + $0x48] sm:$0xff]  }
  0x1f   : > { %v4376_v35 = vld [vmem:[%s4682_s25 + $0x50] sm:$0xff]   ;;  %v4377_v36 = vld [vmem:[%s4682_s25 + $0x58] sm:$0xff]  }
  0x20   : > { %v4378_v25 = vld [vmem:[%s6136_s24] sm:$0xff]   ;;  %v4379_v26 = vld [vmem:[%s6136_s24 + $0x8] sm:$0xff]   ;;  %v4380_v27 = vld [vmem:[%s6136_s24 + $0x10] sm:$0xff]  }
  0x21   : > { %4336 = vmatpush1.bf16.msra.mxu1 %v832_v8  ;;  %848 = vmatpush1.bf16.msra.mxu0 %v832_v8  ;;  %v4381_v29 = vld [vmem:[%s6136_s24 + $0x18] sm:$0xff]   ;;  %v4382_v37 = vld [vmem:[%s6136_s24 + $0x20] sm:$0xff]   ;;  %v4383_v38 = vld [vmem:[%s6136_s24 + $0x28] sm:$0xff]  }
  0x22   : > { %1036 = vmatprep.subr.bf16.mxu1 %v4357_v9  ;;  %4139 = vmatprep.subr.bf16.mxu0 %v4378_v25  ;;  %v4384_v39 = vld [vmem:[%s6136_s24 + $0x30] sm:$0xff]   ;;  %v4385_v40 = vld [vmem:[%s6136_s24 + $0x38] sm:$0xff]  }
  0x24   : > { %3889 = vmatmul.mubr.msk.bf16.vlgmr.msra.gmra.mrb[0].mxu1 %vm781_vm1, %v4689_v11  ;;  %3877 = vmatmul.mubr.msk.bf16.vlgmr.msra.gmra.mrb[0].mxu0 %vm781_vm1, %v4366_v14 }
  0x25   : > { %1037 = vmatpush1.bf16.msra.mxu1 %v4355_v10  ;;  %1005 = vmatprep.mubr.bf16.mxu1 %v6127_v2 }
  0x26   : > { %1038 = vmatprep.subr.bf16.mxu1 %v4361_v12  ;;  %885 = vmatprep.mubr.bf16.mxu0 %v6127_v2 }
  0x27   : > { %4140 = vmatpush3.bf16.msra.mxu0 %v4378_v25 }
  0x28   : > { %4141 = vmatprep.subr.bf16.mxu0 %v4379_v26 }
  0x29   : > { %1039 = vmatpush1.bf16.msra.mxu1 %v4359_v15 }
  0x2a   : > { %3893 = vmatprep.subr.msk.bf16.mxu1 %vm830_vm0, %v3875_v16 }
  0x2b   : > { %4142 = vmatpush3.bf16.msra.mxu0 %v4379_v26 }
  0x2c   : > { %3890 = vmatmul.mubr.msk.bf16.gmra.mrb[4].mxu1 %vm781_vm1, %v4707_v18  ;;  %3878 = vmatmul.mubr.msk.bf16.gmra.mrb[4].mxu0 %vm781_vm1, %v4367_v20 }
  0x2d   : > { %1015 = vmatprep.mubr.bf16.mxu1 %v6127_v2  ;;  %1041 = vmatpush1.bf16.msra.mxu1 %v838_v19  ;;  %v4386_v19 = vld [vmem:[%s6109_s4] sm:$0xff]  }
  0x2e   : > { %895 = vmatprep.mubr.bf16.mxu0 %v6127_v2  ;;  %4143 = vmatprep.subr.bf16.mxu0 %v4380_v27 }
  0x2f   : > { %4144 = vmatpush3.bf16.msra.mxu0 %v4380_v27  ;;  %4187 = vmatprep.subr.bf16.mxu1 %v4386_v19 }
  0x30   : > { %4145 = vmatprep.subr.bf16.mxu0 %v4381_v29 }
  0x33   : > { %4146 = vmatpush3.bf16.msra.mxu0 %v4381_v29 }
  0x34   : > { %3891 = vmatmul.mubr.msk.bf16.gmra.mrb[8].mxu1 %vm781_vm1, %v4716_v21  ;;  %3879 = vmatmul.mubr.msk.bf16.gmra.mrb[8].mxu0 %vm781_vm1, %v4368_v22 }
  0x35   : > { %1025 = vmatprep.mubr.bf16.mxu1 %v6127_v2  ;;  %905 = vmatprep.mubr.bf16.mxu0 %v6127_v2 }
  0x36   : > { %4147 = vmatprep.subr.bf16.mxu0 %v4382_v37 }
  0x37   : > { %4148 = vmatpush3.bf16.msra.mxu0 %v4382_v37 }
  0x38   : > { %4149 = vmatprep.subr.bf16.mxu0 %v4383_v38 }
  0x3b   : > { %4150 = vmatpush3.bf16.msra.mxu0 %v4383_v38 }
  0x3c   : > { %3892 = vmatmul.mubr.msk.bf16.gmra.mrb[12].mxu1 %vm781_vm1, %v4725_v23  ;;  %3880 = vmatmul.mubr.msk.bf16.gmra.mrb[12].mxu0 %vm781_vm1, %v4369_v24 }
  0x3d   : > { %1068 = vmatprep.mubr.bf16.mxu1 %v6127_v2  ;;  %915 = vmatprep.mubr.bf16.mxu0 %v6127_v2 }
  0x3e   : > { %4151 = vmatprep.subr.bf16.mxu0 %v4384_v39 }
  0x3f   : > { %4152 = vmatpush3.bf16.msra.mxu0 %v4384_v39 }
  0x40   : > { %4153 = vmatprep.subr.bf16.mxu0 %v4385_v40 }
  0x43   : > { %4154 = vmatpush3.bf16.msra.mxu0 %v4385_v40 }
  0x44   : > { %3894 = vmatmul.mubr.msk.bf16.vlgmr.msra.gmra.mrb[16].mxu1 %vm781_vm1, %v4366_v14  ;;  %3881 = vmatmul.mubr.msk.bf16.gmra.mrb[16].mxu0 %vm781_vm1, %v4370_v28 }
  0x45   : > { %1078 = vmatprep.mubr.bf16.mxu1 %v6127_v2  ;;  %925 = vmatprep.mubr.bf16.mxu0 %v6127_v2 }
  0x46   : > { %4188 = vmatpush3.bf16.msra.mxu1 %v4386_v19 }
  0x4c   : > { %3895 = vmatmul.mubr.msk.bf16.gmra.mrb[20].mxu1 %vm781_vm1, %v4367_v20  ;;  %3882 = vmatmul.mubr.msk.bf16.gmra.mrb[20].mxu0 %vm781_vm1, %v4371_v30 }
  0x4d   : > { %1088 = vmatprep.mubr.bf16.mxu1 %v6127_v2  ;;  %935 = vmatprep.mubr.bf16.mxu0 %v6127_v2 }
  0x54   : > { %3896 = vmatmul.mubr.msk.bf16.gmra.mrb[24].mxu1 %vm781_vm1, %v4368_v22  ;;  %3883 = vmatmul.mubr.msk.bf16.gmra.mrb[24].mxu0 %vm781_vm1, %v4372_v31 }
  0x55   : > { %1098 = vmatprep.mubr.bf16.mxu1 %v6127_v2  ;;  %945 = vmatprep.mubr.bf16.mxu0 %v6127_v2 }
  0x5c   : > { %3897 = vmatmul.mubr.msk.bf16.gmra.mrb[28].mxu1 %vm781_vm1, %v4369_v24  ;;  %3884 = vmatmul.mubr.msk.bf16.gmra.mrb[28].mxu0 %vm781_vm1, %v4373_v32 }
  0x5d   : > { %1108 = vmatprep.mubr.bf16.mxu1 %v6127_v2  ;;  %955 = vmatprep.mubr.bf16.mxu0 %v6127_v2 }
  0x64   : > { %3898 = vmatmul.mubr.msk.bf16.gmra.mrb[32].mxu1 %vm781_vm1, %v4370_v28  ;;  %3885 = vmatmul.mubr.msk.bf16.gmra.mrb[32].mxu0 %vm781_vm1, %v4374_v33 }
  0x65   : > { %1118 = vmatprep.mubr.bf16.mxu1 %v6127_v2  ;;  %965 = vmatprep.mubr.bf16.mxu0 %v6127_v2 }
  0x6c   : > { %3899 = vmatmul.mubr.msk.bf16.gmra.mrb[36].mxu1 %vm781_vm1, %v4371_v30  ;;  %3886 = vmatmul.mubr.msk.bf16.gmra.mrb[36].mxu0 %vm781_vm1, %v4375_v34 }
  0x6d   : > { %1128 = vmatprep.mubr.bf16.mxu1 %v6127_v2  ;;  %975 = vmatprep.mubr.bf16.mxu0 %v6127_v2 }
  0x74   : > { %3900 = vmatmul.mubr.msk.bf16.gmra.mrb[40].mxu1 %vm781_vm1, %v4372_v31  ;;  %3887 = vmatmul.mubr.msk.bf16.gmra.mrb[40].mxu0 %vm781_vm1, %v4376_v35 }
  0x75   : > { %1138 = vmatprep.mubr.bf16.mxu1 %v6127_v2  ;;  %985 = vmatprep.mubr.bf16.mxu0 %v6127_v2 }
  0x7c   : > { %3901 = vmatmul.mubr.msk.bf16.gmra.mrb[44].mxu1 %vm781_vm1, %v4373_v32  ;;  %3888 = vmatmul.mubr.msk.bf16.gmra.mrb[44].mxu0 %vm781_vm1, %v4377_v36  ;;  %v4387_v32 = vld [vmem:[%s6109_s4 + $0x8] sm:$0xff]  }
  0x7d   : > { %1148 = vmatprep.mubr.bf16.mxu1 %v6127_v2  ;;  %4189 = vmatprep.subr.bf16.mxu1 %v4387_v32 }
  0x7e   : > { %4190 = vmatpush3.bf16.msra.mxu1 %v4387_v32 }
  0x84   : > { %3902 = vmatmul.mubr.msk.bf16.gmra.mrb[48].mxu1 %vm781_vm1, %v4374_v33  ;;  %v4912_v33 = vld [vmem:[%s6137_s2] ss:$0 sm:$0xff] }
  0x85   : > { %1158 = vmatprep.mubr.bf16.mxu1 %v6127_v2 }
  0x8c   : > { %3903 = vmatmul.mubr.msk.bf16.gmra.mrb[52].mxu1 %vm781_vm1, %v4375_v34 }
  0x8d   : > { %1168 = vmatprep.mubr.bf16.mxu1 %v6127_v2 }
  0x94   : > { %3904 = vmatmul.mubr.msk.bf16.gmra.mrb[56].mxu1 %vm781_vm1, %v4376_v35 }
  0x95   : > { %1178 = vmatprep.mubr.bf16.mxu1 %v6127_v2 }
  0x9c   : > { %3905 = vmatmul.mubr.msk.bf16.gmra.mrb[60].mxu1 %vm781_vm1, %v4377_v36 }
  0x9d   : > { %1188 = vmatprep.mubr.bf16.mxu1 %v6127_v2 }
  0xa4   : > { %3906 = vmatmul.mubr.msk.bf16.gmra.mrb[64].mxu1 %vm781_vm1, %v4689_v11 }
  0xa5   : > { %1198 = vmatprep.mubr.bf16.mxu1 %v6127_v2 }
  0xac   : > { %3907 = vmatmul.mubr.msk.bf16.gmra.mrb[68].mxu1 %vm781_vm1, %v4707_v18 }
  0xad   : > { %1208 = vmatprep.mubr.bf16.mxu1 %v6127_v2 }
  0xb4   : > { %3908 = vmatmul.mubr.msk.bf16.gmra.mrb[72].mxu1 %vm781_vm1, %v4716_v21 }
  0xb5   : > { %1218 = vmatprep.mubr.bf16.mxu1 %v6127_v2 }
  0xbc   : > { %3909 = vmatmul.mubr.msk.bf16.gmra.mrb[76].mxu1 %vm781_vm1, %v4725_v23 }
  0xf7   : > { %v4817_v41 = vpop.f32.mrb[0].mxu1  ;;  %v877_v45 = vpop.f32.mrb[0].mxu0 }
  0xf8   : > { %v4819_v42 = vpop.f32.mrb[1].mxu1  ;;  %v879_v47 = vpop.f32.mrb[1].mxu0 }
  0xf9   : > { %v4823_v44 = vpop.f32.mrb[2].mxu1  ;;  %v1229_v49 = vmax.f32 %v877_v45, %v879_v47  ;;  %v881_v50 = vpop.f32.mrb[2].mxu0 }
  0xfa   : > { %v4825_v46 = vpop.f32.mrb[3].mxu1  ;;  %v883_v51 = vpop.f32.mrb[3].mxu0 }
  0xfb   : > { %v1230_v52 = vmax.f32 %v881_v50, %v883_v51  ;;  %v4389_v51 = vld [vmem:[%s6109_s4 + $0x18] sm:$0xff]  }
  0xff   : > { %v4829_v53 = vpop.f32.mrb[4].mxu1  ;;  %v4837_v57 = vpop.f32.mrb[4].mxu0 }
 0x100   : > { %v4831_v54 = vpop.f32.mrb[5].mxu1  ;;  %v4841_v59 = vpop.f32.mrb[5].mxu0 }
 0x101   : > { %v4835_v56 = vpop.f32.mrb[6].mxu1  ;;  %v1231_v61 = vmax.f32 %v4837_v57, %v4841_v59  ;;  %v4847_v62 = vpop.f32.mrb[6].mxu0 }
 0x102   : > { %v4839_v58 = vpop.f32.mrb[7].mxu1  ;;  %v4849_v63 = vpop.f32.mrb[7].mxu0 }
 0x103   : > { %v1232_v0 = vmax.f32 %v4847_v62, %v4849_v63 }
 0x107   : > { %v4853_v1 = vpop.f32.mrb[8].mxu1  ;;  %v4861_v6 = vpop.f32.mrb[8].mxu0 }
 0x108   : > { %v4855_v3 = vpop.f32.mrb[9].mxu1  ;;  %v4865_v8 = vpop.f32.mrb[9].mxu0 }
 0x109   : > { %v4859_v5 = vpop.f32.mrb[10].mxu1  ;;  %v1233_v10 = vmax.f32 %v4861_v6, %v4865_v8  ;;  %v4871_v11 = vpop.f32.mrb[10].mxu0  ;;  %v4393_v8 = vld [vmem:[%s6109_s4 + $0x38] sm:$0xff]  }
 0x10a   : > { %v4863_v7 = vpop.f32.mrb[11].mxu1  ;;  %v4873_v12 = vpop.f32.mrb[11].mxu0 }
 0x10b   : > { %v1234_v13 = vmax.f32 %v4871_v11, %v4873_v12 }
 0x10f   : > { %v4877_v14 = vpop.f32.mrb[12].mxu1  ;;  %v4885_v18 = vpop.f32.mrb[12].mxu0 }
 0x110   : > { %v4879_v15 = vpop.f32.mrb[13].mxu1  ;;  %v4892_v21 = vpop.f32.mrb[13].mxu0 }
 0x111   : > { %v4883_v17 = vpop.f32.mrb[14].mxu1  ;;  %v1235_v23 = vmax.f32 %v4885_v18, %v4892_v21  ;;  %v4898_v24 = vpop.f32.mrb[14].mxu0 }
 0x112   : > { %v4890_v20 = vpop.f32.mrb[15].mxu1  ;;  %v4900_v25 = vpop.f32.mrb[15].mxu0 }
 0x113   : > { %v1236_v26 = vmax.f32 %v4898_v24, %v4900_v25 }
 0x117   : > { %v1070_v27 = vpop.f32.mrb[16].mxu1  ;;  %v4904_v31 = vpop.f32.mrb[16].mxu0 }
 0x118   : > { %v1072_v28 = vpop.f32.mrb[17].mxu1  ;;  %v4914_v35 = vpop.f32.mrb[17].mxu0 }
 0x119   : > { %v1261_v29 = vmax.f32 %v1070_v27, %v1072_v28  ;;  %v1074_v30 = vpop.f32.mrb[18].mxu1  ;;  %v1237_v38 = vmax.f32 %v4904_v31, %v4914_v35  ;;  %v4918_v39 = vpop.f32.mrb[18].mxu0 }
 0x11a   : > { %v1076_v34 = vpop.f32.mrb[19].mxu1  ;;  %v4920_v40 = vpop.f32.mrb[19].mxu0 }
 0x11b   : > { %v1293_v36 = vmax.f32 %v1229_v49, %v1261_v29  ;;  %v1262_v37 = vmax.f32 %v1074_v30, %v1076_v34  ;;  %v1238_v50 = vmax.f32 %v4918_v39, %v4920_v40  ;;  %v4388_v49 = vld [vmem:[%s6109_s4 + $0x10] sm:$0xff]  }
 0x11c   : > { %4191 = vmatprep.subr.bf16.mxu1 %v4388_v49 }
 0x11d   : > { %v1332_v45 = vadd.f32 %v4912_v33, %v1293_v36  ;;  %v1294_v47 = vmax.f32 %v1230_v52, %v1262_v37  ;;  %4192 = vmatpush3.bf16.msra.mxu1 %v4388_v49 }
 0x11e   : > { %4193 = vmatprep.subr.bf16.mxu1 %v4389_v51 }
 0x11f   : > { %v1396_v19 = vmul.f32 0.1, %v1332_v45  ;;  %v1333_v27 = vadd.f32 %v4912_v33, %v1294_v47  ;;  %v1080_v28 = vpop.f32.mrb[20].mxu1  ;;  %vm1364_vm2 = vcmp.ge.f32.partialorder %v1332_v45, 0.0  ;;  %v4932_v34 = vpop.f32.mrb[20].mxu0  ;;  %v4390_v47 = vld [vmem:[%s6109_s4 + $0x20] sm:$0xff]  }
 0x120   : > { %v1082_v29 = vpop.f32.mrb[21].mxu1  ;;  %v4936_v2 = vpop.f32.mrb[21].mxu0 }
 0x121   : > { %v1397_v30 = vmul.f32 0.1, %v1333_v27  ;;  %v1263_v52 = vmax.f32 %v1080_v28, %v1082_v29  ;;  %v1084_v32 = vpop.f32.mrb[22].mxu1  ;;  %vm1365_vm3 = vcmp.ge.f32.partialorder %v1333_v27, 0.0  ;;  %v4934_v37 = vsel %vm1364_vm2, %v1332_v45, %v1396_v19  ;;  %v4948_v16 = vpop.f32.mrb[22].mxu0  ;;  %4194 = vmatpush3.bf16.msra.mxu1 %v4389_v51 }
 0x122   : > { %v1086_v36 = vpop.f32.mrb[23].mxu1  ;;  %v1239_v49 = vmax.f32 %v4932_v34, %v4936_v2  ;;  %v4952_v19 = vpop.f32.mrb[23].mxu0  ;;  %4195 = vmatprep.subr.bf16.mxu1 %v4390_v47 }
 0x123   : > { %v1295_v22 = vmax.f32 %v1231_v61, %v1263_v52  ;;  %v1264_v28 = vmax.f32 %v1084_v32, %v1086_v36  ;;  %v4944_v29 = vsel %vm1365_vm3, %v1333_v27, %v1397_v30  ;;  %v1240_v59 = vmax.f32 %v4948_v16, %v4952_v19  ;;  %v4391_v61 = vld [vmem:[%s6109_s4 + $0x28] sm:$0xff]  }
 0x124   : > { %v1494_v45 = vpack.c.bf16 %v4944_v29, %v4934_v37 }
 0x125   : > { %v1334_v9 = vadd.f32 %v4912_v33, %v1295_v22  ;;  %v1296_v57 = vmax.f32 %v1232_v0, %v1264_v28  ;;  %4196 = vmatpush3.bf16.msra.mxu1 %v4390_v47 }
 0x126   : > { %4155 = vmatprep.mubr.bf16.mxu0 %v1494_v45  ;;  %4197 = vmatprep.subr.bf16.mxu1 %v4391_v61  ;;  %v4392_v45 = vld [vmem:[%s6109_s4 + $0x30] sm:$0xff]  }
 0x127   : > { %vm1366_vm4 = vcmp.ge.f32.partialorder %v1334_v9, 0.0  ;;  %v1398_v27 = vmul.f32 0.1, %v1334_v9  ;;  %v1335_v30 = vadd.f32 %v4912_v33, %v1296_v57  ;;  %v1090_v52 = vpop.f32.mrb[24].mxu1  ;;  %v4964_v0 = vpop.f32.mrb[24].mxu0 }
 0x128   : > { %v1092_v22 = vpop.f32.mrb[25].mxu1  ;;  %v4968_v28 = vpop.f32.mrb[25].mxu0 }
 0x129   : > { %vm1367_vm5 = vcmp.ge.f32.partialorder %v1335_v30, 0.0  ;;  %v1399_v32 = vmul.f32 0.1, %v1335_v30  ;;  %v1265_v62 = vmax.f32 %v1090_v52, %v1092_v22  ;;  %v1094_v63 = vpop.f32.mrb[26].mxu1  ;;  %v4966_v51 = vsel %vm1366_vm4, %v1334_v9, %v1398_v27  ;;  %v4980_v9 = vpop.f32.mrb[26].mxu0  ;;  %4198 = vmatpush3.bf16.msra.mxu1 %v4391_v61 }
 0x12a   : > { %v1096_v36 = vpop.f32.mrb[27].mxu1  ;;  %v1241_v47 = vmax.f32 %v4964_v0, %v4968_v28  ;;  %v4984_v4 = vpop.f32.mrb[27].mxu0  ;;  %4199 = vmatprep.subr.bf16.mxu1 %v4392_v45 }
 0x12b   : > { %v4973_v57 = vsel %vm1367_vm5, %v1335_v30, %v1399_v32  ;;  %v1297_v52 = vmax.f32 %v1233_v10, %v1265_v62  ;;  %v1266_v22 = vmax.f32 %v1094_v63, %v1096_v36  ;;  %v1242_v6 = vmax.f32 %v4980_v9, %v4984_v4 }
 0x12c   : > { %v1495_v27 = vpack.c.bf16 %v4973_v57, %v4966_v51 }
 0x12d   : > { %v1336_v60 = vadd.f32 %v4912_v33, %v1297_v52  ;;  %v1298_v30 = vmax.f32 %v1234_v13, %v1266_v22  ;;  %4200 = vmatpush3.bf16.msra.mxu1 %v4392_v45 }
 0x12e   : > { %4156 = vmatmul.mubr.bf16.vlgmr.msra.gmra.mrb[48].mxu0 %v1495_v27  ;;  %4201 = vmatprep.subr.bf16.mxu1 %v4393_v8 }
 0x12f   : > { %v1400_v10 = vmul.f32 0.1, %v1336_v60  ;;  %v1337_v32 = vadd.f32 %v4912_v33, %v1298_v30  ;;  %v1100_v62 = vpop.f32.mrb[28].mxu1  ;;  %vm1368_vm6 = vcmp.ge.f32.partialorder %v1336_v60, 0.0  ;;  %v4996_v12 = vpop.f32.mrb[28].mxu0 }
 0x130   : > { %v1102_v63 = vpop.f32.mrb[29].mxu1  ;;  %v5000_v22 = vpop.f32.mrb[29].mxu0 }
 0x131   : > { %v1401_v36 = vmul.f32 0.1, %v1337_v32  ;;  %v1267_v52 = vmax.f32 %v1100_v62, %v1102_v63  ;;  %v1104_v11 = vpop.f32.mrb[30].mxu1  ;;  %vm1369_vm7 = vcmp.ge.f32.partialorder %v1337_v32, 0.0  ;;  %v4998_v61 = vsel %vm1368_vm6, %v1336_v60, %v1400_v10  ;;  %v5009_v63 = vpop.f32.mrb[30].mxu0  ;;  %4202 = vmatpush3.bf16.msra.mxu1 %v4393_v8 }
 0x132   : > { %v1106_v13 = vpop.f32.mrb[31].mxu1  ;;  %v1243_v62 = vmax.f32 %v4996_v12, %v5000_v22  ;;  %v5013_v60 = vpop.f32.mrb[31].mxu0 }
 0x133   : > { %v1299_v27 = vmax.f32 %v1235_v23, %v1267_v52  ;;  %v1268_v30 = vmax.f32 %v1104_v11, %v1106_v13  ;;  %v5005_v55 = vsel %vm1369_vm7, %v1337_v32, %v1401_v36 }
 0x134   : > { %v1496_v45 = vpack.c.bf16 %v5005_v55, %v4998_v61 }
 0x135   : > { %v1338_v10 = vadd.f32 %v4912_v33, %v1299_v27  ;;  %v1300_v18 = vmax.f32 %v1236_v26, %v1268_v30 }
 0x136   : > { %4159 = vmatprep.mubr.bf16.mxu0 %v1496_v45 }
 0x137   : > { %v1402_v23 = vmul.f32 0.1, %v1338_v10  ;;  %v1339_v32 = vadd.f32 %v4912_v33, %v1300_v18  ;;  %v1110_v36 = vpop.f32.mrb[32].mxu1  ;;  %vm1370_vm8 = vcmp.ge.f32.partialorder %v1338_v10, 0.0  ;;  %v5022_v27 = vpop.f32.mrb[32].mxu0 }
 0x138   : > { %v1112_v52 = vpop.f32.mrb[33].mxu1  ;;  %v5026_v25 = vpop.f32.mrb[33].mxu0 }
 0x139   : > { %v1403_v11 = vmul.f32 0.1, %v1339_v32  ;;  %v1269_v13 = vmax.f32 %v1110_v36, %v1112_v52  ;;  %v1114_v48 = vpop.f32.mrb[34].mxu1  ;;  %vm1371_vm9 = vcmp.ge.f32.partialorder %v1339_v32, 0.0  ;;  %v5024_v24 = vsel %vm1370_vm8, %v1338_v10, %v1402_v23  ;;  %v5035_v18 = vpop.f32.mrb[34].mxu0 }
 0x13a   : > { %v1116_v43 = vpop.f32.mrb[35].mxu1  ;;  %v5039_v52 = vpop.f32.mrb[35].mxu0 }
 0x13b   : > { %v1301_v26 = vmax.f32 %v1237_v38, %v1269_v13  ;;  %v1270_v8 = vmax.f32 %v1114_v48, %v1116_v43  ;;  %v5031_v30 = vsel %vm1371_vm9, %v1339_v32, %v1403_v11 }
 0x13c   : > { %v1497_v36 = vpack.c.bf16 %v5031_v30, %v5024_v24 }
 0x13d   : > { %v1340_v10 = vadd.f32 %v4912_v33, %v1301_v26  ;;  %v1302_v31 = vmax.f32 %v1238_v50, %v1270_v8 }
 0x13e   : > { %4160 = vmatmul.mubr.bf16.gmra.mrb[52].mxu0 %v1497_v36 }
 0x13f   : > { %v1404_v48 = vmul.f32 0.1, %v1340_v10  ;;  %v1341_v35 = vadd.f32 %v4912_v33, %v1302_v31  ;;  %v1120_v38 = vpop.f32.mrb[36].mxu1  ;;  %vm1372_vm10 = vcmp.ge.f32.partialorder %v1340_v10, 0.0  ;;  %v5048_v45 = vpop.f32.mrb[36].mxu0 }
 0x140   : > { %v1122_v23 = vpop.f32.mrb[37].mxu1  ;;  %v5052_v39 = vpop.f32.mrb[37].mxu0 }
 0x141   : > { %v1405_v32 = vmul.f32 0.1, %v1341_v35  ;;  %v1271_v11 = vmax.f32 %v1120_v38, %v1122_v23  ;;  %v1124_v13 = vpop.f32.mrb[38].mxu1  ;;  %vm1373_vm11 = vcmp.ge.f32.partialorder %v1341_v35, 0.0  ;;  %v5050_v21 = vsel %vm1372_vm10, %v1340_v10, %v1404_v48  ;;  %v5061_v31 = vpop.f32.mrb[38].mxu0 }
 0x142   : > { %v1126_v26 = vpop.f32.mrb[39].mxu1  ;;  %v5065_v23 = vpop.f32.mrb[39].mxu0 }
 0x143   : > { %v1303_v40 = vmax.f32 %v1239_v49, %v1271_v11  ;;  %v1272_v50 = vmax.f32 %v1124_v13, %v1126_v26  ;;  %v5057_v8 = vsel %vm1373_vm11, %v1341_v35, %v1405_v32 }
 0x144   : > { %v1498_v38 = vpack.c.bf16 %v5057_v8, %v5050_v21 }
 0x145   : > { %v1342_v10 = vadd.f32 %v4912_v33, %v1303_v40  ;;  %v1304_v2 = vmax.f32 %v1240_v59, %v1272_v50 }
 0x146   : > { %4163 = vmatprep.mubr.bf16.mxu0 %v1498_v38 }
 0x147   : > { %v1406_v49 = vmul.f32 0.1, %v1342_v10  ;;  %v1343_v48 = vadd.f32 %v4912_v33, %v1304_v2  ;;  %v1130_v35 = vpop.f32.mrb[40].mxu1  ;;  %vm1374_vm12 = vcmp.ge.f32.partialorder %v1342_v10, 0.0  ;;  %v5074_v36 = vpop.f32.mrb[40].mxu0 }
 0x148   : > { %v1132_v32 = vpop.f32.mrb[41].mxu1  ;;  %v5078_v16 = vpop.f32.mrb[41].mxu0 }
 0x149   : > { %v1407_v11 = vmul.f32 0.1, %v1343_v48  ;;  %v1273_v13 = vmax.f32 %v1130_v35, %v1132_v32  ;;  %v1134_v26 = vpop.f32.mrb[42].mxu1  ;;  %vm1375_vm13 = vcmp.ge.f32.partialorder %v1343_v48, 0.0  ;;  %v5076_v43 = vsel %vm1374_vm12, %v1342_v10, %v1406_v49  ;;  %v5087_v2 = vpop.f32.mrb[42].mxu0 }
 0x14a   : > { %v1136_v40 = vpop.f32.mrb[43].mxu1  ;;  %v5091_v32 = vpop.f32.mrb[43].mxu0 }
 0x14b   : > { %v1305_v19 = vmax.f32 %v1241_v47, %v1273_v13  ;;  %v1274_v59 = vmax.f32 %v1134_v26, %v1136_v40  ;;  %v5083_v50 = vsel %vm1375_vm13, %v1343_v48, %v1407_v11 }
 0x14c   : > { %v1499_v35 = vpack.c.bf16 %v5083_v50, %v5076_v43 }
 0x14d   : > { %v1344_v10 = vadd.f32 %v4912_v33, %v1305_v19  ;;  %v1306_v0 = vmax.f32 %v1242_v6, %v1274_v59 }
 0x14e   : > { %4164 = vmatmul.mubr.bf16.gmra.mrb[56].mxu0 %v1499_v35 }
 0x14f   : > { %v1408_v47 = vmul.f32 0.1, %v1344_v10  ;;  %v1345_v49 = vadd.f32 %v4912_v33, %v1306_v0  ;;  %v1140_v48 = vpop.f32.mrb[44].mxu1  ;;  %vm1376_vm14 = vcmp.ge.f32.partialorder %v1344_v10, 0.0  ;;  %v5100_v38 = vpop.f32.mrb[44].mxu0 }
 0x150   : > { %v1142_v11 = vpop.f32.mrb[45].mxu1  ;;  %v5104_v4 = vpop.f32.mrb[45].mxu0 }
 0x151   : > { %v1409_v13 = vmul.f32 0.1, %v1345_v49  ;;  %v1275_v26 = vmax.f32 %v1140_v48, %v1142_v11  ;;  %v1144_v40 = vpop.f32.mrb[46].mxu1  ;;  %vm1377_vm15 = vcmp.ge.f32.partialorder %v1345_v49, 0.0  ;;  %v5102_v34 = vsel %vm1376_vm14, %v1344_v10, %v1408_v47  ;;  %v5113_v0 = vpop.f32.mrb[46].mxu0 }
 0x152   : > { %v1146_v19 = vpop.f32.mrb[47].mxu1  ;;  %v5117_v11 = vpop.f32.mrb[47].mxu0  ;;  %v6139_v47 = vmax.f32 %v5009_v63, %v5013_v60 }
 0x153   : > { %v1307_v9 = vmax.f32 %v1243_v62, %v1275_v26  ;;  %v1276_v6 = vmax.f32 %v1144_v40, %v1146_v19  ;;  %v5109_v59 = vsel %vm1377_vm15, %v1345_v49, %v1409_v13 }
 0x154   : > { %6138 = vst [vmem:[#allocation2_spill] sm:$0xff] %v5109_v59  ;;  %v1500_v48 = vpack.c.bf16 %v5109_v59, %v5102_v34 }
 0x155   : > { %v1346_v10 = vadd.f32 %v4912_v33, %v1307_v9  ;;  %v1308_v12 = vmax.f32 %v6139_v47, %v1276_v6  ;;  %v6140_v9 = vmax.f32 %v5022_v27, %v5026_v25 }
 0x156   : > { %4167 = vmatprep.mubr.bf16.mxu0 %v1500_v48 }
 0x157   : > { %v1410_v62 = vmul.f32 0.1, %v1346_v10  ;;  %v1347_v49 = vadd.f32 %v4912_v33, %v1308_v12  ;;  %v1150_v13 = vpop.f32.mrb[48].mxu1  ;;  %vm1378_vm0 = vcmp.ge.f32.partialorder %v1346_v10, 0.0 }
 0x158   : > { %v1152_v26 = vpop.f32.mrb[49].mxu1 }
 0x159   : > { %v1411_v40 = vmul.f32 0.1, %v1347_v49  ;;  %v1277_v19 = vmax.f32 %v1150_v13, %v1152_v26  ;;  %v1154_v35 = vpop.f32.mrb[50].mxu1  ;;  %vm1379_vm1 = vcmp.ge.f32.partialorder %v1347_v49, 0.0  ;;  %v5129_v6 = vsel %vm1378_vm0, %v1346_v10, %v1410_v62 }
 0x15a   : > { %v1156_v28 = vpop.f32.mrb[51].mxu1  ;;  %v6141_v13 = vmax.f32 %v5035_v18, %v5039_v52 }
 0x15b   : > { %v1309_v63 = vmax.f32 %v6140_v9, %v1277_v19  ;;  %v1278_v60 = vmax.f32 %v1154_v35, %v1156_v28  ;;  %v5131_v47 = vsel %vm1379_vm1, %v1347_v49, %v1411_v40  ;;  %v6142_v49 = vmax.f32 %v5048_v45, %v5052_v39 }
 0x15c   : > { %v1501_v48 = vpack.c.bf16 %v5131_v47, %v5129_v6 }
 0x15d   : > { %v1348_v12 = vadd.f32 %v4912_v33, %v1309_v63  ;;  %v1310_v26 = vmax.f32 %v6141_v13, %v1278_v60  ;;  %v6143_v60 = vmax.f32 %v5061_v31, %v5065_v23 }
 0x15e   : > { %4168 = vmatmul.mubr.bf16.gmra.mrb[60].mxu0 %v1501_v48 }
 0x15f   : > { %v1412_v22 = vmul.f32 0.1, %v1348_v12  ;;  %v1349_v59 = vadd.f32 %v4912_v33, %v1310_v26  ;;  %v1160_v27 = vpop.f32.mrb[52].mxu1  ;;  %vm1380_vm2 = vcmp.ge.f32.partialorder %v1348_v12, 0.0 }
 0x160   : > { %v1162_v25 = vpop.f32.mrb[53].mxu1 }
 0x161   : > { %v1413_v28 = vmul.f32 0.1, %v1349_v59  ;;  %v1279_v35 = vmax.f32 %v1160_v27, %v1162_v25  ;;  %v1164_v10 = vpop.f32.mrb[54].mxu1  ;;  %vm1381_vm3 = vcmp.ge.f32.partialorder %v1349_v59, 0.0  ;;  %v5143_v9 = vsel %vm1380_vm2, %v1348_v12, %v1412_v22 }
 0x162   : > { %v1166_v62 = vpop.f32.mrb[55].mxu1  ;;  %v6144_v25 = vmax.f32 %v5074_v36, %v5078_v16 }
 0x163   : > { %v1311_v40 = vmax.f32 %v6142_v49, %v1279_v35  ;;  %v1280_v19 = vmax.f32 %v1164_v10, %v1166_v62  ;;  %v5145_v18 = vsel %vm1381_vm3, %v1349_v59, %v1413_v28  ;;  %v6145_v49 = vmax.f32 %v5087_v2, %v5091_v32 }
 0x164   : > { %v1502_v52 = vpack.c.bf16 %v5145_v18, %v5143_v9 }
 0x165   : > { %v1350_v63 = vadd.f32 %v4912_v33, %v1311_v40  ;;  %v1312_v48 = vmax.f32 %v6143_v60, %v1280_v19 }
 0x166   : > { %4171 = vmatprep.mubr.bf16.mxu0 %v1502_v52 }
 0x167   : > { %v1414_v13 = vmul.f32 0.1, %v1350_v63  ;;  %v1351_v26 = vadd.f32 %v4912_v33, %v1312_v48  ;;  %v1170_v45 = vpop.f32.mrb[56].mxu1  ;;  %vm1382_vm4 = vcmp.ge.f32.partialorder %v1350_v63, 0.0 }
 0x168   : > { %v1172_v39 = vpop.f32.mrb[57].mxu1 }
 0x169   : > { %v1415_v22 = vmul.f32 0.1, %v1351_v26  ;;  %v1281_v12 = vmax.f32 %v1170_v45, %v1172_v39  ;;  %v1174_v59 = vpop.f32.mrb[58].mxu1  ;;  %vm1383_vm5 = vcmp.ge.f32.partialorder %v1351_v26, 0.0  ;;  %v5157_v10 = vsel %vm1382_vm4, %v1350_v63, %v1414_v13 }
 0x16a   : > { %v1176_v27 = vpop.f32.mrb[59].mxu1 }
 0x16b   : > { %v1313_v28 = vmax.f32 %v6144_v25, %v1281_v12  ;;  %v1282_v35 = vmax.f32 %v1174_v59, %v1176_v27  ;;  %v5159_v31 = vsel %vm1383_vm5, %v1351_v26, %v1415_v22  ;;  %v6146_v26 = vmax.f32 %v5100_v38, %v5104_v4 }
 0x16c   : > { %v1503_v23 = vpack.c.bf16 %v5159_v31, %v5157_v10  ;;  %v6147_v59 = vmax.f32 %v5113_v0, %v5117_v11 }
 0x16d   : > { %v1352_v62 = vadd.f32 %v4912_v33, %v1313_v28  ;;  %v1314_v40 = vmax.f32 %v6145_v49, %v1282_v35 }
 0x16e   : > { %4172 = vmatmul.mubr.bf16.gmra.mrb[64].mxu0 %v1503_v23 }
 0x16f   : > { %v1416_v19 = vmul.f32 0.1, %v1352_v62  ;;  %v1353_v52 = vadd.f32 %v4912_v33, %v1314_v40  ;;  %v1180_v36 = vpop.f32.mrb[60].mxu1  ;;  %vm1384_vm6 = vcmp.ge.f32.partialorder %v1352_v62, 0.0  ;;  %v6148_v40 = vmax.f32 %v4817_v41, %v4819_v42 }
 0x170   : > { %v1182_v16 = vpop.f32.mrb[61].mxu1 }
 0x171   : > { %v1417_v63 = vmul.f32 0.1, %v1353_v52  ;;  %v1283_v60 = vmax.f32 %v1180_v36, %v1182_v16  ;;  %v1184_v48 = vpop.f32.mrb[62].mxu1  ;;  %vm1385_vm7 = vcmp.ge.f32.partialorder %v1353_v52, 0.0  ;;  %v5171_v22 = vsel %vm1384_vm6, %v1352_v62, %v1416_v19 }
 0x172   : > { %v1186_v13 = vpop.f32.mrb[63].mxu1 }
 0x173   : > { %v1315_v45 = vmax.f32 %v6146_v26, %v1283_v60  ;;  %v1284_v39 = vmax.f32 %v1184_v48, %v1186_v13  ;;  %v5173_v2 = vsel %vm1385_vm7, %v1353_v52, %v1417_v63  ;;  %v6149_v63 = vmax.f32 %v4823_v44, %v4825_v46 }
 0x174   : > { %v1504_v32 = vpack.c.bf16 %v5173_v2, %v5171_v22 }
 0x175   : > { %v1354_v12 = vadd.f32 %v4912_v33, %v1315_v45  ;;  %v1316_v27 = vmax.f32 %v6147_v59, %v1284_v39 }
 0x176   : > { %4175 = vmatprep.mubr.bf16.mxu0 %v1504_v32 }
 0x177   : > { %v1418_v25 = vmul.f32 0.1, %v1354_v12  ;;  %v1355_v28 = vadd.f32 %v4912_v33, %v1316_v27  ;;  %v1190_v38 = vpop.f32.mrb[64].mxu1  ;;  %vm1386_vm8 = vcmp.ge.f32.partialorder %v1354_v12, 0.0 }
 0x178   : > { %v1192_v4 = vpop.f32.mrb[65].mxu1 }
 0x179   : > { %v1419_v35 = vmul.f32 0.1, %v1355_v28  ;;  %v1285_v23 = vmax.f32 %v1190_v38, %v1192_v4  ;;  %v1194_v62 = vpop.f32.mrb[66].mxu1  ;;  %vm1387_vm9 = vcmp.ge.f32.partialorder %v1355_v28, 0.0  ;;  %v5185_v36 = vsel %vm1386_vm8, %v1354_v12, %v1418_v25 }
 0x17a   : > { %v1196_v49 = vpop.f32.mrb[67].mxu1  ;;  %v6150_v12 = vmax.f32 %v4829_v53, %v4831_v54  ;;  %v6151_v38 = vmax.f32 %v4835_v56, %v4839_v58 }
 0x17b   : > { %v1317_v19 = vmax.f32 %v6148_v40, %v1285_v23  ;;  %v1286_v52 = vmax.f32 %v1194_v62, %v1196_v49  ;;  %v5187_v0 = vsel %vm1387_vm9, %v1355_v28, %v1419_v35 }
 0x17c   : > { %v1505_v11 = vpack.c.bf16 %v5187_v0, %v5185_v36 }
 0x17d   : > { %v1356_v16 = vadd.f32 %v4912_v33, %v1317_v19  ;;  %v1318_v60 = vmax.f32 %v6149_v63, %v1286_v52  ;;  %v6152_v52 = vmax.f32 %v4853_v1, %v4855_v3 }
 0x17e   : > { %4176 = vmatmul.mubr.bf16.gmra.mrb[68].mxu0 %v1505_v11 }
 0x17f   : > { %v1420_v48 = vmul.f32 0.1, %v1356_v16  ;;  %v1357_v13 = vadd.f32 %v4912_v33, %v1318_v60  ;;  %v1200_v41 = vpop.f32.mrb[68].mxu1  ;;  %vm1388_vm10 = vcmp.ge.f32.partialorder %v1356_v16, 0.0 }
 0x180   : > { %v1202_v42 = vpop.f32.mrb[69].mxu1 }
 0x181   : > { %v1421_v26 = vmul.f32 0.1, %v1357_v13  ;;  %v1287_v45 = vmax.f32 %v1200_v41, %v1202_v42  ;;  %v1204_v39 = vpop.f32.mrb[70].mxu1  ;;  %vm1389_vm11 = vcmp.ge.f32.partialorder %v1357_v13, 0.0  ;;  %v5199_v25 = vsel %vm1388_vm10, %v1356_v16, %v1420_v48 }
 0x182   : > { %v1206_v32 = vpop.f32.mrb[71].mxu1  ;;  %v6153_v48 = vmax.f32 %v4859_v5, %v4863_v7 }
 0x183   : > { %v1319_v59 = vmax.f32 %v6150_v12, %v1287_v45  ;;  %v1288_v27 = vmax.f32 %v1204_v39, %v1206_v32  ;;  %v5201_v44 = vsel %vm1389_vm11, %v1357_v13, %v1421_v26  ;;  %v6154_v12 = vmax.f32 %v4877_v14, %v4879_v15 }
 0x184   : > { %v1506_v46 = vpack.c.bf16 %v5201_v44, %v5199_v25 }
 0x185   : > { %v1358_v28 = vadd.f32 %v4912_v33, %v1319_v59  ;;  %v1320_v4 = vmax.f32 %v6151_v38, %v1288_v27  ;;  %v6155_v38 = vmax.f32 %v4883_v17, %v4890_v20  ;;  %v4394_v17 = vld [vmem:[%s6112_s7] ss:$8 sps:$4 sm:$0xff]   ;;  %v4396_v20 = vld [vmem:[%s6112_s7 + $0x4] ss:$8 sps:$4 sm:$0xff]  }
 0x186   : > { %4179 = vmatprep.mubr.bf16.mxu0 %v1506_v46  ;;  %2225 = vmatprep.subr.bf16.mxu0 %v4396_v20 }
 0x187   : > { %v1422_v35 = vmul.f32 0.1, %v1358_v28  ;;  %v1359_v23 = vadd.f32 %v4912_v33, %v1320_v4  ;;  %v1210_v53 = vpop.f32.mrb[72].mxu1  ;;  %vm1390_vm12 = vcmp.ge.f32.partialorder %v1358_v28, 0.0  ;;  %2226 = vmatpush1.bf16.msra.mxu0 %v4394_v17 }
 0x188   : > { %v1212_v54 = vpop.f32.mrb[73].mxu1 }
 0x189   : > { %v1423_v62 = vmul.f32 0.1, %v1359_v23  ;;  %v1289_v49 = vmax.f32 %v1210_v53, %v1212_v54  ;;  %v1214_v40 = vpop.f32.mrb[74].mxu1  ;;  %vm1391_vm13 = vcmp.ge.f32.partialorder %v1359_v23, 0.0  ;;  %v5213_v63 = vsel %vm1390_vm12, %v1358_v28, %v1422_v35 }
 0x18a   : > { %v1216_v19 = vpop.f32.mrb[75].mxu1 }
 0x18b   : > { %v1321_v11 = vmax.f32 %v6152_v52, %v1289_v49  ;;  %v1290_v16 = vmax.f32 %v1214_v40, %v1216_v19  ;;  %v5215_v56 = vsel %vm1391_vm13, %v1359_v23, %v1423_v62  ;;  %v6156_v62 = vmov 0   ;;  %v4397_v49 = vld [vmem:[%s6112_s7 + $0x10] ss:$8 sps:$4 sm:$0xff]   ;;  %v4402_v40 = vld [vmem:[%s6112_s7 + $0x24] ss:$8 sps:$4 sm:$0xff]  }
 0x18c   : > { %v1507_v58 = vpack.c.bf16 %v5215_v56, %v5213_v63  ;;  %v5263_v52 = vld [vmem:[%s6110_s5] ss:$0 sm:$0xff] }
 0x18d   : > { %v1360_v60 = vadd.f32 %v4912_v33, %v1321_v11  ;;  %v1322_v13 = vmax.f32 %v6153_v48, %v1290_v16  ;;  %v4400_v11 = vld [vmem:[%s6112_s7 + $0x20] ss:$8 sps:$4 sm:$0xff]  }
 0x18e   : > { %4180 = vmatmul.mubr.bf16.gmra.mrb[72].mxu0 %v1507_v58  ;;  %v4405_v58 = vld [vmem:[%s6112_s7 + $0x34] ss:$8 sps:$4 sm:$0xff]  }
 0x18f   : > { %v1424_v41 = vmul.f32 0.1, %v1360_v60  ;;  %v1361_v42 = vadd.f32 %v4912_v33, %v1322_v13  ;;  %v1220_v1 = vpop.f32.mrb[76].mxu1  ;;  %vm1392_vm14 = vcmp.ge.f32.partialorder %v1360_v60, 0.0 }
 0x190   : > { %v1222_v3 = vpop.f32.mrb[77].mxu1 }
 0x191   : > { %v1425_v26 = vmul.f32 0.1, %v1361_v42  ;;  %v1291_v45 = vmax.f32 %v1220_v1, %v1222_v3  ;;  %v1224_v39 = vpop.f32.mrb[78].mxu1  ;;  %vm1393_vm15 = vcmp.ge.f32.partialorder %v1361_v42, 0.0  ;;  %v5227_v46 = vsel %vm1392_vm14, %v1360_v60, %v1424_v41  ;;  %v4403_v3 = vld [vmem:[%s6112_s7 + $0x30] ss:$8 sps:$4 sm:$0xff]  }
 0x192   : > { %v1226_v32 = vpop.f32.mrb[79].mxu1 }
 0x193   : > { %v1323_v59 = vmax.f32 %v6154_v12, %v1291_v45  ;;  %v1292_v27 = vmax.f32 %v1224_v39, %v1226_v32  ;;  %v5229_v5 = vsel %vm1393_vm15, %v1361_v42, %v1425_v26  ;;  %v4408_v45 = vld [vmem:[%s6112_s7 + $0x44] ss:$8 sps:$4 sm:$0xff]   ;;  %v4406_v32 = vld [vmem:[%s6112_s7 + $0x40] ss:$8 sps:$4 sm:$0xff]   ;;  %v4411_v12 = vld [vmem:[%s6112_s7 + $0x54] ss:$8 sps:$4 sm:$0xff]  }
 0x194   : > { %v1508_v7 = vpack.c.bf16 %v5229_v5, %v5227_v46 }
 0x195   : > { %v1362_v28 = vadd.f32 %v4912_v33, %v1323_v59  ;;  %v1324_v4 = vmax.f32 %v6155_v38, %v1292_v27  ;;  %v4409_v59 = vld [vmem:[%s6112_s7 + $0x50] ss:$8 sps:$4 sm:$0xff]   ;;  %v4414_v27 = vld [vmem:[%s6112_s7 + $0x64] ss:$8 sps:$4 sm:$0xff]  }
 0x196   : > { %4183 = vmatprep.mubr.bf16.mxu0 %v1508_v7 }
 0x197   : > { %v1426_v35 = vmul.f32 0.1, %v1362_v28  ;;  %v1363_v23 = vadd.f32 %v4912_v33, %v1324_v4  ;;  %vm1394_vm0 = vcmp.ge.f32.partialorder %v1362_v28, 0.0  ;;  %v4399_v33 = vld [vmem:[%s6112_s7 + $0x14] ss:$8 sps:$4 sm:$0xff]  }
 0x198   : > { %2227 = vmatprep.subr.bf16.mxu0 %v4399_v33 }
 0x199   : > { %v1427_v14 = vmul.f32 0.1, %v1363_v23  ;;  %vm1395_vm1 = vcmp.ge.f32.partialorder %v1363_v23, 0.0  ;;  %v5238_v15 = vsel %vm1394_vm0, %v1362_v28, %v1426_v35  ;;  %2228 = vmatpush1.bf16.msra.mxu0 %v4397_v49  ;;  %v4412_v28 = vld [vmem:[%s6112_s7 + $0x60] ss:$8 sps:$4 sm:$0xff]  }
 0x19a   : > { %2229 = vmatprep.subr.bf16.mxu0 %v4402_v40 }
 0x19b   : > { %v5240_v53 = vsel %vm1395_vm1, %v1363_v23, %v1427_v14 }
 0x19c   : > { %v1509_v54 = vpack.c.bf16 %v5240_v53, %v5238_v15 }
 0x19d   : > { %2230 = vmatpush1.bf16.msra.mxu0 %v4400_v11 }
 0x19e   : > { %4184 = vmatmul.mubr.bf16.gmra.mrb[76].mxu0 %v1509_v54  ;;  %2231 = vmatprep.subr.bf16.mxu0 %v4405_v58 }
 0x19f   : > { %2257 = vmatprep.mubr.bf16.mxu0 %v6156_v62 }
 0x1a1   : > { %2232 = vmatpush1.bf16.msra.mxu0 %v4403_v3 }
 0x1a2   : > { %2233 = vmatprep.subr.bf16.mxu0 %v4408_v45 }
 0x1a5   : > { %2234 = vmatpush1.bf16.msra.mxu0 %v4406_v32 }
 0x1a6   : > { %2235 = vmatprep.subr.bf16.mxu0 %v4411_v12 }
 0x1a9   : > { %2236 = vmatpush1.bf16.msra.mxu0 %v4409_v59 }
 0x1aa   : > { %2237 = vmatprep.subr.bf16.mxu0 %v4414_v27 }
 0x1ad   : > { %2238 = vmatpush1.bf16.msra.mxu0 %v4412_v28 }
 0x201   : > { %v4157_v19 = vpop.f32.mrb[48].mxu0 }
 0x202   : > { %v1598_v16 = vpop.f32.mrb[49].mxu0  ;;  %v1607_v48 = vadd.f32 %v4157_v19, %v5263_v52 }
 0x203   : > { %v4158_v60 = vpop.f32.mrb[50].mxu0  ;;  %v1599_v42 = vadd.f32 %v5263_v52, %v1598_v16 }
 0x204   : > { %v1610_v13 = vadd.f32 %v4158_v60, %v5263_v52  ;;  %v1601_v41 = vpop.f32.mrb[51].mxu0 }
 0x205   : > { %v1602_v1 = vadd.f32 %v5263_v52, %v1601_v41 }
 0x206   : > { %v1726_v26 = vpack.c.bf16 %v1610_v13, %v1607_v48 }
 0x207   : > { %v1725_v39 = vpack.c.bf16 %v1602_v1, %v1599_v42 }
 0x209   : > { %4203 = vmatprep.mubr.bf16.mxu1 %v1725_v39 }
 0x20a   : > { %4204 = vmatmul.mubr.bf16.vlgmr.msra.gmra.mrb[80].mxu1 %v1726_v26 }
 0x211   : > { %v4161_v7 = vpop.f32.mrb[52].mxu0 }
 0x212   : > { %v1614_v38 = vpop.f32.mrb[53].mxu0  ;;  %v1623_v35 = vadd.f32 %v4161_v7, %v5263_v52 }
 0x213   : > { %v4162_v4 = vpop.f32.mrb[54].mxu0  ;;  %v1615_v54 = vadd.f32 %v5263_v52, %v1614_v38 }
 0x214   : > { %v1626_v23 = vadd.f32 %v4162_v4, %v5263_v52  ;;  %v1617_v14 = vpop.f32.mrb[55].mxu0 }
 0x215   : > { %v1618_v17 = vadd.f32 %v5263_v52, %v1617_v14 }
 0x216   : > { %v1728_v20 = vpack.c.bf16 %v1626_v23, %v1623_v35 }
 0x217   : > { %v1727_v33 = vpack.c.bf16 %v1618_v17, %v1615_v54 }
 0x219   : > { %4207 = vmatprep.mubr.bf16.mxu1 %v1727_v33 }
 0x21a   : > { %4208 = vmatmul.mubr.bf16.gmra.mrb[84].mxu1 %v1728_v20 }
 0x221   : > { %v4165_v49 = vpop.f32.mrb[56].mxu0 }
 0x222   : > { %v1630_v40 = vpop.f32.mrb[57].mxu0  ;;  %v1639_v11 = vadd.f32 %v4165_v49, %v5263_v52 }
 0x223   : > { %v4166_v19 = vpop.f32.mrb[58].mxu0  ;;  %v1631_v60 = vadd.f32 %v5263_v52, %v1630_v40 }
 0x224   : > { %v1642_v16 = vadd.f32 %v4166_v19, %v5263_v52  ;;  %v1633_v58 = vpop.f32.mrb[59].mxu0 }
 0x225   : > { %v1634_v48 = vadd.f32 %v5263_v52, %v1633_v58 }
 0x226   : > { %v1730_v13 = vpack.c.bf16 %v1642_v16, %v1639_v11 }
 0x227   : > { %v1729_v41 = vpack.c.bf16 %v1634_v48, %v1631_v60 }
 0x229   : > { %4211 = vmatprep.mubr.bf16.mxu1 %v1729_v41 }
 0x22a   : > { %4212 = vmatmul.mubr.bf16.gmra.mrb[88].mxu1 %v1730_v13 }
 0x231   : > { %v4169_v42 = vpop.f32.mrb[60].mxu0 }
 0x232   : > { %v1646_v1 = vpop.f32.mrb[61].mxu0  ;;  %v1655_v26 = vadd.f32 %v4169_v42, %v5263_v52 }
 0x233   : > { %v4170_v3 = vpop.f32.mrb[62].mxu0  ;;  %v1647_v32 = vadd.f32 %v5263_v52, %v1646_v1 }
 0x234   : > { %v1658_v45 = vadd.f32 %v4170_v3, %v5263_v52  ;;  %v1649_v39 = vpop.f32.mrb[63].mxu0 }
 0x235   : > { %v1650_v12 = vadd.f32 %v5263_v52, %v1649_v39  ;;  %v4417_v39 = vld [vmem:[%s6112_s7 + $0x74] ss:$8 sps:$4 sm:$0xff]  }
 0x236   : > { %v1732_v59 = vpack.c.bf16 %v1658_v45, %v1655_v26  ;;  %2239 = vmatprep.subr.bf16.mxu0 %v4417_v39 }
 0x237   : > { %v1731_v27 = vpack.c.bf16 %v1650_v12, %v1647_v32 }
 0x239   : > { %4215 = vmatprep.mubr.bf16.mxu1 %v1731_v27 }
 0x23a   : > { %4216 = vmatmul.mubr.bf16.gmra.mrb[92].mxu1 %v1732_v59  ;;  %v4415_v59 = vld [vmem:[%s6112_s7 + $0x70] ss:$8 sps:$4 sm:$0xff]  }
 0x23b   : > { %2240 = vmatpush1.bf16.msra.mxu0 %v4415_v59 }
 0x241   : > { %v4173_v7 = vpop.f32.mrb[64].mxu0 }
 0x242   : > { %v1662_v28 = vpop.f32.mrb[65].mxu0  ;;  %v1671_v4 = vadd.f32 %v4173_v7, %v5263_v52 }
 0x243   : > { %v4174_v38 = vpop.f32.mrb[66].mxu0  ;;  %v1663_v14 = vadd.f32 %v5263_v52, %v1662_v28 }
 0x244   : > { %v1674_v35 = vadd.f32 %v4174_v38, %v5263_v52  ;;  %v1665_v23 = vpop.f32.mrb[67].mxu0 }
 0x245   : > { %v1666_v54 = vadd.f32 %v5263_v52, %v1665_v23 }
 0x246   : > { %v1734_v17 = vpack.c.bf16 %v1674_v35, %v1671_v4 }
 0x247   : > { %v1733_v20 = vpack.c.bf16 %v1666_v54, %v1663_v14 }
 0x249   : > { %4219 = vmatprep.mubr.bf16.mxu1 %v1733_v20 }
 0x24a   : > { %4220 = vmatmul.mubr.bf16.gmra.mrb[96].mxu1 %v1734_v17 }
 0x251   : > { %v4177_v33 = vpop.f32.mrb[68].mxu0 }
 0x252   : > { %v1678_v49 = vpop.f32.mrb[69].mxu0  ;;  %v1687_v19 = vadd.f32 %v4177_v33, %v5263_v52 }
 0x253   : > { %v4178_v40 = vpop.f32.mrb[70].mxu0  ;;  %v1679_v58 = vadd.f32 %v5263_v52, %v1678_v49  ;;  %v5333_v49 = vld [vmem:[%s6111_s6] ss:$0 sm:$0xff] }
 0x254   : > { %v1690_v11 = vadd.f32 %v4178_v40, %v5263_v52  ;;  %v1681_v16 = vpop.f32.mrb[71].mxu0 }
 0x255   : > { %v1682_v60 = vadd.f32 %v5263_v52, %v1681_v16 }
 0x256   : > { %v1736_v48 = vpack.c.bf16 %v1690_v11, %v1687_v19 }
 0x257   : > { %v1735_v13 = vpack.c.bf16 %v1682_v60, %v1679_v58 }
 0x259   : > { %4223 = vmatprep.mubr.bf16.mxu1 %v1735_v13 }
 0x25a   : > { %4224 = vmatmul.mubr.bf16.gmra.mrb[100].mxu1 %v1736_v48 }
 0x261   : > { %v4181_v41 = vpop.f32.mrb[72].mxu0 }
 0x262   : > { %v1694_v42 = vpop.f32.mrb[73].mxu0  ;;  %v1703_v3 = vadd.f32 %v4181_v41, %v5263_v52 }
 0x263   : > { %v4182_v1 = vpop.f32.mrb[74].mxu0  ;;  %v1695_v32 = vadd.f32 %v5263_v52, %v1694_v42 }
 0x264   : > { %v1706_v26 = vadd.f32 %v4182_v1, %v5263_v52  ;;  %v1697_v45 = vpop.f32.mrb[75].mxu0 }
 0x265   : > { %v1698_v12 = vadd.f32 %v5263_v52, %v1697_v45 }
 0x266   : > { %v1738_v27 = vpack.c.bf16 %v1706_v26, %v1703_v3  ;;  %v4418_v3 = vld [vmem:[%s6113_s8] sm:$0xff]   ;;  %v4419_v26 = vld [vmem:[%s6113_s8 + $0x8] sm:$0xff]  }
 0x267   : > { %v1737_v7 = vpack.c.bf16 %v1698_v12, %v1695_v32  ;;  %4235 = vmatprep.subr.bf16.mxu1 %v4418_v3 }
 0x268   : > { %4236 = vmatpush3.bf16.msra.mxu1 %v4418_v3 }
 0x269   : > { %4227 = vmatprep.mubr.bf16.mxu1 %v1737_v7  ;;  %4237 = vmatprep.subr.bf16.mxu1 %v4419_v26 }
 0x26a   : > { %4228 = vmatmul.mubr.bf16.gmra.mrb[104].mxu1 %v1738_v27 }
 0x26c   : > { %4238 = vmatpush3.bf16.msra.mxu1 %v4419_v26 }
 0x271   : > { %v4185_v28 = vpop.f32.mrb[76].mxu0 }
 0x272   : > { %v1710_v38 = vpop.f32.mrb[77].mxu0  ;;  %v1719_v35 = vadd.f32 %v4185_v28, %v5263_v52 }
 0x273   : > { %v4186_v4 = vpop.f32.mrb[78].mxu0  ;;  %v1711_v54 = vadd.f32 %v5263_v52, %v1710_v38  ;;  %v4420_v38 = vld [vmem:[%s6113_s8 + $0x10] sm:$0xff]  }
 0x274   : > { %v1722_v23 = vadd.f32 %v4186_v4, %v5263_v52  ;;  %v1713_v14 = vpop.f32.mrb[79].mxu0  ;;  %4239 = vmatprep.subr.bf16.mxu1 %v4420_v38 }
 0x275   : > { %v1714_v17 = vadd.f32 %v5263_v52, %v1713_v14  ;;  %4240 = vmatpush3.bf16.msra.mxu1 %v4420_v38 }
 0x276   : > { %v1740_v20 = vpack.c.bf16 %v1722_v23, %v1719_v35  ;;  %v4422_v23 = vld [vmem:[%s6113_s8 + $0x20] sm:$0xff]  }
 0x277   : > { %v1739_v33 = vpack.c.bf16 %v1714_v17, %v1711_v54 }
 0x279   : > { %4231 = vmatprep.mubr.bf16.mxu1 %v1739_v33 }
 0x27a   : > { %4232 = vmatmul.mubr.bf16.gmra.mrb[108].mxu1 %v1740_v20 }
 0x2dd   : > { %v4205_v40 = vpop.f32.mrb[80].mxu1 }
 0x2de   : > { %v1838_v19 = vadd.f32 %v4205_v40, %v5333_v49  ;;  %v1829_v11 = vpop.f32.mrb[81].mxu1 }
 0x2df   : > { %v1830_v16 = vadd.f32 %v5333_v49, %v1829_v11  ;;  %v4206_v58 = vpop.f32.mrb[82].mxu1 }
 0x2e0   : > { %vm1958_vm2 = vcmp.ge.f32.partialorder %v1838_v19, 0.0  ;;  %v1990_v60 = vmul.f32 0.1, %v1838_v19  ;;  %v1841_v52 = vadd.f32 %v4206_v58, %v5333_v49  ;;  %v1832_v48 = vpop.f32.mrb[83].mxu1 }
 0x2e1   : > { %vm1956_vm3 = vcmp.ge.f32.partialorder %v1830_v16, 0.0  ;;  %v1988_v13 = vmul.f32 0.1, %v1830_v16  ;;  %v1833_v41 = vadd.f32 %v5333_v49, %v1832_v48 }
 0x2e2   : > { %v2022_v42 = vsel %vm1958_vm2, %v1838_v19, %v1990_v60  ;;  %vm1959_vm4 = vcmp.ge.f32.partialorder %v1841_v52, 0.0  ;;  %v1991_v1 = vmul.f32 0.1, %v1841_v52 }
 0x2e3   : > { %v2020_v45 = vsel %vm1956_vm3, %v1830_v16, %v1988_v13  ;;  %vm1957_vm5 = vcmp.ge.f32.partialorder %v1833_v41, 0.0  ;;  %v1989_v39 = vmul.f32 0.1, %v1833_v41  ;;  %v2054_v59 = vadd.f32 %v2022_v42, %v4966_v51  ;;  %v4421_v51 = vld [vmem:[%s6113_s8 + $0x18] sm:$0xff]  }
 0x2e4   : > { %v2023_v32 = vsel %vm1959_vm4, %v1841_v52, %v1991_v1  ;;  %v2052_v7 = vadd.f32 %v2020_v45, %v4934_v37  ;;  %4241 = vmatprep.subr.bf16.mxu1 %v4421_v51 }
 0x2e5   : > { %v2021_v12 = vsel %vm1957_vm5, %v1833_v41, %v1989_v39  ;;  %v2055_v27 = vadd.f32 %v2023_v32, %v4973_v57  ;;  %4242 = vmatpush3.bf16.msra.mxu1 %v4421_v51 }
 0x2e6   : > { %v2053_v28 = vadd.f32 %v2021_v12, %v4944_v29  ;;  %4243 = vmatprep.subr.bf16.mxu1 %v4422_v23 }
 0x2e7   : > { %v2119_v4 = vpack.c.bf16 %v2055_v27, %v2054_v59 }
 0x2e8   : > { %v2118_v35 = vpack.c.bf16 %v2053_v28, %v2052_v7 }
 0x2e9   : > { %4244 = vmatpush3.bf16.msra.mxu1 %v4422_v23 }
 0x2ea   : > { %2258 = vmatmul.mubr.bf16.vlgmr.msra.gmra.mrb[80].mxu0 %v2118_v35 }
 0x2eb   : > { %2267 = vmatprep.mubr.bf16.mxu0 %v6156_v62 }
 0x2ed   : > { %v4209_v57 = vpop.f32.mrb[84].mxu1 }
 0x2ee   : > { %v1854_v37 = vadd.f32 %v4209_v57, %v5333_v49  ;;  %v1845_v29 = vpop.f32.mrb[85].mxu1 }
 0x2ef   : > { %v1846_v14 = vadd.f32 %v5333_v49, %v1845_v29  ;;  %v4210_v54 = vpop.f32.mrb[86].mxu1 }
 0x2f0   : > { %vm1962_vm6 = vcmp.ge.f32.partialorder %v1854_v37, 0.0  ;;  %v1994_v17 = vmul.f32 0.1, %v1854_v37  ;;  %v1857_v20 = vadd.f32 %v4210_v54, %v5333_v49  ;;  %v1848_v33 = vpop.f32.mrb[87].mxu1 }
 0x2f1   : > { %vm1960_vm7 = vcmp.ge.f32.partialorder %v1846_v14, 0.0  ;;  %v1992_v40 = vmul.f32 0.1, %v1846_v14  ;;  %v1849_v19 = vadd.f32 %v5333_v49, %v1848_v33 }
 0x2f2   : > { %v2026_v11 = vsel %vm1962_vm6, %v1854_v37, %v1994_v17  ;;  %vm1963_vm8 = vcmp.ge.f32.partialorder %v1857_v20, 0.0  ;;  %v1995_v16 = vmul.f32 0.1, %v1857_v20  ;;  %2268 = vmatmul.mubr.bf16.gmra.mrb[84].mxu0 %v2119_v4 }
 0x2f3   : > { %v2024_v58 = vsel %vm1960_vm7, %v1846_v14, %v1992_v40  ;;  %vm1961_vm9 = vcmp.ge.f32.partialorder %v1849_v19, 0.0  ;;  %v1993_v60 = vmul.f32 0.1, %v1849_v19  ;;  %2277 = vmatprep.mubr.bf16.mxu0 %v6156_v62  ;;  %v2058_v13 = vadd.f32 %v2026_v11, %v5024_v24 }
 0x2f4   : > { %v2027_v52 = vsel %vm1963_vm8, %v1857_v20, %v1995_v16  ;;  %v2056_v42 = vadd.f32 %v2024_v58, %v4998_v61 }
 0x2f5   : > { %v2025_v48 = vsel %vm1961_vm9, %v1849_v19, %v1993_v60  ;;  %v2059_v41 = vadd.f32 %v2027_v52, %v5031_v30 }
 0x2f6   : > { %v2057_v1 = vadd.f32 %v2025_v48, %v5005_v55 }
 0x2f7   : > { %v2121_v3 = vpack.c.bf16 %v2059_v41, %v2058_v13 }
 0x2f8   : > { %v2120_v26 = vpack.c.bf16 %v2057_v1, %v2056_v42 }
 0x2fa   : > { %2278 = vmatmul.mubr.bf16.gmra.mrb[88].mxu0 %v2120_v26 }
 0x2fb   : > { %2287 = vmatprep.mubr.bf16.mxu0 %v6156_v62 }
 0x2fd   : > { %v4213_v45 = vpop.f32.mrb[88].mxu1 }
 0x2fe   : > { %v1870_v39 = vadd.f32 %v4213_v45, %v5333_v49  ;;  %v1861_v32 = vpop.f32.mrb[89].mxu1 }
 0x2ff   : > { %v1862_v12 = vadd.f32 %v5333_v49, %v1861_v32  ;;  %v4214_v59 = vpop.f32.mrb[90].mxu1 }
 0x300   : > { %vm1966_vm10 = vcmp.ge.f32.partialorder %v1870_v39, 0.0  ;;  %v1998_v24 = vmul.f32 0.1, %v1870_v39  ;;  %v1873_v30 = vadd.f32 %v4214_v59, %v5333_v49  ;;  %v1864_v27 = vpop.f32.mrb[91].mxu1 }
 0x301   : > { %vm1964_vm11 = vcmp.ge.f32.partialorder %v1862_v12, 0.0  ;;  %v1996_v61 = vmul.f32 0.1, %v1862_v12  ;;  %v1865_v55 = vadd.f32 %v5333_v49, %v1864_v27 }
 0x302   : > { %v2030_v7 = vsel %vm1966_vm10, %v1870_v39, %v1998_v24  ;;  %vm1967_vm12 = vcmp.ge.f32.partialorder %v1873_v30, 0.0  ;;  %v1999_v28 = vmul.f32 0.1, %v1873_v30  ;;  %2288 = vmatmul.mubr.bf16.gmra.mrb[92].mxu0 %v2121_v3  ;;  %v6157_v3 = vld [vmem:[#allocation2_spill] sm:$0xff] }
 0x303   : > { %v2028_v38 = vsel %vm1964_vm11, %v1862_v12, %v1996_v61  ;;  %vm1965_vm13 = vcmp.ge.f32.partialorder %v1865_v55, 0.0  ;;  %v1997_v4 = vmul.f32 0.1, %v1865_v55  ;;  %2297 = vmatprep.mubr.bf16.mxu0 %v6156_v62  ;;  %v2062_v57 = vadd.f32 %v2030_v7, %v5076_v43 }
 0x304   : > { %v2031_v35 = vsel %vm1967_vm12, %v1873_v30, %v1999_v28  ;;  %v2060_v29 = vadd.f32 %v2028_v38, %v5050_v21 }
 0x305   : > { %v2029_v51 = vsel %vm1965_vm13, %v1865_v55, %v1997_v4  ;;  %v2063_v37 = vadd.f32 %v2031_v35, %v5083_v50 }
 0x306   : > { %v2061_v23 = vadd.f32 %v2029_v51, %v5057_v8 }
 0x307   : > { %v2123_v14 = vpack.c.bf16 %v2063_v37, %v2062_v57 }
 0x308   : > { %v2122_v54 = vpack.c.bf16 %v2061_v23, %v2060_v29 }
 0x30a   : > { %2298 = vmatmul.mubr.bf16.gmra.mrb[96].mxu0 %v2122_v54 }
 0x30b   : > { %2307 = vmatprep.mubr.bf16.mxu0 %v6156_v62 }
 0x30d   : > { %v4217_v17 = vpop.f32.mrb[92].mxu1 }
 0x30e   : > { %v1886_v20 = vadd.f32 %v4217_v17, %v5333_v49  ;;  %v1877_v33 = vpop.f32.mrb[93].mxu1 }
 0x30f   : > { %v1878_v40 = vadd.f32 %v5333_v49, %v1877_v33  ;;  %v4218_v19 = vpop.f32.mrb[94].mxu1 }
 0x310   : > { %vm1970_vm14 = vcmp.ge.f32.partialorder %v1886_v20, 0.0  ;;  %v2002_v43 = vmul.f32 0.1, %v1886_v20  ;;  %v1889_v50 = vadd.f32 %v4218_v19, %v5333_v49  ;;  %v1880_v11 = vpop.f32.mrb[95].mxu1 }
 0x311   : > { %vm1968_vm15 = vcmp.ge.f32.partialorder %v1878_v40, 0.0  ;;  %v2000_v21 = vmul.f32 0.1, %v1878_v40  ;;  %v1881_v8 = vadd.f32 %v5333_v49, %v1880_v11 }
 0x312   : > { %v2034_v16 = vsel %vm1970_vm14, %v1886_v20, %v2002_v43  ;;  %vm1971_vm0 = vcmp.ge.f32.partialorder %v1889_v50, 0.0  ;;  %v2003_v58 = vmul.f32 0.1, %v1889_v50  ;;  %2308 = vmatmul.mubr.bf16.gmra.mrb[100].mxu0 %v2123_v14 }
 0x313   : > { %v2032_v60 = vsel %vm1968_vm15, %v1878_v40, %v2000_v21  ;;  %vm1969_vm1 = vcmp.ge.f32.partialorder %v1881_v8, 0.0  ;;  %v2001_v52 = vmul.f32 0.1, %v1881_v8  ;;  %2317 = vmatprep.mubr.bf16.mxu0 %v6156_v62  ;;  %v2066_v41 = vadd.f32 %v2034_v16, %v5129_v6 }
 0x314   : > { %v2035_v48 = vsel %vm1971_vm0, %v1889_v50, %v2003_v58  ;;  %v2064_v1 = vadd.f32 %v2032_v60, %v5102_v34 }
 0x315   : > { %v2033_v13 = vsel %vm1969_vm1, %v1881_v8, %v2001_v52  ;;  %v2067_v42 = vadd.f32 %v2035_v48, %v5131_v47 }
 0x316   : > { %v2065_v26 = vadd.f32 %v2033_v13, %v6157_v3 }
 0x317   : > { %v2125_v45 = vpack.c.bf16 %v2067_v42, %v2066_v41 }
 0x318   : > { %v2124_v39 = vpack.c.bf16 %v2065_v26, %v2064_v1  ;;  %v4423_v26 = vld [vmem:[%s6113_s8 + $0x28] sm:$0xff]  }
 0x319   : > { %4245 = vmatprep.subr.bf16.mxu1 %v4423_v26 }
 0x31a   : > { %2318 = vmatmul.mubr.bf16.gmra.mrb[104].mxu0 %v2124_v39  ;;  %4246 = vmatpush3.bf16.msra.mxu1 %v4423_v26 }
 0x31b   : > { %2327 = vmatprep.mubr.bf16.mxu0 %v6156_v62 }
 0x31d   : > { %v4221_v32 = vpop.f32.mrb[96].mxu1 }
 0x31e   : > { %v1902_v12 = vadd.f32 %v4221_v32, %v5333_v49  ;;  %v1893_v59 = vpop.f32.mrb[97].mxu1 }
 0x31f   : > { %v1894_v24 = vadd.f32 %v5333_v49, %v1893_v59  ;;  %v4222_v30 = vpop.f32.mrb[98].mxu1 }
 0x320   : > { %vm1974_vm2 = vcmp.ge.f32.partialorder %v1902_v12, 0.0  ;;  %v2006_v6 = vmul.f32 0.1, %v1902_v12  ;;  %v1905_v47 = vadd.f32 %v4222_v30, %v5333_v49  ;;  %v1896_v27 = vpop.f32.mrb[99].mxu1 }
 0x321   : > { %vm1972_vm3 = vcmp.ge.f32.partialorder %v1894_v24, 0.0  ;;  %v2004_v34 = vmul.f32 0.1, %v1894_v24  ;;  %v1897_v61 = vadd.f32 %v5333_v49, %v1896_v27 }
 0x322   : > { %v2038_v55 = vsel %vm1974_vm2, %v1902_v12, %v2006_v6  ;;  %vm1975_vm4 = vcmp.ge.f32.partialorder %v1905_v47, 0.0  ;;  %v2007_v7 = vmul.f32 0.1, %v1905_v47  ;;  %2328 = vmatmul.mubr.bf16.gmra.mrb[108].mxu0 %v2125_v45 }
 0x323   : > { %v2036_v28 = vsel %vm1972_vm3, %v1894_v24, %v2004_v34  ;;  %vm1973_vm5 = vcmp.ge.f32.partialorder %v1897_v61, 0.0  ;;  %v2005_v38 = vmul.f32 0.1, %v1897_v61  ;;  %2337 = vmatprep.mubr.bf16.mxu0 %v6156_v62  ;;  %v2070_v51 = vadd.f32 %v2038_v55, %v5157_v10  ;;  %v4424_v24 = vld [vmem:[%s6113_s8 + $0x30] sm:$0xff]  }
 0x324   : > { %v2039_v4 = vsel %vm1975_vm4, %v1905_v47, %v2007_v7  ;;  %v2068_v37 = vadd.f32 %v2036_v28, %v5143_v9  ;;  %4247 = vmatprep.subr.bf16.mxu1 %v4424_v24  ;;  %v4425_v28 = vld [vmem:[%s6113_s8 + $0x38] sm:$0xff]  }
 0x325   : > { %v2037_v35 = vsel %vm1973_vm5, %v1897_v61, %v2005_v38  ;;  %v2071_v57 = vadd.f32 %v2039_v4, %v5159_v31  ;;  %4248 = vmatpush3.bf16.msra.mxu1 %v4424_v24 }
 0x326   : > { %v2069_v29 = vadd.f32 %v2037_v35, %v5145_v18  ;;  %4249 = vmatprep.subr.bf16.mxu1 %v4425_v28 }
 0x327   : > { %v2127_v23 = vpack.c.bf16 %v2071_v57, %v2070_v51 }
 0x328   : > { %v2126_v14 = vpack.c.bf16 %v2069_v29, %v2068_v37 }
 0x329   : > { %4250 = vmatpush3.bf16.msra.mxu1 %v4425_v28 }
 0x32a   : > { %2338 = vmatmul.mubr.bf16.gmra.mrb[112].mxu0 %v2126_v14 }
 0x32b   : > { %2347 = vmatprep.mubr.bf16.mxu0 %v6156_v62 }
 0x32d   : > { %v4225_v54 = vpop.f32.mrb[100].mxu1 }
 0x32e   : > { %v1918_v17 = vadd.f32 %v4225_v54, %v5333_v49  ;;  %v1909_v20 = vpop.f32.mrb[101].mxu1 }
 0x32f   : > { %v1910_v33 = vadd.f32 %v5333_v49, %v1909_v20  ;;  %v4226_v40 = vpop.f32.mrb[102].mxu1 }
 0x330   : > { %vm1978_vm6 = vcmp.ge.f32.partialorder %v1918_v17, 0.0  ;;  %v2010_v10 = vmul.f32 0.1, %v1918_v17  ;;  %v1921_v31 = vadd.f32 %v4226_v40, %v5333_v49  ;;  %v1912_v19 = vpop.f32.mrb[103].mxu1 }
 0x331   : > { %vm1976_vm7 = vcmp.ge.f32.partialorder %v1910_v33, 0.0  ;;  %v2008_v9 = vmul.f32 0.1, %v1910_v33  ;;  %v1913_v18 = vadd.f32 %v5333_v49, %v1912_v19 }
 0x332   : > { %v2042_v43 = vsel %vm1978_vm6, %v1918_v17, %v2010_v10  ;;  %vm1979_vm8 = vcmp.ge.f32.partialorder %v1921_v31, 0.0  ;;  %v2011_v50 = vmul.f32 0.1, %v1921_v31  ;;  %2348 = vmatmul.mubr.bf16.gmra.mrb[116].mxu0 %v2127_v23 }
 0x333   : > { %v2040_v11 = vsel %vm1976_vm7, %v1910_v33, %v2008_v9  ;;  %vm1977_vm9 = vcmp.ge.f32.partialorder %v1913_v18, 0.0  ;;  %v2009_v21 = vmul.f32 0.1, %v1913_v18  ;;  %2357 = vmatprep.mubr.bf16.mxu0 %v6156_v62  ;;  %v2074_v58 = vadd.f32 %v2042_v43, %v5185_v36 }
 0x334   : > { %v2043_v8 = vsel %vm1979_vm8, %v1921_v31, %v2011_v50  ;;  %v2072_v52 = vadd.f32 %v2040_v11, %v5171_v22  ;;  %v2135_v43 = vlaneseq }
 0x335   : > { %v2041_v16 = vsel %vm1977_vm9, %v1913_v18, %v2009_v21  ;;  %v2075_v60 = vadd.f32 %v2043_v8, %v5187_v0 }
 0x336   : > { %v2073_v48 = vadd.f32 %v2041_v16, %v5173_v2  ;;  %v5439_v50 = vshrl.u32 %v2135_v43, 7 }
 0x337   : > { %v2129_v13 = vpack.c.bf16 %v2075_v60, %v2074_v58 }
 0x338   : > { %v2128_v41 = vpack.c.bf16 %v2073_v48, %v2072_v52  ;;  %v5442_v11 = vsub.s32 0, %v5439_v50 }
 0x33a   : > { %2358 = vmatmul.mubr.bf16.gmra.mrb[120].mxu0 %v2128_v41 }
 0x33b   : > { %2367 = vmatprep.mubr.bf16.mxu0 %v6156_v62 }
 0x33d   : > { %v4229_v42 = vpop.f32.mrb[104].mxu1 }
 0x33e   : > { %v1934_v1 = vadd.f32 %v4229_v42, %v5333_v49  ;;  %v1925_v3 = vpop.f32.mrb[105].mxu1 }
 0x33f   : > { %v1926_v36 = vadd.f32 %v5333_v49, %v1925_v3  ;;  %v4230_v0 = vpop.f32.mrb[106].mxu1 }
 0x340   : > { %vm1982_vm10 = vcmp.ge.f32.partialorder %v1934_v1, 0.0  ;;  %v2014_v22 = vmul.f32 0.1, %v1934_v1  ;;  %v1937_v2 = vadd.f32 %v4230_v0, %v5333_v49  ;;  %v1928_v45 = vpop.f32.mrb[107].mxu1 }
 0x341   : > { %vm1980_vm11 = vcmp.ge.f32.partialorder %v1926_v36, 0.0  ;;  %v2012_v39 = vmul.f32 0.1, %v1926_v36  ;;  %v1929_v32 = vadd.f32 %v5333_v49, %v1928_v45 }
 0x342   : > { %v2046_v12 = vsel %vm1982_vm10, %v1934_v1, %v2014_v22  ;;  %vm1983_vm12 = vcmp.ge.f32.partialorder %v1937_v2, 0.0  ;;  %v2015_v59 = vmul.f32 0.1, %v1937_v2  ;;  %2368 = vmatmul.mubr.bf16.gmra.mrb[124].mxu0 %v2129_v13 }
 0x343   : > { %v2044_v30 = vsel %vm1980_vm11, %v1926_v36, %v2012_v39  ;;  %vm1981_vm13 = vcmp.ge.f32.partialorder %v1929_v32, 0.0  ;;  %v2013_v6 = vmul.f32 0.1, %v1929_v32  ;;  %2377 = vmatprep.mubr.bf16.mxu0 %v6156_v62  ;;  %v2078_v34 = vadd.f32 %v2046_v12, %v5213_v63 }
 0x344   : > { %v2047_v47 = vsel %vm1983_vm12, %v1937_v2, %v2015_v59  ;;  %v2076_v55 = vadd.f32 %v2044_v30, %v5199_v25  ;;  %v5457_v59 = vsub.s32 1, %v5439_v50 }
 0x345   : > { %v2045_v27 = vsel %vm1981_vm13, %v1929_v32, %v2013_v6  ;;  %v2079_v61 = vadd.f32 %v2047_v47, %v5215_v56 }
 0x346   : > { %v2077_v7 = vadd.f32 %v2045_v27, %v5201_v44 }
 0x347   : > { %v2131_v38 = vpack.c.bf16 %v2079_v61, %v2078_v34 }
 0x348   : > { %v2130_v4 = vpack.c.bf16 %v2077_v7, %v2076_v55 }
 0x34a   : > { %2378 = vmatmul.mubr.bf16.gmra.mrb[128].mxu0 %v2130_v4 }
 0x34b   : > { %2387 = vmatprep.mubr.bf16.mxu0 %v6156_v62 }
 0x34d   : > { %v4233_v35 = vpop.f32.mrb[108].mxu1 }
 0x34e   : > { %v1950_v63 = vadd.f32 %v4233_v35, %v5333_v49  ;;  %v1941_v56 = vpop.f32.mrb[109].mxu1 }
 0x34f   : > { %v1942_v51 = vadd.f32 %v5333_v49, %v1941_v56  ;;  %v4234_v25 = vpop.f32.mrb[110].mxu1 }
 0x350   : > { %vm1986_vm14 = vcmp.ge.f32.partialorder %v1950_v63, 0.0  ;;  %v2018_v44 = vmul.f32 0.1, %v1950_v63  ;;  %v1953_v57 = vadd.f32 %v4234_v25, %v5333_v49  ;;  %v1944_v37 = vpop.f32.mrb[111].mxu1 }
 0x351   : > { %vm1984_vm15 = vcmp.ge.f32.partialorder %v1942_v51, 0.0  ;;  %v2016_v29 = vmul.f32 0.1, %v1942_v51  ;;  %v1945_v23 = vadd.f32 %v5333_v49, %v1944_v37 }
 0x352   : > { %v2050_v14 = vsel %vm1986_vm14, %v1950_v63, %v2018_v44  ;;  %vm1987_vm0 = vcmp.ge.f32.partialorder %v1953_v57, 0.0  ;;  %v2019_v54 = vmul.f32 0.1, %v1953_v57  ;;  %2388 = vmatmul.mubr.bf16.gmra.mrb[132].mxu0 %v2131_v38 }
 0x353   : > { %v2048_v17 = vsel %vm1984_vm15, %v1942_v51, %v2016_v29  ;;  %vm1985_vm1 = vcmp.ge.f32.partialorder %v1945_v23, 0.0  ;;  %v2017_v20 = vmul.f32 0.1, %v1945_v23  ;;  %2397 = vmatprep.mubr.bf16.mxu0 %v6156_v62  ;;  %v2082_v10 = vadd.f32 %v2050_v14, %v5238_v15 }
 0x354   : > { %v2051_v33 = vsel %vm1987_vm0, %v1953_v57, %v2019_v54  ;;  %v2080_v19 = vadd.f32 %v2048_v17, %v5227_v46  ;;  %v2116_v46 = vld [vmem:[%s6114_s9] sm:$0x3] }
 0x355   : > { %v2049_v40 = vsel %vm1985_vm1, %v1945_v23, %v2017_v20  ;;  %v2083_v31 = vadd.f32 %v2051_v33, %v5240_v53  ;;  %v5462_v34 = vrot.slane %v2116_v46, %v5457_v59 }
 0x356   : > { %v2081_v9 = vadd.f32 %v2049_v40, %v5229_v5  ;;  %v5448_v5 = vrot.slane %v2116_v46, %v5442_v11 }
 0x357   : > { %v2133_v49 = vpack.c.bf16 %v2083_v31, %v2082_v10 }
 0x358   : > { %v2132_v18 = vpack.c.bf16 %v2081_v9, %v2080_v19 }
 0x35a   : > { %2398 = vmatmul.mubr.bf16.gmra.mrb[136].mxu0 %v2132_v18 }
 0x35b   : > { %2407 = vmatprep.mubr.bf16.mxu0 %v6156_v62 }
 0x362   : > { %2408 = vmatmul.mubr.bf16.gmra.mrb[140].mxu0 %v2133_v49 }
 0x363   : > { %3348 = vmatprep.mubr.bf16.mxu0 %v6156_v62 }
 0x3bd   : > { %v2259_v15 = vpop.f32.mrb[80].mxu0 }
 0x3be   : > { %v2261_v53 = vpop.f32.mrb[81].mxu0  ;;  %v2260_v8 = vadd.f32 %v2259_v15, %v5448_v5 }
 0x3bf   : > { %v2263_v21 = vpop.f32.mrb[82].mxu0  ;;  %v5465_v7 = vadd.f32 %v2261_v53, %v5462_v34 }
 0x3c0   : > { %v2264_v16 = vadd.f32 %v2263_v21, %v5448_v5  ;;  %v2265_v58 = vpop.f32.mrb[83].mxu0 }
 0x3c1   : > { %v5473_v56 = vadd.f32 %v2265_v58, %v5462_v34 }
 0x3c2   : > { %v2418_v60 = vpack.c.bf16 %v2264_v16, %v2260_v8 }
 0x3c4   : > { %4251 = vmatprep.mubr.bf16.mxu1 %v2418_v60 }
 0x3c5   : > { %v2269_v52 = vpop.f32.mrb[84].mxu0 }
 0x3c6   : > { %v2271_v48 = vpop.f32.mrb[85].mxu0  ;;  %v2270_v41 = vadd.f32 %v2269_v52, %v5448_v5 }
 0x3c7   : > { %v2273_v13 = vpop.f32.mrb[86].mxu0  ;;  %v5483_v23 = vadd.f32 %v2271_v48, %v5462_v34 }
 0x3c8   : > { %v2274_v42 = vadd.f32 %v2273_v13, %v5448_v5  ;;  %v2275_v1 = vpop.f32.mrb[87].mxu0 }
 0x3c9   : > { %v5491_v40 = vadd.f32 %v2275_v1, %v5462_v34 }
 0x3ca   : > { %v2419_v3 = vpack.c.bf16 %v2274_v42, %v2270_v41 }
 0x3cc   : > { %4252 = vmatmul.mubr.bf16.vlgmr.msra.gmra.mrb[112].mxu1 %v2419_v3 }
 0x3cd   : > { %v2279_v26 = vpop.f32.mrb[88].mxu0 }
 0x3ce   : > { %v2281_v36 = vpop.f32.mrb[89].mxu0  ;;  %v2280_v22 = vadd.f32 %v2279_v26, %v5448_v5 }
 0x3cf   : > { %v2283_v0 = vpop.f32.mrb[90].mxu0  ;;  %v5501_v43 = vadd.f32 %v2281_v36, %v5462_v34 }
 0x3d0   : > { %v2284_v2 = vadd.f32 %v2283_v0, %v5448_v5  ;;  %v2285_v45 = vpop.f32.mrb[91].mxu0 }
 0x3d1   : > { %v5509_v16 = vadd.f32 %v2285_v45, %v5462_v34 }
 0x3d2   : > { %v2420_v39 = vpack.c.bf16 %v2284_v2, %v2280_v22 }
 0x3d4   : > { %4255 = vmatprep.mubr.bf16.mxu1 %v2420_v39 }
 0x3d5   : > { %v2289_v32 = vpop.f32.mrb[92].mxu0 }
 0x3d6   : > { %v2291_v12 = vpop.f32.mrb[93].mxu0  ;;  %v2290_v30 = vadd.f32 %v2289_v32, %v5448_v5 }
 0x3d7   : > { %v2293_v24 = vpop.f32.mrb[94].mxu0  ;;  %v5519_v42 = vadd.f32 %v2291_v12, %v5462_v34 }
 0x3d8   : > { %v2294_v6 = vadd.f32 %v2293_v24, %v5448_v5  ;;  %v2295_v47 = vpop.f32.mrb[95].mxu0 }
 0x3d9   : > { %v5527_v22 = vadd.f32 %v2295_v47, %v5462_v34 }
 0x3da   : > { %v2421_v27 = vpack.c.bf16 %v2294_v6, %v2290_v30 }
 0x3dc   : > { %4256 = vmatmul.mubr.bf16.gmra.mrb[116].mxu1 %v2421_v27 }
 0x3dd   : > { %v2299_v61 = vpop.f32.mrb[96].mxu0 }
 0x3de   : > { %v2301_v55 = vpop.f32.mrb[97].mxu0  ;;  %v2300_v4 = vadd.f32 %v2299_v61, %v5448_v5 }
 0x3df   : > { %v5468_v28 = vadd.f32 %v2301_v55, %v5462_v34  ;;  %v2303_v38 = vpop.f32.mrb[98].mxu0 }
 0x3e0   : > { %v2304_v35 = vadd.f32 %v2303_v38, %v5448_v5  ;;  %v2305_v63 = vpop.f32.mrb[99].mxu0 }
 0x3e1   : > { %v2697_v51 = vmax.f32 %v5465_v7, %v5468_v28  ;;  %v5478_v25 = vadd.f32 %v2305_v63, %v5462_v34 }
 0x3e2   : > { %v2422_v44 = vpack.c.bf16 %v2304_v35, %v2300_v4 }
 0x3e3   : > { %v2698_v57 = vmax.f32 %v5473_v56, %v5478_v25 }
 0x3e4   : > { %4259 = vmatprep.mubr.bf16.mxu1 %v2422_v44 }
 0x3e5   : > { %v2309_v37 = vpop.f32.mrb[100].mxu0 }
 0x3e6   : > { %v2311_v29 = vpop.f32.mrb[101].mxu0  ;;  %v2310_v17 = vadd.f32 %v2309_v37, %v5448_v5 }
 0x3e7   : > { %v5486_v14 = vadd.f32 %v2311_v29, %v5462_v34  ;;  %v2313_v54 = vpop.f32.mrb[102].mxu0 }
 0x3e8   : > { %v2314_v20 = vadd.f32 %v2313_v54, %v5448_v5  ;;  %v2315_v33 = vpop.f32.mrb[103].mxu0 }
 0x3e9   : > { %v2699_v10 = vmax.f32 %v5483_v23, %v5486_v14  ;;  %v5496_v31 = vadd.f32 %v2315_v33, %v5462_v34 }
 0x3ea   : > { %v2423_v19 = vpack.c.bf16 %v2314_v20, %v2310_v17 }
 0x3eb   : > { %v2700_v9 = vmax.f32 %v5491_v40, %v5496_v31 }
 0x3ec   : > { %4260 = vmatmul.mubr.bf16.gmra.mrb[120].mxu1 %v2423_v19 }
 0x3ed   : > { %v2319_v49 = vpop.f32.mrb[104].mxu0 }
 0x3ee   : > { %v2321_v18 = vpop.f32.mrb[105].mxu0  ;;  %v2320_v53 = vadd.f32 %v2319_v49, %v5448_v5 }
 0x3ef   : > { %v5504_v46 = vadd.f32 %v2321_v18, %v5462_v34  ;;  %v2323_v15 = vpop.f32.mrb[106].mxu0 }
 0x3f0   : > { %v2324_v21 = vadd.f32 %v2323_v15, %v5448_v5  ;;  %v2325_v8 = vpop.f32.mrb[107].mxu0 }
 0x3f1   : > { %v2701_v58 = vmax.f32 %v5501_v43, %v5504_v46  ;;  %v5514_v60 = vadd.f32 %v2325_v8, %v5462_v34 }
 0x3f2   : > { %v2424_v52 = vpack.c.bf16 %v2324_v21, %v2320_v53 }
 0x3f3   : > { %v2702_v48 = vmax.f32 %v5509_v16, %v5514_v60 }
 0x3f4   : > { %4263 = vmatprep.mubr.bf16.mxu1 %v2424_v52 }
 0x3f5   : > { %v2329_v13 = vpop.f32.mrb[108].mxu0 }
 0x3f6   : > { %v2331_v41 = vpop.f32.mrb[109].mxu0  ;;  %v2330_v26 = vadd.f32 %v2329_v13, %v5448_v5 }
 0x3f7   : > { %v5522_v1 = vadd.f32 %v2331_v41, %v5462_v34  ;;  %v2333_v3 = vpop.f32.mrb[110].mxu0 }
 0x3f8   : > { %v2334_v36 = vadd.f32 %v2333_v3, %v5448_v5  ;;  %v2335_v0 = vpop.f32.mrb[111].mxu0 }
 0x3f9   : > { %v2703_v2 = vmax.f32 %v5519_v42, %v5522_v1  ;;  %v5532_v45 = vadd.f32 %v2335_v0, %v5462_v34  ;;  %v4428_v42 = vld [vmem:[%s6116_s11 + $0x10] sm:$0xff]   ;;  %v4429_v1 = vld [vmem:[%s6116_s11 + $0x18] sm:$0xff]  }
 0x3fa   : > { %v2425_v39 = vpack.c.bf16 %v2334_v36, %v2330_v26 }
 0x3fb   : > { %v2704_v32 = vmax.f32 %v5527_v22, %v5532_v45  ;;  %v4430_v22 = vld [vmem:[%s6116_s11 + $0x20] sm:$0xff]   ;;  %v4432_v45 = vld [vmem:[%s6116_s11 + $0x30] sm:$0xff]  }
 0x3fc   : > { %4264 = vmatmul.mubr.bf16.gmra.mrb[124].mxu1 %v2425_v39 }
 0x3fd   : > { %v2339_v12 = vpop.f32.mrb[112].mxu0 }
 0x3fe   : > { %v2341_v24 = vpop.f32.mrb[113].mxu0  ;;  %v2340_v6 = vadd.f32 %v2339_v12, %v5448_v5 }
 0x3ff   : > { %v2343_v30 = vpop.f32.mrb[114].mxu0  ;;  %v2342_v26 = vadd.f32 %v2341_v24, %v5462_v34 }
 0x400   : > { %v2344_v27 = vadd.f32 %v2343_v30, %v5448_v5  ;;  %v2345_v47 = vpop.f32.mrb[115].mxu0 }
 0x402   : > { %v2426_v61 = vpack.c.bf16 %v2344_v27, %v2340_v6  ;;  %v2346_v6 = vadd.f32 %v2345_v47, %v5462_v34 }
 0x404   : > { %4267 = vmatprep.mubr.bf16.mxu1 %v2426_v61 }
 0x405   : > { %v2349_v55 = vpop.f32.mrb[116].mxu0 }
 0x406   : > { %v2351_v38 = vpop.f32.mrb[117].mxu0  ;;  %v2350_v35 = vadd.f32 %v2349_v55, %v5448_v5 }
 0x407   : > { %v2353_v4 = vpop.f32.mrb[118].mxu0  ;;  %v2352_v47 = vadd.f32 %v2351_v38, %v5462_v34 }
 0x408   : > { %v2354_v63 = vadd.f32 %v2353_v4, %v5448_v5  ;;  %v2355_v44 = vpop.f32.mrb[119].mxu0 }
 0x40a   : > { %v2427_v37 = vpack.c.bf16 %v2354_v63, %v2350_v35 }
 0x40c   : > { %4268 = vmatmul.mubr.bf16.gmra.mrb[128].mxu1 %v2427_v37 }
 0x40d   : > { %v2359_v29 = vpop.f32.mrb[120].mxu0 }
 0x40e   : > { %v2361_v54 = vpop.f32.mrb[121].mxu0  ;;  %v2360_v20 = vadd.f32 %v2359_v29, %v5448_v5 }
 0x40f   : > { %v2363_v17 = vpop.f32.mrb[122].mxu0 }
 0x410   : > { %v2364_v33 = vadd.f32 %v2363_v17, %v5448_v5  ;;  %v2365_v19 = vpop.f32.mrb[123].mxu0 }
 0x412   : > { %v2428_v49 = vpack.c.bf16 %v2364_v33, %v2360_v20 }
 0x414   : > { %4271 = vmatprep.mubr.bf16.mxu1 %v2428_v49 }
 0x415   : > { %v2369_v18 = vpop.f32.mrb[124].mxu0 }
 0x416   : > { %v2371_v15 = vpop.f32.mrb[125].mxu0  ;;  %v2370_v21 = vadd.f32 %v2369_v18, %v5448_v5 }
 0x417   : > { %v2373_v53 = vpop.f32.mrb[126].mxu0 }
 0x418   : > { %v2374_v8 = vadd.f32 %v2373_v53, %v5448_v5  ;;  %v2375_v52 = vpop.f32.mrb[127].mxu0 }
 0x41a   : > { %v2429_v13 = vpack.c.bf16 %v2374_v8, %v2370_v21 }
 0x41c   : > { %4272 = vmatmul.mubr.bf16.gmra.mrb[132].mxu1 %v2429_v13 }
 0x41d   : > { %v2379_v41 = vpop.f32.mrb[128].mxu0 }
 0x41e   : > { %v2381_v3 = vpop.f32.mrb[129].mxu0  ;;  %v2380_v39 = vadd.f32 %v2379_v41, %v5448_v5 }
 0x41f   : > { %v2382_v36 = vadd.f32 %v2381_v3, %v5462_v34  ;;  %v2383_v0 = vpop.f32.mrb[130].mxu0 }
 0x420   : > { %v2384_v12 = vadd.f32 %v2383_v0, %v5448_v5  ;;  %v2385_v30 = vpop.f32.mrb[131].mxu0 }
 0x421   : > { %v2705_v27 = vmax.f32 %v2342_v26, %v2382_v36  ;;  %v2386_v61 = vadd.f32 %v2385_v30, %v5462_v34 }
 0x422   : > { %v2430_v55 = vpack.c.bf16 %v2384_v12, %v2380_v39 }
 0x423   : > { %v5553_v4 = vmax.f32 %v2697_v51, %v2705_v27  ;;  %v2706_v24 = vmax.f32 %v2346_v6, %v2386_v61  ;;  %v2356_v51 = vadd.f32 %v2355_v44, %v5462_v34  ;;  %v2362_v44 = vadd.f32 %v2361_v54, %v5462_v34 }
 0x424   : > { %4275 = vmatprep.mubr.bf16.mxu1 %v2430_v55  ;;  %v5635_v55 = vld [vmem:[%s6117_s12] sm:$0xff]  }
 0x425   : > { %v5558_v35 = vmax.f32 %v2698_v57, %v2706_v24  ;;  %v2389_v63 = vpop.f32.mrb[132].mxu0  ;;  %vm2721_vm2 = vcmp.ge.f32.partialorder %v5553_v4, 0.0 }
 0x426   : > { %v2391_v37 = vpop.f32.mrb[133].mxu0  ;;  %v2390_v20 = vadd.f32 %v2389_v63, %v5448_v5 }
 0x427   : > { %v2392_v29 = vadd.f32 %v2391_v37, %v5462_v34  ;;  %v2393_v17 = vpop.f32.mrb[134].mxu0  ;;  %vm2722_vm3 = vcmp.ge.f32.partialorder %v5558_v35, 0.0 }
 0x428   : > { %v2394_v7 = vadd.f32 %v2393_v17, %v5448_v5  ;;  %v2395_v28 = vpop.f32.mrb[135].mxu0  ;;  %v5641_v17 = vld [vmem:[%s6115_s10] ss:$0 sm:$0xff] }
 0x429   : > { %v2707_v33 = vmax.f32 %v2352_v47, %v2392_v29  ;;  %v2396_v49 = vadd.f32 %v2395_v28, %v5462_v34 }
 0x42a   : > { %v2431_v56 = vpack.c.bf16 %v2394_v7, %v2390_v20 }
 0x42b   : > { %v5569_v25 = vmax.f32 %v2699_v10, %v2707_v33  ;;  %v2708_v57 = vmax.f32 %v2356_v51, %v2396_v49  ;;  %v2366_v10 = vadd.f32 %v2365_v19, %v5462_v34  ;;  %v2372_v19 = vadd.f32 %v2371_v15, %v5462_v34 }
 0x42c   : > { %4276 = vmatmul.mubr.bf16.gmra.mrb[136].mxu1 %v2431_v56 }
 0x42d   : > { %v5574_v38 = vmax.f32 %v2700_v9, %v2708_v57  ;;  %v2399_v18 = vpop.f32.mrb[136].mxu0  ;;  %vm2723_vm4 = vcmp.ge.f32.partialorder %v5569_v25, 0.0 }
 0x42e   : > { %v2401_v53 = vpop.f32.mrb[137].mxu0  ;;  %v2400_v13 = vadd.f32 %v2399_v18, %v5448_v5 }
 0x42f   : > { %v2402_v21 = vadd.f32 %v2401_v53, %v5462_v34  ;;  %v2403_v8 = vpop.f32.mrb[138].mxu0  ;;  %vm2724_vm6 = vcmp.ge.f32.partialorder %v5574_v38, 0.0 }
 0x430   : > { %v2404_v23 = vadd.f32 %v2403_v8, %v5448_v5  ;;  %v2405_v14 = vpop.f32.mrb[139].mxu0 }
 0x431   : > { %v2709_v41 = vmax.f32 %v2362_v44, %v2402_v21  ;;  %v2406_v3 = vadd.f32 %v2405_v14, %v5462_v34 }
 0x432   : > { %v2432_v40 = vpack.c.bf16 %v2404_v23, %v2400_v13 }
 0x433   : > { %v5585_v31 = vmax.f32 %v2701_v58, %v2709_v41  ;;  %v2710_v9 = vmax.f32 %v2366_v10, %v2406_v3  ;;  %v2376_v58 = vadd.f32 %v2375_v52, %v5462_v34 }
 0x434   : > { %4279 = vmatprep.mubr.bf16.mxu1 %v2432_v40 }
 0x435   : > { %v5590_v54 = vmax.f32 %v2702_v48, %v2710_v9  ;;  %v2409_v26 = vpop.f32.mrb[140].mxu0  ;;  %vm2725_vm10 = vcmp.ge.f32.partialorder %v5585_v31, 0.0 }
 0x436   : > { %v2411_v36 = vpop.f32.mrb[141].mxu0  ;;  %v2410_v12 = vadd.f32 %v2409_v26, %v5448_v5 }
 0x437   : > { %v2412_v0 = vadd.f32 %v2411_v36, %v5462_v34  ;;  %v2413_v39 = vpop.f32.mrb[142].mxu0  ;;  %vm2726_vm11 = vcmp.ge.f32.partialorder %v5590_v54, 0.0 }
 0x438   : > { %v2414_v43 = vadd.f32 %v2413_v39, %v5448_v5  ;;  %v2415_v46 = vpop.f32.mrb[143].mxu0  ;;  %v4426_v5 = vld [vmem:[%s6116_s11] sm:$0xff]  }
 0x439   : > { %v2711_v30 = vmax.f32 %v2372_v19, %v2412_v0  ;;  %v2416_v6 = vadd.f32 %v2415_v46, %v5462_v34  ;;  %v4427_v34 = vld [vmem:[%s6116_s11 + $0x8] sm:$0xff]   ;;  %4283 = vmatprep.subr.bf16.mxu1 %v4426_v5 }
 0x43a   : > { %v2433_v16 = vpack.c.bf16 %v2414_v43, %v2410_v12  ;;  %4284 = vmatpush3.bf16.msra.mxu1 %v4426_v5 }
 0x43b   : > { %v5601_v60 = vmax.f32 %v2703_v2, %v2711_v30  ;;  %v2712_v48 = vmax.f32 %v2376_v58, %v2416_v6  ;;  %4285 = vmatprep.subr.bf16.mxu1 %v4427_v34  ;;  %v4431_v2 = vld [vmem:[%s6116_s11 + $0x28] sm:$0xff]  }
 0x43c   : > { %4280 = vmatmul.mubr.bf16.gmra.mrb[140].mxu1 %v2433_v16 }
 0x43d   : > { %v5606_v15 = vmax.f32 %v2704_v32, %v2712_v48  ;;  %v4433_v32 = vld [vmem:[%s6116_s11 + $0x38] sm:$0xff]   ;;  %vm2727_vm12 = vcmp.ge.f32.partialorder %v5601_v60, 0.0 }
 0x43e   : > { %4286 = vmatpush3.bf16.msra.mxu1 %v4427_v34 }
 0x43f   : > { %4287 = vmatprep.subr.bf16.mxu1 %v4428_v42  ;;  %vm2728_vm14 = vcmp.ge.f32.partialorder %v5606_v15, 0.0 }
 0x442   : > { %4288 = vmatpush3.bf16.msra.mxu1 %v4428_v42 }
 0x443   : > { %4289 = vmatprep.subr.bf16.mxu1 %v4429_v1 }
 0x446   : > { %4290 = vmatpush3.bf16.msra.mxu1 %v4429_v1 }
 0x447   : > { %4291 = vmatprep.subr.bf16.mxu1 %v4430_v22 }
 0x44a   : > { %4292 = vmatpush3.bf16.msra.mxu1 %v4430_v22 }
 0x44b   : > { %4293 = vmatprep.subr.bf16.mxu1 %v4431_v2 }
 0x44e   : > { %4294 = vmatpush3.bf16.msra.mxu1 %v4431_v2 }
 0x44f   : > { %4295 = vmatprep.subr.bf16.mxu1 %v4432_v45 }
 0x452   : > { %4296 = vmatpush3.bf16.msra.mxu1 %v4432_v45 }
 0x453   : > { %4297 = vmatprep.subr.bf16.mxu1 %v4433_v32 }
 0x456   : > { %4298 = vmatpush3.bf16.msra.mxu1 %v4433_v32 }
 0x457   : > { %4307 = vmatprep.subr.bf16.mxu1 %v5635_v55 }
 0x49f   : > { %v4253_v52 = vpop.f32.mrb[112].mxu1 }
 0x4a0   : > { %v2522_v27 = vpop.f32.mrb[113].mxu1  ;;  %v2531_v7 = vadd.f32 %v4253_v52, %v5641_v17 }
 0x4a1   : > { %v4254_v61 = vpop.f32.mrb[114].mxu1  ;;  %v2523_v33 = vadd.f32 %v5641_v17, %v2522_v27 }
 0x4a2   : > { %v2525_v24 = vpop.f32.mrb[115].mxu1  ;;  %v2534_v57 = vadd.f32 %v4254_v61, %v5641_v17  ;;  %v2729_v61 = vmul.f32 0.1, %v5553_v4 }
 0x4a3   : > { %v2526_v21 = vadd.f32 %v5641_v17, %v2525_v24 }
 0x4af   : > { %v4257_v63 = vpop.f32.mrb[116].mxu1 }
 0x4b0   : > { %v2538_v37 = vpop.f32.mrb[117].mxu1  ;;  %v5652_v41 = vadd.f32 %v4257_v63, %v5641_v17 }
 0x4b1   : > { %v4258_v47 = vpop.f32.mrb[118].mxu1  ;;  %v5658_v9 = vadd.f32 %v5641_v17, %v2538_v37 }
 0x4b2   : > { %v2541_v29 = vpop.f32.mrb[119].mxu1  ;;  %v5664_v19 = vadd.f32 %v4258_v47, %v5641_v17 }
 0x4b3   : > { %v5672_v43 = vadd.f32 %v5641_v17, %v2541_v29 }
 0x4bf   : > { %v4261_v20 = vpop.f32.mrb[120].mxu1 }
 0x4c0   : > { %v2563_v28 = vadd.f32 %v4261_v20, %v5641_v17  ;;  %v2554_v51 = vpop.f32.mrb[121].mxu1 }
 0x4c1   : > { %v2555_v49 = vadd.f32 %v5641_v17, %v2554_v51  ;;  %v4262_v56 = vpop.f32.mrb[122].mxu1 }
 0x4c2   : > { %v2651_v18 = vmax.f32 %v2531_v7, %v2563_v28  ;;  %v2566_v53 = vadd.f32 %v4262_v56, %v5641_v17  ;;  %v2557_v44 = vpop.f32.mrb[123].mxu1  ;;  %v2731_v56 = vmul.f32 0.1, %v5569_v25 }
 0x4c3   : > { %v2649_v8 = vmax.f32 %v2523_v33, %v2555_v49  ;;  %v2558_v13 = vadd.f32 %v5641_v17, %v2557_v44  ;;  %v2730_v49 = vmul.f32 0.1, %v5558_v35 }
 0x4c4   : > { %v2652_v23 = vmax.f32 %v2534_v57, %v2566_v53 }
 0x4c5   : > { %v2650_v14 = vmax.f32 %v2526_v21, %v2558_v13  ;;  %v2737_v13 = vsel %vm2721_vm2, %v5553_v4, %v2729_v61 }
 0x4cf   : > { %v4265_v10 = vpop.f32.mrb[124].mxu1 }
 0x4d0   : > { %v5655_v3 = vadd.f32 %v4265_v10, %v5641_v17  ;;  %v2570_v40 = vpop.f32.mrb[125].mxu1  ;;  %v2732_v10 = vmul.f32 0.1, %v5574_v38 }
 0x4d1   : > { %v5661_v26 = vadd.f32 %v5641_v17, %v2570_v40  ;;  %v4266_v36 = vpop.f32.mrb[126].mxu1 }
 0x4d2   : > { %v2655_v0 = vmax.f32 %v5652_v41, %v5655_v3  ;;  %v5669_v39 = vadd.f32 %v4266_v36, %v5641_v17  ;;  %v2573_v12 = vpop.f32.mrb[127].mxu1 }
 0x4d3   : > { %v2653_v46 = vmax.f32 %v5658_v9, %v5661_v26  ;;  %v5677_v58 = vadd.f32 %v5641_v17, %v2573_v12 }
 0x4d4   : > { %v2656_v30 = vmax.f32 %v5664_v19, %v5669_v39 }
 0x4d5   : > { %v2654_v6 = vmax.f32 %v5672_v43, %v5677_v58 }
 0x4df   : > { %v4269_v16 = vpop.f32.mrb[128].mxu1 }
 0x4e0   : > { %v2586_v48 = vpop.f32.mrb[129].mxu1  ;;  %v2595_v32 = vadd.f32 %v4269_v16, %v5641_v17 }
 0x4e1   : > { %v4270_v5 = vpop.f32.mrb[130].mxu1  ;;  %v2587_v24 = vadd.f32 %v5641_v17, %v2586_v48 }
 0x4e2   : > { %v2589_v34 = vpop.f32.mrb[131].mxu1  ;;  %v2598_v47 = vadd.f32 %v4270_v5, %v5641_v17 }
 0x4e3   : > { %v2590_v28 = vadd.f32 %v5641_v17, %v2589_v34 }
 0x4ef   : > { %v4273_v42 = vpop.f32.mrb[132].mxu1 }
 0x4f0   : > { %v2602_v1 = vpop.f32.mrb[133].mxu1 }
 0x4f1   : > { %v5683_v22 = vpop.f32.mrb[134].mxu1 }
 0x4f2   : > { %v5685_v2 = vpop.f32.mrb[135].mxu1 }
 0x4ff   : > { %v4277_v45 = vpop.f32.mrb[136].mxu1 }
 0x500   : > { %v2627_v52 = vadd.f32 %v4277_v45, %v5641_v17  ;;  %v2618_v27 = vpop.f32.mrb[137].mxu1  ;;  %v2740_v45 = vsel %vm2724_vm6, %v5574_v38, %v2732_v10  ;;  %v4435_v38 = vld [vmem:[%s6117_s12 + $0x8] sm:$0xff]   ;;  %v2736_v10 = vmul.f32 0.1, %v5606_v15 }
 0x501   : > { %v2619_v63 = vadd.f32 %v5641_v17, %v2618_v27  ;;  %v4278_v37 = vpop.f32.mrb[138].mxu1 }
 0x502   : > { %v2659_v29 = vmax.f32 %v2595_v32, %v2627_v52  ;;  %v2630_v20 = vadd.f32 %v4278_v37, %v5641_v17  ;;  %v2621_v7 = vpop.f32.mrb[139].mxu1  ;;  %v2611_v37 = vadd.f32 %v4273_v42, %v5641_v17  ;;  %v2744_v58 = vsel %vm2728_vm14, %v5606_v15, %v2736_v10  ;;  %v4471_v10 = vld [vmem:[%s6120_s15 + $0x4c] ss:$16 sps:$4 sm:$0xff]  }
 0x503   : > { %v2657_v51 = vmax.f32 %v2587_v24, %v2619_v63  ;;  %v2622_v33 = vadd.f32 %v5641_v17, %v2621_v7 }
 0x504   : > { %v2667_v57 = vmax.f32 %v2651_v18, %v2659_v29  ;;  %v2660_v53 = vmax.f32 %v2598_v47, %v2630_v20  ;;  %v2739_v18 = vsel %vm2723_vm4, %v5569_v25, %v2731_v56  ;;  %v2738_v25 = vsel %vm2722_vm3, %v5558_v35, %v2730_v49 }
 0x505   : > { %v2665_v44 = vmax.f32 %v2649_v8, %v2657_v51  ;;  %v2658_v21 = vmax.f32 %v2590_v28, %v2622_v33  ;;  %v2733_v35 = vmul.f32 0.1, %v5585_v31  ;;  %v2603_v20 = vadd.f32 %v5641_v17, %v2602_v1 }
 0x506   : > { %vm2675_vm5 = vcmp.ge.f32.partialorder %v2667_v57, 0.0  ;;  %v2683_v40 = vmul.f32 0.1, %v2667_v57  ;;  %v2668_v36 = vmax.f32 %v2652_v23, %v2660_v53  ;;  %v2614_v51 = vadd.f32 %v5683_v22, %v5641_v17  ;;  %v4436_v53 = vld [vmem:[%s6117_s12 + $0x10] sm:$0xff]  }
 0x507   : > { %vm2673_vm7 = vcmp.ge.f32.partialorder %v2665_v44, 0.0  ;;  %v2681_v12 = vmul.f32 0.1, %v2665_v44  ;;  %v2666_v16 = vmax.f32 %v2650_v14, %v2658_v21  ;;  %v2606_v1 = vadd.f32 %v5641_v17, %v5685_v2 }
 0x508   : > { %v2691_v48 = vsel %vm2675_vm5, %v2667_v57, %v2683_v40  ;;  %vm2676_vm8 = vcmp.ge.f32.partialorder %v2668_v36, 0.0  ;;  %v2684_v8 = vmul.f32 0.1, %v2668_v36  ;;  %v2734_v22 = vmul.f32 0.1, %v5590_v54 }
 0x509   : > { %v5707_v5 = vadd.f32 %v2739_v18, %v2691_v48  ;;  %vm2674_vm9 = vcmp.ge.f32.partialorder %v2666_v16, 0.0  ;;  %v2682_v34 = vmul.f32 0.1, %v2666_v16  ;;  %v2689_v4 = vsel %vm2673_vm7, %v2665_v44, %v2681_v12 }
 0x50a   : > { %v2692_v32 = vsel %vm2676_vm8, %v2668_v36, %v2684_v8  ;;  %v5710_v52 = vadd.f32 %v2737_v13, %v2689_v4  ;;  %v2735_v44 = vmul.f32 0.1, %v5601_v60  ;;  %v2741_v13 = vsel %vm2725_vm10, %v5585_v31, %v2733_v35  ;;  %v4437_v31 = vld [vmem:[%s6117_s12 + $0x18] sm:$0xff]   ;;  %v4440_v8 = vld [vmem:[%s6117_s12 + $0x30] sm:$0xff]  }
 0x50b   : > { %v5712_v23 = vadd.f32 %v2740_v45, %v2692_v32  ;;  %v2690_v27 = vsel %vm2674_vm9, %v2666_v16, %v2682_v34  ;;  %v2742_v12 = vsel %vm2726_vm11, %v5590_v54, %v2734_v22  ;;  %v4439_v54 = vld [vmem:[%s6117_s12 + $0x28] sm:$0xff]   ;;  %v4441_v34 = vld [vmem:[%s6117_s12 + $0x38] sm:$0xff]   ;;  %v4442_v4 = vld [vmem:[%s6120_s15] ss:$16 sps:$4 sm:$0xff]  }
 0x50c   : > { %v5717_v14 = vadd.f32 %v2738_v25, %v2690_v27  ;;  %v2743_v19 = vsel %vm2727_vm12, %v5601_v60, %v2735_v44  ;;  %v4438_v60 = vld [vmem:[%s6117_s12 + $0x20] sm:$0xff]  }
 0x50d   : > { %v2788_v63 = vpack.c.bf16 %v5712_v23, %v5707_v5  ;;  %v4444_v45 = vld [vmem:[%s6120_s15 + $0x4] ss:$16 sps:$4 sm:$0xff]   ;;  %v4445_v27 = vld [vmem:[%s6120_s15 + $0x20] ss:$16 sps:$4 sm:$0xff]  }
 0x50e   : > { %v2787_v61 = vpack.c.bf16 %v5717_v14, %v5710_v52  ;;  %v4447_v32 = vld [vmem:[%s6120_s15 + $0x24] ss:$16 sps:$4 sm:$0xff]   ;;  %3316 = vmatprep.subr.bf16.mxu0 %v4444_v45  ;;  %v4457_v35 = vld [vmem:[%s6120_s15 + $0xa0] ss:$16 sps:$4 sm:$0xff]  }
 0x50f   : > { %v4281_v24 = vpop.f32.mrb[140].mxu1  ;;  %3317 = vmatpush1.bf16.msra.mxu0 %v4442_v4  ;;  %v4450_v25 = vld [vmem:[%s6120_s15 + $0x44] ss:$16 sps:$4 sm:$0xff]   ;;  %v4487_v4 = vld [vmem:[%s6120_s15 + $0xe8] ss:$16 sps:$4 sm:$0xff]  }
 0x510   : > { %v2643_v47 = vadd.f32 %v4281_v24, %v5641_v17  ;;  %v2634_v29 = vpop.f32.mrb[141].mxu1  ;;  %4299 = vmatprep.mubr.bf16.mxu1 %v2787_v61  ;;  %3318 = vmatprep.subr.bf16.mxu0 %v4447_v32  ;;  %v4465_v61 = vld [vmem:[%s6120_s15 + $0xc] ss:$16 sps:$4 sm:$0xff]   ;;  %v4448_v24 = vld [vmem:[%s6120_s15 + $0x40] ss:$16 sps:$4 sm:$0xff]  }
 0x511   : > { %v2635_v7 = vadd.f32 %v5641_v17, %v2634_v29  ;;  %v4282_v28 = vpop.f32.mrb[142].mxu1  ;;  %4300 = vmatmul.mubr.bf16.vlgmr.msra.gmra.mrb[144].mxu1 %v2788_v63  ;;  %v4453_v63 = vld [vmem:[%s6120_s15 + $0x64] ss:$16 sps:$4 sm:$0xff]   ;;  %v3963_v32 = vld [vmem:[%s6119_s14] ss:$0 sm:$0xff] }
 0x512   : > { %v2663_v33 = vmax.f32 %v2611_v37, %v2643_v47  ;;  %v2646_v42 = vadd.f32 %v4282_v28, %v5641_v17  ;;  %v2637_v49 = vpop.f32.mrb[143].mxu1  ;;  %4308 = vmatpush3.bf16.msra.mxu1 %v5635_v55  ;;  %v4456_v37 = vld [vmem:[%s6120_s15 + $0x84] ss:$16 sps:$4 sm:$0xff]   ;;  %v4454_v47 = vld [vmem:[%s6120_s15 + $0x80] ss:$16 sps:$4 sm:$0xff]  }
 0x513   : > { %v2661_v56 = vmax.f32 %v2603_v20, %v2635_v7  ;;  %v2638_v57 = vadd.f32 %v5641_v17, %v2637_v49  ;;  %4309 = vmatprep.subr.bf16.mxu1 %v4435_v38  ;;  %3319 = vmatpush1.bf16.msra.mxu0 %v4445_v27  ;;  %v4459_v29 = vld [vmem:[%s6120_s15 + $0xa4] ss:$16 sps:$4 sm:$0xff]   ;;  %v4460_v7 = vld [vmem:[%s6120_s15 + $0xc0] ss:$16 sps:$4 sm:$0xff]  }
 0x514   : > { %v2671_v55 = vmax.f32 %v2655_v0, %v2663_v33  ;;  %v2664_v21 = vmax.f32 %v2614_v51, %v2646_v42  ;;  %3320 = vmatprep.subr.bf16.mxu0 %v4450_v25  ;;  %v4462_v20 = vld [vmem:[%s6120_s15 + $0xc4] ss:$16 sps:$4 sm:$0xff]   ;;  %v4475_v51 = vld [vmem:[%s6120_s15 + $0xe0] ss:$16 sps:$4 sm:$0xff]  }
 0x515   : > { %v2669_v17 = vmax.f32 %v2653_v46, %v2661_v56  ;;  %v2662_v2 = vmax.f32 %v2606_v1, %v2638_v57  ;;  %v4477_v28 = vld [vmem:[%s6120_s15 + $0xe4] ss:$16 sps:$4 sm:$0xff]   ;;  %v3954_v42 = vld [vmem:[%s6118_s13] ss:$0 sm:$0xff] }
 0x516   : > { %vm2679_vm13 = vcmp.ge.f32.partialorder %v2671_v55, 0.0  ;;  %v2687_v40 = vmul.f32 0.1, %v2671_v55  ;;  %v2672_v41 = vmax.f32 %v2656_v30, %v2664_v21  ;;  %4310 = vmatpush3.bf16.msra.mxu1 %v4435_v38  ;;  %v4451_v38 = vld [vmem:[%s6120_s15 + $0x60] ss:$16 sps:$4 sm:$0xff]  }
 0x517   : > { %vm2677_vm15 = vcmp.ge.f32.partialorder %v2669_v17, 0.0  ;;  %v2685_v3 = vmul.f32 0.1, %v2669_v17  ;;  %v2670_v9 = vmax.f32 %v2654_v6, %v2662_v2  ;;  %4311 = vmatprep.subr.bf16.mxu1 %v4436_v53  ;;  %3321 = vmatpush1.bf16.msra.mxu0 %v4448_v24  ;;  %v4468_v2 = vld [vmem:[%s6120_s15 + $0x2c] ss:$16 sps:$4 sm:$0xff]  }
 0x518   : > { %vm2680_vm0 = vcmp.ge.f32.partialorder %v2672_v41, 0.0  ;;  %v2688_v26 = vmul.f32 0.1, %v2672_v41  ;;  %v2695_v0 = vsel %vm2679_vm13, %v2671_v55, %v2687_v40  ;;  %3322 = vmatprep.subr.bf16.mxu0 %v4453_v63  ;;  %v4469_v40 = vld [vmem:[%s6120_s15 + $0x48] ss:$16 sps:$4 sm:$0xff]  }
 0x519   : > { %vm2678_vm1 = vcmp.ge.f32.partialorder %v2670_v9, 0.0  ;;  %v2686_v39 = vmul.f32 0.1, %v2670_v9  ;;  %v2693_v46 = vsel %vm2677_vm15, %v2669_v17, %v2685_v3  ;;  %v5769_v30 = vadd.f32 %v2743_v19, %v2695_v0  ;;  %v4463_v17 = vld [vmem:[%s6120_s15 + $0x8] ss:$16 sps:$4 sm:$0xff]  }
 0x51a   : > { %v5771_v36 = vadd.f32 %v2741_v13, %v2693_v46  ;;  %v2696_v43 = vsel %vm2680_vm0, %v2672_v41, %v2688_v26  ;;  %4312 = vmatpush3.bf16.msra.mxu1 %v4436_v53  ;;  %v4466_v13 = vld [vmem:[%s6120_s15 + $0x28] ss:$16 sps:$4 sm:$0xff]   ;;  %v4474_v41 = vld [vmem:[%s6120_s15 + $0x6c] ss:$16 sps:$4 sm:$0xff]  }
 0x51b   : > { %v2694_v6 = vsel %vm2678_vm1, %v2670_v9, %v2686_v39  ;;  %v5779_v16 = vadd.f32 %v2744_v58, %v2696_v43  ;;  %4313 = vmatprep.subr.bf16.mxu1 %v4437_v31  ;;  %3323 = vmatpush1.bf16.msra.mxu0 %v4451_v38  ;;  %v4472_v26 = vld [vmem:[%s6120_s15 + $0x68] ss:$16 sps:$4 sm:$0xff]   ;;  %v4480_v46 = vld [vmem:[%s6120_s15 + $0x8c] ss:$16 sps:$4 sm:$0xff]  }
 0x51c   : > { %v5784_v18 = vadd.f32 %v2742_v12, %v2694_v6  ;;  %3324 = vmatprep.subr.bf16.mxu0 %v4456_v37  ;;  %v4492_v45 = vld [vmem:[%s6121_s16 + $0x4] ss:$8 sps:$4 sm:$0xff]  }
 0x51d   : > { %v2790_v15 = vpack.c.bf16 %v5779_v16, %v5769_v30 }
 0x51e   : > { %v2789_v48 = vpack.c.bf16 %v5784_v18, %v5771_v36  ;;  %4314 = vmatpush3.bf16.msra.mxu1 %v4437_v31 }
 0x51f   : > { %4315 = vmatprep.subr.bf16.mxu1 %v4438_v60  ;;  %3325 = vmatpush1.bf16.msra.mxu0 %v4454_v47 }
 0x520   : > { %4303 = vmatprep.mubr.bf16.mxu1 %v2789_v48  ;;  %3326 = vmatprep.subr.bf16.mxu0 %v4459_v29  ;;  %v4483_v48 = vld [vmem:[%s6120_s15 + $0xac] ss:$16 sps:$4 sm:$0xff]  }
 0x521   : > { %4304 = vmatmul.mubr.bf16.gmra.mrb[148].mxu1 %v2790_v15  ;;  %v4481_v15 = vld [vmem:[%s6120_s15 + $0xa8] ss:$16 sps:$4 sm:$0xff]  }
 0x522   : > { %4316 = vmatpush3.bf16.msra.mxu1 %v4438_v60  ;;  %v4478_v60 = vld [vmem:[%s6120_s15 + $0x88] ss:$16 sps:$4 sm:$0xff]  }
 0x523   : > { %4317 = vmatprep.subr.bf16.mxu1 %v4439_v54  ;;  %3327 = vmatpush1.bf16.msra.mxu0 %v4457_v35 }
 0x524   : > { %3328 = vmatprep.subr.bf16.mxu0 %v4462_v20 }
 0x526   : > { %4318 = vmatpush3.bf16.msra.mxu1 %v4439_v54  ;;  %v4486_v54 = vld [vmem:[%s6120_s15 + $0xcc] ss:$16 sps:$4 sm:$0xff]  }
 0x527   : > { %4319 = vmatprep.subr.bf16.mxu1 %v4440_v8  ;;  %3329 = vmatpush1.bf16.msra.mxu0 %v4460_v7 }
 0x528   : > { %3330 = vmatprep.subr.bf16.mxu0 %v4477_v28 }
 0x52a   : > { %4320 = vmatpush3.bf16.msra.mxu1 %v4440_v8  ;;  %v4484_v8 = vld [vmem:[%s6120_s15 + $0xc8] ss:$16 sps:$4 sm:$0xff]  }
 0x52b   : > { %4321 = vmatprep.subr.bf16.mxu1 %v4441_v34  ;;  %3331 = vmatpush1.bf16.msra.mxu0 %v4475_v51 }
 0x52c   : > { %3641 = vmatprep.subr.bf16.mxu0 %v4492_v45  ;;  %v4516_v45 = vld [vmem:[%s6121_s16 + $0x84] ss:$8 sps:$4 sm:$0xff]  }
 0x52e   : > { %4322 = vmatpush3.bf16.msra.mxu1 %v4441_v34  ;;  %v4489_v34 = vld [vmem:[%s6120_s15 + $0xec] ss:$16 sps:$4 sm:$0xff]  }
 0x52f   : > { %3389 = vmatprep.subr.bf16.mxu1 %v4465_v61 }
 0x5e4   : > { %v4301_v33 = vpop.f32.mrb[144].mxu1 }
 0x5e5   : > { %v2879_v49 = vpop.f32.mrb[145].mxu1  ;;  %v2888_v56 = vadd.f32 %v4301_v33, %v3954_v42 }
 0x5e6   : > { %v4302_v1 = vpop.f32.mrb[146].mxu1  ;;  %v2880_v22 = vadd.f32 %v3954_v42, %v2879_v49 }
 0x5e7   : > { %v2891_v57 = vadd.f32 %v4302_v1, %v3954_v42  ;;  %v2882_v53 = vpop.f32.mrb[147].mxu1 }
 0x5e8   : > { %v2883_v44 = vadd.f32 %v3954_v42, %v2882_v53 }
 0x5e9   : > { %v2911_v55 = vpack.c.bf16 %v2891_v57, %v2888_v56 }
 0x5ea   : > { %v2910_v21 = vpack.c.bf16 %v2883_v44, %v2880_v22  ;;  %v4490_v44 = vld [vmem:[%s6121_s16] ss:$8 sps:$4 sm:$0xff]  }
 0x5ec   : > { %4323 = vmatprep.mubr.bf16.mxu1 %v2910_v21 }
 0x5ed   : > { %4324 = vmatmul.mubr.bf16.vlgmr.msra.gmra.mrb[152].mxu1 %v2911_v55  ;;  %v4495_v55 = vld [vmem:[%s6121_s16 + $0x14] ss:$8 sps:$4 sm:$0xff]  }
 0x5ee   : > { %3390 = vmatpush1.bf16.msra.mxu1 %v4463_v17 }
 0x5ef   : > { %3391 = vmatprep.subr.bf16.mxu1 %v4468_v2 }
 0x5f2   : > { %3392 = vmatpush1.bf16.msra.mxu1 %v4466_v13 }
 0x5f3   : > { %3393 = vmatprep.subr.bf16.mxu1 %v4471_v10 }
 0x5f4   : > { %v4305_v3 = vpop.f32.mrb[148].mxu1 }
 0x5f5   : > { %v2895_v9 = vpop.f32.mrb[149].mxu1  ;;  %v2904_v0 = vadd.f32 %v4305_v3, %v3954_v42 }
 0x5f6   : > { %v4306_v31 = vpop.f32.mrb[150].mxu1  ;;  %3394 = vmatpush1.bf16.msra.mxu1 %v4469_v40  ;;  %v2896_v43 = vadd.f32 %v3954_v42, %v2895_v9 }
 0x5f7   : > { %v2907_v19 = vadd.f32 %v4306_v31, %v3954_v42  ;;  %v2898_v39 = vpop.f32.mrb[151].mxu1  ;;  %3395 = vmatprep.subr.bf16.mxu1 %v4474_v41  ;;  %v4496_v41 = vld [vmem:[%s6121_s16 + $0x20] ss:$8 sps:$4 sm:$0xff]   ;;  %v4501_v31 = vld [vmem:[%s6121_s16 + $0x34] ss:$8 sps:$4 sm:$0xff]  }
 0x5f8   : > { %v2899_v58 = vadd.f32 %v3954_v42, %v2898_v39 }
 0x5f9   : > { %v2913_v6 = vpack.c.bf16 %v2907_v19, %v2904_v0 }
 0x5fa   : > { %v2912_v12 = vpack.c.bf16 %v2899_v58, %v2896_v43  ;;  %3396 = vmatpush1.bf16.msra.mxu1 %v4472_v26  ;;  %v4499_v43 = vld [vmem:[%s6121_s16 + $0x30] ss:$8 sps:$4 sm:$0xff]  }
 0x5fb   : > { %3397 = vmatprep.subr.bf16.mxu1 %v4480_v46 }
 0x5fc   : > { %4327 = vmatprep.mubr.bf16.mxu1 %v2912_v12 }
 0x5fd   : > { %4328 = vmatmul.mubr.bf16.gmra.mrb[156].mxu1 %v2913_v6 }
 0x5fe   : > { %3398 = vmatpush1.bf16.msra.mxu1 %v4478_v60  ;;  %3421 = vmatprep.mubr.bf16.mxu1 %v6156_v62  ;;  %v4504_v60 = vld [vmem:[%s6121_s16 + $0x44] ss:$8 sps:$4 sm:$0xff]  }
 0x5ff   : > { %3399 = vmatprep.subr.bf16.mxu1 %v4483_v48 }
 0x602   : > { %3400 = vmatpush1.bf16.msra.mxu1 %v4481_v15 }
 0x603   : > { %3401 = vmatprep.subr.bf16.mxu1 %v4486_v54 }
 0x606   : > { %3402 = vmatpush1.bf16.msra.mxu1 %v4484_v8 }
 0x607   : > { %3403 = vmatprep.subr.bf16.mxu1 %v4489_v34  ;;  %v4502_v34 = vld [vmem:[%s6121_s16 + $0x40] ss:$8 sps:$4 sm:$0xff]  }
 0x60a   : > { %3404 = vmatpush1.bf16.msra.mxu1 %v4487_v4  ;;  %v4511_v4 = vld [vmem:[%s6121_s16 + $0x70] ss:$8 sps:$4 sm:$0xff]  }
 0x6c0   : > { %v4325_v27 = vpop.f32.mrb[152].mxu1 }
 0x6c1   : > { %v3011_v25 = vadd.f32 %v4325_v27, %v3963_v32  ;;  %v3002_v61 = vpop.f32.mrb[153].mxu1  ;;  %v4519_v27 = vld [vmem:[%s6121_s16 + $0x94] ss:$8 sps:$4 sm:$0xff]  }
 0x6c2   : > { %v3003_v24 = vadd.f32 %v3963_v32, %v3002_v61  ;;  %v4326_v63 = vpop.f32.mrb[154].mxu1  ;;  %v4522_v61 = vld [vmem:[%s6121_s16 + $0xa4] ss:$8 sps:$4 sm:$0xff]  }
 0x6c3   : > { %vm3035_vm2 = vcmp.ge.f32.partialorder %v3011_v25, 0.0  ;;  %v3043_v38 = vmul.f32 0.1, %v3011_v25  ;;  %v3014_v37 = vadd.f32 %v4326_v63, %v3963_v32  ;;  %v3005_v47 = vpop.f32.mrb[155].mxu1  ;;  %v4525_v63 = vld [vmem:[%s6121_s16 + $0xb4] ss:$8 sps:$4 sm:$0xff]  }
 0x6c4   : > { %vm3033_vm3 = vcmp.ge.f32.partialorder %v3003_v24, 0.0  ;;  %v3041_v29 = vmul.f32 0.1, %v3003_v24  ;;  %v3006_v35 = vadd.f32 %v3963_v32, %v3005_v47  ;;  %v4526_v47 = vld [vmem:[%s6121_s16 + $0xc0] ss:$8 sps:$4 sm:$0xff]  }
 0x6c5   : > { %v3051_v20 = vsel %vm3035_vm2, %v3011_v25, %v3043_v38  ;;  %vm3036_vm4 = vcmp.ge.f32.partialorder %v3014_v37, 0.0  ;;  %v3044_v7 = vmul.f32 0.1, %v3014_v37  ;;  %v4517_v25 = vld [vmem:[%s6121_s16 + $0x90] ss:$8 sps:$4 sm:$0xff]  }
 0x6c6   : > { %v3049_v28 = vsel %vm3033_vm3, %v3003_v24, %v3041_v29  ;;  %vm3034_vm5 = vcmp.ge.f32.partialorder %v3006_v35, 0.0  ;;  %v3042_v51 = vmul.f32 0.1, %v3006_v35  ;;  %v3059_v49 = vadd.f32 %v3051_v20, %v5707_v5  ;;  %v4493_v5 = vld [vmem:[%s6121_s16 + $0x10] ss:$8 sps:$4 sm:$0xff]  }
 0x6c7   : > { %v3052_v33 = vsel %vm3036_vm4, %v3014_v37, %v3044_v7  ;;  %v3057_v56 = vadd.f32 %v3049_v28, %v5710_v52  ;;  %v4520_v24 = vld [vmem:[%s6121_s16 + $0xa0] ss:$8 sps:$4 sm:$0xff]   ;;  %v4523_v38 = vld [vmem:[%s6121_s16 + $0xb0] ss:$8 sps:$4 sm:$0xff]   ;;  %v4528_v37 = vld [vmem:[%s6121_s16 + $0xc4] ss:$8 sps:$4 sm:$0xff]  }
 0x6c8   : > { %v3050_v42 = vsel %vm3034_vm5, %v3006_v35, %v3042_v51  ;;  %v3060_v1 = vadd.f32 %v3052_v33, %v5712_v23  ;;  %v4498_v23 = vld [vmem:[%s6121_s16 + $0x24] ss:$8 sps:$4 sm:$0xff]   ;;  %v4531_v29 = vld [vmem:[%s6121_s16 + $0xd4] ss:$8 sps:$4 sm:$0xff]   ;;  %v4529_v35 = vld [vmem:[%s6121_s16 + $0xd0] ss:$8 sps:$4 sm:$0xff]  }
 0x6c9   : > { %v3058_v57 = vadd.f32 %v3050_v42, %v5717_v14  ;;  %v4534_v20 = vld [vmem:[%s6121_s16 + $0xe4] ss:$8 sps:$4 sm:$0xff]   ;;  %v4532_v7 = vld [vmem:[%s6121_s16 + $0xe0] ss:$8 sps:$4 sm:$0xff]   ;;  %v4537_v28 = vld [vmem:[%s6121_s16 + $0xf4] ss:$8 sps:$4 sm:$0xff]  }
 0x6ca   : > { %v3132_v53 = vpack.c.bf16 %v3060_v1, %v3059_v49  ;;  %v4535_v51 = vld [vmem:[%s6121_s16 + $0xf0] ss:$8 sps:$4 sm:$0xff]   ;;  %v3129_v33 = vld [vmem:[%s6122_s17] sm:$0xf] }
 0x6cb   : > { %v3131_v22 = vpack.c.bf16 %v3058_v57, %v3057_v56  ;;  %v6016_v42 = vrot.slane %v3129_v33, %v5442_v11  ;;  %v6019_v56 = vrot.slane %v3129_v33, %v5457_v59  ;;  %v3146_v57 = vsub.s32 2, %v5439_v50 }
 0x6cd   : > { %3349 = vmatmul.mubr.bf16.vlgmr.msra.gmra.mrb[144].mxu0 %v3131_v22  ;;  %3422 = vmatmul.mubr.bf16.vlgmr.msra.gmra.mrb[160].mxu1 %v3131_v22 }
 0x6ce   : > { %3358 = vmatprep.mubr.bf16.mxu0 %v6156_v62  ;;  %3431 = vmatprep.mubr.bf16.mxu1 %v6156_v62 }
 0x6cf   : > { %3642 = vmatpush1.bf16.msra.mxu0 %v4490_v44  ;;  %v3150_v44 = vsub.s32 3, %v5439_v50 }
 0x6d0   : > { %v4329_v52 = vpop.f32.mrb[156].mxu1  ;;  %3643 = vmatprep.subr.bf16.mxu0 %v4495_v55 }
 0x6d1   : > { %v3027_v14 = vadd.f32 %v4329_v52, %v3963_v32  ;;  %v3018_v21 = vpop.f32.mrb[157].mxu1 }
 0x6d2   : > { %v3019_v17 = vadd.f32 %v3963_v32, %v3018_v21  ;;  %v4330_v2 = vpop.f32.mrb[158].mxu1 }
 0x6d3   : > { %vm3039_vm6 = vcmp.ge.f32.partialorder %v3027_v14, 0.0  ;;  %v3047_v13 = vmul.f32 0.1, %v3027_v14  ;;  %v3030_v10 = vadd.f32 %v4330_v2, %v3963_v32  ;;  %v3021_v40 = vpop.f32.mrb[159].mxu1  ;;  %3644 = vmatpush1.bf16.msra.mxu0 %v4493_v5 }
 0x6d4   : > { %vm3037_vm7 = vcmp.ge.f32.partialorder %v3019_v17, 0.0  ;;  %v3045_v3 = vmul.f32 0.1, %v3019_v17  ;;  %v3022_v9 = vadd.f32 %v3963_v32, %v3021_v40  ;;  %3645 = vmatprep.subr.bf16.mxu0 %v4498_v23  ;;  %v4514_v32 = vld [vmem:[%s6121_s16 + $0x80] ss:$8 sps:$4 sm:$0xff]   ;;  %v6029_v40 = vrot.slane %v3129_v33, %v3150_v44 }
 0x6d5   : > { %v3055_v26 = vsel %vm3039_vm6, %v3027_v14, %v3047_v13  ;;  %vm3040_vm8 = vcmp.ge.f32.partialorder %v3030_v10, 0.0  ;;  %v3048_v0 = vmul.f32 0.1, %v3030_v10  ;;  %3359 = vmatmul.mubr.bf16.gmra.mrb[148].mxu0 %v3132_v53  ;;  %3432 = vmatmul.mubr.bf16.gmra.mrb[164].mxu1 %v3132_v53  ;;  %v6027_v13 = vrot.slane %v3129_v33, %v3146_v57 }
 0x6d6   : > { %v3053_v19 = vsel %vm3037_vm7, %v3019_v17, %v3045_v3  ;;  %vm3038_vm9 = vcmp.ge.f32.partialorder %v3022_v9, 0.0  ;;  %v3046_v39 = vmul.f32 0.1, %v3022_v9  ;;  %3368 = vmatprep.mubr.bf16.mxu0 %v6156_v62  ;;  %3441 = vmatprep.mubr.bf16.mxu1 %v6156_v62  ;;  %v3063_v6 = vadd.f32 %v3055_v26, %v5769_v30  ;;  %v4507_v30 = vld [vmem:[%s6121_s16 + $0x54] ss:$8 sps:$4 sm:$0xff]  }
 0x6d7   : > { %v3056_v46 = vsel %vm3040_vm8, %v3030_v10, %v3048_v0  ;;  %3646 = vmatpush1.bf16.msra.mxu0 %v4496_v41  ;;  %v3061_v48 = vadd.f32 %v3053_v19, %v5771_v36  ;;  %v4505_v36 = vld [vmem:[%s6121_s16 + $0x50] ss:$8 sps:$4 sm:$0xff]  }
 0x6d8   : > { %v3054_v58 = vsel %vm3038_vm9, %v3022_v9, %v3046_v39  ;;  %v3064_v12 = vadd.f32 %v3056_v46, %v5779_v16  ;;  %3647 = vmatprep.subr.bf16.mxu0 %v4501_v31  ;;  %v4510_v16 = vld [vmem:[%s6121_s16 + $0x64] ss:$8 sps:$4 sm:$0xff]  }
 0x6d9   : > { %v3062_v15 = vadd.f32 %v3054_v58, %v5784_v18  ;;  %v4508_v18 = vld [vmem:[%s6121_s16 + $0x60] ss:$8 sps:$4 sm:$0xff]  }
 0x6da   : > { %v3134_v54 = vpack.c.bf16 %v3064_v12, %v3063_v6 }
 0x6db   : > { %v3133_v8 = vpack.c.bf16 %v3062_v15, %v3061_v48  ;;  %3648 = vmatpush1.bf16.msra.mxu0 %v4499_v43 }
 0x6dc   : > { %3649 = vmatprep.subr.bf16.mxu0 %v4504_v60 }
 0x6dd   : > { %3369 = vmatmul.mubr.bf16.gmra.mrb[152].mxu0 %v3133_v8  ;;  %3442 = vmatmul.mubr.bf16.gmra.mrb[168].mxu1 %v3133_v8 }
 0x6de   : > { %3378 = vmatprep.mubr.bf16.mxu0 %v6156_v62  ;;  %3451 = vmatprep.mubr.bf16.mxu1 %v6156_v62  ;;  %v4513_v62 = vld [vmem:[%s6121_s16 + $0x74] ss:$8 sps:$4 sm:$0xff]  }
 0x6df   : > { %3650 = vmatpush1.bf16.msra.mxu0 %v4502_v34 }
 0x6e0   : > { %3651 = vmatprep.subr.bf16.mxu0 %v4507_v30 }
 0x6e3   : > { %3652 = vmatpush1.bf16.msra.mxu0 %v4505_v36 }
 0x6e4   : > { %3653 = vmatprep.subr.bf16.mxu0 %v4510_v16 }
 0x6e5   : > { %3379 = vmatmul.mubr.bf16.gmra.mrb[156].mxu0 %v3134_v54  ;;  %3452 = vmatmul.mubr.bf16.gmra.mrb[172].mxu1 %v3134_v54 }
 0x6e7   : > { %3654 = vmatpush1.bf16.msra.mxu0 %v4508_v18 }
 0x6e8   : > { %3655 = vmatprep.subr.bf16.mxu0 %v4513_v62 }
 0x6eb   : > { %3656 = vmatpush1.bf16.msra.mxu0 %v4511_v4 }
 0x6ec   : > { %3657 = vmatprep.subr.bf16.mxu0 %v4516_v45 }
 0x6ef   : > { %3658 = vmatpush1.bf16.msra.mxu0 %v4514_v32 }
 0x6f0   : > { %3659 = vmatprep.subr.bf16.mxu0 %v4519_v27 }
 0x6f3   : > { %3660 = vmatpush1.bf16.msra.mxu0 %v4517_v25 }
 0x6f4   : > { %3661 = vmatprep.subr.bf16.mxu0 %v4522_v61 }
 0x6f7   : > { %3662 = vmatpush1.bf16.msra.mxu0 %v4520_v24 }
 0x6f8   : > { %3663 = vmatprep.subr.bf16.mxu0 %v4525_v63 }
 0x6fb   : > { %3664 = vmatpush1.bf16.msra.mxu0 %v4523_v38 }
 0x6fc   : > { %3665 = vmatprep.subr.bf16.mxu0 %v4528_v37 }
 0x6ff   : > { %3666 = vmatpush1.bf16.msra.mxu0 %v4526_v47 }
 0x700   : > { %3667 = vmatprep.subr.bf16.mxu0 %v4531_v29 }
 0x703   : > { %3668 = vmatpush1.bf16.msra.mxu0 %v4529_v35 }
 0x704   : > { %3669 = vmatprep.subr.bf16.mxu0 %v4534_v20 }
 0x707   : > { %3670 = vmatpush1.bf16.msra.mxu0 %v4532_v7 }
 0x708   : > { %3671 = vmatprep.subr.bf16.mxu0 %v4537_v28 }
 0x70b   : > { %3672 = vmatpush1.bf16.msra.mxu0 %v4535_v51 }
 0x7a0   : > { %v3350_v49 = vpop.f32.mrb[144].mxu0  ;;  %v3423_v1 = vpop.f32.mrb[160].mxu1 }
 0x7a1   : > { %v3352_v53 = vpop.f32.mrb[145].mxu0  ;;  %v3425_v22 = vpop.f32.mrb[161].mxu1  ;;  %v3351_v52 = vadd.f32 %v3350_v49, %v6016_v42  ;;  %v6032_v9 = vadd.f32 %v3423_v1, %v6027_v13 }
 0x7a2   : > { %v3354_v55 = vpop.f32.mrb[146].mxu0  ;;  %v3427_v5 = vpop.f32.mrb[162].mxu1  ;;  %v3353_v17 = vadd.f32 %v3352_v53, %v6019_v56  ;;  %v6038_v19 = vadd.f32 %v3425_v22, %v6029_v40 }
 0x7a3   : > { %v3355_v23 = vadd.f32 %v3354_v55, %v6016_v42  ;;  %v3356_v14 = vpop.f32.mrb[147].mxu0  ;;  %v3429_v21 = vpop.f32.mrb[163].mxu1  ;;  %v6041_v39 = vadd.f32 %v3427_v5, %v6027_v13 }
 0x7a4   : > { %v3357_v2 = vadd.f32 %v3356_v14, %v6019_v56  ;;  %v6044_v46 = vadd.f32 %v3429_v21, %v6029_v40 }
 0x7a5   : > { %v3462_v10 = vpack.c.bf16 %v3355_v23, %v3351_v52 }
 0x7a6   : > { %v3463_v41 = vpack.c.bf16 %v3357_v2, %v3353_v17 }
 0x7a8   : > { %v3360_v3 = vpop.f32.mrb[148].mxu0  ;;  %v3433_v50 = vpop.f32.mrb[164].mxu1  ;;  %3673 = vmatprep.mubr.bf16.mxu0 %v3463_v41 }
 0x7a9   : > { %v6035_v31 = vadd.f32 %v3433_v50, %v6027_v13  ;;  %v3362_v26 = vpop.f32.mrb[149].mxu0  ;;  %v3435_v0 = vpop.f32.mrb[165].mxu1  ;;  %3674 = vmatmul.mubr.bf16.vlgmr.msra.gmra.mrb[160].mxu0 %v3462_v10  ;;  %v3361_v12 = vadd.f32 %v3360_v3, %v6016_v42 }
 0x7aa   : > { %v3436_v43 = vadd.f32 %v3435_v0, %v6029_v40  ;;  %v3364_v58 = vpop.f32.mrb[150].mxu0  ;;  %v3437_v6 = vpop.f32.mrb[166].mxu1  ;;  %v3363_v34 = vadd.f32 %v3362_v26, %v6019_v56 }
 0x7ab   : > { %v3738_v60 = vmax.f32 %v6032_v9, %v6035_v31  ;;  %v3365_v48 = vadd.f32 %v3364_v58, %v6016_v42  ;;  %v3438_v15 = vadd.f32 %v3437_v6, %v6027_v13  ;;  %v3366_v54 = vpop.f32.mrb[151].mxu0  ;;  %v3439_v8 = vpop.f32.mrb[167].mxu1 }
 0x7ac   : > { %v3739_v30 = vmax.f32 %v6038_v19, %v3436_v43  ;;  %v3367_v36 = vadd.f32 %v3366_v54, %v6019_v56  ;;  %v3440_v16 = vadd.f32 %v3439_v8, %v6029_v40 }
 0x7ad   : > { %v3464_v18 = vpack.c.bf16 %v3365_v48, %v3361_v12  ;;  %v3740_v62 = vmax.f32 %v6041_v39, %v3438_v15 }
 0x7ae   : > { %v3465_v4 = vpack.c.bf16 %v3367_v36, %v3363_v34  ;;  %v3741_v45 = vmax.f32 %v6044_v46, %v3440_v16 }
 0x7b0   : > { %v3370_v32 = vpop.f32.mrb[152].mxu0  ;;  %v3443_v27 = vpop.f32.mrb[168].mxu1  ;;  %3683 = vmatprep.mubr.bf16.mxu0 %v3465_v4 }
 0x7b1   : > { %v3372_v25 = vpop.f32.mrb[153].mxu0  ;;  %v3445_v61 = vpop.f32.mrb[169].mxu1  ;;  %3684 = vmatmul.mubr.bf16.gmra.mrb[164].mxu0 %v3464_v18  ;;  %v3371_v38 = vadd.f32 %v3370_v32, %v6016_v42  ;;  %v3444_v49 = vadd.f32 %v3443_v27, %v6027_v13 }
 0x7b2   : > { %v3374_v24 = vpop.f32.mrb[154].mxu0  ;;  %v3447_v63 = vpop.f32.mrb[170].mxu1  ;;  %v3373_v35 = vadd.f32 %v3372_v25, %v6019_v56  ;;  %v3446_v22 = vadd.f32 %v3445_v61, %v6029_v40 }
 0x7b3   : > { %v3375_v37 = vadd.f32 %v3374_v24, %v6016_v42  ;;  %v3376_v47 = vpop.f32.mrb[155].mxu0  ;;  %v3449_v29 = vpop.f32.mrb[171].mxu1  ;;  %v3448_v44 = vadd.f32 %v3447_v63, %v6027_v13 }
 0x7b4   : > { %v3377_v20 = vadd.f32 %v3376_v47, %v6019_v56  ;;  %v3450_v55 = vadd.f32 %v3449_v29, %v6029_v40 }
 0x7b5   : > { %v3466_v7 = vpack.c.bf16 %v3375_v37, %v3371_v38 }
 0x7b6   : > { %v3467_v28 = vpack.c.bf16 %v3377_v20, %v3373_v35 }
 0x7b8   : > { %v3380_v51 = vpop.f32.mrb[156].mxu0  ;;  %v3453_v33 = vpop.f32.mrb[172].mxu1  ;;  %3693 = vmatprep.mubr.bf16.mxu0 %v3467_v28 }
 0x7b9   : > { %v3454_v1 = vadd.f32 %v3453_v33, %v6027_v13  ;;  %v3382_v57 = vpop.f32.mrb[157].mxu0  ;;  %v3455_v53 = vpop.f32.mrb[173].mxu1  ;;  %3694 = vmatmul.mubr.bf16.gmra.mrb[168].mxu0 %v3466_v7  ;;  %v3381_v14 = vadd.f32 %v3380_v51, %v6016_v42 }
 0x7ba   : > { %v3456_v5 = vadd.f32 %v3455_v53, %v6029_v40  ;;  %v3384_v52 = vpop.f32.mrb[158].mxu0  ;;  %v3457_v23 = vpop.f32.mrb[174].mxu1  ;;  %v3383_v3 = vadd.f32 %v3382_v57, %v6019_v56 }
 0x7bb   : > { %v3742_v21 = vmax.f32 %v3444_v49, %v3454_v1  ;;  %v3385_v17 = vadd.f32 %v3384_v52, %v6016_v42  ;;  %v3458_v2 = vadd.f32 %v3457_v23, %v6027_v13  ;;  %v3386_v10 = vpop.f32.mrb[159].mxu0  ;;  %v3459_v41 = vpop.f32.mrb[175].mxu1 }
 0x7bc   : > { %v3743_v50 = vmax.f32 %v3446_v22, %v3456_v5  ;;  %v3387_v9 = vadd.f32 %v3386_v10, %v6019_v56  ;;  %v3460_v31 = vadd.f32 %v3459_v41, %v6029_v40  ;;  %v3130_v56 = vld [vmem:[%s6123_s18] sm:$0x3] }
 0x7bd   : > { %v3746_v26 = vmax.f32 %v3738_v60, %v3742_v21  ;;  %v3468_v0 = vpack.c.bf16 %v3385_v17, %v3381_v14  ;;  %v3744_v19 = vmax.f32 %v3448_v44, %v3458_v2  ;;  %v3474_v60 = vrot.slane %v3130_v56, %v5442_v11 }
 0x7be   : > { %v6074_v39 = vmax.f32 %v3739_v30, %v3743_v50  ;;  %v3469_v46 = vpack.c.bf16 %v3387_v9, %v3383_v3  ;;  %v3745_v43 = vmax.f32 %v3450_v55, %v3460_v31  ;;  %v3478_v48 = vrot.slane %v3130_v56, %v5457_v59 }
 0x7bf   : > { %v6076_v58 = vmax.f32 %v3740_v62, %v3744_v19  ;;  %v3754_v47 = vmul.f32 0.1, %v3746_v26  ;;  %vm3750_vm10 = vcmp.ge.f32.partialorder %v3746_v26, 0.0 }
 0x7c0   : > { %v6078_v42 = vmax.f32 %v3741_v45, %v3745_v43  ;;  %3703 = vmatprep.mubr.bf16.mxu0 %v3469_v46  ;;  %v3755_v33 = vmul.f32 0.1, %v6074_v39  ;;  %vm3751_vm11 = vcmp.ge.f32.partialorder %v6074_v39, 0.0 }
 0x7c1   : > { %3704 = vmatmul.mubr.bf16.gmra.mrb[172].mxu0 %v3468_v0  ;;  %v3758_v5 = vsel %vm3750_vm10, %v3746_v26, %v3754_v47  ;;  %vm3752_vm12 = vcmp.ge.f32.partialorder %v6076_v58, 0.0  ;;  %v3756_v14 = vmul.f32 0.1, %v6076_v58 }
 0x7c2   : > { %v3759_v2 = vsel %vm3751_vm11, %v6074_v39, %v3755_v33  ;;  %v3757_v3 = vmul.f32 0.1, %v6078_v42  ;;  %vm3753_vm15 = vcmp.ge.f32.partialorder %v6078_v42, 0.0 }
 0x7c3   : > { %v3760_v39 = vsel %vm3752_vm12, %v6076_v58, %v3756_v14 }
 0x87c   : > { %v3675_v13 = vpop.f32.mrb[160].mxu0 }
 0x87d   : > { %v3677_v6 = vpop.f32.mrb[161].mxu0  ;;  %v3676_v54 = vadd.f32 %v3675_v13, %v3474_v60 }
 0x87e   : > { %v3679_v40 = vpop.f32.mrb[162].mxu0  ;;  %v3678_v30 = vadd.f32 %v3677_v6, %v3478_v48  ;;  %v3761_v6 = vsel %vm3753_vm15, %v6078_v42, %v3757_v3 }
 0x87f   : > { %v3681_v12 = vpop.f32.mrb[163].mxu0  ;;  %v3680_v18 = vadd.f32 %v3679_v40, %v3474_v60 }
 0x880   : > { %v3682_v32 = vadd.f32 %v3681_v12, %v3478_v48 }
 0x884   : > { %v3685_v15 = vpop.f32.mrb[164].mxu0 }
 0x885   : > { %v3686_v8 = vadd.f32 %v3685_v15, %v3474_v60  ;;  %v3687_v34 = vpop.f32.mrb[165].mxu0 }
 0x886   : > { %v3688_v36 = vadd.f32 %v3687_v34, %v3478_v48  ;;  %v3689_v16 = vpop.f32.mrb[166].mxu0 }
 0x887   : > { %v3714_v62 = vmax.f32 %v3676_v54, %v3686_v8  ;;  %v3690_v4 = vadd.f32 %v3689_v16, %v3474_v60  ;;  %v3691_v45 = vpop.f32.mrb[167].mxu0 }
 0x888   : > { %v3715_v27 = vmax.f32 %v3678_v30, %v3688_v36  ;;  %v3692_v25 = vadd.f32 %v3691_v45, %v3478_v48 }
 0x889   : > { %v3716_v61 = vmax.f32 %v3680_v18, %v3690_v4 }
 0x88a   : > { %v3717_v24 = vmax.f32 %v3682_v32, %v3692_v25 }
 0x88c   : > { %v3695_v11 = vpop.f32.mrb[168].mxu0 }
 0x88d   : > { %v3697_v63 = vpop.f32.mrb[169].mxu0  ;;  %v3696_v29 = vadd.f32 %v3695_v11, %v3474_v60 }
 0x88e   : > { %v3699_v59 = vpop.f32.mrb[170].mxu0  ;;  %v3698_v7 = vadd.f32 %v3697_v63, %v3478_v48 }
 0x88f   : > { %v3701_v38 = vpop.f32.mrb[171].mxu0  ;;  %v3700_v49 = vadd.f32 %v3699_v59, %v3474_v60 }
 0x890   : > { %v3702_v22 = vadd.f32 %v3701_v38, %v3478_v48 }
 0x894   : > { %v3705_v37 = vpop.f32.mrb[172].mxu0 }
 0x895   : > { %v3706_v35 = vadd.f32 %v3705_v37, %v3474_v60  ;;  %v3707_v20 = vpop.f32.mrb[173].mxu0 }
 0x896   : > { %v3708_v28 = vadd.f32 %v3707_v20, %v3478_v48  ;;  %v3709_v51 = vpop.f32.mrb[174].mxu0 }
 0x897   : > { %v3718_v1 = vmax.f32 %v3696_v29, %v3706_v35  ;;  %v3710_v57 = vadd.f32 %v3709_v51, %v3474_v60  ;;  %v3711_v53 = vpop.f32.mrb[175].mxu0 }
 0x898   : > { %v3719_v44 = vmax.f32 %v3698_v7, %v3708_v28  ;;  %v3712_v55 = vadd.f32 %v3711_v53, %v3478_v48 }
 0x899   : > { %v3722_v52 = vmax.f32 %v3714_v62, %v3718_v1  ;;  %v3720_v23 = vmax.f32 %v3700_v49, %v3710_v57 }
 0x89a   : > { %v3723_v21 = vmax.f32 %v3715_v27, %v3719_v44  ;;  %v3721_v17 = vmax.f32 %v3702_v22, %v3712_v55 }
 0x89b   : > { %vm3726_vm13 = vcmp.ge.f32.partialorder %v3722_v52, 0.0  ;;  %v3730_v10 = vmul.f32 0.1, %v3722_v52  ;;  %v3724_v41 = vmax.f32 %v3716_v61, %v3720_v23 }
 0x89c   : > { %vm3727_vm14 = vcmp.ge.f32.partialorder %v3723_v21, 0.0  ;;  %v3731_v50 = vmul.f32 0.1, %v3723_v21  ;;  %v3725_v9 = vmax.f32 %v3717_v24, %v3721_v17 }
 0x89d   : > { %v3734_v31 = vsel %vm3726_vm13, %v3722_v52, %v3730_v10  ;;  %vm3728_vm0 = vcmp.ge.f32.partialorder %v3724_v41, 0.0  ;;  %v3732_v26 = vmul.f32 0.1, %v3724_v41 }
 0x89e   : > { %v3762_v0 = vadd.f32 %v3758_v5, %v3734_v31  ;;  %v3735_v19 = vsel %vm3727_vm14, %v3723_v21, %v3731_v50  ;;  %vm3729_vm1 = vcmp.ge.f32.partialorder %v3725_v9, 0.0  ;;  %v3733_v46 = vmul.f32 0.1, %v3725_v9 }
 0x89f   : > { %v3763_v43 = vadd.f32 %v3759_v2, %v3735_v19  ;;  %v3736_v13 = vsel %vm3728_vm0, %v3724_v41, %v3732_v26 }
 0x8a0   : > { %v3764_v56 = vadd.f32 %v3760_v39, %v3736_v13  ;;  %v3737_v40 = vsel %vm3729_vm1, %v3725_v9, %v3733_v46 }
 0x8a1   : > { %v4041_v12 = vpack.c.bf16 %v3763_v43, %v3762_v0  ;;  %v3765_v60 = vadd.f32 %v3761_v6, %v3737_v40 }
 0x8a3   : > { %3778 = vst [vmem:[%s606_s21] sm:$0xff] %v4041_v12  ;;  %v4042_v48 = vpack.c.bf16 %v3765_v60, %v3764_v56 }
 0x8a5   : > { %3779 = vst [vmem:[%s606_s21 + $0x8] sm:$0xff] %v4042_v48 }
 0x8a6 PF: > { %s29_s0 = sadd.s32 1, %s4544_s0  }
 0x8a7   : > { %p26_p5 = scmp.ge.s32.totalorder %s29_s0, 14  }
 0x8a9   :  { %28 = sbr.rel (!%p26_p5) target bundleno = 5 (0x5), region = 126 }

// kernel: forward.3
= control target key start
LH: loop header
LB: loop body
LE: loop exit
PB: predicated region body
PF: predicated region fallthrough
CT: control target
= control target key end

     0   :  { %v3153_v28 = vlaneseq  ;;  %v22987_v36 = vmov 1966171168   ;;  %s28129_s0 = inlined_call_operand.vmem [shape: bf16[2,24576], index: 0, kind: input, shape index: {}]   ;;  %s28130_s1 = inlined_call_operand.vmem [shape: bf16[24576,128], index: 1, kind: input, shape index: {}]   ;;  %s28131_s2 = inlined_call_operand.vmem [shape: f32[1,128], index: 2, kind: input, shape index: {}]   ;;  %s28132_s3 = inlined_call_operand.vmem [shape: bf16[128,2], index: 3, kind: input, shape index: {}]   ;;  %s28133_s4 = inlined_call_operand.vmem [shape: f32[1,2], index: 4, kind: input, shape index: {}]   ;;  %s28134_s5 = inlined_call_operand.hbm [shape: f32[2,2], index: 5, kind: output, shape index: {}]  }
   0x1   :  { %v21395_v0 = vld [vmem:[%s28130_s1 + $0x40] sm:$0xff]   ;;  %v21399_v4 = vld [vmem:[%s28130_s1 + $0x48] sm:$0xff]   ;;  %v21403_v8 = vld [vmem:[%s28130_s1 + $0x50] sm:$0xff]   ;;  %v3151_v37 = vunpack.c.l.s4 %v22987_v36 }
   0x2   :  { %v21396_v1 = vld [vmem:[%s28130_s1 + $0xc0] sm:$0xff]   ;;  %19250 = vmatprep.subr.bf16.mxu0 %v21395_v0  ;;  %v21400_v5 = vld [vmem:[%s28130_s1 + $0xc8] sm:$0xff]   ;;  %v21404_v9 = vld [vmem:[%s28130_s1 + $0xd0] sm:$0xff]   ;;  %v3154_v33 = vshrl.u32 %v3153_v28, 7 }
   0x3   :  { %v21397_v2 = vld [vmem:[%s28130_s1] sm:$0xff]   ;;  %19272 = vmatprep.subr.bf16.mxu1 %v21396_v1  ;;  %v21401_v6 = vld [vmem:[%s28130_s1 + $0x8] sm:$0xff]   ;;  %v21405_v10 = vld [vmem:[%s28130_s1 + $0x10] sm:$0xff]   ;;  %v3152_v40 = vunpack.c.0.s8 %v3151_v37 }
   0x4   :  { %v21398_v3 = vld [vmem:[%s28130_s1 + $0x80] sm:$0xff]   ;;  %19251 = vmatpush3.bf16.msra.mxu0 %v21397_v2  ;;  %v21402_v7 = vld [vmem:[%s28130_s1 + $0x88] sm:$0xff]   ;;  %v21406_v11 = vld [vmem:[%s28130_s1 + $0x90] sm:$0xff]  }
   0x5   :  { %19273 = vmatpush3.bf16.msra.mxu1 %v21398_v3  ;;  %19252 = vmatprep.subr.bf16.mxu0 %v21399_v4  ;;  %v21407_v12 = vld [vmem:[%s28130_s1 + $0x58] sm:$0xff]   ;;  %v21411_v16 = vld [vmem:[%s28130_s1 + $0x60] sm:$0xff]   ;;  %v21415_v20 = vld [vmem:[%s28130_s1 + $0x68] sm:$0xff]   ;;  %v23126_v41 = vsub.s32 %v3152_v40, %v3154_v33 }
   0x6   :  { %19274 = vmatprep.subr.bf16.mxu1 %v21400_v5  ;;  %v21408_v13 = vld [vmem:[%s28130_s1 + $0xd8] sm:$0xff]   ;;  %v21412_v17 = vld [vmem:[%s28130_s1 + $0xe0] sm:$0xff]   ;;  %v21416_v21 = vld [vmem:[%s28130_s1 + $0xe8] sm:$0xff]  }
   0x7   :  { %v21409_v14 = vld [vmem:[%s28130_s1 + $0x18] sm:$0xff]   ;;  %v21413_v18 = vld [vmem:[%s28130_s1 + $0x20] sm:$0xff]   ;;  %v21417_v22 = vld [vmem:[%s28130_s1 + $0x28] sm:$0xff]  }
   0x8   :  { %19253 = vmatpush3.bf16.msra.mxu0 %v21401_v6  ;;  %v21410_v15 = vld [vmem:[%s28130_s1 + $0x98] sm:$0xff]   ;;  %v21414_v19 = vld [vmem:[%s28130_s1 + $0xa0] sm:$0xff]   ;;  %v21418_v23 = vld [vmem:[%s28130_s1 + $0xa8] sm:$0xff]  }
   0x9   :  { %19275 = vmatpush3.bf16.msra.mxu1 %v21402_v7  ;;  %19254 = vmatprep.subr.bf16.mxu0 %v21403_v8  ;;  %v21419_v24 = vld [vmem:[%s28130_s1 + $0x70] sm:$0xff]   ;;  %v21423_v29 = vld [vmem:[%s28130_s1 + $0x78] sm:$0xff]   ;;  %v22_v34 = vld [vmem:[%s28129_s0] sm:$0xff] }
   0xa   :  { %19276 = vmatprep.subr.bf16.mxu1 %v21404_v9  ;;  %v21420_v25 = vld [vmem:[%s28130_s1 + $0xf0] sm:$0xff]   ;;  %v21424_v30 = vld [vmem:[%s28130_s1 + $0xf8] sm:$0xff]   ;;  %v21428_v35 = vld [vmem:[%s28130_s1 + $0x140] sm:$0xff]   ;;  %v3149_v39 = vcombine.high %v22_v34, %v22_v34  ;;  %v3156_v42 = vrot.slane %v22_v34, %v23126_v41 }
   0xb   :  { %v21421_v26 = vld [vmem:[%s28130_s1 + $0x30] sm:$0xff]   ;;  %v21425_v31 = vld [vmem:[%s28130_s1 + $0x38] sm:$0xff]   ;;  %v21429_v38 = vld [vmem:[%s28130_s1 + $0x1c0] sm:$0xff]  }
   0xc   :  { %19255 = vmatpush3.bf16.msra.mxu0 %v21405_v10  ;;  %v21422_v27 = vld [vmem:[%s28130_s1 + $0xb0] sm:$0xff]   ;;  %v21426_v32 = vld [vmem:[%s28130_s1 + $0xb8] sm:$0xff]   ;;  %v23130_v43 = vrot.slane %v3149_v39, %v23126_v41  ;;  %v3164_v44 = vcombine.high %v3156_v42, %v3156_v42  ;;  %v3172_v45 = vrot.slane %v3156_v42, %v23126_v41  ;;  %v21430_v47 = vld [vmem:[%s28130_s1 + $0x100] sm:$0xff]  }
   0xd   :  { %19277 = vmatpush3.bf16.msra.mxu1 %v21406_v11  ;;  %19256 = vmatprep.subr.bf16.mxu0 %v21407_v12  ;;  %v21431_v49 = vld [vmem:[%s28130_s1 + $0x180] sm:$0xff]   ;;  %v21432_v52 = vld [vmem:[%s28130_s1 + $0x148] sm:$0xff]   ;;  %v21436_v58 = vld [vmem:[%s28130_s1 + $0x150] sm:$0xff]  }
   0xe   :  { %19278 = vmatprep.subr.bf16.mxu1 %v21408_v13  ;;  %v3165_v46 = vcombine.high %v23130_v43, %v23130_v43  ;;  %v3186_v48 = vrot.slane %v3164_v44, %v23126_v41  ;;  %v3194_v51 = vcombine.high %v3172_v45, %v3172_v45  ;;  %v21433_v54 = vld [vmem:[%s28130_s1 + $0x1c8] sm:$0xff]   ;;  %v21437_v59 = vld [vmem:[%s28130_s1 + $0x1d0] sm:$0xff]   ;;  %v21440_v62 = vld [vmem:[%s28130_s1 + $0x158] sm:$0xff]  }
   0xf   :  { %v21434_v55 = vld [vmem:[%s28130_s1 + $0x108] sm:$0xff]   ;;  %v21438_v60 = vld [vmem:[%s28130_s1 + $0x110] sm:$0xff]   ;;  %v21441_v63 = vld [vmem:[%s28130_s1 + $0x1d8] sm:$0xff]  }
  0x10   :  { %19257 = vmatpush3.bf16.msra.mxu0 %v21409_v14  ;;  %v3193_v50 = vrot.slane %v3165_v46, %v23126_v41  ;;  %13765 = vmatprep.mubr.bf16.mxu0 %v3186_v48  ;;  %v3196_v53 = vcombine.high %v3186_v48, %v3186_v48  ;;  %v21435_v57 = vld [vmem:[%s28130_s1 + $0x188] sm:$0xff]   ;;  %v21439_v61 = vld [vmem:[%s28130_s1 + $0x190] sm:$0xff]   ;;  %v21442_v0 = vld [vmem:[%s28130_s1 + $0x118] sm:$0xff]  }
  0x11   :  { %19279 = vmatpush3.bf16.msra.mxu1 %v21410_v15  ;;  %19258 = vmatprep.subr.bf16.mxu0 %v21411_v16  ;;  %v21443_v1 = vld [vmem:[%s28130_s1 + $0x198] sm:$0xff]   ;;  %v21444_v2 = vld [vmem:[%s28130_s1 + $0x160] sm:$0xff]   ;;  %v21448_v6 = vld [vmem:[%s28130_s1 + $0x168] sm:$0xff]  }
  0x12   :  { %19280 = vmatprep.subr.bf16.mxu1 %v21412_v17  ;;  %v3197_v56 = vcombine.high %v3193_v50, %v3193_v50  ;;  %13805 = vmatprep.mubr.bf16.mxu1 %v3196_v53  ;;  %v21445_v3 = vld [vmem:[%s28130_s1 + $0x1e0] sm:$0xff]   ;;  %v21449_v7 = vld [vmem:[%s28130_s1 + $0x1e8] sm:$0xff]   ;;  %v21452_v10 = vld [vmem:[%s28130_s1 + $0x170] sm:$0xff]  }
  0x13   :  { %v21446_v4 = vld [vmem:[%s28130_s1 + $0x120] sm:$0xff]   ;;  %v21450_v8 = vld [vmem:[%s28130_s1 + $0x128] sm:$0xff]   ;;  %v21453_v11 = vld [vmem:[%s28130_s1 + $0x1f0] sm:$0xff]  }
  0x14   :  { %19259 = vmatpush3.bf16.msra.mxu0 %v21413_v18  ;;  %v21447_v5 = vld [vmem:[%s28130_s1 + $0x1a0] sm:$0xff]   ;;  %v21451_v9 = vld [vmem:[%s28130_s1 + $0x1a8] sm:$0xff]   ;;  %v21454_v12 = vld [vmem:[%s28130_s1 + $0x130] sm:$0xff]   ;;  %v3179_v18 = vrot.slane %v23130_v43, %v23126_v41 }
  0x15   :  { %19281 = vmatpush3.bf16.msra.mxu1 %v21414_v19  ;;  %19260 = vmatprep.subr.bf16.mxu0 %v21415_v20  ;;  %v21455_v13 = vld [vmem:[%s28130_s1 + $0x1b0] sm:$0xff]   ;;  %v21456_v14 = vld [vmem:[%s28130_s1 + $0x178] sm:$0xff]   ;;  %v21460_v19 = vld [vmem:[%s28130_s1 + $0x240] sm:$0xff]  }
  0x16   :  { %19282 = vmatprep.subr.bf16.mxu1 %v21416_v21  ;;  %v21457_v15 = vld [vmem:[%s28130_s1 + $0x1f8] sm:$0xff]   ;;  %v21461_v20 = vld [vmem:[%s28130_s1 + $0x2c0] sm:$0xff]   ;;  %v21468_v28 = vld [vmem:[%s28130_s1 + $0x250] sm:$0xff]  }
  0x17   :  { %v21458_v16 = vld [vmem:[%s28130_s1 + $0x138] sm:$0xff]   ;;  %v21462_v21 = vld [vmem:[%s28130_s1 + $0x200] sm:$0xff]   ;;  %v21480_v40 = vld [vmem:[%s28130_s1 + $0x268] sm:$0xff]  }
  0x18   :  { %19261 = vmatpush3.bf16.msra.mxu0 %v21417_v22  ;;  %v21459_v17 = vld [vmem:[%s28130_s1 + $0x1b8] sm:$0xff]   ;;  %v21463_v22 = vld [vmem:[%s28130_s1 + $0x280] sm:$0xff]   ;;  %v21481_v42 = vld [vmem:[%s28130_s1 + $0x2e8] sm:$0xff]  }
  0x19   :  { %19283 = vmatpush3.bf16.msra.mxu1 %v21418_v23  ;;  %19262 = vmatprep.subr.bf16.mxu0 %v21419_v24  ;;  %v3195_v23 = vcombine.high %v3179_v18, %v3179_v18  ;;  %v21464_v24 = vld [vmem:[%s28130_s1 + $0x248] sm:$0xff]   ;;  %v21473_v33 = vld [vmem:[%s28130_s1 + $0x2d8] sm:$0xff]   ;;  %v21476_v36 = vld [vmem:[%s28130_s1 + $0x260] sm:$0xff]  }
  0x1a   :  { %19284 = vmatprep.subr.bf16.mxu1 %v21420_v25  ;;  %v21465_v25 = vld [vmem:[%s28130_s1 + $0x2c8] sm:$0xff]   ;;  %v21474_v34 = vld [vmem:[%s28130_s1 + $0x218] sm:$0xff]   ;;  %v21477_v37 = vld [vmem:[%s28130_s1 + $0x2e0] sm:$0xff]  }
  0x1b   :  { %v21479_v39 = vld [vmem:[%s28130_s1 + $0x2a0] sm:$0xff]   ;;  %v21482_v43 = vld [vmem:[%s28130_s1 + $0x228] sm:$0xff]  }
  0x1c   :  { %19263 = vmatpush3.bf16.msra.mxu0 %v21421_v26  ;;  %v21466_v26 = vld [vmem:[%s28130_s1 + $0x208] sm:$0xff]  }
  0x1d   :  { %19285 = vmatpush3.bf16.msra.mxu1 %v21422_v27  ;;  %19264 = vmatprep.subr.bf16.mxu0 %v21423_v29  ;;  %v21467_v27 = vld [vmem:[%s28130_s1 + $0x288] sm:$0xff]   ;;  %v21469_v29 = vld [vmem:[%s28130_s1 + $0x2d0] sm:$0xff]  }
  0x1e   :  { %19286 = vmatprep.subr.bf16.mxu1 %v21424_v30  ;;  %v21470_v30 = vld [vmem:[%s28130_s1 + $0x210] sm:$0xff]   ;;  %v21483_v44 = vld [vmem:[%s28130_s1 + $0x2a8] sm:$0xff]  }
  0x1f   :  { %v23_v46 = vld [vmem:[%s28129_s0 + $0x8] sm:$0xff] }
  0x20   :  { %19265 = vmatpush3.bf16.msra.mxu0 %v21425_v31  ;;  %v21471_v31 = vld [vmem:[%s28130_s1 + $0x290] sm:$0xff]   ;;  %v3205_v48 = vrot.slane %v23_v46, %v23126_v41 }
  0x21   :  { %19287 = vmatpush3.bf16.msra.mxu1 %v21426_v32  ;;  %19294 = vmatprep.subr.bf16.mxu0 %v21428_v35  ;;  %v21472_v32 = vld [vmem:[%s28130_s1 + $0x258] sm:$0xff]  }
  0x22   :  { %19316 = vmatprep.subr.bf16.mxu1 %v21429_v38  ;;  %v21475_v35 = vld [vmem:[%s28130_s1 + $0x298] sm:$0xff]   ;;  %v21478_v38 = vld [vmem:[%s28130_s1 + $0x220] sm:$0xff]  }
  0x23   :  { %13766 = vmatmul.mubr.bf16.vlgmr.msra.gmra.mrb[0].mxu0 %v3172_v45  ;;  %v21484_v45 = vld [vmem:[%s28130_s1 + $0x270] sm:$0xff]  }
  0x24   :  { %19295 = vmatpush3.bf16.msra.mxu0 %v21430_v47  ;;  %13806 = vmatmul.mubr.bf16.vlgmr.msra.gmra.mrb[0].mxu1 %v3194_v51  ;;  %v21485_v47 = vld [vmem:[%s28130_s1 + $0x2f0] sm:$0xff]  }
  0x25   :  { %19296 = vmatprep.subr.bf16.mxu0 %v21432_v52  ;;  %19317 = vmatpush3.bf16.msra.mxu1 %v21431_v49  ;;  %v3198_v49 = vcombine.high %v23_v46, %v23_v46  ;;  %v21487_v51 = vld [vmem:[%s28130_s1 + $0x2b0] sm:$0xff]   ;;  %v3213_v52 = vcombine.high %v3205_v48, %v3205_v48 }
  0x26   :  { %13845 = vmatprep.mubr.bf16.mxu0 %v3193_v50  ;;  %19318 = vmatprep.subr.bf16.mxu1 %v21433_v54  ;;  %v21486_v50 = vld [vmem:[%s28130_s1 + $0x230] sm:$0xff]   ;;  %v21488_v54 = vld [vmem:[%s28130_s1 + $0x278] sm:$0xff]  }
  0x27   :  { %13885 = vmatprep.mubr.bf16.mxu1 %v3197_v56  ;;  %v23318_v53 = vrot.slane %v3198_v49, %v23126_v41  ;;  %v3235_v56 = vrot.slane %v3213_v52, %v23126_v41  ;;  %v21535_v46 = vld [vmem:[%s28130_s1 + $0x410] sm:$0xff]   ;;  %v21538_v49 = vld [vmem:[%s28130_s1 + $0x4d8] sm:$0xff]   ;;  %v21541_v52 = vld [vmem:[%s28130_s1 + $0x460] sm:$0xff]  }
  0x28   :  { %19297 = vmatpush3.bf16.msra.mxu0 %v21434_v55  ;;  %v21489_v55 = vld [vmem:[%s28130_s1 + $0x2f8] sm:$0xff]  }
  0x29   :  { %19298 = vmatprep.subr.bf16.mxu0 %v21436_v58  ;;  %19319 = vmatpush3.bf16.msra.mxu1 %v21435_v57  ;;  %v3214_v57 = vcombine.high %v23318_v53, %v23318_v53  ;;  %v21490_v58 = vld [vmem:[%s28130_s1 + $0x238] sm:$0xff]  }
  0x2a   :  { %19320 = vmatprep.subr.bf16.mxu1 %v21437_v59  ;;  %v21491_v59 = vld [vmem:[%s28130_s1 + $0x2b8] sm:$0xff]  }
  0x2c   :  { %19299 = vmatpush3.bf16.msra.mxu0 %v21438_v60  ;;  %v3245_v60 = vcombine.high %v3235_v56, %v3235_v56 }
  0x2d   :  { %19300 = vmatprep.subr.bf16.mxu0 %v21440_v62  ;;  %19321 = vmatpush3.bf16.msra.mxu1 %v21439_v61  ;;  %v3221_v61 = vrot.slane %v3205_v48, %v23126_v41  ;;  %v21492_v62 = vld [vmem:[%s28130_s1 + $0x340] sm:$0xff]   ;;  %v21537_v48 = vld [vmem:[%s28130_s1 + $0x458] sm:$0xff]  }
  0x2e   :  { %19322 = vmatprep.subr.bf16.mxu1 %v21441_v63  ;;  %v21493_v63 = vld [vmem:[%s28130_s1 + $0x3c0] sm:$0xff]  }
  0x30   :  { %19301 = vmatpush3.bf16.msra.mxu0 %v21442_v0  ;;  %v3242_v0 = vrot.slane %v3214_v57, %v23126_v41  ;;  %v21546_v57 = vld [vmem:[%s28130_s1 + $0x4e8] sm:$0xff]  }
  0x31   :  { %19302 = vmatprep.subr.bf16.mxu0 %v21444_v2  ;;  %19323 = vmatpush3.bf16.msra.mxu1 %v21443_v1  ;;  %v21494_v1 = vld [vmem:[%s28130_s1 + $0x300] sm:$0xff]  }
  0x32   :  { %19324 = vmatprep.subr.bf16.mxu1 %v21445_v3  ;;  %v21495_v2 = vld [vmem:[%s28130_s1 + $0x380] sm:$0xff]   ;;  %v3243_v3 = vcombine.high %v3221_v61, %v3221_v61 }
  0x34   :  { %19303 = vmatpush3.bf16.msra.mxu0 %v21446_v4  ;;  %v21496_v4 = vld [vmem:[%s28130_s1 + $0x348] sm:$0xff]  }
  0x35   :  { %19304 = vmatprep.subr.bf16.mxu0 %v21448_v6  ;;  %19325 = vmatpush3.bf16.msra.mxu1 %v21447_v5  ;;  %v21497_v5 = vld [vmem:[%s28130_s1 + $0x3c8] sm:$0xff]   ;;  %v3246_v6 = vcombine.high %v3242_v0, %v3242_v0 }
  0x36   :  { %19326 = vmatprep.subr.bf16.mxu1 %v21449_v7  ;;  %v21498_v7 = vld [vmem:[%s28130_s1 + $0x308] sm:$0xff]  }
  0x38   :  { %19305 = vmatpush3.bf16.msra.mxu0 %v21450_v8  ;;  %v21499_v8 = vld [vmem:[%s28130_s1 + $0x388] sm:$0xff]  }
  0x39   :  { %19306 = vmatprep.subr.bf16.mxu0 %v21452_v10  ;;  %19327 = vmatpush3.bf16.msra.mxu1 %v21451_v9  ;;  %v21500_v9 = vld [vmem:[%s28130_s1 + $0x350] sm:$0xff]  }
  0x3a   :  { %19328 = vmatprep.subr.bf16.mxu1 %v21453_v11  ;;  %v21501_v10 = vld [vmem:[%s28130_s1 + $0x3d0] sm:$0xff]  }
  0x3b   :  { %v21502_v11 = vld [vmem:[%s28130_s1 + $0x310] sm:$0xff]  }
  0x3c   :  { %19307 = vmatpush3.bf16.msra.mxu0 %v21454_v12  ;;  %v21503_v12 = vld [vmem:[%s28130_s1 + $0x390] sm:$0xff]  }
  0x3d   :  { %19308 = vmatprep.subr.bf16.mxu0 %v21456_v14  ;;  %19329 = vmatpush3.bf16.msra.mxu1 %v21455_v13  ;;  %v21504_v13 = vld [vmem:[%s28130_s1 + $0x358] sm:$0xff]  }
  0x3e   :  { %19330 = vmatprep.subr.bf16.mxu1 %v21457_v15  ;;  %v21505_v14 = vld [vmem:[%s28130_s1 + $0x3d8] sm:$0xff]  }
  0x3f   :  { %v21506_v15 = vld [vmem:[%s28130_s1 + $0x318] sm:$0xff]  }
  0x40   :  { %19309 = vmatpush3.bf16.msra.mxu0 %v21458_v16  ;;  %v21507_v16 = vld [vmem:[%s28130_s1 + $0x398] sm:$0xff]  }
  0x41   :  { %19338 = vmatprep.subr.bf16.mxu0 %v21460_v19  ;;  %19331 = vmatpush3.bf16.msra.mxu1 %v21459_v17  ;;  %v21508_v17 = vld [vmem:[%s28130_s1 + $0x360] sm:$0xff]  }
  0x42   :  { %19360 = vmatprep.subr.bf16.mxu1 %v21461_v20  ;;  %v21510_v19 = vld [vmem:[%s28130_s1 + $0x320] sm:$0xff]  }
  0x43   :  { %13846 = vmatmul.mubr.bf16.vlgmr.msra.gmra.mrb[4].mxu0 %v3179_v18  ;;  %v21509_v18 = vld [vmem:[%s28130_s1 + $0x3e0] sm:$0xff]  }
  0x44   :  { %19339 = vmatpush3.bf16.msra.mxu0 %v21462_v21  ;;  %13886 = vmatmul.mubr.bf16.vlgmr.msra.gmra.mrb[4].mxu1 %v3195_v23  ;;  %v21511_v20 = vld [vmem:[%s28130_s1 + $0x3a0] sm:$0xff]   ;;  %v21512_v21 = vld [vmem:[%s28130_s1 + $0x368] sm:$0xff]  }
  0x45   :  { %19340 = vmatprep.subr.bf16.mxu0 %v21464_v24  ;;  %19361 = vmatpush3.bf16.msra.mxu1 %v21463_v22  ;;  %v21513_v22 = vld [vmem:[%s28130_s1 + $0x3e8] sm:$0xff]  }
  0x46   :  { %19362 = vmatprep.subr.bf16.mxu1 %v21465_v25  ;;  %13925 = vmatprep.mubr.bf16.mxu0 %v3235_v56  ;;  %v21514_v23 = vld [vmem:[%s28130_s1 + $0x328] sm:$0xff]   ;;  %v21516_v25 = vld [vmem:[%s28130_s1 + $0x370] sm:$0xff]  }
  0x47   :  { %13965 = vmatprep.mubr.bf16.mxu1 %v3245_v60  ;;  %v21515_v24 = vld [vmem:[%s28130_s1 + $0x3a8] sm:$0xff]   ;;  %v21549_v60 = vld [vmem:[%s28130_s1 + $0x470] sm:$0xff]  }
  0x48   :  { %19341 = vmatpush3.bf16.msra.mxu0 %v21466_v26  ;;  %v21517_v26 = vld [vmem:[%s28130_s1 + $0x3f0] sm:$0xff]   ;;  %v21545_v56 = vld [vmem:[%s28130_s1 + $0x468] sm:$0xff]  }
  0x49   :  { %19342 = vmatprep.subr.bf16.mxu0 %v21468_v28  ;;  %19363 = vmatpush3.bf16.msra.mxu1 %v21467_v27  ;;  %v21518_v27 = vld [vmem:[%s28130_s1 + $0x330] sm:$0xff]  }
  0x4a   :  { %19364 = vmatprep.subr.bf16.mxu1 %v21469_v29  ;;  %v21519_v28 = vld [vmem:[%s28130_s1 + $0x3b0] sm:$0xff]   ;;  %v21520_v29 = vld [vmem:[%s28130_s1 + $0x378] sm:$0xff]  }
  0x4c   :  { %19343 = vmatpush3.bf16.msra.mxu0 %v21470_v30  ;;  %v21521_v30 = vld [vmem:[%s28130_s1 + $0x3f8] sm:$0xff]  }
  0x4d   :  { %19344 = vmatprep.subr.bf16.mxu0 %v21472_v32  ;;  %19365 = vmatpush3.bf16.msra.mxu1 %v21471_v31  ;;  %v21522_v31 = vld [vmem:[%s28130_s1 + $0x338] sm:$0xff]  }
  0x4e   :  { %19366 = vmatprep.subr.bf16.mxu1 %v21473_v33  ;;  %v21523_v32 = vld [vmem:[%s28130_s1 + $0x3b8] sm:$0xff]   ;;  %v3228_v33 = vrot.slane %v23318_v53, %v23126_v41  ;;  %v21542_v53 = vld [vmem:[%s28130_s1 + $0x4e0] sm:$0xff]  }
  0x50   :  { %19345 = vmatpush3.bf16.msra.mxu0 %v21474_v34  ;;  %v21525_v34 = vld [vmem:[%s28130_s1 + $0x440] sm:$0xff]  }
  0x51   :  { %19346 = vmatprep.subr.bf16.mxu0 %v21476_v36  ;;  %19367 = vmatpush3.bf16.msra.mxu1 %v21475_v35  ;;  %v21526_v35 = vld [vmem:[%s28130_s1 + $0x4c0] sm:$0xff]  }
  0x52   :  { %19368 = vmatprep.subr.bf16.mxu1 %v21477_v37  ;;  %v21527_v36 = vld [vmem:[%s28130_s1 + $0x400] sm:$0xff]  }
  0x53   :  { %v21528_v37 = vld [vmem:[%s28130_s1 + $0x480] sm:$0xff]  }
  0x54   :  { %19347 = vmatpush3.bf16.msra.mxu0 %v21478_v38  ;;  %v3244_v38 = vcombine.high %v3228_v33, %v3228_v33 }
  0x55   :  { %19348 = vmatprep.subr.bf16.mxu0 %v21480_v40  ;;  %19369 = vmatpush3.bf16.msra.mxu1 %v21479_v39  ;;  %v21529_v39 = vld [vmem:[%s28130_s1 + $0x448] sm:$0xff]  }
  0x56   :  { %19370 = vmatprep.subr.bf16.mxu1 %v21481_v42  ;;  %v21530_v40 = vld [vmem:[%s28130_s1 + $0x4c8] sm:$0xff]  }
  0x57   :  { %v21531_v42 = vld [vmem:[%s28130_s1 + $0x408] sm:$0xff]  }
  0x58   :  { %19349 = vmatpush3.bf16.msra.mxu0 %v21482_v43  ;;  %v21532_v43 = vld [vmem:[%s28130_s1 + $0x488] sm:$0xff]  }
  0x59   :  { %19350 = vmatprep.subr.bf16.mxu0 %v21484_v45  ;;  %19371 = vmatpush3.bf16.msra.mxu1 %v21483_v44  ;;  %v21533_v44 = vld [vmem:[%s28130_s1 + $0x450] sm:$0xff]  }
  0x5a   :  { %19372 = vmatprep.subr.bf16.mxu1 %v21485_v47  ;;  %v21534_v45 = vld [vmem:[%s28130_s1 + $0x4d0] sm:$0xff]  }
  0x5b   :  { %v21536_v47 = vld [vmem:[%s28130_s1 + $0x490] sm:$0xff]  }
  0x5c   :  { %19351 = vmatpush3.bf16.msra.mxu0 %v21486_v50  ;;  %v21539_v50 = vld [vmem:[%s28130_s1 + $0x418] sm:$0xff]  }
  0x5d   :  { %19352 = vmatprep.subr.bf16.mxu0 %v21488_v54  ;;  %19373 = vmatpush3.bf16.msra.mxu1 %v21487_v51  ;;  %v21540_v51 = vld [vmem:[%s28130_s1 + $0x498] sm:$0xff]   ;;  %v21543_v54 = vld [vmem:[%s28130_s1 + $0x420] sm:$0xff]  }
  0x5e   :  { %19374 = vmatprep.subr.bf16.mxu1 %v21489_v55  ;;  %v21544_v55 = vld [vmem:[%s28130_s1 + $0x4a0] sm:$0xff]  }
  0x60   :  { %19353 = vmatpush3.bf16.msra.mxu0 %v21490_v58  ;;  %v21547_v58 = vld [vmem:[%s28130_s1 + $0x428] sm:$0xff]  }
  0x61   :  { %19382 = vmatprep.subr.bf16.mxu0 %v21492_v62  ;;  %19375 = vmatpush3.bf16.msra.mxu1 %v21491_v59  ;;  %v21548_v59 = vld [vmem:[%s28130_s1 + $0x4a8] sm:$0xff]   ;;  %v21550_v62 = vld [vmem:[%s28130_s1 + $0x4f0] sm:$0xff]  }
  0x62   :  { %19404 = vmatprep.subr.bf16.mxu1 %v21493_v63 }
  0x63   :  { %13926 = vmatmul.mubr.bf16.vlgmr.msra.gmra.mrb[8].mxu0 %v3221_v61  ;;  %v24_v61 = vld [vmem:[%s28129_s0 + $0x10] sm:$0xff] }
  0x64   :  { %19383 = vmatpush3.bf16.msra.mxu0 %v21494_v1  ;;  %14005 = vmatprep.mubr.bf16.mxu0 %v3242_v0  ;;  %v3254_v63 = vrot.slane %v24_v61, %v23126_v41  ;;  %v3247_v0 = vcombine.high %v24_v61, %v24_v61  ;;  %v21551_v1 = vld [vmem:[%s28130_s1 + $0x430] sm:$0xff]  }
  0x65   :  { %13966 = vmatmul.mubr.bf16.vlgmr.msra.gmra.mrb[8].mxu1 %v3243_v3  ;;  %19384 = vmatprep.subr.bf16.mxu0 %v21496_v4  ;;  %v21600_v61 = vld [vmem:[%s28130_s1 + $0x610] sm:$0xff]  }
  0x66   :  { %19405 = vmatpush3.bf16.msra.mxu1 %v21495_v2  ;;  %14045 = vmatprep.mubr.bf16.mxu1 %v3246_v6  ;;  %v21552_v2 = vld [vmem:[%s28130_s1 + $0x4b0] sm:$0xff]   ;;  %v3262_v3 = vcombine.high %v3254_v63, %v3254_v63  ;;  %v23524_v4 = vrot.slane %v3247_v0, %v23126_v41  ;;  %v21554_v6 = vld [vmem:[%s28130_s1 + $0x4f8] sm:$0xff]  }
  0x67   :  { %19406 = vmatprep.subr.bf16.mxu1 %v21497_v5  ;;  %v21553_v5 = vld [vmem:[%s28130_s1 + $0x478] sm:$0xff]  }
  0x68   :  { %19385 = vmatpush3.bf16.msra.mxu0 %v21498_v7  ;;  %v3284_v7 = vrot.slane %v3262_v3, %v23126_v41  ;;  %v21603_v0 = vld [vmem:[%s28130_s1 + $0x6d8] sm:$0xff]   ;;  %v21606_v3 = vld [vmem:[%s28130_s1 + $0x660] sm:$0xff]  }
  0x69   :  { %19386 = vmatprep.subr.bf16.mxu0 %v21500_v9  ;;  %v21555_v9 = vld [vmem:[%s28130_s1 + $0x438] sm:$0xff]  }
  0x6a   :  { %19407 = vmatpush3.bf16.msra.mxu1 %v21499_v8  ;;  %v3263_v8 = vcombine.high %v23524_v4, %v23524_v4 }
  0x6b   :  { %19408 = vmatprep.subr.bf16.mxu1 %v21501_v10  ;;  %v21556_v10 = vld [vmem:[%s28130_s1 + $0x4b8] sm:$0xff]  }
  0x6c   :  { %19387 = vmatpush3.bf16.msra.mxu0 %v21502_v11  ;;  %v3294_v11 = vcombine.high %v3284_v7, %v3284_v7 }
  0x6d   :  { %19388 = vmatprep.subr.bf16.mxu0 %v21504_v13  ;;  %v21557_v13 = vld [vmem:[%s28130_s1 + $0x540] sm:$0xff]  }
  0x6e   :  { %19409 = vmatpush3.bf16.msra.mxu1 %v21503_v12  ;;  %v3270_v12 = vrot.slane %v3254_v63, %v23126_v41  ;;  %v21602_v63 = vld [vmem:[%s28130_s1 + $0x658] sm:$0xff]  }
  0x6f   :  { %19410 = vmatprep.subr.bf16.mxu1 %v21505_v14  ;;  %v21558_v14 = vld [vmem:[%s28130_s1 + $0x5c0] sm:$0xff]  }
  0x70   :  { %19389 = vmatpush3.bf16.msra.mxu0 %v21506_v15  ;;  %v3291_v15 = vrot.slane %v3263_v8, %v23126_v41  ;;  %v21611_v8 = vld [vmem:[%s28130_s1 + $0x6e8] sm:$0xff]  }
  0x71   :  { %19390 = vmatprep.subr.bf16.mxu0 %v21508_v17  ;;  %v21560_v17 = vld [vmem:[%s28130_s1 + $0x580] sm:$0xff]  }
  0x72   :  { %19411 = vmatpush3.bf16.msra.mxu1 %v21507_v16  ;;  %v21559_v16 = vld [vmem:[%s28130_s1 + $0x500] sm:$0xff]  }
  0x73   :  { %19412 = vmatprep.subr.bf16.mxu1 %v21509_v18  ;;  %v3292_v18 = vcombine.high %v3270_v12, %v3270_v12 }
  0x74   :  { %19391 = vmatpush3.bf16.msra.mxu0 %v21510_v19  ;;  %v21561_v19 = vld [vmem:[%s28130_s1 + $0x548] sm:$0xff]  }
  0x75   :  { %19392 = vmatprep.subr.bf16.mxu0 %v21512_v21  ;;  %v3295_v21 = vcombine.high %v3291_v15, %v3291_v15 }
  0x76   :  { %19413 = vmatpush3.bf16.msra.mxu1 %v21511_v20  ;;  %v21562_v20 = vld [vmem:[%s28130_s1 + $0x5c8] sm:$0xff]  }
  0x77   :  { %19414 = vmatprep.subr.bf16.mxu1 %v21513_v22  ;;  %v21563_v22 = vld [vmem:[%s28130_s1 + $0x508] sm:$0xff]  }
  0x78   :  { %19393 = vmatpush3.bf16.msra.mxu0 %v21514_v23  ;;  %v21564_v23 = vld [vmem:[%s28130_s1 + $0x588] sm:$0xff]  }
  0x79   :  { %19394 = vmatprep.subr.bf16.mxu0 %v21516_v25  ;;  %v21566_v25 = vld [vmem:[%s28130_s1 + $0x5d0] sm:$0xff]  }
  0x7a   :  { %19415 = vmatpush3.bf16.msra.mxu1 %v21515_v24  ;;  %v21565_v24 = vld [vmem:[%s28130_s1 + $0x550] sm:$0xff]  }
  0x7b   :  { %19416 = vmatprep.subr.bf16.mxu1 %v21517_v26  ;;  %v21567_v26 = vld [vmem:[%s28130_s1 + $0x510] sm:$0xff]  }
  0x7c   :  { %19395 = vmatpush3.bf16.msra.mxu0 %v21518_v27  ;;  %v21568_v27 = vld [vmem:[%s28130_s1 + $0x590] sm:$0xff]  }
  0x7d   :  { %19396 = vmatprep.subr.bf16.mxu0 %v21520_v29  ;;  %v21570_v29 = vld [vmem:[%s28130_s1 + $0x5d8] sm:$0xff]  }
  0x7e   :  { %19417 = vmatpush3.bf16.msra.mxu1 %v21519_v28  ;;  %v21569_v28 = vld [vmem:[%s28130_s1 + $0x558] sm:$0xff]  }
  0x7f   :  { %19418 = vmatprep.subr.bf16.mxu1 %v21521_v30  ;;  %v21571_v30 = vld [vmem:[%s28130_s1 + $0x518] sm:$0xff]  }
  0x80   :  { %19397 = vmatpush3.bf16.msra.mxu0 %v21522_v31  ;;  %v21572_v31 = vld [vmem:[%s28130_s1 + $0x598] sm:$0xff]  }
  0x81   :  { %19426 = vmatprep.subr.bf16.mxu0 %v21525_v34  ;;  %v21575_v34 = vld [vmem:[%s28130_s1 + $0x520] sm:$0xff]  }
  0x82   :  { %19419 = vmatpush3.bf16.msra.mxu1 %v21523_v32  ;;  %v21573_v32 = vld [vmem:[%s28130_s1 + $0x560] sm:$0xff]  }
  0x83   :  { %14006 = vmatmul.mubr.bf16.vlgmr.msra.gmra.mrb[12].mxu0 %v3228_v33  ;;  %19448 = vmatprep.subr.bf16.mxu1 %v21526_v35  ;;  %v21574_v33 = vld [vmem:[%s28130_s1 + $0x5e0] sm:$0xff]  }
  0x84   :  { %19427 = vmatpush3.bf16.msra.mxu0 %v21527_v36  ;;  %14085 = vmatprep.mubr.bf16.mxu0 %v3284_v7  ;;  %v21576_v35 = vld [vmem:[%s28130_s1 + $0x5a0] sm:$0xff]   ;;  %v21577_v36 = vld [vmem:[%s28130_s1 + $0x568] sm:$0xff]  }
  0x85   :  { %14046 = vmatmul.mubr.bf16.vlgmr.msra.gmra.mrb[12].mxu1 %v3244_v38  ;;  %19428 = vmatprep.subr.bf16.mxu0 %v21529_v39  ;;  %v21579_v38 = vld [vmem:[%s28130_s1 + $0x528] sm:$0xff]  }
  0x86   :  { %19449 = vmatpush3.bf16.msra.mxu1 %v21528_v37  ;;  %14125 = vmatprep.mubr.bf16.mxu1 %v3294_v11  ;;  %v21578_v37 = vld [vmem:[%s28130_s1 + $0x5e8] sm:$0xff]   ;;  %v21614_v11 = vld [vmem:[%s28130_s1 + $0x670] sm:$0xff]  }
  0x87   :  { %19450 = vmatprep.subr.bf16.mxu1 %v21530_v40  ;;  %v21580_v39 = vld [vmem:[%s28130_s1 + $0x5a8] sm:$0xff]   ;;  %v21581_v40 = vld [vmem:[%s28130_s1 + $0x570] sm:$0xff]  }
  0x88   :  { %19429 = vmatpush3.bf16.msra.mxu0 %v21531_v42  ;;  %v21582_v42 = vld [vmem:[%s28130_s1 + $0x5f0] sm:$0xff]   ;;  %v21610_v7 = vld [vmem:[%s28130_s1 + $0x668] sm:$0xff]  }
  0x89   :  { %19430 = vmatprep.subr.bf16.mxu0 %v21533_v44  ;;  %v21584_v44 = vld [vmem:[%s28130_s1 + $0x5b0] sm:$0xff]  }
  0x8a   :  { %19451 = vmatpush3.bf16.msra.mxu1 %v21532_v43  ;;  %v21583_v43 = vld [vmem:[%s28130_s1 + $0x530] sm:$0xff]  }
  0x8b   :  { %19452 = vmatprep.subr.bf16.mxu1 %v21534_v45  ;;  %v21585_v45 = vld [vmem:[%s28130_s1 + $0x578] sm:$0xff]  }
  0x8c   :  { %19431 = vmatpush3.bf16.msra.mxu0 %v21535_v46  ;;  %v21586_v46 = vld [vmem:[%s28130_s1 + $0x5f8] sm:$0xff]  }
  0x8d   :  { %19432 = vmatprep.subr.bf16.mxu0 %v21537_v48  ;;  %v21588_v48 = vld [vmem:[%s28130_s1 + $0x5b8] sm:$0xff]  }
  0x8e   :  { %19453 = vmatpush3.bf16.msra.mxu1 %v21536_v47  ;;  %v21587_v47 = vld [vmem:[%s28130_s1 + $0x538] sm:$0xff]  }
  0x8f   :  { %19454 = vmatprep.subr.bf16.mxu1 %v21538_v49  ;;  %v3277_v49 = vrot.slane %v23524_v4, %v23126_v41  ;;  %v21607_v4 = vld [vmem:[%s28130_s1 + $0x6e0] sm:$0xff]  }
  0x90   :  { %19433 = vmatpush3.bf16.msra.mxu0 %v21539_v50  ;;  %v21590_v50 = vld [vmem:[%s28130_s1 + $0x640] sm:$0xff]  }
  0x91   :  { %19434 = vmatprep.subr.bf16.mxu0 %v21541_v52  ;;  %v21592_v52 = vld [vmem:[%s28130_s1 + $0x600] sm:$0xff]  }
  0x92   :  { %19455 = vmatpush3.bf16.msra.mxu1 %v21540_v51  ;;  %v21591_v51 = vld [vmem:[%s28130_s1 + $0x6c0] sm:$0xff]  }
  0x93   :  { %19456 = vmatprep.subr.bf16.mxu1 %v21542_v53  ;;  %v21593_v53 = vld [vmem:[%s28130_s1 + $0x680] sm:$0xff]  }
  0x94   :  { %19435 = vmatpush3.bf16.msra.mxu0 %v21543_v54  ;;  %v3293_v54 = vcombine.high %v3277_v49, %v3277_v49 }
  0x95   :  { %19436 = vmatprep.subr.bf16.mxu0 %v21545_v56  ;;  %v21595_v56 = vld [vmem:[%s28130_s1 + $0x6c8] sm:$0xff]  }
  0x96   :  { %19457 = vmatpush3.bf16.msra.mxu1 %v21544_v55  ;;  %v21594_v55 = vld [vmem:[%s28130_s1 + $0x648] sm:$0xff]  }
  0x97   :  { %19458 = vmatprep.subr.bf16.mxu1 %v21546_v57  ;;  %v21596_v57 = vld [vmem:[%s28130_s1 + $0x608] sm:$0xff]  }
  0x98   :  { %19437 = vmatpush3.bf16.msra.mxu0 %v21547_v58  ;;  %v21597_v58 = vld [vmem:[%s28130_s1 + $0x688] sm:$0xff]  }
  0x99   :  { %19438 = vmatprep.subr.bf16.mxu0 %v21549_v60  ;;  %v21599_v60 = vld [vmem:[%s28130_s1 + $0x6d0] sm:$0xff]  }
  0x9a   :  { %19459 = vmatpush3.bf16.msra.mxu1 %v21548_v59  ;;  %v21598_v59 = vld [vmem:[%s28130_s1 + $0x650] sm:$0xff]  }
  0x9b   :  { %19460 = vmatprep.subr.bf16.mxu1 %v21550_v62  ;;  %v21601_v62 = vld [vmem:[%s28130_s1 + $0x690] sm:$0xff]  }
  0x9c   :  { %19439 = vmatpush3.bf16.msra.mxu0 %v21551_v1  ;;  %v21604_v1 = vld [vmem:[%s28130_s1 + $0x618] sm:$0xff]  }
  0x9d   :  { %19440 = vmatprep.subr.bf16.mxu0 %v21553_v5  ;;  %v21608_v5 = vld [vmem:[%s28130_s1 + $0x620] sm:$0xff]  }
  0x9e   :  { %19461 = vmatpush3.bf16.msra.mxu1 %v21552_v2  ;;  %v21605_v2 = vld [vmem:[%s28130_s1 + $0x698] sm:$0xff]  }
  0x9f   :  { %19462 = vmatprep.subr.bf16.mxu1 %v21554_v6  ;;  %v21609_v6 = vld [vmem:[%s28130_s1 + $0x6a0] sm:$0xff]  }
  0xa0   :  { %19441 = vmatpush3.bf16.msra.mxu0 %v21555_v9  ;;  %v21612_v9 = vld [vmem:[%s28130_s1 + $0x628] sm:$0xff]  }
  0xa1   :  { %19470 = vmatprep.subr.bf16.mxu0 %v21557_v13  ;;  %v21615_v13 = vld [vmem:[%s28130_s1 + $0x6f0] sm:$0xff]  }
  0xa2   :  { %19463 = vmatpush3.bf16.msra.mxu1 %v21556_v10  ;;  %v21613_v10 = vld [vmem:[%s28130_s1 + $0x6a8] sm:$0xff]  }
  0xa3   :  { %14086 = vmatmul.mubr.bf16.vlgmr.msra.gmra.mrb[16].mxu0 %v3270_v12  ;;  %19492 = vmatprep.subr.bf16.mxu1 %v21558_v14  ;;  %v25_v12 = vld [vmem:[%s28129_s0 + $0x18] sm:$0xff] }
  0xa4   :  { %19471 = vmatpush3.bf16.msra.mxu0 %v21559_v16  ;;  %14165 = vmatprep.mubr.bf16.mxu0 %v3291_v15  ;;  %v3303_v14 = vrot.slane %v25_v12, %v23126_v41  ;;  %v3296_v15 = vcombine.high %v25_v12, %v25_v12  ;;  %v21616_v16 = vld [vmem:[%s28130_s1 + $0x630] sm:$0xff]   ;;  %v21653_v12 = vld [vmem:[%s28130_s1 + $0x7b8] sm:$0xff]  }
  0xa5   :  { %14126 = vmatmul.mubr.bf16.vlgmr.msra.gmra.mrb[16].mxu1 %v3292_v18  ;;  %19472 = vmatprep.subr.bf16.mxu0 %v21561_v19 }
  0xa6   :  { %19493 = vmatpush3.bf16.msra.mxu1 %v21560_v17  ;;  %14205 = vmatprep.mubr.bf16.mxu1 %v3295_v21  ;;  %v21618_v17 = vld [vmem:[%s28130_s1 + $0x678] sm:$0xff]   ;;  %v3311_v18 = vcombine.high %v3303_v14, %v3303_v14  ;;  %v23730_v19 = vrot.slane %v3296_v15, %v23126_v41  ;;  %v21656_v15 = vld [vmem:[%s28130_s1 + $0x8c0] sm:$0xff]  }
  0xa7   :  { %19494 = vmatprep.subr.bf16.mxu1 %v21562_v20  ;;  %v21617_v20 = vld [vmem:[%s28130_s1 + $0x6b0] sm:$0xff]   ;;  %v21619_v21 = vld [vmem:[%s28130_s1 + $0x6f8] sm:$0xff]  }
  0xa8   :  { %19473 = vmatpush3.bf16.msra.mxu0 %v21563_v22  ;;  %v3333_v22 = vrot.slane %v3311_v18, %v23126_v41 }
  0xa9   :  { %19474 = vmatprep.subr.bf16.mxu0 %v21565_v24  ;;  %v21620_v24 = vld [vmem:[%s28130_s1 + $0x638] sm:$0xff]  }
  0xaa   :  { %19495 = vmatpush3.bf16.msra.mxu1 %v21564_v23  ;;  %v3312_v23 = vcombine.high %v23730_v19, %v23730_v19 }
  0xab   :  { %19496 = vmatprep.subr.bf16.mxu1 %v21566_v25  ;;  %v3343_v25 = vcombine.high %v3333_v22, %v3333_v22 }
  0xac   :  { %19475 = vmatpush3.bf16.msra.mxu0 %v21567_v26  ;;  %v3319_v26 = vrot.slane %v3303_v14, %v23126_v41  ;;  %v21655_v14 = vld [vmem:[%s28130_s1 + $0x840] sm:$0xff]  }
  0xad   :  { %19476 = vmatprep.subr.bf16.mxu0 %v21569_v28  ;;  %v21621_v28 = vld [vmem:[%s28130_s1 + $0x6b8] sm:$0xff]  }
  0xae   :  { %19497 = vmatpush3.bf16.msra.mxu1 %v21568_v27  ;;  %v21622_v27 = vld [vmem:[%s28130_s1 + $0x740] sm:$0xff]  }
  0xaf   :  { %19498 = vmatprep.subr.bf16.mxu1 %v21570_v29  ;;  %v3340_v29 = vrot.slane %v3312_v23, %v23126_v41  ;;  %v21663_v23 = vld [vmem:[%s28130_s1 + $0x850] sm:$0xff]  }
  0xb0   :  { %19477 = vmatpush3.bf16.msra.mxu0 %v21571_v30  ;;  %v21623_v30 = vld [vmem:[%s28130_s1 + $0x7c0] sm:$0xff]  }
  0xb1   :  { %19478 = vmatprep.subr.bf16.mxu0 %v21573_v32  ;;  %v3341_v32 = vcombine.high %v3319_v26, %v3319_v26 }
  0xb2   :  { %19499 = vmatpush3.bf16.msra.mxu1 %v21572_v31  ;;  %v21624_v31 = vld [vmem:[%s28130_s1 + $0x700] sm:$0xff]  }
  0xb3   :  { %19500 = vmatprep.subr.bf16.mxu1 %v21574_v33  ;;  %v21626_v33 = vld [vmem:[%s28130_s1 + $0x748] sm:$0xff]  }
  0xb4   :  { %19479 = vmatpush3.bf16.msra.mxu0 %v21575_v34  ;;  %v21625_v34 = vld [vmem:[%s28130_s1 + $0x780] sm:$0xff]  }
  0xb5   :  { %19480 = vmatprep.subr.bf16.mxu0 %v21577_v36  ;;  %v21627_v36 = vld [vmem:[%s28130_s1 + $0x7c8] sm:$0xff]  }
  0xb6   :  { %19501 = vmatpush3.bf16.msra.mxu1 %v21576_v35  ;;  %v3344_v35 = vcombine.high %v3340_v29, %v3340_v29 }
  0xb7   :  { %19502 = vmatprep.subr.bf16.mxu1 %v21578_v37  ;;  %v21628_v37 = vld [vmem:[%s28130_s1 + $0x708] sm:$0xff]  }
  0xb8   :  { %19481 = vmatpush3.bf16.msra.mxu0 %v21579_v38  ;;  %v21630_v38 = vld [vmem:[%s28130_s1 + $0x750] sm:$0xff]  }
  0xb9   :  { %19482 = vmatprep.subr.bf16.mxu0 %v21581_v40  ;;  %v21631_v40 = vld [vmem:[%s28130_s1 + $0x7d0] sm:$0xff]  }
  0xba   :  { %19503 = vmatpush3.bf16.msra.mxu1 %v21580_v39  ;;  %v21629_v39 = vld [vmem:[%s28130_s1 + $0x788] sm:$0xff]  }
  0xbb   :  { %19504 = vmatprep.subr.bf16.mxu1 %v21582_v42  ;;  %v21632_v42 = vld [vmem:[%s28130_s1 + $0x710] sm:$0xff]  }
  0xbc   :  { %19483 = vmatpush3.bf16.msra.mxu0 %v21583_v43  ;;  %v21634_v43 = vld [vmem:[%s28130_s1 + $0x758] sm:$0xff]  }
  0xbd   :  { %19484 = vmatprep.subr.bf16.mxu0 %v21585_v45  ;;  %v21635_v45 = vld [vmem:[%s28130_s1 + $0x7d8] sm:$0xff]  }
  0xbe   :  { %19505 = vmatpush3.bf16.msra.mxu1 %v21584_v44  ;;  %v21633_v44 = vld [vmem:[%s28130_s1 + $0x790] sm:$0xff]  }
  0xbf   :  { %19506 = vmatprep.subr.bf16.mxu1 %v21586_v46  ;;  %v21636_v46 = vld [vmem:[%s28130_s1 + $0x718] sm:$0xff]  }
  0xc0   :  { %19485 = vmatpush3.bf16.msra.mxu0 %v21587_v47  ;;  %v21637_v47 = vld [vmem:[%s28130_s1 + $0x798] sm:$0xff]  }
  0xc1   :  { %19514 = vmatprep.subr.bf16.mxu0 %v21590_v50  ;;  %v21640_v50 = vld [vmem:[%s28130_s1 + $0x720] sm:$0xff]  }
  0xc2   :  { %19507 = vmatpush3.bf16.msra.mxu1 %v21588_v48  ;;  %v21638_v48 = vld [vmem:[%s28130_s1 + $0x760] sm:$0xff]  }
  0xc3   :  { %14166 = vmatmul.mubr.bf16.vlgmr.msra.gmra.mrb[20].mxu0 %v3277_v49  ;;  %19536 = vmatprep.subr.bf16.mxu1 %v21591_v51  ;;  %v21639_v49 = vld [vmem:[%s28130_s1 + $0x7e0] sm:$0xff]  }
  0xc4   :  { %19515 = vmatpush3.bf16.msra.mxu0 %v21592_v52  ;;  %14245 = vmatprep.mubr.bf16.mxu0 %v3333_v22  ;;  %v21641_v51 = vld [vmem:[%s28130_s1 + $0x7a0] sm:$0xff]   ;;  %v21642_v52 = vld [vmem:[%s28130_s1 + $0x768] sm:$0xff]  }
  0xc5   :  { %14206 = vmatmul.mubr.bf16.vlgmr.msra.gmra.mrb[20].mxu1 %v3293_v54  ;;  %19516 = vmatprep.subr.bf16.mxu0 %v21594_v55  ;;  %v21644_v54 = vld [vmem:[%s28130_s1 + $0x728] sm:$0xff]  }
  0xc6   :  { %19537 = vmatpush3.bf16.msra.mxu1 %v21593_v53  ;;  %14285 = vmatprep.mubr.bf16.mxu1 %v3343_v25  ;;  %v21643_v53 = vld [vmem:[%s28130_s1 + $0x7e8] sm:$0xff]   ;;  %v21665_v25 = vld [vmem:[%s28130_s1 + $0x810] sm:$0xff]  }
  0xc7   :  { %19538 = vmatprep.subr.bf16.mxu1 %v21595_v56  ;;  %v21645_v55 = vld [vmem:[%s28130_s1 + $0x7a8] sm:$0xff]   ;;  %v17704_v56 = vld [vmem:[%s28131_s2] ss:$0 sm:$0xff] }
  0xc8   :  { %19517 = vmatpush3.bf16.msra.mxu0 %v21596_v57  ;;  %v21646_v57 = vld [vmem:[%s28130_s1 + $0x770] sm:$0xff]   ;;  %v21662_v22 = vld [vmem:[%s28130_s1 + $0x888] sm:$0xff]  }
  0xc9   :  { %19518 = vmatprep.subr.bf16.mxu0 %v21598_v59  ;;  %v21647_v59 = vld [vmem:[%s28130_s1 + $0x7f0] sm:$0xff]  }
  0xca   :  { %19539 = vmatpush3.bf16.msra.mxu1 %v21597_v58 }
  0xcb   :  { %19540 = vmatprep.subr.bf16.mxu1 %v21599_v60 }
  0xcc   :  { %19519 = vmatpush3.bf16.msra.mxu0 %v21600_v61  ;;  %v21648_v61 = vld [vmem:[%s28130_s1 + $0x730] sm:$0xff]  }
  0xcd   :  { %19520 = vmatprep.subr.bf16.mxu0 %v21602_v63 }
  0xce   :  { %19541 = vmatpush3.bf16.msra.mxu1 %v21601_v62 }
  0xcf   :  { %19542 = vmatprep.subr.bf16.mxu1 %v21603_v0 }
  0xd0   :  { %19521 = vmatpush3.bf16.msra.mxu0 %v21604_v1  ;;  %v21649_v1 = vld [vmem:[%s28130_s1 + $0x7b0] sm:$0xff]  }
  0xd1   :  { %19522 = vmatprep.subr.bf16.mxu0 %v21606_v3 }
  0xd2   :  { %19543 = vmatpush3.bf16.msra.mxu1 %v21605_v2  ;;  %v21650_v2 = vld [vmem:[%s28130_s1 + $0x778] sm:$0xff]  }
  0xd3   :  { %19544 = vmatprep.subr.bf16.mxu1 %v21607_v4 }
  0xd4   :  { %19523 = vmatpush3.bf16.msra.mxu0 %v21608_v5 }
  0xd5   :  { %19524 = vmatprep.subr.bf16.mxu0 %v21610_v7 }
  0xd6   :  { %19545 = vmatpush3.bf16.msra.mxu1 %v21609_v6 }
  0xd7   :  { %19546 = vmatprep.subr.bf16.mxu1 %v21611_v8  ;;  %v21651_v8 = vld [vmem:[%s28130_s1 + $0x7f8] sm:$0xff]  }
  0xd8   :  { %19525 = vmatpush3.bf16.msra.mxu0 %v21612_v9 }
  0xd9   :  { %19526 = vmatprep.subr.bf16.mxu0 %v21614_v11 }
  0xda   :  { %19547 = vmatpush3.bf16.msra.mxu1 %v21613_v10  ;;  %v21652_v10 = vld [vmem:[%s28130_s1 + $0x738] sm:$0xff]  }
  0xdb   :  { %19548 = vmatprep.subr.bf16.mxu1 %v21615_v13  ;;  %v3326_v13 = vrot.slane %v23730_v19, %v23126_v41  ;;  %v21659_v19 = vld [vmem:[%s28130_s1 + $0x848] sm:$0xff]  }
  0xdc   :  { %19527 = vmatpush3.bf16.msra.mxu0 %v21616_v16  ;;  %v21657_v16 = vld [vmem:[%s28130_s1 + $0x800] sm:$0xff]  }
  0xdd   :  { %19528 = vmatprep.subr.bf16.mxu0 %v21618_v17  ;;  %v21658_v17 = vld [vmem:[%s28130_s1 + $0x880] sm:$0xff]   ;;  %v3342_v18 = vcombine.high %v3326_v13, %v3326_v13 }
  0xde   :  { %19549 = vmatpush3.bf16.msra.mxu1 %v21617_v20  ;;  %v21660_v20 = vld [vmem:[%s28130_s1 + $0x8c8] sm:$0xff]  }
  0xdf   :  { %19550 = vmatprep.subr.bf16.mxu1 %v21619_v21  ;;  %v21661_v21 = vld [vmem:[%s28130_s1 + $0x808] sm:$0xff]  }
  0xe0   :  { %19529 = vmatpush3.bf16.msra.mxu0 %v21620_v24  ;;  %v21664_v24 = vld [vmem:[%s28130_s1 + $0x8d0] sm:$0xff]  }
  0xe1   :  { %19558 = vmatprep.subr.bf16.mxu0 %v21622_v27  ;;  %v21667_v27 = vld [vmem:[%s28130_s1 + $0x858] sm:$0xff]  }
  0xe2   :  { %19551 = vmatpush3.bf16.msra.mxu1 %v21621_v28  ;;  %v21668_v28 = vld [vmem:[%s28130_s1 + $0x8d8] sm:$0xff]  }
  0xe3   :  { %14246 = vmatmul.mubr.bf16.vlgmr.msra.gmra.mrb[24].mxu0 %v3319_v26  ;;  %19580 = vmatprep.subr.bf16.mxu1 %v21623_v30  ;;  %v21666_v26 = vld [vmem:[%s28130_s1 + $0x890] sm:$0xff]   ;;  %v21670_v30 = vld [vmem:[%s28130_s1 + $0x898] sm:$0xff]  }
  0xe4   :  { %19559 = vmatpush3.bf16.msra.mxu0 %v21624_v31  ;;  %14325 = vmatprep.mubr.bf16.mxu0 %v3340_v29  ;;  %v21669_v29 = vld [vmem:[%s28130_s1 + $0x818] sm:$0xff]   ;;  %v21671_v31 = vld [vmem:[%s28130_s1 + $0x860] sm:$0xff]  }
  0xe5   :  { %14286 = vmatmul.mubr.bf16.vlgmr.msra.gmra.mrb[24].mxu1 %v3341_v32  ;;  %19560 = vmatprep.subr.bf16.mxu0 %v21626_v33  ;;  %v21672_v32 = vld [vmem:[%s28130_s1 + $0x8e0] sm:$0xff]  }
  0xe6   :  { %19581 = vmatpush3.bf16.msra.mxu1 %v21625_v34  ;;  %14365 = vmatprep.mubr.bf16.mxu1 %v3344_v35  ;;  %v21673_v33 = vld [vmem:[%s28130_s1 + $0x820] sm:$0xff]   ;;  %v21675_v35 = vld [vmem:[%s28130_s1 + $0x868] sm:$0xff]  }
  0xe7   :  { %19582 = vmatprep.subr.bf16.mxu1 %v21627_v36  ;;  %v21674_v34 = vld [vmem:[%s28130_s1 + $0x8a0] sm:$0xff]   ;;  %v21676_v36 = vld [vmem:[%s28130_s1 + $0x8e8] sm:$0xff]  }
  0xe8   :  { %19561 = vmatpush3.bf16.msra.mxu0 %v21628_v37  ;;  %v21677_v37 = vld [vmem:[%s28130_s1 + $0x828] sm:$0xff]  }
  0xe9   :  { %19562 = vmatprep.subr.bf16.mxu0 %v21630_v38  ;;  %v21678_v38 = vld [vmem:[%s28130_s1 + $0x8a8] sm:$0xff]  }
  0xea   :  { %19583 = vmatpush3.bf16.msra.mxu1 %v21629_v39  ;;  %v21679_v39 = vld [vmem:[%s28130_s1 + $0x870] sm:$0xff]  }
  0xeb   :  { %19584 = vmatprep.subr.bf16.mxu1 %v21631_v40  ;;  %v21680_v40 = vld [vmem:[%s28130_s1 + $0x8f0] sm:$0xff]  }
  0xec   :  { %19563 = vmatpush3.bf16.msra.mxu0 %v21632_v42 }
  0xed   :  { %19564 = vmatprep.subr.bf16.mxu0 %v21634_v43  ;;  %v21681_v43 = vld [vmem:[%s28130_s1 + $0x830] sm:$0xff]  }
  0xee   :  { %19585 = vmatpush3.bf16.msra.mxu1 %v21633_v44 }
  0xef   :  { %19586 = vmatprep.subr.bf16.mxu1 %v21635_v45  ;;  %v26_v45 = vld [vmem:[%s28129_s0 + $0x20] sm:$0xff] }
  0xf0   :  { %19565 = vmatpush3.bf16.msra.mxu0 %v21636_v46 }
  0xf1   :  { %19566 = vmatprep.subr.bf16.mxu0 %v21638_v48 }
  0xf2   :  { %19587 = vmatpush3.bf16.msra.mxu1 %v21637_v47 }
  0xf3   :  { %19588 = vmatprep.subr.bf16.mxu1 %v21639_v49  ;;  %v21682_v49 = vld [vmem:[%s28130_s1 + $0x8b0] sm:$0xff]  }
  0xf4   :  { %19567 = vmatpush3.bf16.msra.mxu0 %v21640_v50  ;;  %v21683_v50 = vld [vmem:[%s28130_s1 + $0x878] sm:$0xff]  }
  0xf5   :  { %19568 = vmatprep.subr.bf16.mxu0 %v21642_v52  ;;  %v3345_v52 = vcombine.high %v26_v45, %v26_v45 }
  0xf6   :  { %19589 = vmatpush3.bf16.msra.mxu1 %v21641_v51  ;;  %v19266_v58 = vpop.f32.mrb[0].mxu0  ;;  %v3352_v51 = vrot.slane %v26_v45, %v23126_v41 }
  0xf7   :  { %v19267_v60 = vpop.f32.mrb[1].mxu0  ;;  %19590 = vmatprep.subr.bf16.mxu1 %v21643_v53  ;;  %v19288_v62 = vpop.f32.mrb[0].mxu1 }
  0xf8   :  { %v19268_v63 = vadd.f32 %v19267_v60, %v19266_v58  ;;  %v19269_v0 = vpop.f32.mrb[2].mxu0  ;;  %19569 = vmatpush3.bf16.msra.mxu0 %v21644_v54  ;;  %v19289_v3 = vpop.f32.mrb[1].mxu1  ;;  %v21684_v58 = vld [vmem:[%s28130_s1 + $0x8f8] sm:$0xff]  }
  0xf9   :  { %v19270_v4 = vpop.f32.mrb[3].mxu0  ;;  %19570 = vmatprep.subr.bf16.mxu0 %v21646_v57  ;;  %v19290_v6 = vadd.f32 %v19289_v3, %v19288_v62  ;;  %v19291_v7 = vpop.f32.mrb[2].mxu1  ;;  %v23951_v62 = vrot.slane %v3345_v52, %v23126_v41  ;;  %v21686_v0 = vld [vmem:[%s28130_s1 + $0x8b8] sm:$0xff]   ;;  %v21687_v3 = vld [vmem:[%s28130_s1 + $0x940] sm:$0xff]  }
  0xfa   :  { %v13768_v5 = vadd.f32 %v19268_v63, %v17704_v56  ;;  %19591 = vmatpush3.bf16.msra.mxu1 %v21645_v55  ;;  %v19292_v9 = vpop.f32.mrb[3].mxu1  ;;  %v21689_v7 = vld [vmem:[%s28130_s1 + $0x900] sm:$0xff]   ;;  %v21718_v52 = vld [vmem:[%s28130_s1 + $0x9b8] sm:$0xff]  }
  0xfb   :  { %19592 = vmatprep.subr.bf16.mxu1 %v21647_v59  ;;  %v3360_v59 = vcombine.high %v3352_v51, %v3352_v51  ;;  %v3361_v4 = vcombine.high %v23951_v62, %v23951_v62  ;;  %v21690_v9 = vld [vmem:[%s28130_s1 + $0x980] sm:$0xff]  }
  0xfc   :  { %v23845_v11 = vadd.f32 %v19290_v6, %v13768_v5  ;;  %19571 = vmatpush3.bf16.msra.mxu0 %v21648_v61  ;;  %v21685_v61 = vld [vmem:[%s28130_s1 + $0x838] sm:$0xff]   ;;  %v21688_v6 = vld [vmem:[%s28130_s1 + $0x9c0] sm:$0xff]  }
  0xfd   :  { %19572 = vmatprep.subr.bf16.mxu0 %v21650_v2  ;;  %v3368_v2 = vrot.slane %v3352_v51, %v23126_v41 }
  0xfe   :  { %19593 = vmatpush3.bf16.msra.mxu1 %v21649_v1  ;;  %v3382_v1 = vrot.slane %v3360_v59, %v23126_v41  ;;  %v21724_v59 = vld [vmem:[%s28130_s1 + $0xa48] sm:$0xff]  }
  0xff   :  { %19594 = vmatprep.subr.bf16.mxu1 %v21651_v8  ;;  %v3389_v8 = vrot.slane %v3361_v4, %v23126_v41  ;;  %v21733_v4 = vld [vmem:[%s28130_s1 + $0xad8] sm:$0xff]  }
 0x100   :  { %19573 = vmatpush3.bf16.msra.mxu0 %v21652_v10  ;;  %v3392_v5 = vcombine.high %v3382_v1, %v3382_v1  ;;  %v3390_v10 = vcombine.high %v3368_v2, %v3368_v2 }
 0x101   :  { %19602 = vmatprep.subr.bf16.mxu0 %v21655_v14  ;;  %v21693_v14 = vld [vmem:[%s28130_s1 + $0x908] sm:$0xff]  }
 0x102   :  { %19595 = vmatpush3.bf16.msra.mxu1 %v21653_v12  ;;  %v21692_v12 = vld [vmem:[%s28130_s1 + $0x9c8] sm:$0xff]  }
 0x103   :  { %14326 = vmatmul.mubr.bf16.vlgmr.msra.gmra.mrb[28].mxu0 %v3326_v13  ;;  %19624 = vmatprep.subr.bf16.mxu1 %v21656_v15  ;;  %v3393_v13 = vcombine.high %v3389_v8, %v3389_v8  ;;  %v21694_v15 = vld [vmem:[%s28130_s1 + $0x988] sm:$0xff]  }
 0x104   :  { %19603 = vmatpush3.bf16.msra.mxu0 %v21657_v16  ;;  %14405 = vmatprep.mubr.bf16.mxu0 %v3382_v1  ;;  %v21695_v16 = vld [vmem:[%s28130_s1 + $0x950] sm:$0xff]  }
 0x105   :  { %14366 = vmatmul.mubr.bf16.vlgmr.msra.gmra.mrb[28].mxu1 %v3342_v18  ;;  %19604 = vmatprep.subr.bf16.mxu0 %v21659_v19  ;;  %v21697_v18 = vld [vmem:[%s28130_s1 + $0x910] sm:$0xff]  }
 0x106   :  { %19625 = vmatpush3.bf16.msra.mxu1 %v21658_v17  ;;  %14445 = vmatprep.mubr.bf16.mxu1 %v3392_v5  ;;  %v21696_v17 = vld [vmem:[%s28130_s1 + $0x9d0] sm:$0xff]   ;;  %v21734_v5 = vld [vmem:[%s28130_s1 + $0xa18] sm:$0xff]  }
 0x107   :  { %19626 = vmatprep.subr.bf16.mxu1 %v21660_v20  ;;  %v21698_v19 = vld [vmem:[%s28130_s1 + $0x990] sm:$0xff]   ;;  %v21699_v20 = vld [vmem:[%s28130_s1 + $0x958] sm:$0xff]  }
 0x108   :  { %19605 = vmatpush3.bf16.msra.mxu0 %v21661_v21  ;;  %v21700_v21 = vld [vmem:[%s28130_s1 + $0x9d8] sm:$0xff]   ;;  %v21730_v1 = vld [vmem:[%s28130_s1 + $0xa10] sm:$0xff]  }
 0x109   :  { %19606 = vmatprep.subr.bf16.mxu0 %v21663_v23  ;;  %v21702_v23 = vld [vmem:[%s28130_s1 + $0x998] sm:$0xff]  }
 0x10a   :  { %19627 = vmatpush3.bf16.msra.mxu1 %v21662_v22  ;;  %v21701_v22 = vld [vmem:[%s28130_s1 + $0x918] sm:$0xff]  }
 0x10b   :  { %19628 = vmatprep.subr.bf16.mxu1 %v21664_v24  ;;  %v21703_v24 = vld [vmem:[%s28130_s1 + $0x960] sm:$0xff]  }
 0x10c   :  { %19607 = vmatpush3.bf16.msra.mxu0 %v21665_v25  ;;  %v21704_v25 = vld [vmem:[%s28130_s1 + $0x9e0] sm:$0xff]  }
 0x10d   :  { %19608 = vmatprep.subr.bf16.mxu0 %v21667_v27  ;;  %v21706_v27 = vld [vmem:[%s28130_s1 + $0x9a0] sm:$0xff]  }
 0x10e   :  { %19629 = vmatpush3.bf16.msra.mxu1 %v21666_v26  ;;  %v21705_v26 = vld [vmem:[%s28130_s1 + $0x920] sm:$0xff]  }
 0x10f   :  { %19630 = vmatprep.subr.bf16.mxu1 %v21668_v28  ;;  %v21707_v28 = vld [vmem:[%s28130_s1 + $0x968] sm:$0xff]  }
 0x110   :  { %19609 = vmatpush3.bf16.msra.mxu0 %v21669_v29  ;;  %v21708_v29 = vld [vmem:[%s28130_s1 + $0x9e8] sm:$0xff]  }
 0x111   :  { %19610 = vmatprep.subr.bf16.mxu0 %v21671_v31  ;;  %v21710_v31 = vld [vmem:[%s28130_s1 + $0x9a8] sm:$0xff]  }
 0x112   :  { %19631 = vmatpush3.bf16.msra.mxu1 %v21670_v30  ;;  %v21709_v30 = vld [vmem:[%s28130_s1 + $0x928] sm:$0xff]  }
 0x113   :  { %19632 = vmatprep.subr.bf16.mxu1 %v21672_v32  ;;  %v21711_v32 = vld [vmem:[%s28130_s1 + $0x970] sm:$0xff]  }
 0x114   :  { %19611 = vmatpush3.bf16.msra.mxu0 %v21673_v33 }
 0x115   :  { %19612 = vmatprep.subr.bf16.mxu0 %v21675_v35 }
 0x116   :  { %19633 = vmatpush3.bf16.msra.mxu1 %v21674_v34  ;;  %v19310_v42 = vpop.f32.mrb[4].mxu0  ;;  %v21712_v34 = vld [vmem:[%s28130_s1 + $0x9f0] sm:$0xff]  }
 0x117   :  { %v19311_v44 = vpop.f32.mrb[5].mxu0  ;;  %19634 = vmatprep.subr.bf16.mxu1 %v21676_v36  ;;  %v19332_v46 = vpop.f32.mrb[4].mxu1  ;;  %v21713_v36 = vld [vmem:[%s28130_s1 + $0x930] sm:$0xff]  }
 0x118   :  { %v19312_v47 = vadd.f32 %v19311_v44, %v19310_v42  ;;  %v19313_v48 = vpop.f32.mrb[6].mxu0  ;;  %19613 = vmatpush3.bf16.msra.mxu0 %v21677_v37  ;;  %v19333_v53 = vpop.f32.mrb[5].mxu1  ;;  %v21715_v42 = vld [vmem:[%s28130_s1 + $0x978] sm:$0xff]  }
 0x119   :  { %v19314_v54 = vpop.f32.mrb[7].mxu0  ;;  %19614 = vmatprep.subr.bf16.mxu0 %v21679_v39  ;;  %v19334_v56 = vadd.f32 %v19333_v53, %v19332_v46  ;;  %v19335_v57 = vpop.f32.mrb[6].mxu1  ;;  %v21716_v48 = vld [vmem:[%s28130_s1 + $0x9f8] sm:$0xff]   ;;  %v3375_v53 = vrot.slane %v23951_v62, %v23126_v41  ;;  %v21727_v62 = vld [vmem:[%s28130_s1 + $0xa88] sm:$0xff]  }
 0x11a   :  { %v13848_v55 = vadd.f32 %v19312_v47, %v23845_v11  ;;  %19635 = vmatpush3.bf16.msra.mxu1 %v21678_v38  ;;  %v19336_v60 = vpop.f32.mrb[7].mxu1  ;;  %v21691_v11 = vld [vmem:[%s28130_s1 + $0x948] sm:$0xff]   ;;  %v21720_v54 = vld [vmem:[%s28130_s1 + $0xa40] sm:$0xff]  }
 0x11b   :  { %19636 = vmatprep.subr.bf16.mxu1 %v21680_v40  ;;  %v21714_v40 = vld [vmem:[%s28130_s1 + $0x9b0] sm:$0xff]   ;;  %v21723_v57 = vld [vmem:[%s28130_s1 + $0xa80] sm:$0xff]   ;;  %v21725_v60 = vld [vmem:[%s28130_s1 + $0xac8] sm:$0xff]  }
 0x11c   :  { %v23953_v63 = vadd.f32 %v19334_v56, %v13848_v55  ;;  %19615 = vmatpush3.bf16.msra.mxu0 %v21681_v43  ;;  %v21721_v55 = vld [vmem:[%s28130_s1 + $0xac0] sm:$0xff]  }
 0x11d   :  { %19616 = vmatprep.subr.bf16.mxu0 %v21683_v50  ;;  %v21717_v50 = vld [vmem:[%s28130_s1 + $0x938] sm:$0xff]   ;;  %v21722_v56 = vld [vmem:[%s28130_s1 + $0xa00] sm:$0xff]  }
 0x11e   :  { %19637 = vmatpush3.bf16.msra.mxu1 %v21682_v49 }
 0x11f   :  { %19638 = vmatprep.subr.bf16.mxu1 %v21684_v58  ;;  %v3391_v58 = vcombine.high %v3375_v53, %v3375_v53 }
 0x120   :  { %19617 = vmatpush3.bf16.msra.mxu0 %v21685_v61  ;;  %v21726_v61 = vld [vmem:[%s28130_s1 + $0xa08] sm:$0xff]  }
 0x121   :  { %19646 = vmatprep.subr.bf16.mxu0 %v21687_v3  ;;  %v21732_v3 = vld [vmem:[%s28130_s1 + $0xa58] sm:$0xff]  }
 0x122   :  { %19639 = vmatpush3.bf16.msra.mxu1 %v21686_v0  ;;  %v21729_v0 = vld [vmem:[%s28130_s1 + $0xad0] sm:$0xff]  }
 0x123   :  { %14406 = vmatmul.mubr.bf16.vlgmr.msra.gmra.mrb[32].mxu0 %v3368_v2  ;;  %19668 = vmatprep.subr.bf16.mxu1 %v21688_v6  ;;  %v21731_v2 = vld [vmem:[%s28130_s1 + $0xa90] sm:$0xff]   ;;  %v21735_v6 = vld [vmem:[%s28130_s1 + $0xa98] sm:$0xff]  }
 0x124   :  { %19647 = vmatpush3.bf16.msra.mxu0 %v21689_v7  ;;  %14485 = vmatprep.mubr.bf16.mxu0 %v3389_v8  ;;  %v21736_v7 = vld [vmem:[%s28130_s1 + $0xa60] sm:$0xff]  }
 0x125   :  { %14446 = vmatmul.mubr.bf16.vlgmr.msra.gmra.mrb[32].mxu1 %v3390_v10  ;;  %19648 = vmatprep.subr.bf16.mxu0 %v21691_v11  ;;  %v21737_v8 = vld [vmem:[%s28130_s1 + $0xae0] sm:$0xff]   ;;  %v21740_v11 = vld [vmem:[%s28130_s1 + $0xa68] sm:$0xff]  }
 0x126   :  { %19669 = vmatpush3.bf16.msra.mxu1 %v21690_v9  ;;  %14525 = vmatprep.mubr.bf16.mxu1 %v3393_v13  ;;  %v21738_v9 = vld [vmem:[%s28130_s1 + $0xa20] sm:$0xff]   ;;  %v21742_v13 = vld [vmem:[%s28130_s1 + $0xa28] sm:$0xff]  }
 0x127   :  { %19670 = vmatprep.subr.bf16.mxu1 %v21692_v12  ;;  %v21739_v10 = vld [vmem:[%s28130_s1 + $0xaa0] sm:$0xff]   ;;  %v21741_v12 = vld [vmem:[%s28130_s1 + $0xae8] sm:$0xff]  }
 0x128   :  { %19649 = vmatpush3.bf16.msra.mxu0 %v21693_v14  ;;  %v21743_v14 = vld [vmem:[%s28130_s1 + $0xaa8] sm:$0xff]  }
 0x129   :  { %19650 = vmatprep.subr.bf16.mxu0 %v21695_v16 }
 0x12a   :  { %19671 = vmatpush3.bf16.msra.mxu1 %v21694_v15  ;;  %v21744_v15 = vld [vmem:[%s28130_s1 + $0xa70] sm:$0xff]  }
 0x12b   :  { %19672 = vmatprep.subr.bf16.mxu1 %v21696_v17  ;;  %v21745_v17 = vld [vmem:[%s28130_s1 + $0xaf0] sm:$0xff]  }
 0x12c   :  { %19651 = vmatpush3.bf16.msra.mxu0 %v21697_v18 }
 0x12d   :  { %19652 = vmatprep.subr.bf16.mxu0 %v21699_v20 }
 0x12e   :  { %19673 = vmatpush3.bf16.msra.mxu1 %v21698_v19  ;;  %v21746_v19 = vld [vmem:[%s28130_s1 + $0xa30] sm:$0xff]  }
 0x12f   :  { %19674 = vmatprep.subr.bf16.mxu1 %v21700_v21 }
 0x130   :  { %19653 = vmatpush3.bf16.msra.mxu0 %v21701_v22 }
 0x131   :  { %19654 = vmatprep.subr.bf16.mxu0 %v21703_v24  ;;  %v21748_v24 = vld [vmem:[%s28130_s1 + $0xa78] sm:$0xff]  }
 0x132   :  { %19675 = vmatpush3.bf16.msra.mxu1 %v21702_v23  ;;  %v21747_v23 = vld [vmem:[%s28130_s1 + $0xab0] sm:$0xff]  }
 0x133   :  { %19676 = vmatprep.subr.bf16.mxu1 %v21704_v25  ;;  %v27_v25 = vld [vmem:[%s28129_s0 + $0x28] sm:$0xff] }
 0x134   :  { %19655 = vmatpush3.bf16.msra.mxu0 %v21705_v26 }
 0x135   :  { %19656 = vmatprep.subr.bf16.mxu0 %v21707_v28  ;;  %v3401_v28 = vrot.slane %v27_v25, %v23126_v41 }
 0x136   :  { %19677 = vmatpush3.bf16.msra.mxu1 %v21706_v27  ;;  %v19354_v33 = vpop.f32.mrb[8].mxu0 }
 0x137   :  { %v19355_v35 = vpop.f32.mrb[9].mxu0  ;;  %19678 = vmatprep.subr.bf16.mxu1 %v21708_v29  ;;  %v3394_v29 = vcombine.high %v27_v25, %v27_v25  ;;  %v21782_v25 = vld [vmem:[%s28130_s1 + $0xb38] sm:$0xff]  }
 0x138   :  { %v19376_v37 = vpop.f32.mrb[8].mxu1  ;;  %v19356_v38 = vadd.f32 %v19355_v35, %v19354_v33  ;;  %v19357_v39 = vpop.f32.mrb[10].mxu0  ;;  %19657 = vmatpush3.bf16.msra.mxu0 %v21709_v30  ;;  %v21749_v33 = vld [vmem:[%s28130_s1 + $0xaf8] sm:$0xff]  }
 0x139   :  { %v19377_v43 = vpop.f32.mrb[9].mxu1  ;;  %v19358_v44 = vpop.f32.mrb[11].mxu0  ;;  %19658 = vmatprep.subr.bf16.mxu0 %v21711_v32  ;;  %v21750_v35 = vld [vmem:[%s28130_s1 + $0xa38] sm:$0xff]  }
 0x13a   :  { %v13928_v45 = vadd.f32 %v19356_v38, %v23953_v63  ;;  %v19378_v46 = vadd.f32 %v19377_v43, %v19376_v37  ;;  %v19379_v47 = vpop.f32.mrb[10].mxu1  ;;  %19679 = vmatpush3.bf16.msra.mxu1 %v21710_v31  ;;  %v21728_v63 = vld [vmem:[%s28130_s1 + $0xa50] sm:$0xff]   ;;  %v24163_v37 = vrot.slane %v3394_v29, %v23126_v41  ;;  %v21751_v39 = vld [vmem:[%s28130_s1 + $0xab8] sm:$0xff]   ;;  %v21752_v43 = vld [vmem:[%s28130_s1 + $0xb40] sm:$0xff]  }
 0x13b   :  { %v19380_v49 = vpop.f32.mrb[11].mxu1  ;;  %19680 = vmatprep.subr.bf16.mxu1 %v21712_v34  ;;  %v21754_v47 = vld [vmem:[%s28130_s1 + $0xb00] sm:$0xff]  }
 0x13c   :  { %v24057_v51 = vadd.f32 %v19378_v46, %v13928_v45  ;;  %19659 = vmatpush3.bf16.msra.mxu0 %v21713_v36  ;;  %v3409_v36 = vcombine.high %v3401_v28, %v3401_v28  ;;  %v3410_v44 = vcombine.high %v24163_v37, %v24163_v37  ;;  %v21753_v45 = vld [vmem:[%s28130_s1 + $0xbc0] sm:$0xff]  }
 0x13d   :  { %19660 = vmatprep.subr.bf16.mxu0 %v21715_v42  ;;  %v3417_v42 = vrot.slane %v3401_v28, %v23126_v41  ;;  %v21755_v49 = vld [vmem:[%s28130_s1 + $0xb80] sm:$0xff]   ;;  %v3424_v28 = vrot.slane %v24163_v37, %v23126_v41  ;;  %v21792_v37 = vld [vmem:[%s28130_s1 + $0xc88] sm:$0xff]  }
 0x13e   :  { %19681 = vmatpush3.bf16.msra.mxu1 %v21714_v40  ;;  %v3431_v40 = vrot.slane %v3409_v36, %v23126_v41  ;;  %v21785_v29 = vld [vmem:[%s28130_s1 + $0xc40] sm:$0xff]   ;;  %v21791_v36 = vld [vmem:[%s28130_s1 + $0xc08] sm:$0xff]  }
 0x13f   :  { %19682 = vmatprep.subr.bf16.mxu1 %v21716_v48  ;;  %v3438_v48 = vrot.slane %v3410_v44, %v23126_v41  ;;  %v21798_v44 = vld [vmem:[%s28130_s1 + $0xcd8] sm:$0xff]  }
 0x140   :  { %19661 = vmatpush3.bf16.msra.mxu0 %v21717_v50  ;;  %v3441_v46 = vcombine.high %v3431_v40, %v3431_v40  ;;  %v3439_v50 = vcombine.high %v3417_v42, %v3417_v42 }
 0x141   :  { %19690 = vmatprep.subr.bf16.mxu0 %v21720_v54  ;;  %v21758_v54 = vld [vmem:[%s28130_s1 + $0xb08] sm:$0xff]  }
 0x142   :  { %19683 = vmatpush3.bf16.msra.mxu1 %v21718_v52  ;;  %v21757_v52 = vld [vmem:[%s28130_s1 + $0xbc8] sm:$0xff]  }
 0x143   :  { %14486 = vmatmul.mubr.bf16.vlgmr.msra.gmra.mrb[36].mxu0 %v3375_v53  ;;  %19712 = vmatprep.subr.bf16.mxu1 %v21721_v55  ;;  %v3442_v53 = vcombine.high %v3438_v48, %v3438_v48  ;;  %v21759_v55 = vld [vmem:[%s28130_s1 + $0xb88] sm:$0xff]  }
 0x144   :  { %19691 = vmatpush3.bf16.msra.mxu0 %v21722_v56  ;;  %14565 = vmatprep.mubr.bf16.mxu0 %v3431_v40  ;;  %v21760_v56 = vld [vmem:[%s28130_s1 + $0xb50] sm:$0xff]  }
 0x145   :  { %14526 = vmatmul.mubr.bf16.vlgmr.msra.gmra.mrb[36].mxu1 %v3391_v58  ;;  %19692 = vmatprep.subr.bf16.mxu0 %v21724_v59  ;;  %v21762_v58 = vld [vmem:[%s28130_s1 + $0xb10] sm:$0xff]  }
 0x146   :  { %19713 = vmatpush3.bf16.msra.mxu1 %v21723_v57  ;;  %14605 = vmatprep.mubr.bf16.mxu1 %v3441_v46  ;;  %v21761_v57 = vld [vmem:[%s28130_s1 + $0xbd0] sm:$0xff]   ;;  %v21800_v46 = vld [vmem:[%s28130_s1 + $0xc98] sm:$0xff]  }
 0x147   :  { %19714 = vmatprep.subr.bf16.mxu1 %v21725_v60  ;;  %v21763_v59 = vld [vmem:[%s28130_s1 + $0xb90] sm:$0xff]   ;;  %v21764_v60 = vld [vmem:[%s28130_s1 + $0xb58] sm:$0xff]  }
 0x148   :  { %19693 = vmatpush3.bf16.msra.mxu0 %v21726_v61  ;;  %v21765_v61 = vld [vmem:[%s28130_s1 + $0xbd8] sm:$0xff]   ;;  %v21795_v40 = vld [vmem:[%s28130_s1 + $0xc10] sm:$0xff]  }
 0x149   :  { %19694 = vmatprep.subr.bf16.mxu0 %v21728_v63  ;;  %v21767_v63 = vld [vmem:[%s28130_s1 + $0xb98] sm:$0xff]  }
 0x14a   :  { %19715 = vmatpush3.bf16.msra.mxu1 %v21727_v62  ;;  %v21766_v62 = vld [vmem:[%s28130_s1 + $0xb18] sm:$0xff]  }
 0x14b   :  { %19716 = vmatprep.subr.bf16.mxu1 %v21729_v0  ;;  %v21768_v0 = vld [vmem:[%s28130_s1 + $0xb60] sm:$0xff]  }
 0x14c   :  { %19695 = vmatpush3.bf16.msra.mxu0 %v21730_v1  ;;  %v21769_v1 = vld [vmem:[%s28130_s1 + $0xbe0] sm:$0xff]  }
 0x14d   :  { %19696 = vmatprep.subr.bf16.mxu0 %v21732_v3  ;;  %v21771_v3 = vld [vmem:[%s28130_s1 + $0xba0] sm:$0xff]  }
 0x14e   :  { %19717 = vmatpush3.bf16.msra.mxu1 %v21731_v2  ;;  %v21770_v2 = vld [vmem:[%s28130_s1 + $0xb20] sm:$0xff]  }
 0x14f   :  { %19718 = vmatprep.subr.bf16.mxu1 %v21733_v4  ;;  %v21772_v4 = vld [vmem:[%s28130_s1 + $0xb68] sm:$0xff]  }
 0x150   :  { %19697 = vmatpush3.bf16.msra.mxu0 %v21734_v5  ;;  %v21773_v5 = vld [vmem:[%s28130_s1 + $0xbe8] sm:$0xff]  }
 0x151   :  { %19698 = vmatprep.subr.bf16.mxu0 %v21736_v7  ;;  %v21775_v7 = vld [vmem:[%s28130_s1 + $0xba8] sm:$0xff]  }
 0x152   :  { %19719 = vmatpush3.bf16.msra.mxu1 %v21735_v6  ;;  %v21774_v6 = vld [vmem:[%s28130_s1 + $0xb28] sm:$0xff]  }
 0x153   :  { %19720 = vmatprep.subr.bf16.mxu1 %v21737_v8  ;;  %v21776_v8 = vld [vmem:[%s28130_s1 + $0xb70] sm:$0xff]  }
 0x154   :  { %19699 = vmatpush3.bf16.msra.mxu0 %v21738_v9 }
 0x155   :  { %19700 = vmatprep.subr.bf16.mxu0 %v21740_v11 }
 0x156   :  { %19721 = vmatpush3.bf16.msra.mxu1 %v21739_v10  ;;  %v19398_v16 = vpop.f32.mrb[12].mxu0  ;;  %v21777_v10 = vld [vmem:[%s28130_s1 + $0xbf0] sm:$0xff]  }
 0x157   :  { %v19399_v18 = vpop.f32.mrb[13].mxu0  ;;  %19722 = vmatprep.subr.bf16.mxu1 %v21741_v12  ;;  %v21778_v12 = vld [vmem:[%s28130_s1 + $0xb30] sm:$0xff]  }
 0x158   :  { %v19420_v20 = vpop.f32.mrb[12].mxu1  ;;  %v19400_v21 = vadd.f32 %v19399_v18, %v19398_v16  ;;  %v19401_v22 = vpop.f32.mrb[14].mxu0  ;;  %19701 = vmatpush3.bf16.msra.mxu0 %v21742_v13  ;;  %v21779_v16 = vld [vmem:[%s28130_s1 + $0xbb0] sm:$0xff]  }
 0x159   :  { %v19421_v26 = vpop.f32.mrb[13].mxu1  ;;  %v19402_v27 = vpop.f32.mrb[15].mxu0  ;;  %19702 = vmatprep.subr.bf16.mxu0 %v21744_v15 }
 0x15a   :  { %v14008_v30 = vadd.f32 %v19400_v21, %v24057_v51  ;;  %v19422_v31 = vadd.f32 %v19421_v26, %v19420_v20  ;;  %v19423_v32 = vpop.f32.mrb[14].mxu1  ;;  %19723 = vmatpush3.bf16.msra.mxu1 %v21743_v14  ;;  %v21756_v51 = vld [vmem:[%s28130_s1 + $0xb48] sm:$0xff]   ;;  %v21783_v27 = vld [vmem:[%s28130_s1 + $0xbb8] sm:$0xff]  }
 0x15b   :  { %v19424_v34 = vpop.f32.mrb[15].mxu1  ;;  %19724 = vmatprep.subr.bf16.mxu1 %v21745_v17  ;;  %v21780_v17 = vld [vmem:[%s28130_s1 + $0xb78] sm:$0xff]   ;;  %v21788_v32 = vld [vmem:[%s28130_s1 + $0xc80] sm:$0xff]  }
 0x15c   :  { %v24165_v38 = vadd.f32 %v19422_v31, %v14008_v30  ;;  %19703 = vmatpush3.bf16.msra.mxu0 %v21746_v19  ;;  %v21786_v30 = vld [vmem:[%s28130_s1 + $0xcc0] sm:$0xff]   ;;  %v21789_v34 = vld [vmem:[%s28130_s1 + $0xc48] sm:$0xff]  }
 0x15d   :  { %19704 = vmatprep.subr.bf16.mxu0 %v21748_v24  ;;  %v21787_v31 = vld [vmem:[%s28130_s1 + $0xc00] sm:$0xff]  }
 0x15e   :  { %19725 = vmatpush3.bf16.msra.mxu1 %v21747_v23  ;;  %v21781_v23 = vld [vmem:[%s28130_s1 + $0xbf8] sm:$0xff]  }
 0x15f   :  { %19726 = vmatprep.subr.bf16.mxu1 %v21749_v33  ;;  %v3440_v33 = vcombine.high %v3424_v28, %v3424_v28 }
 0x160   :  { %19705 = vmatpush3.bf16.msra.mxu0 %v21750_v35  ;;  %v21790_v35 = vld [vmem:[%s28130_s1 + $0xcc8] sm:$0xff]  }
 0x161   :  { %19734 = vmatprep.subr.bf16.mxu0 %v21752_v43  ;;  %v21797_v43 = vld [vmem:[%s28130_s1 + $0xc58] sm:$0xff]  }
 0x162   :  { %19727 = vmatpush3.bf16.msra.mxu1 %v21751_v39  ;;  %v21794_v39 = vld [vmem:[%s28130_s1 + $0xcd0] sm:$0xff]  }
 0x163   :  { %14566 = vmatmul.mubr.bf16.vlgmr.msra.gmra.mrb[40].mxu0 %v3417_v42  ;;  %19756 = vmatprep.subr.bf16.mxu1 %v21753_v45  ;;  %v21796_v42 = vld [vmem:[%s28130_s1 + $0xc90] sm:$0xff]   ;;  %v21799_v45 = vld [vmem:[%s28130_s1 + $0xc18] sm:$0xff]  }
 0x164   :  { %19735 = vmatpush3.bf16.msra.mxu0 %v21754_v47  ;;  %14645 = vmatprep.mubr.bf16.mxu0 %v3438_v48  ;;  %v21801_v47 = vld [vmem:[%s28130_s1 + $0xc60] sm:$0xff]  }
 0x165   :  { %14606 = vmatmul.mubr.bf16.vlgmr.msra.gmra.mrb[40].mxu1 %v3439_v50  ;;  %19736 = vmatprep.subr.bf16.mxu0 %v21756_v51  ;;  %v21802_v48 = vld [vmem:[%s28130_s1 + $0xce0] sm:$0xff]   ;;  %v21805_v51 = vld [vmem:[%s28130_s1 + $0xc68] sm:$0xff]  }
 0x166   :  { %19757 = vmatpush3.bf16.msra.mxu1 %v21755_v49  ;;  %14685 = vmatprep.mubr.bf16.mxu1 %v3442_v53  ;;  %v21803_v49 = vld [vmem:[%s28130_s1 + $0xc20] sm:$0xff]   ;;  %v21807_v53 = vld [vmem:[%s28130_s1 + $0xc28] sm:$0xff]  }
 0x167   :  { %19758 = vmatprep.subr.bf16.mxu1 %v21757_v52  ;;  %v21804_v50 = vld [vmem:[%s28130_s1 + $0xca0] sm:$0xff]   ;;  %v21806_v52 = vld [vmem:[%s28130_s1 + $0xce8] sm:$0xff]  }
 0x168   :  { %19737 = vmatpush3.bf16.msra.mxu0 %v21758_v54  ;;  %v21808_v54 = vld [vmem:[%s28130_s1 + $0xca8] sm:$0xff]  }
 0x169   :  { %19738 = vmatprep.subr.bf16.mxu0 %v21760_v56 }
 0x16a   :  { %19759 = vmatpush3.bf16.msra.mxu1 %v21759_v55  ;;  %v21809_v55 = vld [vmem:[%s28130_s1 + $0xc70] sm:$0xff]  }
 0x16b   :  { %19760 = vmatprep.subr.bf16.mxu1 %v21761_v57  ;;  %v21810_v57 = vld [vmem:[%s28130_s1 + $0xcf0] sm:$0xff]  }
 0x16c   :  { %19739 = vmatpush3.bf16.msra.mxu0 %v21762_v58 }
 0x16d   :  { %19740 = vmatprep.subr.bf16.mxu0 %v21764_v60 }
 0x16e   :  { %19761 = vmatpush3.bf16.msra.mxu1 %v21763_v59  ;;  %v21811_v59 = vld [vmem:[%s28130_s1 + $0xc30] sm:$0xff]  }
 0x16f   :  { %19762 = vmatprep.subr.bf16.mxu1 %v21765_v61 }
 0x170   :  { %19741 = vmatpush3.bf16.msra.mxu0 %v21766_v62 }
 0x171   :  { %19742 = vmatprep.subr.bf16.mxu0 %v21768_v0 }
 0x172   :  { %19763 = vmatpush3.bf16.msra.mxu1 %v21767_v63  ;;  %v21812_v63 = vld [vmem:[%s28130_s1 + $0xcb0] sm:$0xff]  }
 0x173   :  { %19764 = vmatprep.subr.bf16.mxu1 %v21769_v1 }
 0x174   :  { %19743 = vmatpush3.bf16.msra.mxu0 %v21770_v2  ;;  %v21813_v2 = vld [vmem:[%s28130_s1 + $0xc78] sm:$0xff]  }
 0x175   :  { %19744 = vmatprep.subr.bf16.mxu0 %v21772_v4 }
 0x176   :  { %19765 = vmatpush3.bf16.msra.mxu1 %v21771_v3  ;;  %v19442_v9 = vpop.f32.mrb[16].mxu0  ;;  %v28_v3 = vld [vmem:[%s28129_s0 + $0x30] sm:$0xff] }
 0x177   :  { %v19443_v11 = vpop.f32.mrb[17].mxu0  ;;  %19766 = vmatprep.subr.bf16.mxu1 %v21773_v5 }
 0x178   :  { %v19464_v13 = vpop.f32.mrb[16].mxu1  ;;  %v19444_v14 = vadd.f32 %v19443_v11, %v19442_v9  ;;  %v19445_v15 = vpop.f32.mrb[18].mxu0  ;;  %19745 = vmatpush3.bf16.msra.mxu0 %v21774_v6  ;;  %v3443_v9 = vcombine.high %v28_v3, %v28_v3  ;;  %v21815_v11 = vld [vmem:[%s28130_s1 + $0xc38] sm:$0xff]  }
 0x179   :  { %v19465_v18 = vpop.f32.mrb[17].mxu1  ;;  %v19446_v19 = vpop.f32.mrb[19].mxu0  ;;  %19746 = vmatprep.subr.bf16.mxu0 %v21776_v8  ;;  %v3450_v8 = vrot.slane %v28_v3, %v23126_v41  ;;  %v21848_v3 = vld [vmem:[%s28130_s1 + $0xdb8] sm:$0xff]  }
 0x17a   :  { %v14088_v20 = vadd.f32 %v19444_v14, %v24165_v38  ;;  %v19466_v21 = vadd.f32 %v19465_v18, %v19464_v13  ;;  %v19467_v22 = vpop.f32.mrb[18].mxu1  ;;  %19767 = vmatpush3.bf16.msra.mxu1 %v21775_v7  ;;  %v21793_v38 = vld [vmem:[%s28130_s1 + $0xc50] sm:$0xff]   ;;  %v21814_v7 = vld [vmem:[%s28130_s1 + $0xcf8] sm:$0xff]   ;;  %v24380_v15 = vrot.slane %v3443_v9, %v23126_v41  ;;  %v21818_v19 = vld [vmem:[%s28130_s1 + $0xdc0] sm:$0xff]  }
 0x17b   :  { %v19468_v24 = vpop.f32.mrb[19].mxu1  ;;  %19768 = vmatprep.subr.bf16.mxu1 %v21777_v10  ;;  %v21816_v13 = vld [vmem:[%s28130_s1 + $0xcb8] sm:$0xff]   ;;  %v3458_v14 = vcombine.high %v3450_v8, %v3450_v8 }
 0x17c   :  { %v24269_v26 = vadd.f32 %v19466_v21, %v14088_v20  ;;  %19747 = vmatpush3.bf16.msra.mxu0 %v21778_v12  ;;  %v3459_v20 = vcombine.high %v24380_v15, %v24380_v15  ;;  %v21819_v21 = vld [vmem:[%s28130_s1 + $0xd00] sm:$0xff]  }
 0x17d   :  { %19748 = vmatprep.subr.bf16.mxu0 %v21780_v17  ;;  %v21817_v17 = vld [vmem:[%s28130_s1 + $0xd40] sm:$0xff]   ;;  %v3480_v18 = vrot.slane %v3458_v14, %v23126_v41  ;;  %v21858_v14 = vld [vmem:[%s28130_s1 + $0xe50] sm:$0xff]  }
 0x17e   :  { %19769 = vmatpush3.bf16.msra.mxu1 %v21779_v16  ;;  %v3466_v16 = vrot.slane %v3450_v8, %v23126_v41  ;;  %v3487_v24 = vrot.slane %v3459_v20, %v23126_v41  ;;  %v21853_v8 = vld [vmem:[%s28130_s1 + $0xe80] sm:$0xff]   ;;  %v21864_v20 = vld [vmem:[%s28130_s1 + $0xe18] sm:$0xff]  }
 0x17f   :  { %19770 = vmatprep.subr.bf16.mxu1 %v21781_v23  ;;  %v3490_v22 = vcombine.high %v3480_v18, %v3480_v18  ;;  %v21820_v23 = vld [vmem:[%s28130_s1 + $0xd80] sm:$0xff]  }
 0x180   :  { %19749 = vmatpush3.bf16.msra.mxu0 %v21782_v25  ;;  %v3488_v25 = vcombine.high %v3466_v16, %v3466_v16 }
 0x181   :  { %19778 = vmatprep.subr.bf16.mxu0 %v21785_v29  ;;  %v21823_v29 = vld [vmem:[%s28130_s1 + $0xd08] sm:$0xff]  }
 0x182   :  { %19771 = vmatpush3.bf16.msra.mxu1 %v21783_v27  ;;  %v21822_v27 = vld [vmem:[%s28130_s1 + $0xdc8] sm:$0xff]  }
 0x183   :  { %14646 = vmatmul.mubr.bf16.vlgmr.msra.gmra.mrb[44].mxu0 %v3424_v28  ;;  %19800 = vmatprep.subr.bf16.mxu1 %v21786_v30  ;;  %v3491_v28 = vcombine.high %v3487_v24, %v3487_v24  ;;  %v21824_v30 = vld [vmem:[%s28130_s1 + $0xd88] sm:$0xff]  }
 0x184   :  { %19779 = vmatpush3.bf16.msra.mxu0 %v21787_v31  ;;  %14725 = vmatprep.mubr.bf16.mxu0 %v3480_v18  ;;  %v21825_v31 = vld [vmem:[%s28130_s1 + $0xd50] sm:$0xff]   ;;  %v21862_v18 = vld [vmem:[%s28130_s1 + $0xe58] sm:$0xff]  }
 0x185   :  { %14686 = vmatmul.mubr.bf16.vlgmr.msra.gmra.mrb[44].mxu1 %v3440_v33  ;;  %19780 = vmatprep.subr.bf16.mxu0 %v21789_v34  ;;  %v21827_v33 = vld [vmem:[%s28130_s1 + $0xd10] sm:$0xff]  }
 0x186   :  { %19801 = vmatpush3.bf16.msra.mxu1 %v21788_v32  ;;  %14765 = vmatprep.mubr.bf16.mxu1 %v3490_v22  ;;  %v21826_v32 = vld [vmem:[%s28130_s1 + $0xdd0] sm:$0xff]   ;;  %v21866_v22 = vld [vmem:[%s28130_s1 + $0xe60] sm:$0xff]  }
 0x187   :  { %19802 = vmatprep.subr.bf16.mxu1 %v21790_v35  ;;  %v21828_v34 = vld [vmem:[%s28130_s1 + $0xd90] sm:$0xff]   ;;  %v21829_v35 = vld [vmem:[%s28130_s1 + $0xd58] sm:$0xff]  }
 0x188   :  { %19781 = vmatpush3.bf16.msra.mxu0 %v21791_v36  ;;  %v21830_v36 = vld [vmem:[%s28130_s1 + $0xdd8] sm:$0xff]  }
 0x189   :  { %19782 = vmatprep.subr.bf16.mxu0 %v21793_v38  ;;  %v21832_v38 = vld [vmem:[%s28130_s1 + $0xd98] sm:$0xff]  }
 0x18a   :  { %19803 = vmatpush3.bf16.msra.mxu1 %v21792_v37  ;;  %v21831_v37 = vld [vmem:[%s28130_s1 + $0xd18] sm:$0xff]  }
 0x18b   :  { %19804 = vmatprep.subr.bf16.mxu1 %v21794_v39  ;;  %v21833_v39 = vld [vmem:[%s28130_s1 + $0xd60] sm:$0xff]  }
 0x18c   :  { %19783 = vmatpush3.bf16.msra.mxu0 %v21795_v40  ;;  %v21834_v40 = vld [vmem:[%s28130_s1 + $0xde0] sm:$0xff]  }
 0x18d   :  { %19784 = vmatprep.subr.bf16.mxu0 %v21797_v43  ;;  %v21836_v43 = vld [vmem:[%s28130_s1 + $0xda0] sm:$0xff]  }
 0x18e   :  { %19805 = vmatpush3.bf16.msra.mxu1 %v21796_v42  ;;  %v21835_v42 = vld [vmem:[%s28130_s1 + $0xd20] sm:$0xff]  }
 0x18f   :  { %19806 = vmatprep.subr.bf16.mxu1 %v21798_v44  ;;  %v21837_v44 = vld [vmem:[%s28130_s1 + $0xd68] sm:$0xff]  }
 0x190   :  { %19785 = vmatpush3.bf16.msra.mxu0 %v21799_v45  ;;  %v21838_v45 = vld [vmem:[%s28130_s1 + $0xde8] sm:$0xff]  }
 0x191   :  { %19786 = vmatprep.subr.bf16.mxu0 %v21801_v47  ;;  %v21840_v47 = vld [vmem:[%s28130_s1 + $0xda8] sm:$0xff]  }
 0x192   :  { %19807 = vmatpush3.bf16.msra.mxu1 %v21800_v46  ;;  %v21839_v46 = vld [vmem:[%s28130_s1 + $0xd28] sm:$0xff]  }
 0x193   :  { %19808 = vmatprep.subr.bf16.mxu1 %v21802_v48  ;;  %v21841_v48 = vld [vmem:[%s28130_s1 + $0xd70] sm:$0xff]  }
 0x194   :  { %19787 = vmatpush3.bf16.msra.mxu0 %v21803_v49 }
 0x195   :  { %19788 = vmatprep.subr.bf16.mxu0 %v21805_v51 }
 0x196   :  { %19809 = vmatpush3.bf16.msra.mxu1 %v21804_v50  ;;  %v19486_v56 = vpop.f32.mrb[20].mxu0  ;;  %v21842_v50 = vld [vmem:[%s28130_s1 + $0xdf0] sm:$0xff]  }
 0x197   :  { %v19487_v58 = vpop.f32.mrb[21].mxu0  ;;  %19810 = vmatprep.subr.bf16.mxu1 %v21806_v52  ;;  %v21843_v52 = vld [vmem:[%s28130_s1 + $0xd30] sm:$0xff]  }
 0x198   :  { %v19508_v60 = vpop.f32.mrb[20].mxu1  ;;  %v19488_v61 = vadd.f32 %v19487_v58, %v19486_v56  ;;  %v19489_v62 = vpop.f32.mrb[22].mxu0  ;;  %19789 = vmatpush3.bf16.msra.mxu0 %v21807_v53  ;;  %v21844_v56 = vld [vmem:[%s28130_s1 + $0xdb0] sm:$0xff]  }
 0x199   :  { %v19509_v0 = vpop.f32.mrb[21].mxu1  ;;  %v19490_v1 = vpop.f32.mrb[23].mxu0  ;;  %19790 = vmatprep.subr.bf16.mxu0 %v21809_v55 }
 0x19a   :  { %v14168_v4 = vadd.f32 %v19488_v61, %v24269_v26  ;;  %v19510_v5 = vadd.f32 %v19509_v0, %v19508_v60  ;;  %v19511_v6 = vpop.f32.mrb[22].mxu1  ;;  %19811 = vmatpush3.bf16.msra.mxu1 %v21808_v54  ;;  %v21821_v26 = vld [vmem:[%s28130_s1 + $0xd48] sm:$0xff]   ;;  %v21847_v1 = vld [vmem:[%s28130_s1 + $0xd38] sm:$0xff]  }
 0x19b   :  { %v19512_v10 = vpop.f32.mrb[23].mxu1  ;;  %19812 = vmatprep.subr.bf16.mxu1 %v21810_v57  ;;  %v21845_v57 = vld [vmem:[%s28130_s1 + $0xd78] sm:$0xff]   ;;  %v21851_v6 = vld [vmem:[%s28130_s1 + $0xec0] sm:$0xff]  }
 0x19c   :  { %v24374_v12 = vadd.f32 %v19510_v5, %v14168_v4  ;;  %19791 = vmatpush3.bf16.msra.mxu0 %v21811_v59  ;;  %v3473_v4 = vrot.slane %v24380_v15, %v23126_v41  ;;  %v21850_v5 = vld [vmem:[%s28130_s1 + $0xe40] sm:$0xff]   ;;  %v21854_v10 = vld [vmem:[%s28130_s1 + $0xe48] sm:$0xff]   ;;  %v21859_v15 = vld [vmem:[%s28130_s1 + $0xed0] sm:$0xff]  }
 0x19d   :  { %19792 = vmatprep.subr.bf16.mxu0 %v21813_v2 }
 0x19e   :  { %19813 = vmatpush3.bf16.msra.mxu1 %v21812_v63  ;;  %v21846_v63 = vld [vmem:[%s28130_s1 + $0xdf8] sm:$0xff]   ;;  %v3489_v9 = vcombine.high %v3473_v4, %v3473_v4 }
 0x19f   :  { %19814 = vmatprep.subr.bf16.mxu1 %v21814_v7  ;;  %v21852_v7 = vld [vmem:[%s28130_s1 + $0xe00] sm:$0xff]  }
 0x1a0   :  { %19793 = vmatpush3.bf16.msra.mxu0 %v21815_v11  ;;  %v21855_v11 = vld [vmem:[%s28130_s1 + $0xec8] sm:$0xff]  }
 0x1a1   :  { %19822 = vmatprep.subr.bf16.mxu0 %v21817_v17  ;;  %v21861_v17 = vld [vmem:[%s28130_s1 + $0xe90] sm:$0xff]  }
 0x1a2   :  { %19815 = vmatpush3.bf16.msra.mxu1 %v21816_v13  ;;  %v21857_v13 = vld [vmem:[%s28130_s1 + $0xe88] sm:$0xff]  }
 0x1a3   :  { %14726 = vmatmul.mubr.bf16.vlgmr.msra.gmra.mrb[48].mxu0 %v3466_v16  ;;  %19844 = vmatprep.subr.bf16.mxu1 %v21818_v19  ;;  %v21860_v16 = vld [vmem:[%s28130_s1 + $0xe10] sm:$0xff]   ;;  %v21863_v19 = vld [vmem:[%s28130_s1 + $0xed8] sm:$0xff]  }
 0x1a4   :  { %19823 = vmatpush3.bf16.msra.mxu0 %v21819_v21  ;;  %14805 = vmatprep.mubr.bf16.mxu0 %v3487_v24  ;;  %v21865_v21 = vld [vmem:[%s28130_s1 + $0xe98] sm:$0xff]   ;;  %v21868_v24 = vld [vmem:[%s28130_s1 + $0xe20] sm:$0xff]  }
 0x1a5   :  { %14766 = vmatmul.mubr.bf16.vlgmr.msra.gmra.mrb[48].mxu1 %v3488_v25  ;;  %19824 = vmatprep.subr.bf16.mxu0 %v21821_v26  ;;  %v21869_v25 = vld [vmem:[%s28130_s1 + $0xea0] sm:$0xff]   ;;  %v21870_v26 = vld [vmem:[%s28130_s1 + $0xe68] sm:$0xff]  }
 0x1a6   :  { %19845 = vmatpush3.bf16.msra.mxu1 %v21820_v23  ;;  %14845 = vmatprep.mubr.bf16.mxu1 %v3491_v28  ;;  %v21867_v23 = vld [vmem:[%s28130_s1 + $0xee0] sm:$0xff]   ;;  %v21872_v28 = vld [vmem:[%s28130_s1 + $0xe28] sm:$0xff]  }
 0x1a7   :  { %19846 = vmatprep.subr.bf16.mxu1 %v21822_v27  ;;  %v21871_v27 = vld [vmem:[%s28130_s1 + $0xee8] sm:$0xff]  }
 0x1a8   :  { %19825 = vmatpush3.bf16.msra.mxu0 %v21823_v29  ;;  %v21873_v29 = vld [vmem:[%s28130_s1 + $0xea8] sm:$0xff]  }
 0x1a9   :  { %19826 = vmatprep.subr.bf16.mxu0 %v21825_v31 }
 0x1aa   :  { %19847 = vmatpush3.bf16.msra.mxu1 %v21824_v30  ;;  %v21874_v30 = vld [vmem:[%s28130_s1 + $0xe70] sm:$0xff]  }
 0x1ab   :  { %19848 = vmatprep.subr.bf16.mxu1 %v21826_v32  ;;  %v21875_v32 = vld [vmem:[%s28130_s1 + $0xef0] sm:$0xff]  }
 0x1ac   :  { %19827 = vmatpush3.bf16.msra.mxu0 %v21827_v33 }
 0x1ad   :  { %19828 = vmatprep.subr.bf16.mxu0 %v21829_v35 }
 0x1ae   :  { %19849 = vmatpush3.bf16.msra.mxu1 %v21828_v34  ;;  %v21876_v34 = vld [vmem:[%s28130_s1 + $0xe30] sm:$0xff]  }
 0x1af   :  { %19850 = vmatprep.subr.bf16.mxu1 %v21830_v36 }
 0x1b0   :  { %19829 = vmatpush3.bf16.msra.mxu0 %v21831_v37 }
 0x1b1   :  { %19830 = vmatprep.subr.bf16.mxu0 %v21833_v39 }
 0x1b2   :  { %19851 = vmatpush3.bf16.msra.mxu1 %v21832_v38  ;;  %v21877_v38 = vld [vmem:[%s28130_s1 + $0xeb0] sm:$0xff]  }
 0x1b3   :  { %19852 = vmatprep.subr.bf16.mxu1 %v21834_v40 }
 0x1b4   :  { %19831 = vmatpush3.bf16.msra.mxu0 %v21835_v42  ;;  %v21878_v42 = vld [vmem:[%s28130_s1 + $0xe78] sm:$0xff]  }
 0x1b5   :  { %19832 = vmatprep.subr.bf16.mxu0 %v21837_v44 }
 0x1b6   :  { %19853 = vmatpush3.bf16.msra.mxu1 %v21836_v43  ;;  %v19530_v49 = vpop.f32.mrb[24].mxu0  ;;  %v21879_v43 = vld [vmem:[%s28130_s1 + $0xef8] sm:$0xff]  }
 0x1b7   :  { %v19531_v51 = vpop.f32.mrb[25].mxu0  ;;  %19854 = vmatprep.subr.bf16.mxu1 %v21838_v45 }
 0x1b8   :  { %v19552_v53 = vpop.f32.mrb[24].mxu1  ;;  %v19532_v54 = vadd.f32 %v19531_v51, %v19530_v49  ;;  %v19533_v55 = vpop.f32.mrb[26].mxu0  ;;  %19833 = vmatpush3.bf16.msra.mxu0 %v21839_v46  ;;  %v21880_v49 = vld [vmem:[%s28130_s1 + $0xe38] sm:$0xff]  }
 0x1b9   :  { %v19553_v58 = vpop.f32.mrb[25].mxu1  ;;  %v19534_v59 = vpop.f32.mrb[27].mxu0  ;;  %19834 = vmatprep.subr.bf16.mxu0 %v21841_v48 }
 0x1ba   :  { %v14248_v60 = vadd.f32 %v19532_v54, %v24374_v12  ;;  %v19554_v61 = vadd.f32 %v19553_v58, %v19552_v53  ;;  %v19555_v62 = vpop.f32.mrb[26].mxu1  ;;  %19855 = vmatpush3.bf16.msra.mxu1 %v21840_v47  ;;  %v21856_v12 = vld [vmem:[%s28130_s1 + $0xe08] sm:$0xff]   ;;  %v29_v47 = vld [vmem:[%s28129_s0 + $0x38] sm:$0xff]  ;;  %v21883_v58 = vld [vmem:[%s28130_s1 + $0xfc0] sm:$0xff]  }
 0x1bb   :  { %v19556_v0 = vpop.f32.mrb[27].mxu1  ;;  %19856 = vmatprep.subr.bf16.mxu1 %v21842_v50  ;;  %v3499_v50 = vrot.slane %v29_v47, %v23126_v41  ;;  %v3492_v51 = vcombine.high %v29_v47, %v29_v47  ;;  %v21881_v53 = vld [vmem:[%s28130_s1 + $0xeb8] sm:$0xff]   ;;  %v21885_v62 = vld [vmem:[%s28130_s1 + $0xf80] sm:$0xff]  }
 0x1bc   :  { %v24481_v2 = vadd.f32 %v19554_v61, %v14248_v60  ;;  %19835 = vmatpush3.bf16.msra.mxu0 %v21843_v52  ;;  %v21884_v60 = vld [vmem:[%s28130_s1 + $0xf00] sm:$0xff]  }
 0x1bd   :  { %19836 = vmatprep.subr.bf16.mxu0 %v21845_v57  ;;  %v3507_v54 = vcombine.high %v3499_v50, %v3499_v50  ;;  %v3515_v55 = vrot.slane %v3499_v50, %v23126_v41  ;;  %v24596_v57 = vrot.slane %v3492_v51, %v23126_v41  ;;  %v21917_v47 = vld [vmem:[%s28130_s1 + $0x1000] sm:$0xff]   ;;  %v21919_v50 = vld [vmem:[%s28130_s1 + $0x1048] sm:$0xff]  }
 0x1be   :  { %19857 = vmatpush3.bf16.msra.mxu1 %v21844_v56  ;;  %v21882_v56 = vld [vmem:[%s28130_s1 + $0xf40] sm:$0xff]   ;;  %v21920_v51 = vld [vmem:[%s28130_s1 + $0x10c8] sm:$0xff]  }
 0x1bf   :  { %19858 = vmatprep.subr.bf16.mxu1 %v21846_v63  ;;  %v3529_v59 = vrot.slane %v3507_v54, %v23126_v41  ;;  %v3508_v61 = vcombine.high %v24596_v57, %v24596_v57  ;;  %v3537_v0 = vcombine.high %v3515_v55, %v3515_v55  ;;  %v21923_v54 = vld [vmem:[%s28130_s1 + $0x1050] sm:$0xff]  }
 0x1c0   :  { %19837 = vmatpush3.bf16.msra.mxu0 %v21847_v1  ;;  %v21886_v1 = vld [vmem:[%s28130_s1 + $0xf48] sm:$0xff]  }
 0x1c1   :  { %19866 = vmatprep.subr.bf16.mxu0 %v21850_v5  ;;  %v3539_v63 = vcombine.high %v3529_v59, %v3529_v59 }
 0x1c2   :  { %19859 = vmatpush3.bf16.msra.mxu1 %v21848_v3  ;;  %v21887_v3 = vld [vmem:[%s28130_s1 + $0xfc8] sm:$0xff]  }
 0x1c3   :  { %14806 = vmatmul.mubr.bf16.vlgmr.msra.gmra.mrb[52].mxu0 %v3473_v4  ;;  %19888 = vmatprep.subr.bf16.mxu1 %v21851_v6  ;;  %v21888_v4 = vld [vmem:[%s28130_s1 + $0xf08] sm:$0xff]  }
 0x1c4   :  { %19867 = vmatpush3.bf16.msra.mxu0 %v21852_v7  ;;  %14885 = vmatprep.mubr.bf16.mxu0 %v3529_v59  ;;  %v21889_v6 = vld [vmem:[%s28130_s1 + $0xf88] sm:$0xff]   ;;  %v21890_v7 = vld [vmem:[%s28130_s1 + $0xf50] sm:$0xff]   ;;  %v21928_v59 = vld [vmem:[%s28130_s1 + $0x10d8] sm:$0xff]  }
 0x1c5   :  { %14846 = vmatmul.mubr.bf16.vlgmr.msra.gmra.mrb[52].mxu1 %v3489_v9  ;;  %19868 = vmatprep.subr.bf16.mxu0 %v21854_v10  ;;  %v21892_v9 = vld [vmem:[%s28130_s1 + $0xf10] sm:$0xff]  }
 0x1c6   :  { %19889 = vmatpush3.bf16.msra.mxu1 %v21853_v8  ;;  %14925 = vmatprep.mubr.bf16.mxu1 %v3539_v63  ;;  %v21891_v8 = vld [vmem:[%s28130_s1 + $0xfd0] sm:$0xff]   ;;  %v21932_v63 = vld [vmem:[%s28130_s1 + $0x10e0] sm:$0xff]  }
 0x1c7   :  { %19890 = vmatprep.subr.bf16.mxu1 %v21855_v11  ;;  %v21893_v10 = vld [vmem:[%s28130_s1 + $0xf90] sm:$0xff]   ;;  %v21894_v11 = vld [vmem:[%s28130_s1 + $0xf58] sm:$0xff]  }
 0x1c8   :  { %19869 = vmatpush3.bf16.msra.mxu0 %v21856_v12  ;;  %v21895_v12 = vld [vmem:[%s28130_s1 + $0xfd8] sm:$0xff]  }
 0x1c9   :  { %19870 = vmatprep.subr.bf16.mxu0 %v21858_v14  ;;  %v21897_v14 = vld [vmem:[%s28130_s1 + $0xf98] sm:$0xff]  }
 0x1ca   :  { %19891 = vmatpush3.bf16.msra.mxu1 %v21857_v13  ;;  %v21896_v13 = vld [vmem:[%s28130_s1 + $0xf18] sm:$0xff]  }
 0x1cb   :  { %19892 = vmatprep.subr.bf16.mxu1 %v21859_v15  ;;  %v21898_v15 = vld [vmem:[%s28130_s1 + $0xf60] sm:$0xff]  }
 0x1cc   :  { %19871 = vmatpush3.bf16.msra.mxu0 %v21860_v16  ;;  %v21899_v16 = vld [vmem:[%s28130_s1 + $0xfe0] sm:$0xff]  }
 0x1cd   :  { %19872 = vmatprep.subr.bf16.mxu0 %v21862_v18  ;;  %v21901_v18 = vld [vmem:[%s28130_s1 + $0xfa0] sm:$0xff]  }
 0x1ce   :  { %19893 = vmatpush3.bf16.msra.mxu1 %v21861_v17  ;;  %v21900_v17 = vld [vmem:[%s28130_s1 + $0xf20] sm:$0xff]  }
 0x1cf   :  { %19894 = vmatprep.subr.bf16.mxu1 %v21863_v19  ;;  %v21902_v19 = vld [vmem:[%s28130_s1 + $0xf68] sm:$0xff]  }
 0x1d0   :  { %19873 = vmatpush3.bf16.msra.mxu0 %v21864_v20  ;;  %v21903_v20 = vld [vmem:[%s28130_s1 + $0xfe8] sm:$0xff]  }
 0x1d1   :  { %19874 = vmatprep.subr.bf16.mxu0 %v21866_v22  ;;  %v21905_v22 = vld [vmem:[%s28130_s1 + $0xfa8] sm:$0xff]  }
 0x1d2   :  { %19895 = vmatpush3.bf16.msra.mxu1 %v21865_v21  ;;  %v21904_v21 = vld [vmem:[%s28130_s1 + $0xf28] sm:$0xff]  }
 0x1d3   :  { %19896 = vmatprep.subr.bf16.mxu1 %v21867_v23  ;;  %v21906_v23 = vld [vmem:[%s28130_s1 + $0xf70] sm:$0xff]  }
 0x1d4   :  { %19875 = vmatpush3.bf16.msra.mxu0 %v21868_v24 }
 0x1d5   :  { %19876 = vmatprep.subr.bf16.mxu0 %v21870_v26 }
 0x1d6   :  { %19897 = vmatpush3.bf16.msra.mxu1 %v21869_v25  ;;  %v19574_v31 = vpop.f32.mrb[28].mxu0  ;;  %v21907_v25 = vld [vmem:[%s28130_s1 + $0xff0] sm:$0xff]  }
 0x1d7   :  { %v19575_v33 = vpop.f32.mrb[29].mxu0  ;;  %19898 = vmatprep.subr.bf16.mxu1 %v21871_v27  ;;  %v21908_v27 = vld [vmem:[%s28130_s1 + $0xf30] sm:$0xff]  }
 0x1d8   :  { %v19596_v35 = vpop.f32.mrb[28].mxu1  ;;  %v19576_v36 = vadd.f32 %v19575_v33, %v19574_v31  ;;  %v19577_v37 = vpop.f32.mrb[30].mxu0  ;;  %19877 = vmatpush3.bf16.msra.mxu0 %v21872_v28  ;;  %v21909_v31 = vld [vmem:[%s28130_s1 + $0xfb0] sm:$0xff]  }
 0x1d9   :  { %v19597_v39 = vpop.f32.mrb[29].mxu1  ;;  %v19578_v40 = vpop.f32.mrb[31].mxu0  ;;  %19878 = vmatprep.subr.bf16.mxu0 %v21874_v30 }
 0x1da   :  { %v14328_v44 = vadd.f32 %v19576_v36, %v24481_v2  ;;  %v19598_v45 = vadd.f32 %v19597_v39, %v19596_v35  ;;  %v19599_v46 = vpop.f32.mrb[30].mxu1  ;;  %19899 = vmatpush3.bf16.msra.mxu1 %v21873_v29  ;;  %v3536_v2 = vrot.slane %v3508_v61, %v23126_v41  ;;  %v21912_v40 = vld [vmem:[%s28130_s1 + $0xf38] sm:$0xff]  }
 0x1db   :  { %v19600_v48 = vpop.f32.mrb[31].mxu1  ;;  %19900 = vmatprep.subr.bf16.mxu1 %v21875_v32  ;;  %v21910_v32 = vld [vmem:[%s28130_s1 + $0xf78] sm:$0xff]   ;;  %v21916_v46 = vld [vmem:[%s28130_s1 + $0x10c0] sm:$0xff]  }
 0x1dc   :  { %v24586_v52 = vadd.f32 %v19598_v45, %v14328_v44  ;;  %19879 = vmatpush3.bf16.msra.mxu0 %v21876_v34  ;;  %v3540_v5 = vcombine.high %v3536_v2, %v3536_v2  ;;  %v3522_v44 = vrot.slane %v24596_v57, %v23126_v41  ;;  %v21915_v45 = vld [vmem:[%s28130_s1 + $0x1040] sm:$0xff]   ;;  %v21926_v57 = vld [vmem:[%s28130_s1 + $0x1090] sm:$0xff]   ;;  %v21930_v61 = vld [vmem:[%s28130_s1 + $0x1098] sm:$0xff]  }
 0x1dd   :  { %19880 = vmatprep.subr.bf16.mxu0 %v21878_v42  ;;  %v21918_v48 = vld [vmem:[%s28130_s1 + $0x1080] sm:$0xff]  }
 0x1de   :  { %19901 = vmatpush3.bf16.msra.mxu1 %v21877_v38  ;;  %v21911_v38 = vld [vmem:[%s28130_s1 + $0xff8] sm:$0xff]  }
 0x1df   :  { %19902 = vmatprep.subr.bf16.mxu1 %v21879_v43  ;;  %v21913_v43 = vld [vmem:[%s28130_s1 + $0xfb8] sm:$0xff]  }
 0x1e0   :  { %19881 = vmatpush3.bf16.msra.mxu0 %v21880_v49  ;;  %v3538_v49 = vcombine.high %v3522_v44, %v3522_v44 }
 0x1e1   :  { %19910 = vmatprep.subr.bf16.mxu0 %v21882_v56  ;;  %v21925_v56 = vld [vmem:[%s28130_s1 + $0x1010] sm:$0xff]  }
 0x1e2   :  { %19903 = vmatpush3.bf16.msra.mxu1 %v21881_v53  ;;  %v21922_v53 = vld [vmem:[%s28130_s1 + $0x1088] sm:$0xff]  }
 0x1e3   :  { %14886 = vmatmul.mubr.bf16.vlgmr.msra.gmra.mrb[56].mxu0 %v3515_v55  ;;  %19932 = vmatprep.subr.bf16.mxu1 %v21883_v58  ;;  %v21924_v55 = vld [vmem:[%s28130_s1 + $0x10d0] sm:$0xff]   ;;  %v21927_v58 = vld [vmem:[%s28130_s1 + $0x1058] sm:$0xff]  }
 0x1e4   :  { %19911 = vmatpush3.bf16.msra.mxu0 %v21884_v60  ;;  %14965 = vmatprep.mubr.bf16.mxu0 %v3536_v2  ;;  %v21929_v60 = vld [vmem:[%s28130_s1 + $0x1018] sm:$0xff]   ;;  %v21935_v2 = vld [vmem:[%s28130_s1 + $0x1068] sm:$0xff]  }
 0x1e5   :  { %14926 = vmatmul.mubr.bf16.vlgmr.msra.gmra.mrb[56].mxu1 %v3537_v0  ;;  %19912 = vmatprep.subr.bf16.mxu0 %v21886_v1  ;;  %v21933_v0 = vld [vmem:[%s28130_s1 + $0x1020] sm:$0xff]  }
 0x1e6   :  { %19933 = vmatpush3.bf16.msra.mxu1 %v21885_v62  ;;  %15005 = vmatprep.mubr.bf16.mxu1 %v3540_v5  ;;  %v21931_v62 = vld [vmem:[%s28130_s1 + $0x1060] sm:$0xff]   ;;  %v21938_v5 = vld [vmem:[%s28130_s1 + $0x10a8] sm:$0xff]  }
 0x1e7   :  { %19934 = vmatprep.subr.bf16.mxu1 %v21887_v3  ;;  %v21934_v1 = vld [vmem:[%s28130_s1 + $0x10a0] sm:$0xff]   ;;  %v21936_v3 = vld [vmem:[%s28130_s1 + $0x10e8] sm:$0xff]  }
 0x1e8   :  { %19913 = vmatpush3.bf16.msra.mxu0 %v21888_v4  ;;  %v21937_v4 = vld [vmem:[%s28130_s1 + $0x1028] sm:$0xff]  }
 0x1e9   :  { %19914 = vmatprep.subr.bf16.mxu0 %v21890_v7 }
 0x1ea   :  { %19935 = vmatpush3.bf16.msra.mxu1 %v21889_v6  ;;  %v21939_v6 = vld [vmem:[%s28130_s1 + $0x1070] sm:$0xff]  }
 0x1eb   :  { %19936 = vmatprep.subr.bf16.mxu1 %v21891_v8  ;;  %v21940_v8 = vld [vmem:[%s28130_s1 + $0x10f0] sm:$0xff]  }
 0x1ec   :  { %19915 = vmatpush3.bf16.msra.mxu0 %v21892_v9 }
 0x1ed   :  { %19916 = vmatprep.subr.bf16.mxu0 %v21894_v11 }
 0x1ee   :  { %19937 = vmatpush3.bf16.msra.mxu1 %v21893_v10  ;;  %v21941_v10 = vld [vmem:[%s28130_s1 + $0x1030] sm:$0xff]  }
 0x1ef   :  { %19938 = vmatprep.subr.bf16.mxu1 %v21895_v12 }
 0x1f0   :  { %19917 = vmatpush3.bf16.msra.mxu0 %v21896_v13 }
 0x1f1   :  { %19918 = vmatprep.subr.bf16.mxu0 %v21898_v15 }
 0x1f2   :  { %19939 = vmatpush3.bf16.msra.mxu1 %v21897_v14  ;;  %v21942_v14 = vld [vmem:[%s28130_s1 + $0x10b0] sm:$0xff]  }
 0x1f3   :  { %19940 = vmatprep.subr.bf16.mxu1 %v21899_v16 }
 0x1f4   :  { %19919 = vmatpush3.bf16.msra.mxu0 %v21900_v17  ;;  %v21943_v17 = vld [vmem:[%s28130_s1 + $0x1078] sm:$0xff]  }
 0x1f5   :  { %19920 = vmatprep.subr.bf16.mxu0 %v21902_v19 }
 0x1f6   :  { %19941 = vmatpush3.bf16.msra.mxu1 %v21901_v18  ;;  %v19618_v24 = vpop.f32.mrb[32].mxu0  ;;  %v21944_v18 = vld [vmem:[%s28130_s1 + $0x10f8] sm:$0xff]  }
 0x1f7   :  { %v19619_v26 = vpop.f32.mrb[33].mxu0  ;;  %19942 = vmatprep.subr.bf16.mxu1 %v21903_v20 }
 0x1f8   :  { %v19640_v28 = vpop.f32.mrb[32].mxu1  ;;  %v19620_v29 = vadd.f32 %v19619_v26, %v19618_v24  ;;  %v19621_v30 = vpop.f32.mrb[34].mxu0  ;;  %19921 = vmatpush3.bf16.msra.mxu0 %v21904_v21  ;;  %v30_v24 = vld [vmem:[%s28129_s0 + $0x40] sm:$0xff]  ;;  %v21946_v26 = vld [vmem:[%s28130_s1 + $0x10b8] sm:$0xff]  }
 0x1f9   :  { %v19641_v33 = vpop.f32.mrb[33].mxu1  ;;  %v19622_v34 = vpop.f32.mrb[35].mxu0  ;;  %19922 = vmatprep.subr.bf16.mxu0 %v21906_v23 }
 0x1fa   :  { %v14408_v35 = vadd.f32 %v19620_v29, %v24586_v52  ;;  %v19642_v36 = vadd.f32 %v19641_v33, %v19640_v28  ;;  %v19643_v37 = vpop.f32.mrb[34].mxu1  ;;  %19943 = vmatpush3.bf16.msra.mxu1 %v21905_v22  ;;  %v21921_v52 = vld [vmem:[%s28130_s1 + $0x1008] sm:$0xff]   ;;  %v21945_v22 = vld [vmem:[%s28130_s1 + $0x1038] sm:$0xff]   ;;  %v3541_v28 = vcombine.high %v30_v24, %v30_v24  ;;  %v21947_v29 = vld [vmem:[%s28130_s1 + $0x1140] sm:$0xff]  }
 0x1fb   :  { %v19644_v39 = vpop.f32.mrb[35].mxu1  ;;  %19944 = vmatprep.subr.bf16.mxu1 %v21907_v25  ;;  %v21949_v34 = vld [vmem:[%s28130_s1 + $0x1100] sm:$0xff]  }
 0x1fc   :  { %v24693_v42 = vadd.f32 %v19642_v36, %v14408_v35  ;;  %19923 = vmatpush3.bf16.msra.mxu0 %v21908_v27  ;;  %v3548_v27 = vrot.slane %v30_v24, %v23126_v41  ;;  %v24811_v33 = vrot.slane %v3541_v28, %v23126_v41  ;;  %v21950_v36 = vld [vmem:[%s28130_s1 + $0x1180] sm:$0xff]   ;;  %v21951_v39 = vld [vmem:[%s28130_s1 + $0x1148] sm:$0xff]  }
 0x1fd   :  { %19924 = vmatprep.subr.bf16.mxu0 %v21910_v32  ;;  %v21948_v32 = vld [vmem:[%s28130_s1 + $0x11c0] sm:$0xff]   ;;  %v21987_v28 = vld [vmem:[%s28130_s1 + $0x1288] sm:$0xff]  }
 0x1fe   :  { %19945 = vmatpush3.bf16.msra.mxu1 %v21909_v31  ;;  %v3556_v30 = vcombine.high %v3548_v27, %v3548_v27  ;;  %v3564_v31 = vrot.slane %v3548_v27, %v23126_v41  ;;  %v3557_v37 = vcombine.high %v24811_v33, %v24811_v33  ;;  %v21986_v27 = vld [vmem:[%s28130_s1 + $0x1208] sm:$0xff]  }
 0x1ff   :  { %19946 = vmatprep.subr.bf16.mxu1 %v21911_v38 }
 0x200   :  { %19925 = vmatpush3.bf16.msra.mxu0 %v21912_v40  ;;  %v3578_v35 = vrot.slane %v3556_v30, %v23126_v41  ;;  %v3586_v38 = vcombine.high %v3564_v31, %v3564_v31  ;;  %v21989_v30 = vld [vmem:[%s28130_s1 + $0x12d0] sm:$0xff]  }
 0x201   :  { %19954 = vmatprep.subr.bf16.mxu0 %v21915_v45  ;;  %v21954_v45 = vld [vmem:[%s28130_s1 + $0x1188] sm:$0xff]  }
 0x202   :  { %19947 = vmatpush3.bf16.msra.mxu1 %v21913_v43  ;;  %v3588_v40 = vcombine.high %v3578_v35, %v3578_v35  ;;  %v3585_v43 = vrot.slane %v3557_v37, %v23126_v41  ;;  %v21996_v37 = vld [vmem:[%s28130_s1 + $0x1260] sm:$0xff]  }
 0x203   :  { %14966 = vmatmul.mubr.bf16.vlgmr.msra.gmra.mrb[60].mxu0 %v3522_v44  ;;  %19976 = vmatprep.subr.bf16.mxu1 %v21916_v46  ;;  %v21953_v44 = vld [vmem:[%s28130_s1 + $0x1108] sm:$0xff]  }
 0x204   :  { %19955 = vmatpush3.bf16.msra.mxu0 %v21917_v47  ;;  %15045 = vmatprep.mubr.bf16.mxu0 %v3578_v35  ;;  %v3589_v46 = vcombine.high %v3585_v43, %v3585_v43  ;;  %v21955_v47 = vld [vmem:[%s28130_s1 + $0x1150] sm:$0xff]   ;;  %v21994_v35 = vld [vmem:[%s28130_s1 + $0x1218] sm:$0xff]  }
 0x205   :  { %15006 = vmatmul.mubr.bf16.vlgmr.msra.gmra.mrb[60].mxu1 %v3538_v49  ;;  %19956 = vmatprep.subr.bf16.mxu0 %v21919_v50  ;;  %v21957_v49 = vld [vmem:[%s28130_s1 + $0x1110] sm:$0xff]  }
 0x206   :  { %19977 = vmatpush3.bf16.msra.mxu1 %v21918_v48  ;;  %15085 = vmatprep.mubr.bf16.mxu1 %v3588_v40  ;;  %v21956_v48 = vld [vmem:[%s28130_s1 + $0x11d0] sm:$0xff]   ;;  %v21999_v40 = vld [vmem:[%s28130_s1 + $0x12a0] sm:$0xff]  }
 0x207   :  { %19978 = vmatprep.subr.bf16.mxu1 %v21920_v51  ;;  %v21958_v50 = vld [vmem:[%s28130_s1 + $0x1190] sm:$0xff]   ;;  %v21959_v51 = vld [vmem:[%s28130_s1 + $0x1158] sm:$0xff]  }
 0x208   :  { %19957 = vmatpush3.bf16.msra.mxu0 %v21921_v52  ;;  %v21960_v52 = vld [vmem:[%s28130_s1 + $0x11d8] sm:$0xff]  }
 0x209   :  { %19958 = vmatprep.subr.bf16.mxu0 %v21923_v54  ;;  %v21962_v54 = vld [vmem:[%s28130_s1 + $0x1198] sm:$0xff]  }
 0x20a   :  { %19979 = vmatpush3.bf16.msra.mxu1 %v21922_v53  ;;  %v21961_v53 = vld [vmem:[%s28130_s1 + $0x1118] sm:$0xff]  }
 0x20b   :  { %19980 = vmatprep.subr.bf16.mxu1 %v21924_v55  ;;  %v21963_v55 = vld [vmem:[%s28130_s1 + $0x1160] sm:$0xff]  }
 0x20c   :  { %19959 = vmatpush3.bf16.msra.mxu0 %v21925_v56  ;;  %v21964_v56 = vld [vmem:[%s28130_s1 + $0x11e0] sm:$0xff]  }
 0x20d   :  { %19960 = vmatprep.subr.bf16.mxu0 %v21927_v58  ;;  %v21966_v58 = vld [vmem:[%s28130_s1 + $0x11a0] sm:$0xff]  }
 0x20e   :  { %19981 = vmatpush3.bf16.msra.mxu1 %v21926_v57  ;;  %v21965_v57 = vld [vmem:[%s28130_s1 + $0x1120] sm:$0xff]  }
 0x20f   :  { %19982 = vmatprep.subr.bf16.mxu1 %v21928_v59  ;;  %v21967_v59 = vld [vmem:[%s28130_s1 + $0x1168] sm:$0xff]  }
 0x210   :  { %19961 = vmatpush3.bf16.msra.mxu0 %v21929_v60  ;;  %v21968_v60 = vld [vmem:[%s28130_s1 + $0x11e8] sm:$0xff]  }
 0x211   :  { %19962 = vmatprep.subr.bf16.mxu0 %v21931_v62  ;;  %v21970_v62 = vld [vmem:[%s28130_s1 + $0x11a8] sm:$0xff]  }
 0x212   :  { %19983 = vmatpush3.bf16.msra.mxu1 %v21930_v61  ;;  %v21969_v61 = vld [vmem:[%s28130_s1 + $0x1128] sm:$0xff]  }
 0x213   :  { %19984 = vmatprep.subr.bf16.mxu1 %v21932_v63  ;;  %v21971_v63 = vld [vmem:[%s28130_s1 + $0x1170] sm:$0xff]  }
 0x214   :  { %19963 = vmatpush3.bf16.msra.mxu0 %v21933_v0 }
 0x215   :  { %19964 = vmatprep.subr.bf16.mxu0 %v21935_v2 }
 0x216   :  { %19985 = vmatpush3.bf16.msra.mxu1 %v21934_v1  ;;  %v19662_v7 = vpop.f32.mrb[36].mxu0  ;;  %v21972_v1 = vld [vmem:[%s28130_s1 + $0x11f0] sm:$0xff]  }
 0x217   :  { %v19663_v9 = vpop.f32.mrb[37].mxu0  ;;  %19986 = vmatprep.subr.bf16.mxu1 %v21936_v3  ;;  %v21973_v3 = vld [vmem:[%s28130_s1 + $0x1130] sm:$0xff]  }
 0x218   :  { %v19684_v11 = vpop.f32.mrb[36].mxu1  ;;  %v19664_v12 = vadd.f32 %v19663_v9, %v19662_v7  ;;  %v19665_v13 = vpop.f32.mrb[38].mxu0  ;;  %19965 = vmatpush3.bf16.msra.mxu0 %v21937_v4  ;;  %v21974_v7 = vld [vmem:[%s28130_s1 + $0x11b0] sm:$0xff]  }
 0x219   :  { %v19685_v15 = vpop.f32.mrb[37].mxu1  ;;  %v19666_v16 = vpop.f32.mrb[39].mxu0  ;;  %19966 = vmatprep.subr.bf16.mxu0 %v21939_v6 }
 0x21a   :  { %v14488_v19 = vadd.f32 %v19664_v12, %v24693_v42  ;;  %v19686_v20 = vadd.f32 %v19685_v15, %v19684_v11  ;;  %v19687_v21 = vpop.f32.mrb[38].mxu1  ;;  %19987 = vmatpush3.bf16.msra.mxu1 %v21938_v5  ;;  %v21952_v42 = vld [vmem:[%s28130_s1 + $0x11c8] sm:$0xff]   ;;  %v21977_v16 = vld [vmem:[%s28130_s1 + $0x1138] sm:$0xff]  }
 0x21b   :  { %v19688_v23 = vpop.f32.mrb[39].mxu1  ;;  %19988 = vmatprep.subr.bf16.mxu1 %v21940_v8  ;;  %v21975_v8 = vld [vmem:[%s28130_s1 + $0x1178] sm:$0xff]   ;;  %v21981_v21 = vld [vmem:[%s28130_s1 + $0x12c0] sm:$0xff]  }
 0x21c   :  { %v24797_v25 = vadd.f32 %v19686_v20, %v14488_v19  ;;  %19967 = vmatpush3.bf16.msra.mxu0 %v21941_v10  ;;  %v3571_v19 = vrot.slane %v24811_v33, %v23126_v41  ;;  %v21980_v20 = vld [vmem:[%s28130_s1 + $0x1240] sm:$0xff]   ;;  %v21992_v33 = vld [vmem:[%s28130_s1 + $0x1258] sm:$0xff]  }
 0x21d   :  { %19968 = vmatprep.subr.bf16.mxu0 %v21943_v17  ;;  %v21983_v23 = vld [vmem:[%s28130_s1 + $0x1280] sm:$0xff]  }
 0x21e   :  { %19989 = vmatpush3.bf16.msra.mxu1 %v21942_v14  ;;  %v21976_v14 = vld [vmem:[%s28130_s1 + $0x11f8] sm:$0xff]   ;;  %v3587_v24 = vcombine.high %v3571_v19, %v3571_v19 }
 0x21f   :  { %19990 = vmatprep.subr.bf16.mxu1 %v21944_v18  ;;  %v21978_v18 = vld [vmem:[%s28130_s1 + $0x11b8] sm:$0xff]  }
 0x220   :  { %19969 = vmatpush3.bf16.msra.mxu0 %v21945_v22  ;;  %v21982_v22 = vld [vmem:[%s28130_s1 + $0x1200] sm:$0xff]  }
 0x221   :  { %19998 = vmatprep.subr.bf16.mxu0 %v21947_v29  ;;  %v21988_v29 = vld [vmem:[%s28130_s1 + $0x1250] sm:$0xff]  }
 0x222   :  { %19991 = vmatpush3.bf16.msra.mxu1 %v21946_v26  ;;  %v21985_v26 = vld [vmem:[%s28130_s1 + $0x12c8] sm:$0xff]  }
 0x223   :  { %15046 = vmatmul.mubr.bf16.vlgmr.msra.gmra.mrb[64].mxu0 %v3564_v31  ;;  %20020 = vmatprep.subr.bf16.mxu1 %v21948_v32  ;;  %v21990_v31 = vld [vmem:[%s28130_s1 + $0x1210] sm:$0xff]  }
 0x224   :  { %19999 = vmatpush3.bf16.msra.mxu0 %v21949_v34  ;;  %15125 = vmatprep.mubr.bf16.mxu0 %v3585_v43  ;;  %v21991_v32 = vld [vmem:[%s28130_s1 + $0x1290] sm:$0xff]   ;;  %v21993_v34 = vld [vmem:[%s28130_s1 + $0x12d8] sm:$0xff]   ;;  %v22001_v43 = vld [vmem:[%s28130_s1 + $0x12e8] sm:$0xff]  }
 0x225   :  { %15086 = vmatmul.mubr.bf16.vlgmr.msra.gmra.mrb[64].mxu1 %v3586_v38  ;;  %20000 = vmatprep.subr.bf16.mxu0 %v21951_v39  ;;  %v21997_v38 = vld [vmem:[%s28130_s1 + $0x12e0] sm:$0xff]  }
 0x226   :  { %20021 = vmatpush3.bf16.msra.mxu1 %v21950_v36  ;;  %15165 = vmatprep.mubr.bf16.mxu1 %v3589_v46  ;;  %v21995_v36 = vld [vmem:[%s28130_s1 + $0x1298] sm:$0xff]   ;;  %v21998_v39 = vld [vmem:[%s28130_s1 + $0x1220] sm:$0xff]   ;;  %v22004_v46 = vld [vmem:[%s28130_s1 + $0x1270] sm:$0xff]  }
 0x227   :  { %20022 = vmatprep.subr.bf16.mxu1 %v21952_v42  ;;  %v22000_v42 = vld [vmem:[%s28130_s1 + $0x1268] sm:$0xff]  }
 0x228   :  { %20001 = vmatpush3.bf16.msra.mxu0 %v21953_v44  ;;  %v22002_v44 = vld [vmem:[%s28130_s1 + $0x1228] sm:$0xff]  }
 0x229   :  { %20002 = vmatprep.subr.bf16.mxu0 %v21955_v47 }
 0x22a   :  { %20023 = vmatpush3.bf16.msra.mxu1 %v21954_v45  ;;  %v22003_v45 = vld [vmem:[%s28130_s1 + $0x12a8] sm:$0xff]  }
 0x22b   :  { %20024 = vmatprep.subr.bf16.mxu1 %v21956_v48  ;;  %v22005_v48 = vld [vmem:[%s28130_s1 + $0x12f0] sm:$0xff]  }
 0x22c   :  { %20003 = vmatpush3.bf16.msra.mxu0 %v21957_v49 }
 0x22d   :  { %20004 = vmatprep.subr.bf16.mxu0 %v21959_v51 }
 0x22e   :  { %20025 = vmatpush3.bf16.msra.mxu1 %v21958_v50  ;;  %v22006_v50 = vld [vmem:[%s28130_s1 + $0x1230] sm:$0xff]  }
 0x22f   :  { %20026 = vmatprep.subr.bf16.mxu1 %v21960_v52 }
 0x230   :  { %20005 = vmatpush3.bf16.msra.mxu0 %v21961_v53 }
 0x231   :  { %20006 = vmatprep.subr.bf16.mxu0 %v21963_v55 }
 0x232   :  { %20027 = vmatpush3.bf16.msra.mxu1 %v21962_v54 }
 0x233   :  { %20028 = vmatprep.subr.bf16.mxu1 %v21964_v56  ;;  %v22007_v56 = vld [vmem:[%s28130_s1 + $0x12b0] sm:$0xff]  }
 0x234   :  { %20007 = vmatpush3.bf16.msra.mxu0 %v21965_v57  ;;  %v22008_v57 = vld [vmem:[%s28130_s1 + $0x1278] sm:$0xff]  }
 0x235   :  { %20008 = vmatprep.subr.bf16.mxu0 %v21967_v59 }
 0x236   :  { %20029 = vmatpush3.bf16.msra.mxu1 %v21966_v58  ;;  %v19706_v0 = vpop.f32.mrb[40].mxu0 }
 0x237   :  { %v19707_v2 = vpop.f32.mrb[41].mxu0  ;;  %20030 = vmatprep.subr.bf16.mxu1 %v21968_v60 }
 0x238   :  { %v19728_v4 = vpop.f32.mrb[40].mxu1  ;;  %v19708_v5 = vadd.f32 %v19707_v2, %v19706_v0  ;;  %v19709_v6 = vpop.f32.mrb[42].mxu0  ;;  %20009 = vmatpush3.bf16.msra.mxu0 %v21969_v61  ;;  %v22009_v61 = vld [vmem:[%s28130_s1 + $0x12f8] sm:$0xff]  }
 0x239   :  { %v19729_v9 = vpop.f32.mrb[41].mxu1  ;;  %v19710_v10 = vpop.f32.mrb[43].mxu0  ;;  %20010 = vmatprep.subr.bf16.mxu0 %v21971_v63  ;;  %v22010_v63 = vld [vmem:[%s28130_s1 + $0x1238] sm:$0xff]  }
 0x23a   :  { %v14568_v11 = vadd.f32 %v19708_v5, %v24797_v25  ;;  %v19730_v12 = vadd.f32 %v19729_v9, %v19728_v4  ;;  %v19731_v13 = vpop.f32.mrb[42].mxu1  ;;  %20031 = vmatpush3.bf16.msra.mxu1 %v21970_v62  ;;  %v21984_v25 = vld [vmem:[%s28130_s1 + $0x1248] sm:$0xff]   ;;  %v22011_v5 = vld [vmem:[%s28130_s1 + $0x12b8] sm:$0xff]  }
 0x23b   :  { %v19732_v15 = vpop.f32.mrb[43].mxu1  ;;  %20032 = vmatprep.subr.bf16.mxu1 %v21972_v1  ;;  %v31_v1 = vld [vmem:[%s28129_s0 + $0x48] sm:$0xff] }
 0x23c   :  { %v24905_v17 = vadd.f32 %v19730_v12, %v14568_v11  ;;  %20011 = vmatpush3.bf16.msra.mxu0 %v21973_v3  ;;  %v3597_v2 = vrot.slane %v31_v1, %v23126_v41  ;;  %v22012_v3 = vld [vmem:[%s28130_s1 + $0x1340] sm:$0xff]   ;;  %v3590_v4 = vcombine.high %v31_v1, %v31_v1  ;;  %v22049_v1 = vld [vmem:[%s28130_s1 + $0x1448] sm:$0xff]  }
 0x23d   :  { %20012 = vmatprep.subr.bf16.mxu0 %v21975_v8  ;;  %v22013_v8 = vld [vmem:[%s28130_s1 + $0x13c0] sm:$0xff]  }
 0x23e   :  { %20033 = vmatpush3.bf16.msra.mxu1 %v21974_v7  ;;  %v3605_v6 = vcombine.high %v3597_v2, %v3597_v2  ;;  %v3613_v7 = vrot.slane %v3597_v2, %v23126_v41  ;;  %v25023_v9 = vrot.slane %v3590_v4, %v23126_v41  ;;  %v22014_v11 = vld [vmem:[%s28130_s1 + $0x1300] sm:$0xff]   ;;  %v22050_v2 = vld [vmem:[%s28130_s1 + $0x14c8] sm:$0xff]  }
 0x23f   :  { %20034 = vmatprep.subr.bf16.mxu1 %v21976_v14  ;;  %v22016_v14 = vld [vmem:[%s28130_s1 + $0x1348] sm:$0xff]  }
 0x240   :  { %20013 = vmatpush3.bf16.msra.mxu0 %v21977_v16  ;;  %v3627_v10 = vrot.slane %v3605_v6, %v23126_v41  ;;  %v3606_v12 = vcombine.high %v25023_v9, %v25023_v9  ;;  %v3635_v13 = vcombine.high %v3613_v7, %v3613_v7  ;;  %v22015_v16 = vld [vmem:[%s28130_s1 + $0x1380] sm:$0xff]   ;;  %v22052_v4 = vld [vmem:[%s28130_s1 + $0x1488] sm:$0xff]   ;;  %v22054_v6 = vld [vmem:[%s28130_s1 + $0x14d0] sm:$0xff]  }
 0x241   :  { %20042 = vmatprep.subr.bf16.mxu0 %v21980_v20 }
 0x242   :  { %20035 = vmatpush3.bf16.msra.mxu1 %v21978_v18  ;;  %v3637_v15 = vcombine.high %v3627_v10, %v3627_v10  ;;  %v22017_v18 = vld [vmem:[%s28130_s1 + $0x13c8] sm:$0xff]  }
 0x243   :  { %15126 = vmatmul.mubr.bf16.vlgmr.msra.gmra.mrb[68].mxu0 %v3571_v19  ;;  %20064 = vmatprep.subr.bf16.mxu1 %v21981_v21  ;;  %v22018_v19 = vld [vmem:[%s28130_s1 + $0x1308] sm:$0xff]   ;;  %v22020_v21 = vld [vmem:[%s28130_s1 + $0x1350] sm:$0xff]  }
 0x244   :  { %20043 = vmatpush3.bf16.msra.mxu0 %v21982_v22  ;;  %15205 = vmatprep.mubr.bf16.mxu0 %v3627_v10  ;;  %v22019_v22 = vld [vmem:[%s28130_s1 + $0x1388] sm:$0xff]   ;;  %v22058_v10 = vld [vmem:[%s28130_s1 + $0x14d8] sm:$0xff]  }
 0x245   :  { %15166 = vmatmul.mubr.bf16.vlgmr.msra.gmra.mrb[68].mxu1 %v3587_v24  ;;  %20044 = vmatprep.subr.bf16.mxu0 %v21984_v25  ;;  %v22022_v24 = vld [vmem:[%s28130_s1 + $0x1310] sm:$0xff]   ;;  %v22024_v25 = vld [vmem:[%s28130_s1 + $0x1358] sm:$0xff]  }
 0x246   :  { %20065 = vmatpush3.bf16.msra.mxu1 %v21983_v23  ;;  %15245 = vmatprep.mubr.bf16.mxu1 %v3637_v15  ;;  %v22021_v23 = vld [vmem:[%s28130_s1 + $0x13d0] sm:$0xff]   ;;  %v22063_v15 = vld [vmem:[%s28130_s1 + $0x1420] sm:$0xff]  }
 0x247   :  { %20066 = vmatprep.subr.bf16.mxu1 %v21985_v26  ;;  %v22023_v26 = vld [vmem:[%s28130_s1 + $0x1390] sm:$0xff]  }
 0x248   :  { %20045 = vmatpush3.bf16.msra.mxu0 %v21986_v27  ;;  %v22025_v27 = vld [vmem:[%s28130_s1 + $0x13d8] sm:$0xff]  }
 0x249   :  { %20046 = vmatprep.subr.bf16.mxu0 %v21988_v29  ;;  %v22028_v29 = vld [vmem:[%s28130_s1 + $0x1360] sm:$0xff]  }
 0x24a   :  { %20067 = vmatpush3.bf16.msra.mxu1 %v21987_v28  ;;  %v22026_v28 = vld [vmem:[%s28130_s1 + $0x1318] sm:$0xff]  }
 0x24b   :  { %20068 = vmatprep.subr.bf16.mxu1 %v21989_v30  ;;  %v22027_v30 = vld [vmem:[%s28130_s1 + $0x1398] sm:$0xff]  }
 0x24c   :  { %20047 = vmatpush3.bf16.msra.mxu0 %v21990_v31  ;;  %v22029_v31 = vld [vmem:[%s28130_s1 + $0x13e0] sm:$0xff]  }
 0x24d   :  { %20048 = vmatprep.subr.bf16.mxu0 %v21992_v33  ;;  %v22032_v33 = vld [vmem:[%s28130_s1 + $0x1368] sm:$0xff]  }
 0x24e   :  { %20069 = vmatpush3.bf16.msra.mxu1 %v21991_v32  ;;  %v22030_v32 = vld [vmem:[%s28130_s1 + $0x1320] sm:$0xff]  }
 0x24f   :  { %20070 = vmatprep.subr.bf16.mxu1 %v21993_v34  ;;  %v22031_v34 = vld [vmem:[%s28130_s1 + $0x13a0] sm:$0xff]  }
 0x250   :  { %20049 = vmatpush3.bf16.msra.mxu0 %v21994_v35  ;;  %v22033_v35 = vld [vmem:[%s28130_s1 + $0x13e8] sm:$0xff]  }
 0x251   :  { %20050 = vmatprep.subr.bf16.mxu0 %v21996_v37 }
 0x252   :  { %20071 = vmatpush3.bf16.msra.mxu1 %v21995_v36  ;;  %v22034_v36 = vld [vmem:[%s28130_s1 + $0x1328] sm:$0xff]  }
 0x253   :  { %20072 = vmatprep.subr.bf16.mxu1 %v21997_v38  ;;  %v22036_v38 = vld [vmem:[%s28130_s1 + $0x1370] sm:$0xff]  }
 0x254   :  { %20051 = vmatpush3.bf16.msra.mxu0 %v21998_v39 }
 0x255   :  { %20052 = vmatprep.subr.bf16.mxu0 %v22000_v42 }
 0x256   :  { %20073 = vmatpush3.bf16.msra.mxu1 %v21999_v40  ;;  %v19750_v47 = vpop.f32.mrb[44].mxu0  ;;  %v22035_v40 = vld [vmem:[%s28130_s1 + $0x13a8] sm:$0xff]  }
 0x257   :  { %v19751_v49 = vpop.f32.mrb[45].mxu0  ;;  %20074 = vmatprep.subr.bf16.mxu1 %v22001_v43 }
 0x258   :  { %v19772_v51 = vpop.f32.mrb[44].mxu1  ;;  %v19752_v52 = vadd.f32 %v19751_v49, %v19750_v47  ;;  %v19753_v53 = vpop.f32.mrb[46].mxu0  ;;  %20053 = vmatpush3.bf16.msra.mxu0 %v22002_v44  ;;  %v22039_v49 = vld [vmem:[%s28130_s1 + $0x13b0] sm:$0xff]  }
 0x259   :  { %v19773_v54 = vpop.f32.mrb[45].mxu1  ;;  %v19754_v55 = vpop.f32.mrb[47].mxu0  ;;  %20054 = vmatprep.subr.bf16.mxu0 %v22004_v46  ;;  %v22038_v46 = vld [vmem:[%s28130_s1 + $0x1330] sm:$0xff]   ;;  %v22040_v53 = vld [vmem:[%s28130_s1 + $0x1378] sm:$0xff]  }
 0x25a   :  { %v14648_v58 = vadd.f32 %v19752_v52, %v24905_v17  ;;  %v19774_v59 = vadd.f32 %v19773_v54, %v19772_v51  ;;  %v19775_v60 = vpop.f32.mrb[46].mxu1  ;;  %20075 = vmatpush3.bf16.msra.mxu1 %v22003_v45  ;;  %v3634_v17 = vrot.slane %v3606_v12, %v23126_v41  ;;  %v22037_v45 = vld [vmem:[%s28130_s1 + $0x13f0] sm:$0xff]   ;;  %v22041_v55 = vld [vmem:[%s28130_s1 + $0x13f8] sm:$0xff]  }
 0x25b   :  { %v19776_v62 = vpop.f32.mrb[47].mxu1  ;;  %20076 = vmatprep.subr.bf16.mxu1 %v22005_v48  ;;  %v22045_v60 = vld [vmem:[%s28130_s1 + $0x1440] sm:$0xff]   ;;  %v22060_v12 = vld [vmem:[%s28130_s1 + $0x1498] sm:$0xff]  }
 0x25c   :  { %v25006_v0 = vadd.f32 %v19774_v59, %v14648_v58  ;;  %20055 = vmatpush3.bf16.msra.mxu0 %v22006_v50  ;;  %v3638_v20 = vcombine.high %v3634_v17, %v3634_v17  ;;  %v22043_v58 = vld [vmem:[%s28130_s1 + $0x13b8] sm:$0xff]   ;;  %v3620_v59 = vrot.slane %v25023_v9, %v23126_v41  ;;  %v22047_v62 = vld [vmem:[%s28130_s1 + $0x1400] sm:$0xff]  }
 0x25d   :  { %20056 = vmatprep.subr.bf16.mxu0 %v22008_v57  ;;  %v22042_v57 = vld [vmem:[%s28130_s1 + $0x1338] sm:$0xff]  }
 0x25e   :  { %20077 = vmatpush3.bf16.msra.mxu1 %v22007_v56  ;;  %v22057_v9 = vld [vmem:[%s28130_s1 + $0x1458] sm:$0xff]  }
 0x25f   :  { %20078 = vmatprep.subr.bf16.mxu1 %v22009_v61  ;;  %v22046_v61 = vld [vmem:[%s28130_s1 + $0x14c0] sm:$0xff]  }
 0x260   :  { %20057 = vmatpush3.bf16.msra.mxu0 %v22010_v63  ;;  %v22048_v63 = vld [vmem:[%s28130_s1 + $0x1480] sm:$0xff]  }
 0x261   :  { %20086 = vmatprep.subr.bf16.mxu0 %v22012_v3  ;;  %v22051_v3 = vld [vmem:[%s28130_s1 + $0x1408] sm:$0xff]  }
 0x262   :  { %20079 = vmatpush3.bf16.msra.mxu1 %v22011_v5  ;;  %v22053_v5 = vld [vmem:[%s28130_s1 + $0x1450] sm:$0xff]  }
 0x263   :  { %20108 = vmatprep.subr.bf16.mxu1 %v22013_v8  ;;  %15206 = vmatmul.mubr.bf16.vlgmr.msra.gmra.mrb[72].mxu0 %v3613_v7  ;;  %v22055_v7 = vld [vmem:[%s28130_s1 + $0x1410] sm:$0xff]  }
 0x264   :  { %20087 = vmatpush3.bf16.msra.mxu0 %v22014_v11  ;;  %15285 = vmatprep.mubr.bf16.mxu0 %v3634_v17  ;;  %v22056_v8 = vld [vmem:[%s28130_s1 + $0x1490] sm:$0xff]   ;;  %v22059_v11 = vld [vmem:[%s28130_s1 + $0x1418] sm:$0xff]   ;;  %v22065_v17 = vld [vmem:[%s28130_s1 + $0x1468] sm:$0xff]  }
 0x265   :  { %15246 = vmatmul.mubr.bf16.vlgmr.msra.gmra.mrb[72].mxu1 %v3635_v13  ;;  %20088 = vmatprep.subr.bf16.mxu0 %v22016_v14  ;;  %v22061_v13 = vld [vmem:[%s28130_s1 + $0x1460] sm:$0xff]  }
 0x266   :  { %20109 = vmatpush3.bf16.msra.mxu1 %v22015_v16  ;;  %15325 = vmatprep.mubr.bf16.mxu1 %v3638_v20  ;;  %v22062_v14 = vld [vmem:[%s28130_s1 + $0x14e0] sm:$0xff]   ;;  %v22068_v20 = vld [vmem:[%s28130_s1 + $0x14a8] sm:$0xff]  }
 0x267   :  { %20110 = vmatprep.subr.bf16.mxu1 %v22017_v18  ;;  %v22064_v16 = vld [vmem:[%s28130_s1 + $0x14a0] sm:$0xff]   ;;  %v22066_v18 = vld [vmem:[%s28130_s1 + $0x14e8] sm:$0xff]  }
 0x268   :  { %20089 = vmatpush3.bf16.msra.mxu0 %v22018_v19  ;;  %v22067_v19 = vld [vmem:[%s28130_s1 + $0x1428] sm:$0xff]  }
 0x269   :  { %20090 = vmatprep.subr.bf16.mxu0 %v22020_v21 }
 0x26a   :  { %20111 = vmatpush3.bf16.msra.mxu1 %v22019_v22  ;;  %v22069_v22 = vld [vmem:[%s28130_s1 + $0x1470] sm:$0xff]  }
 0x26b   :  { %20112 = vmatprep.subr.bf16.mxu1 %v22021_v23 }
 0x26c   :  { %20091 = vmatpush3.bf16.msra.mxu0 %v22022_v24  ;;  %v22070_v24 = vld [vmem:[%s28130_s1 + $0x14f0] sm:$0xff]  }
 0x26d   :  { %20092 = vmatprep.subr.bf16.mxu0 %v22024_v25 }
 0x26e   :  { %20113 = vmatpush3.bf16.msra.mxu1 %v22023_v26 }
 0x26f   :  { %20114 = vmatprep.subr.bf16.mxu1 %v22025_v27 }
 0x270   :  { %20093 = vmatpush3.bf16.msra.mxu0 %v22026_v28 }
 0x271   :  { %20094 = vmatprep.subr.bf16.mxu0 %v22028_v29 }
 0x272   :  { %20115 = vmatpush3.bf16.msra.mxu1 %v22027_v30  ;;  %v22071_v30 = vld [vmem:[%s28130_s1 + $0x1430] sm:$0xff]  }
 0x273   :  { %20116 = vmatprep.subr.bf16.mxu1 %v22029_v31  ;;  %v22072_v31 = vld [vmem:[%s28130_s1 + $0x14b0] sm:$0xff]  }
 0x274   :  { %20095 = vmatpush3.bf16.msra.mxu0 %v22030_v32 }
 0x275   :  { %20096 = vmatprep.subr.bf16.mxu0 %v22032_v33 }
 0x276   :  { %v19794_v37 = vpop.f32.mrb[48].mxu0  ;;  %20117 = vmatpush3.bf16.msra.mxu1 %v22031_v34 }
 0x277   :  { %v19795_v39 = vpop.f32.mrb[49].mxu0  ;;  %20118 = vmatprep.subr.bf16.mxu1 %v22033_v35  ;;  %v22073_v35 = vld [vmem:[%s28130_s1 + $0x1478] sm:$0xff]  }
 0x278   :  { %v19816_v42 = vpop.f32.mrb[48].mxu1  ;;  %v19796_v43 = vadd.f32 %v19795_v39, %v19794_v37  ;;  %v19797_v44 = vpop.f32.mrb[50].mxu0  ;;  %20097 = vmatpush3.bf16.msra.mxu0 %v22034_v36  ;;  %v22074_v37 = vld [vmem:[%s28130_s1 + $0x14f8] sm:$0xff]  }
 0x279   :  { %v19817_v47 = vpop.f32.mrb[49].mxu1  ;;  %v19798_v48 = vpop.f32.mrb[51].mxu0  ;;  %20098 = vmatprep.subr.bf16.mxu0 %v22036_v38  ;;  %v22075_v39 = vld [vmem:[%s28130_s1 + $0x1438] sm:$0xff]  }
 0x27a   :  { %v14728_v50 = vadd.f32 %v19796_v43, %v25006_v0  ;;  %v19818_v51 = vadd.f32 %v19817_v47, %v19816_v42  ;;  %v19819_v52 = vpop.f32.mrb[50].mxu1  ;;  %20119 = vmatpush3.bf16.msra.mxu1 %v22035_v40  ;;  %v3636_v0 = vcombine.high %v3620_v59, %v3620_v59  ;;  %v32_v40 = vld [vmem:[%s28129_s0 + $0x50] sm:$0xff]  ;;  %v22077_v43 = vld [vmem:[%s28130_s1 + $0x1540] sm:$0xff]  }
 0x27b   :  { %v19820_v54 = vpop.f32.mrb[51].mxu1  ;;  %20120 = vmatprep.subr.bf16.mxu1 %v22037_v45  ;;  %v3646_v42 = vrot.slane %v32_v40, %v23126_v41  ;;  %v3639_v44 = vcombine.high %v32_v40, %v32_v40  ;;  %v22076_v45 = vld [vmem:[%s28130_s1 + $0x14b8] sm:$0xff]   ;;  %v22078_v48 = vld [vmem:[%s28130_s1 + $0x15c0] sm:$0xff]   ;;  %v22114_v40 = vld [vmem:[%s28130_s1 + $0x1648] sm:$0xff]  }
 0x27c   :  { %v25114_v56 = vadd.f32 %v19818_v51, %v14728_v50  ;;  %20099 = vmatpush3.bf16.msra.mxu0 %v22038_v46  ;;  %v22079_v50 = vld [vmem:[%s28130_s1 + $0x1500] sm:$0xff]  }
 0x27d   :  { %20100 = vmatprep.subr.bf16.mxu0 %v22040_v53  ;;  %v3654_v46 = vcombine.high %v3646_v42, %v3646_v42  ;;  %v3662_v47 = vrot.slane %v3646_v42, %v23126_v41  ;;  %v22080_v52 = vld [vmem:[%s28130_s1 + $0x1580] sm:$0xff]   ;;  %v22115_v42 = vld [vmem:[%s28130_s1 + $0x16c8] sm:$0xff]  }
 0x27e   :  { %20121 = vmatpush3.bf16.msra.mxu1 %v22039_v49  ;;  %v25235_v49 = vrot.slane %v3639_v44, %v23126_v41  ;;  %v22117_v44 = vld [vmem:[%s28130_s1 + $0x1688] sm:$0xff]  }
 0x27f   :  { %20122 = vmatprep.subr.bf16.mxu1 %v22041_v55  ;;  %v3676_v51 = vrot.slane %v3654_v46, %v23126_v41  ;;  %v3684_v54 = vcombine.high %v3662_v47, %v3662_v47  ;;  %v22081_v55 = vld [vmem:[%s28130_s1 + $0x1548] sm:$0xff]   ;;  %v22119_v46 = vld [vmem:[%s28130_s1 + $0x16d0] sm:$0xff]  }
 0x280   :  { %20101 = vmatpush3.bf16.msra.mxu0 %v22042_v57  ;;  %v3655_v53 = vcombine.high %v25235_v49, %v25235_v49  ;;  %v22082_v57 = vld [vmem:[%s28130_s1 + $0x15c8] sm:$0xff]  }
 0x281   :  { %20130 = vmatprep.subr.bf16.mxu0 %v22045_v60  ;;  %v22084_v60 = vld [vmem:[%s28130_s1 + $0x1588] sm:$0xff]  }
 0x282   :  { %20123 = vmatpush3.bf16.msra.mxu1 %v22043_v58  ;;  %v3683_v58 = vrot.slane %v3655_v53, %v23126_v41  ;;  %v22126_v53 = vld [vmem:[%s28130_s1 + $0x1660] sm:$0xff]  }
 0x283   :  { %15286 = vmatmul.mubr.bf16.vlgmr.msra.gmra.mrb[76].mxu0 %v3620_v59  ;;  %20152 = vmatprep.subr.bf16.mxu1 %v22046_v61  ;;  %v22083_v59 = vld [vmem:[%s28130_s1 + $0x1508] sm:$0xff]  }
 0x284   :  { %20131 = vmatpush3.bf16.msra.mxu0 %v22047_v62  ;;  %15365 = vmatprep.mubr.bf16.mxu0 %v3676_v51  ;;  %v3687_v61 = vcombine.high %v3683_v58, %v3683_v58  ;;  %v22085_v62 = vld [vmem:[%s28130_s1 + $0x1550] sm:$0xff]  }
 0x285   :  { %15326 = vmatmul.mubr.bf16.vlgmr.msra.gmra.mrb[76].mxu1 %v3636_v0  ;;  %20132 = vmatprep.subr.bf16.mxu0 %v22049_v1  ;;  %v22087_v0 = vld [vmem:[%s28130_s1 + $0x1510] sm:$0xff]  }
 0x286   :  { %20153 = vmatpush3.bf16.msra.mxu1 %v22048_v63  ;;  %v22086_v63 = vld [vmem:[%s28130_s1 + $0x15d0] sm:$0xff]  }
 0x287   :  { %20154 = vmatprep.subr.bf16.mxu1 %v22050_v2  ;;  %v22088_v1 = vld [vmem:[%s28130_s1 + $0x1590] sm:$0xff]   ;;  %v22089_v2 = vld [vmem:[%s28130_s1 + $0x1558] sm:$0xff]  }
 0x288   :  { %20133 = vmatpush3.bf16.msra.mxu0 %v22051_v3  ;;  %v22090_v3 = vld [vmem:[%s28130_s1 + $0x15d8] sm:$0xff]  }
 0x289   :  { %20134 = vmatprep.subr.bf16.mxu0 %v22053_v5  ;;  %v22092_v5 = vld [vmem:[%s28130_s1 + $0x1598] sm:$0xff]  }
 0x28a   :  { %20155 = vmatpush3.bf16.msra.mxu1 %v22052_v4  ;;  %v22091_v4 = vld [vmem:[%s28130_s1 + $0x1518] sm:$0xff]  }
 0x28b   :  { %20156 = vmatprep.subr.bf16.mxu1 %v22054_v6  ;;  %v22093_v6 = vld [vmem:[%s28130_s1 + $0x1560] sm:$0xff]  }
 0x28c   :  { %20135 = vmatpush3.bf16.msra.mxu0 %v22055_v7  ;;  %v22094_v7 = vld [vmem:[%s28130_s1 + $0x15e0] sm:$0xff]  }
 0x28d   :  { %20136 = vmatprep.subr.bf16.mxu0 %v22057_v9  ;;  %v22096_v9 = vld [vmem:[%s28130_s1 + $0x15a0] sm:$0xff]  }
 0x28e   :  { %20157 = vmatpush3.bf16.msra.mxu1 %v22056_v8  ;;  %v22095_v8 = vld [vmem:[%s28130_s1 + $0x1520] sm:$0xff]  }
 0x28f   :  { %20158 = vmatprep.subr.bf16.mxu1 %v22058_v10  ;;  %v22097_v10 = vld [vmem:[%s28130_s1 + $0x1568] sm:$0xff]  }
 0x290   :  { %20137 = vmatpush3.bf16.msra.mxu0 %v22059_v11  ;;  %v22098_v11 = vld [vmem:[%s28130_s1 + $0x15e8] sm:$0xff]  }
 0x291   :  { %20138 = vmatprep.subr.bf16.mxu0 %v22061_v13 }
 0x292   :  { %20159 = vmatpush3.bf16.msra.mxu1 %v22060_v12  ;;  %v22099_v12 = vld [vmem:[%s28130_s1 + $0x1528] sm:$0xff]  }
 0x293   :  { %20160 = vmatprep.subr.bf16.mxu1 %v22062_v14  ;;  %v22100_v14 = vld [vmem:[%s28130_s1 + $0x15a8] sm:$0xff]  }
 0x294   :  { %20139 = vmatpush3.bf16.msra.mxu0 %v22063_v15 }
 0x295   :  { %20140 = vmatprep.subr.bf16.mxu0 %v22065_v17 }
 0x296   :  { %v19838_v21 = vpop.f32.mrb[52].mxu0  ;;  %20161 = vmatpush3.bf16.msra.mxu1 %v22064_v16  ;;  %v22101_v16 = vld [vmem:[%s28130_s1 + $0x1570] sm:$0xff]  }
 0x297   :  { %v19839_v23 = vpop.f32.mrb[53].mxu0  ;;  %20162 = vmatprep.subr.bf16.mxu1 %v22066_v18 }
 0x298   :  { %v19860_v25 = vpop.f32.mrb[52].mxu1  ;;  %v19840_v26 = vadd.f32 %v19839_v23, %v19838_v21  ;;  %v19841_v27 = vpop.f32.mrb[54].mxu0  ;;  %20141 = vmatpush3.bf16.msra.mxu0 %v22067_v19  ;;  %v22103_v21 = vld [vmem:[%s28130_s1 + $0x1530] sm:$0xff]  }
 0x299   :  { %v19861_v28 = vpop.f32.mrb[53].mxu1  ;;  %v19842_v29 = vpop.f32.mrb[55].mxu0  ;;  %20142 = vmatprep.subr.bf16.mxu0 %v22069_v22  ;;  %v22104_v27 = vld [vmem:[%s28130_s1 + $0x15b0] sm:$0xff]  }
 0x29a   :  { %v14808_v32 = vadd.f32 %v19840_v26, %v25114_v56  ;;  %v19862_v33 = vadd.f32 %v19861_v28, %v19860_v25  ;;  %v19863_v34 = vpop.f32.mrb[54].mxu1  ;;  %20163 = vmatpush3.bf16.msra.mxu1 %v22068_v20  ;;  %v3686_v56 = vcombine.high %v3676_v51, %v3676_v51  ;;  %v22102_v20 = vld [vmem:[%s28130_s1 + $0x15f0] sm:$0xff]   ;;  %v22105_v29 = vld [vmem:[%s28130_s1 + $0x1578] sm:$0xff]  }
 0x29b   :  { %v19864_v36 = vpop.f32.mrb[55].mxu1  ;;  %20164 = vmatprep.subr.bf16.mxu1 %v22070_v24  ;;  %v3669_v34 = vrot.slane %v25235_v49, %v23126_v41  ;;  %v22122_v49 = vld [vmem:[%s28130_s1 + $0x1658] sm:$0xff]  }
 0x29c   :  { %v25215_v38 = vadd.f32 %v19862_v33, %v14808_v32  ;;  %20143 = vmatpush3.bf16.msra.mxu0 %v22071_v30  ;;  %15405 = vmatprep.mubr.bf16.mxu1 %v3686_v56  ;;  %v22107_v32 = vld [vmem:[%s28130_s1 + $0x1538] sm:$0xff]   ;;  %v22111_v36 = vld [vmem:[%s28130_s1 + $0x16c0] sm:$0xff]  }
 0x29d   :  { %20144 = vmatprep.subr.bf16.mxu0 %v22073_v35  ;;  %v22108_v33 = vld [vmem:[%s28130_s1 + $0x15b8] sm:$0xff]   ;;  %v22110_v35 = vld [vmem:[%s28130_s1 + $0x1640] sm:$0xff]  }
 0x29e   :  { %20165 = vmatpush3.bf16.msra.mxu1 %v22072_v31  ;;  %v22106_v31 = vld [vmem:[%s28130_s1 + $0x15f8] sm:$0xff]   ;;  %v22129_v56 = vld [vmem:[%s28130_s1 + $0x16a0] sm:$0xff]  }
 0x29f   :  { %20166 = vmatprep.subr.bf16.mxu1 %v22074_v37  ;;  %v22112_v37 = vld [vmem:[%s28130_s1 + $0x1600] sm:$0xff]   ;;  %v22124_v51 = vld [vmem:[%s28130_s1 + $0x1618] sm:$0xff]  }
 0x2a0   :  { %20145 = vmatpush3.bf16.msra.mxu0 %v22075_v39  ;;  %v3685_v39 = vcombine.high %v3669_v34, %v3669_v34 }
 0x2a1   :  { %20174 = vmatprep.subr.bf16.mxu0 %v22077_v43  ;;  %v22116_v43 = vld [vmem:[%s28130_s1 + $0x1608] sm:$0xff]  }
 0x2a2   :  { %20167 = vmatpush3.bf16.msra.mxu1 %v22076_v45  ;;  %v22118_v45 = vld [vmem:[%s28130_s1 + $0x1650] sm:$0xff]  }
 0x2a3   :  { %20196 = vmatprep.subr.bf16.mxu1 %v22078_v48  ;;  %15366 = vmatmul.mubr.bf16.vlgmr.msra.gmra.mrb[80].mxu0 %v3662_v47  ;;  %v22120_v47 = vld [vmem:[%s28130_s1 + $0x1610] sm:$0xff]  }
 0x2a4   :  { %20175 = vmatpush3.bf16.msra.mxu0 %v22079_v50  ;;  %15445 = vmatprep.mubr.bf16.mxu0 %v3683_v58  ;;  %v22121_v48 = vld [vmem:[%s28130_s1 + $0x1690] sm:$0xff]   ;;  %v22123_v50 = vld [vmem:[%s28130_s1 + $0x16d8] sm:$0xff]   ;;  %v22131_v58 = vld [vmem:[%s28130_s1 + $0x16e8] sm:$0xff]  }
 0x2a5   :  { %15406 = vmatmul.mubr.bf16.vlgmr.msra.gmra.mrb[80].mxu1 %v3684_v54  ;;  %20176 = vmatprep.subr.bf16.mxu0 %v22081_v55  ;;  %v22127_v54 = vld [vmem:[%s28130_s1 + $0x16e0] sm:$0xff]  }
 0x2a6   :  { %20197 = vmatpush3.bf16.msra.mxu1 %v22080_v52  ;;  %15485 = vmatprep.mubr.bf16.mxu1 %v3687_v61  ;;  %v22125_v52 = vld [vmem:[%s28130_s1 + $0x1698] sm:$0xff]   ;;  %v22128_v55 = vld [vmem:[%s28130_s1 + $0x1620] sm:$0xff]   ;;  %v22133_v61 = vld [vmem:[%s28130_s1 + $0x16a8] sm:$0xff]  }
 0x2a7   :  { %20198 = vmatprep.subr.bf16.mxu1 %v22082_v57  ;;  %v22130_v57 = vld [vmem:[%s28130_s1 + $0x1668] sm:$0xff]  }
 0x2a8   :  { %20177 = vmatpush3.bf16.msra.mxu0 %v22083_v59  ;;  %v22132_v59 = vld [vmem:[%s28130_s1 + $0x1628] sm:$0xff]  }
 0x2a9   :  { %20178 = vmatprep.subr.bf16.mxu0 %v22085_v62 }
 0x2aa   :  { %20199 = vmatpush3.bf16.msra.mxu1 %v22084_v60 }
 0x2ab   :  { %20200 = vmatprep.subr.bf16.mxu1 %v22086_v63  ;;  %v22134_v63 = vld [vmem:[%s28130_s1 + $0x1670] sm:$0xff]  }
 0x2ac   :  { %20179 = vmatpush3.bf16.msra.mxu0 %v22087_v0 }
 0x2ad   :  { %20180 = vmatprep.subr.bf16.mxu0 %v22089_v2 }
 0x2ae   :  { %20201 = vmatpush3.bf16.msra.mxu1 %v22088_v1 }
 0x2af   :  { %20202 = vmatprep.subr.bf16.mxu1 %v22090_v3 }
 0x2b0   :  { %20181 = vmatpush3.bf16.msra.mxu0 %v22091_v4 }
 0x2b1   :  { %20182 = vmatprep.subr.bf16.mxu0 %v22093_v6  ;;  %v22136_v6 = vld [vmem:[%s28130_s1 + $0x1630] sm:$0xff]  }
 0x2b2   :  { %20203 = vmatpush3.bf16.msra.mxu1 %v22092_v5  ;;  %v22135_v5 = vld [vmem:[%s28130_s1 + $0x16f0] sm:$0xff]  }
 0x2b3   :  { %20204 = vmatprep.subr.bf16.mxu1 %v22094_v7 }
 0x2b4   :  { %20183 = vmatpush3.bf16.msra.mxu0 %v22095_v8 }
 0x2b5   :  { %20184 = vmatprep.subr.bf16.mxu0 %v22097_v10  ;;  %v22137_v10 = vld [vmem:[%s28130_s1 + $0x16b0] sm:$0xff]  }
 0x2b6   :  { %v19882_v13 = vpop.f32.mrb[56].mxu0  ;;  %20205 = vmatpush3.bf16.msra.mxu1 %v22096_v9 }
 0x2b7   :  { %v19883_v15 = vpop.f32.mrb[57].mxu0  ;;  %20206 = vmatprep.subr.bf16.mxu1 %v22098_v11 }
 0x2b8   :  { %v19904_v17 = vpop.f32.mrb[56].mxu1  ;;  %v19884_v18 = vadd.f32 %v19883_v15, %v19882_v13  ;;  %v19885_v19 = vpop.f32.mrb[58].mxu0  ;;  %20185 = vmatpush3.bf16.msra.mxu0 %v22099_v12  ;;  %v22138_v12 = vld [vmem:[%s28130_s1 + $0x1678] sm:$0xff]  }
 0x2b9   :  { %v19905_v22 = vpop.f32.mrb[57].mxu1  ;;  %v19886_v23 = vpop.f32.mrb[59].mxu0  ;;  %20186 = vmatprep.subr.bf16.mxu0 %v22101_v16  ;;  %v22140_v15 = vld [vmem:[%s28130_s1 + $0x1638] sm:$0xff]  }
 0x2ba   :  { %v14888_v24 = vadd.f32 %v19884_v18, %v25215_v38  ;;  %v19906_v25 = vadd.f32 %v19905_v22, %v19904_v17  ;;  %v19907_v26 = vpop.f32.mrb[58].mxu1  ;;  %20207 = vmatpush3.bf16.msra.mxu1 %v22100_v14  ;;  %v22113_v38 = vld [vmem:[%s28130_s1 + $0x1680] sm:$0xff]   ;;  %v22139_v14 = vld [vmem:[%s28130_s1 + $0x16f8] sm:$0xff]  }
 0x2bb   :  { %v19908_v28 = vpop.f32.mrb[59].mxu1  ;;  %20208 = vmatprep.subr.bf16.mxu1 %v22102_v20  ;;  %v33_v16 = vld [vmem:[%s28129_s0 + $0x58] sm:$0xff]  ;;  %v22142_v18 = vld [vmem:[%s28130_s1 + $0x1740] sm:$0xff]  }
 0x2bc   :  { %v25323_v30 = vadd.f32 %v19906_v25, %v14888_v24  ;;  %20187 = vmatpush3.bf16.msra.mxu0 %v22103_v21  ;;  %v3695_v17 = vrot.slane %v33_v16, %v23126_v41  ;;  %v3688_v19 = vcombine.high %v33_v16, %v33_v16  ;;  %v22141_v20 = vld [vmem:[%s28130_s1 + $0x16b8] sm:$0xff]   ;;  %v22143_v23 = vld [vmem:[%s28130_s1 + $0x17c0] sm:$0xff]   ;;  %v22179_v16 = vld [vmem:[%s28130_s1 + $0x1848] sm:$0xff]  }
 0x2bd   :  { %20188 = vmatprep.subr.bf16.mxu0 %v22105_v29  ;;  %v22144_v25 = vld [vmem:[%s28130_s1 + $0x1700] sm:$0xff]  }
 0x2be   :  { %20209 = vmatpush3.bf16.msra.mxu1 %v22104_v27  ;;  %v3703_v21 = vcombine.high %v3695_v17, %v3695_v17  ;;  %v3711_v22 = vrot.slane %v3695_v17, %v23126_v41  ;;  %v25447_v24 = vrot.slane %v3688_v19, %v23126_v41  ;;  %v22145_v27 = vld [vmem:[%s28130_s1 + $0x1780] sm:$0xff]   ;;  %v22180_v17 = vld [vmem:[%s28130_s1 + $0x18c8] sm:$0xff]  }
 0x2bf   :  { %20210 = vmatprep.subr.bf16.mxu1 %v22106_v31  ;;  %v22182_v19 = vld [vmem:[%s28130_s1 + $0x1888] sm:$0xff]  }
 0x2c0   :  { %20189 = vmatpush3.bf16.msra.mxu0 %v22107_v32  ;;  %v3725_v26 = vrot.slane %v3703_v21, %v23126_v41  ;;  %v3704_v28 = vcombine.high %v25447_v24, %v25447_v24  ;;  %v3733_v29 = vcombine.high %v3711_v22, %v3711_v22  ;;  %v22147_v32 = vld [vmem:[%s28130_s1 + $0x17c8] sm:$0xff]   ;;  %v22184_v21 = vld [vmem:[%s28130_s1 + $0x18d0] sm:$0xff]  }
 0x2c1   :  { %20218 = vmatprep.subr.bf16.mxu0 %v22110_v35  ;;  %v22149_v35 = vld [vmem:[%s28130_s1 + $0x1788] sm:$0xff]  }
 0x2c2   :  { %20211 = vmatpush3.bf16.msra.mxu1 %v22108_v33  ;;  %v3735_v31 = vcombine.high %v3725_v26, %v3725_v26  ;;  %v3732_v33 = vrot.slane %v3704_v28, %v23126_v41  ;;  %v22191_v28 = vld [vmem:[%s28130_s1 + $0x1860] sm:$0xff]  }
 0x2c3   :  { %15446 = vmatmul.mubr.bf16.vlgmr.msra.gmra.mrb[84].mxu0 %v3669_v34  ;;  %20240 = vmatprep.subr.bf16.mxu1 %v22111_v36  ;;  %v22148_v34 = vld [vmem:[%s28130_s1 + $0x1708] sm:$0xff]  }
 0x2c4   :  { %20219 = vmatpush3.bf16.msra.mxu0 %v22112_v37  ;;  %15525 = vmatprep.mubr.bf16.mxu0 %v3725_v26  ;;  %v3736_v36 = vcombine.high %v3732_v33, %v3732_v33  ;;  %v22150_v37 = vld [vmem:[%s28130_s1 + $0x1750] sm:$0xff]   ;;  %v22189_v26 = vld [vmem:[%s28130_s1 + $0x1818] sm:$0xff]  }
 0x2c5   :  { %15486 = vmatmul.mubr.bf16.vlgmr.msra.gmra.mrb[84].mxu1 %v3685_v39  ;;  %20220 = vmatprep.subr.bf16.mxu0 %v22114_v40  ;;  %v22152_v39 = vld [vmem:[%s28130_s1 + $0x1710] sm:$0xff]  }
 0x2c6   :  { %20241 = vmatpush3.bf16.msra.mxu1 %v22113_v38  ;;  %15565 = vmatprep.mubr.bf16.mxu1 %v3735_v31  ;;  %v22151_v38 = vld [vmem:[%s28130_s1 + $0x17d0] sm:$0xff]   ;;  %v22194_v31 = vld [vmem:[%s28130_s1 + $0x18a0] sm:$0xff]  }
 0x2c7   :  { %20242 = vmatprep.subr.bf16.mxu1 %v22115_v42  ;;  %v22153_v40 = vld [vmem:[%s28130_s1 + $0x1790] sm:$0xff]   ;;  %v22154_v42 = vld [vmem:[%s28130_s1 + $0x1758] sm:$0xff]  }
 0x2c8   :  { %20221 = vmatpush3.bf16.msra.mxu0 %v22116_v43  ;;  %v22155_v43 = vld [vmem:[%s28130_s1 + $0x17d8] sm:$0xff]  }
 0x2c9   :  { %20222 = vmatprep.subr.bf16.mxu0 %v22118_v45  ;;  %v22157_v45 = vld [vmem:[%s28130_s1 + $0x1798] sm:$0xff]  }
 0x2ca   :  { %20243 = vmatpush3.bf16.msra.mxu1 %v22117_v44  ;;  %v22156_v44 = vld [vmem:[%s28130_s1 + $0x1718] sm:$0xff]  }
 0x2cb   :  { %20244 = vmatprep.subr.bf16.mxu1 %v22119_v46  ;;  %v22158_v46 = vld [vmem:[%s28130_s1 + $0x1760] sm:$0xff]  }
 0x2cc   :  { %20223 = vmatpush3.bf16.msra.mxu0 %v22120_v47  ;;  %v22159_v47 = vld [vmem:[%s28130_s1 + $0x17e0] sm:$0xff]  }
 0x2cd   :  { %20224 = vmatprep.subr.bf16.mxu0 %v22122_v49  ;;  %v22161_v49 = vld [vmem:[%s28130_s1 + $0x17a0] sm:$0xff]  }
 0x2ce   :  { %20245 = vmatpush3.bf16.msra.mxu1 %v22121_v48  ;;  %v22160_v48 = vld [vmem:[%s28130_s1 + $0x1720] sm:$0xff]  }
 0x2cf   :  { %20246 = vmatprep.subr.bf16.mxu1 %v22123_v50  ;;  %v22162_v50 = vld [vmem:[%s28130_s1 + $0x1768] sm:$0xff]  }
 0x2d0   :  { %20225 = vmatpush3.bf16.msra.mxu0 %v22124_v51  ;;  %v22163_v51 = vld [vmem:[%s28130_s1 + $0x17e8] sm:$0xff]  }
 0x2d1   :  { %20226 = vmatprep.subr.bf16.mxu0 %v22126_v53  ;;  %v22164_v53 = vld [vmem:[%s28130_s1 + $0x1728] sm:$0xff]  }
 0x2d2   :  { %20247 = vmatpush3.bf16.msra.mxu1 %v22125_v52 }
 0x2d3   :  { %20248 = vmatprep.subr.bf16.mxu1 %v22127_v54 }
 0x2d4   :  { %20227 = vmatpush3.bf16.msra.mxu0 %v22128_v55  ;;  %v22165_v55 = vld [vmem:[%s28130_s1 + $0x17a8] sm:$0xff]  }
 0x2d5   :  { %20228 = vmatprep.subr.bf16.mxu0 %v22130_v57 }
 0x2d6   :  { %v19926_v60 = vpop.f32.mrb[60].mxu0  ;;  %20249 = vmatpush3.bf16.msra.mxu1 %v22129_v56 }
 0x2d7   :  { %v19927_v62 = vpop.f32.mrb[61].mxu0  ;;  %20250 = vmatprep.subr.bf16.mxu1 %v22131_v58 }
 0x2d8   :  { %v19948_v0 = vpop.f32.mrb[60].mxu1  ;;  %v19928_v1 = vadd.f32 %v19927_v62, %v19926_v60  ;;  %v19929_v2 = vpop.f32.mrb[62].mxu0  ;;  %20229 = vmatpush3.bf16.msra.mxu0 %v22132_v59  ;;  %v22166_v59 = vld [vmem:[%s28130_s1 + $0x1770] sm:$0xff]  }
 0x2d9   :  { %v19949_v3 = vpop.f32.mrb[61].mxu1  ;;  %v19930_v4 = vpop.f32.mrb[63].mxu0  ;;  %20230 = vmatprep.subr.bf16.mxu0 %v22134_v63  ;;  %v22167_v60 = vld [vmem:[%s28130_s1 + $0x17f0] sm:$0xff]  }
 0x2da   :  { %v14968_v7 = vadd.f32 %v19928_v1, %v25323_v30  ;;  %v19950_v8 = vadd.f32 %v19949_v3, %v19948_v0  ;;  %v19951_v9 = vpop.f32.mrb[62].mxu1  ;;  %20251 = vmatpush3.bf16.msra.mxu1 %v22133_v61  ;;  %v22146_v30 = vld [vmem:[%s28130_s1 + $0x1748] sm:$0xff]   ;;  %v22168_v2 = vld [vmem:[%s28130_s1 + $0x1730] sm:$0xff]  }
 0x2db   :  { %v19952_v11 = vpop.f32.mrb[63].mxu1  ;;  %20252 = vmatprep.subr.bf16.mxu1 %v22135_v5  ;;  %v22169_v4 = vld [vmem:[%s28130_s1 + $0x17b0] sm:$0xff]   ;;  %v22173_v9 = vld [vmem:[%s28130_s1 + $0x17b8] sm:$0xff]  }
 0x2dc   :  { %v25424_v13 = vadd.f32 %v19950_v8, %v14968_v7  ;;  %20231 = vmatpush3.bf16.msra.mxu0 %v22136_v6  ;;  %v22170_v6 = vld [vmem:[%s28130_s1 + $0x1778] sm:$0xff]   ;;  %v22175_v11 = vld [vmem:[%s28130_s1 + $0x1840] sm:$0xff]  }
 0x2dd   :  { %20232 = vmatprep.subr.bf16.mxu0 %v22138_v12  ;;  %v22171_v7 = vld [vmem:[%s28130_s1 + $0x17f8] sm:$0xff]   ;;  %v22176_v12 = vld [vmem:[%s28130_s1 + $0x18c0] sm:$0xff]  }
 0x2de   :  { %20253 = vmatpush3.bf16.msra.mxu1 %v22137_v10  ;;  %v22172_v8 = vld [vmem:[%s28130_s1 + $0x1738] sm:$0xff]   ;;  %v3718_v10 = vrot.slane %v25447_v24, %v23126_v41 }
 0x2df   :  { %20254 = vmatprep.subr.bf16.mxu1 %v22139_v14  ;;  %v22178_v14 = vld [vmem:[%s28130_s1 + $0x1880] sm:$0xff]   ;;  %v22187_v24 = vld [vmem:[%s28130_s1 + $0x1858] sm:$0xff]  }
 0x2e0   :  { %20233 = vmatpush3.bf16.msra.mxu0 %v22140_v15  ;;  %v3734_v15 = vcombine.high %v3718_v10, %v3718_v10 }
 0x2e1   :  { %20262 = vmatprep.subr.bf16.mxu0 %v22142_v18  ;;  %v22181_v18 = vld [vmem:[%s28130_s1 + $0x1808] sm:$0xff]  }
 0x2e2   :  { %20255 = vmatpush3.bf16.msra.mxu1 %v22141_v20  ;;  %v22183_v20 = vld [vmem:[%s28130_s1 + $0x1850] sm:$0xff]  }
 0x2e3   :  { %20284 = vmatprep.subr.bf16.mxu1 %v22143_v23  ;;  %15526 = vmatmul.mubr.bf16.vlgmr.msra.gmra.mrb[88].mxu0 %v3711_v22  ;;  %v22185_v22 = vld [vmem:[%s28130_s1 + $0x1810] sm:$0xff]  }
 0x2e4   :  { %20263 = vmatpush3.bf16.msra.mxu0 %v22144_v25  ;;  %15605 = vmatprep.mubr.bf16.mxu0 %v3732_v33  ;;  %v22186_v23 = vld [vmem:[%s28130_s1 + $0x1890] sm:$0xff]   ;;  %v22188_v25 = vld [vmem:[%s28130_s1 + $0x18d8] sm:$0xff]   ;;  %v22196_v33 = vld [vmem:[%s28130_s1 + $0x18e8] sm:$0xff]  }
 0x2e5   :  { %15566 = vmatmul.mubr.bf16.vlgmr.msra.gmra.mrb[88].mxu1 %v3733_v29  ;;  %20264 = vmatprep.subr.bf16.mxu0 %v22146_v30  ;;  %v22192_v29 = vld [vmem:[%s28130_s1 + $0x18e0] sm:$0xff]  }
 0x2e6   :  { %20285 = vmatpush3.bf16.msra.mxu1 %v22145_v27  ;;  %15645 = vmatprep.mubr.bf16.mxu1 %v3736_v36  ;;  %v22190_v27 = vld [vmem:[%s28130_s1 + $0x1898] sm:$0xff]   ;;  %v22193_v30 = vld [vmem:[%s28130_s1 + $0x1820] sm:$0xff]  }
 0x2e7   :  { %20286 = vmatprep.subr.bf16.mxu1 %v22147_v32  ;;  %v22195_v32 = vld [vmem:[%s28130_s1 + $0x1868] sm:$0xff]  }
 0x2e8   :  { %20265 = vmatpush3.bf16.msra.mxu0 %v22148_v34 }
 0x2e9   :  { %20266 = vmatprep.subr.bf16.mxu0 %v22150_v37  ;;  %v22199_v37 = vld [vmem:[%s28130_s1 + $0x1870] sm:$0xff]  }
 0x2ea   :  { %20287 = vmatpush3.bf16.msra.mxu1 %v22149_v35  ;;  %v22197_v35 = vld [vmem:[%s28130_s1 + $0x1828] sm:$0xff]  }
 0x2eb   :  { %20288 = vmatprep.subr.bf16.mxu1 %v22151_v38 }
 0x2ec   :  { %20267 = vmatpush3.bf16.msra.mxu0 %v22152_v39 }
 0x2ed   :  { %20268 = vmatprep.subr.bf16.mxu0 %v22154_v42 }
 0x2ee   :  { %20289 = vmatpush3.bf16.msra.mxu1 %v22153_v40 }
 0x2ef   :  { %20290 = vmatprep.subr.bf16.mxu1 %v22155_v43  ;;  %v22198_v43 = vld [vmem:[%s28130_s1 + $0x18a8] sm:$0xff]  }
 0x2f0   :  { %20269 = vmatpush3.bf16.msra.mxu0 %v22156_v44 }
 0x2f1   :  { %20270 = vmatprep.subr.bf16.mxu0 %v22158_v46 }
 0x2f2   :  { %20291 = vmatpush3.bf16.msra.mxu1 %v22157_v45  ;;  %v22200_v45 = vld [vmem:[%s28130_s1 + $0x18f0] sm:$0xff]  }
 0x2f3   :  { %20292 = vmatprep.subr.bf16.mxu1 %v22159_v47 }
 0x2f4   :  { %20271 = vmatpush3.bf16.msra.mxu0 %v22160_v48 }
 0x2f5   :  { %20272 = vmatprep.subr.bf16.mxu0 %v22162_v50 }
 0x2f6   :  { %v19970_v52 = vpop.f32.mrb[64].mxu0  ;;  %20293 = vmatpush3.bf16.msra.mxu1 %v22161_v49  ;;  %v22201_v49 = vld [vmem:[%s28130_s1 + $0x1830] sm:$0xff]  }
 0x2f7   :  { %v19971_v54 = vpop.f32.mrb[65].mxu0  ;;  %20294 = vmatprep.subr.bf16.mxu1 %v22163_v51  ;;  %v22203_v51 = vld [vmem:[%s28130_s1 + $0x1878] sm:$0xff]  }
 0x2f8   :  { %v19992_v56 = vpop.f32.mrb[64].mxu1  ;;  %v19972_v57 = vadd.f32 %v19971_v54, %v19970_v52  ;;  %v19973_v58 = vpop.f32.mrb[66].mxu0  ;;  %20273 = vmatpush3.bf16.msra.mxu0 %v22164_v53  ;;  %v22202_v53 = vld [vmem:[%s28130_s1 + $0x18b0] sm:$0xff]   ;;  %v22204_v54 = vld [vmem:[%s28130_s1 + $0x18f8] sm:$0xff]  }
 0x2f9   :  { %v19993_v61 = vpop.f32.mrb[65].mxu1  ;;  %v19974_v62 = vpop.f32.mrb[67].mxu0  ;;  %20274 = vmatprep.subr.bf16.mxu0 %v22166_v59  ;;  %v22207_v58 = vld [vmem:[%s28130_s1 + $0x1940] sm:$0xff]  }
 0x2fa   :  { %v15048_v63 = vadd.f32 %v19972_v57, %v25424_v13  ;;  %v19994_v0 = vadd.f32 %v19993_v61, %v19992_v56  ;;  %v19995_v1 = vpop.f32.mrb[66].mxu1  ;;  %20295 = vmatpush3.bf16.msra.mxu1 %v22165_v55  ;;  %v22177_v13 = vld [vmem:[%s28130_s1 + $0x1800] sm:$0xff]   ;;  %v22205_v55 = vld [vmem:[%s28130_s1 + $0x1838] sm:$0xff]  }
 0x2fb   :  { %v19996_v3 = vpop.f32.mrb[67].mxu1  ;;  %20296 = vmatprep.subr.bf16.mxu1 %v22167_v60  ;;  %v34_v56 = vld [vmem:[%s28129_s0 + $0x60] sm:$0xff]  ;;  %v22206_v60 = vld [vmem:[%s28130_s1 + $0x18b8] sm:$0xff]  }
 0x2fc   :  { %v25532_v5 = vadd.f32 %v19994_v0, %v15048_v63  ;;  %20275 = vmatpush3.bf16.msra.mxu0 %v22168_v2  ;;  %v3744_v57 = vrot.slane %v34_v56, %v23126_v41  ;;  %v3737_v59 = vcombine.high %v34_v56, %v34_v56  ;;  %v22208_v63 = vld [vmem:[%s28130_s1 + $0x19c0] sm:$0xff]   ;;  %v22244_v56 = vld [vmem:[%s28130_s1 + $0x1a48] sm:$0xff]  }
 0x2fd   :  { %20276 = vmatprep.subr.bf16.mxu0 %v22170_v6  ;;  %v22209_v1 = vld [vmem:[%s28130_s1 + $0x1900] sm:$0xff]   ;;  %v22211_v6 = vld [vmem:[%s28130_s1 + $0x1948] sm:$0xff]  }
 0x2fe   :  { %20297 = vmatpush3.bf16.msra.mxu1 %v22169_v4  ;;  %v3752_v61 = vcombine.high %v3744_v57, %v3744_v57  ;;  %v3760_v62 = vrot.slane %v3744_v57, %v23126_v41  ;;  %v25659_v0 = vrot.slane %v3737_v59, %v23126_v41  ;;  %v22210_v3 = vld [vmem:[%s28130_s1 + $0x1980] sm:$0xff]   ;;  %v22245_v57 = vld [vmem:[%s28130_s1 + $0x1ac8] sm:$0xff]  }
 0x2ff   :  { %20298 = vmatprep.subr.bf16.mxu1 %v22171_v7  ;;  %v22247_v59 = vld [vmem:[%s28130_s1 + $0x1a88] sm:$0xff]  }
 0x300   :  { %20277 = vmatpush3.bf16.msra.mxu0 %v22172_v8  ;;  %v3774_v2 = vrot.slane %v3752_v61, %v23126_v41  ;;  %v3753_v4 = vcombine.high %v25659_v0, %v25659_v0  ;;  %v22212_v8 = vld [vmem:[%s28130_s1 + $0x19c8] sm:$0xff]   ;;  %v22249_v61 = vld [vmem:[%s28130_s1 + $0x1ad0] sm:$0xff]  }
 0x301   :  { %20306 = vmatprep.subr.bf16.mxu0 %v22175_v11  ;;  %v22214_v11 = vld [vmem:[%s28130_s1 + $0x1988] sm:$0xff]  }
 0x302   :  { %20299 = vmatpush3.bf16.msra.mxu1 %v22173_v9  ;;  %v3784_v7 = vcombine.high %v3774_v2, %v3774_v2  ;;  %v3781_v9 = vrot.slane %v3753_v4, %v23126_v41  ;;  %v22256_v4 = vld [vmem:[%s28130_s1 + $0x1a60] sm:$0xff]  }
 0x303   :  { %15606 = vmatmul.mubr.bf16.vlgmr.msra.gmra.mrb[92].mxu0 %v3718_v10  ;;  %20328 = vmatprep.subr.bf16.mxu1 %v22176_v12  ;;  %v22213_v10 = vld [vmem:[%s28130_s1 + $0x1908] sm:$0xff]  }
 0x304   :  { %20307 = vmatpush3.bf16.msra.mxu0 %v22177_v13  ;;  %15685 = vmatprep.mubr.bf16.mxu0 %v3774_v2  ;;  %v3785_v12 = vcombine.high %v3781_v9, %v3781_v9  ;;  %v22215_v13 = vld [vmem:[%s28130_s1 + $0x1950] sm:$0xff]   ;;  %v22254_v2 = vld [vmem:[%s28130_s1 + $0x1a18] sm:$0xff]  }
 0x305   :  { %15646 = vmatmul.mubr.bf16.vlgmr.msra.gmra.mrb[92].mxu1 %v3734_v15  ;;  %20308 = vmatprep.subr.bf16.mxu0 %v22179_v16  ;;  %v22217_v15 = vld [vmem:[%s28130_s1 + $0x1910] sm:$0xff]  }
 0x306   :  { %20329 = vmatpush3.bf16.msra.mxu1 %v22178_v14  ;;  %15725 = vmatprep.mubr.bf16.mxu1 %v3784_v7  ;;  %v22216_v14 = vld [vmem:[%s28130_s1 + $0x19d0] sm:$0xff]   ;;  %v22259_v7 = vld [vmem:[%s28130_s1 + $0x1aa0] sm:$0xff]  }
 0x307   :  { %20330 = vmatprep.subr.bf16.mxu1 %v22180_v17  ;;  %v22218_v16 = vld [vmem:[%s28130_s1 + $0x1990] sm:$0xff]   ;;  %v22219_v17 = vld [vmem:[%s28130_s1 + $0x1958] sm:$0xff]  }
 0x308   :  { %20309 = vmatpush3.bf16.msra.mxu0 %v22181_v18  ;;  %v22220_v18 = vld [vmem:[%s28130_s1 + $0x19d8] sm:$0xff]  }
 0x309   :  { %20310 = vmatprep.subr.bf16.mxu0 %v22183_v20  ;;  %v22222_v20 = vld [vmem:[%s28130_s1 + $0x1998] sm:$0xff]  }
 0x30a   :  { %20331 = vmatpush3.bf16.msra.mxu1 %v22182_v19  ;;  %v22221_v19 = vld [vmem:[%s28130_s1 + $0x1918] sm:$0xff]  }
 0x30b   :  { %20332 = vmatprep.subr.bf16.mxu1 %v22184_v21  ;;  %v22223_v21 = vld [vmem:[%s28130_s1 + $0x1960] sm:$0xff]  }
 0x30c   :  { %20311 = vmatpush3.bf16.msra.mxu0 %v22185_v22  ;;  %v22224_v22 = vld [vmem:[%s28130_s1 + $0x19e0] sm:$0xff]  }
 0x30d   :  { %20312 = vmatprep.subr.bf16.mxu0 %v22187_v24  ;;  %v22226_v24 = vld [vmem:[%s28130_s1 + $0x19a0] sm:$0xff]  }
 0x30e   :  { %20333 = vmatpush3.bf16.msra.mxu1 %v22186_v23  ;;  %v22225_v23 = vld [vmem:[%s28130_s1 + $0x1920] sm:$0xff]  }
 0x30f   :  { %20334 = vmatprep.subr.bf16.mxu1 %v22188_v25  ;;  %v22227_v25 = vld [vmem:[%s28130_s1 + $0x1968] sm:$0xff]  }
 0x310   :  { %20313 = vmatpush3.bf16.msra.mxu0 %v22189_v26  ;;  %v22228_v26 = vld [vmem:[%s28130_s1 + $0x19e8] sm:$0xff]  }
 0x311   :  { %20314 = vmatprep.subr.bf16.mxu0 %v22191_v28  ;;  %v22229_v28 = vld [vmem:[%s28130_s1 + $0x1928] sm:$0xff]  }
 0x312   :  { %20335 = vmatpush3.bf16.msra.mxu1 %v22190_v27 }
 0x313   :  { %20336 = vmatprep.subr.bf16.mxu1 %v22192_v29 }
 0x314   :  { %20315 = vmatpush3.bf16.msra.mxu0 %v22193_v30  ;;  %v22230_v30 = vld [vmem:[%s28130_s1 + $0x19a8] sm:$0xff]  }
 0x315   :  { %20316 = vmatprep.subr.bf16.mxu0 %v22195_v32 }
 0x316   :  { %v20014_v34 = vpop.f32.mrb[68].mxu0  ;;  %20337 = vmatpush3.bf16.msra.mxu1 %v22194_v31 }
 0x317   :  { %v20015_v36 = vpop.f32.mrb[69].mxu0  ;;  %20338 = vmatprep.subr.bf16.mxu1 %v22196_v33 }
 0x318   :  { %v20036_v38 = vpop.f32.mrb[68].mxu1  ;;  %v20016_v39 = vadd.f32 %v20015_v36, %v20014_v34  ;;  %v20017_v40 = vpop.f32.mrb[70].mxu0  ;;  %20317 = vmatpush3.bf16.msra.mxu0 %v22197_v35  ;;  %v22231_v34 = vld [vmem:[%s28130_s1 + $0x1970] sm:$0xff]  }
 0x319   :  { %v20037_v42 = vpop.f32.mrb[69].mxu1  ;;  %v20018_v44 = vpop.f32.mrb[71].mxu0  ;;  %20318 = vmatprep.subr.bf16.mxu0 %v22199_v37  ;;  %v22232_v35 = vld [vmem:[%s28130_s1 + $0x19f0] sm:$0xff]  }
 0x31a   :  { %v15128_v46 = vadd.f32 %v20016_v39, %v25532_v5  ;;  %v20038_v47 = vadd.f32 %v20037_v42, %v20036_v38  ;;  %v20039_v48 = vpop.f32.mrb[70].mxu1  ;;  %20339 = vmatpush3.bf16.msra.mxu1 %v22198_v43  ;;  %v3782_v5 = vcombine.high %v3760_v62, %v3760_v62  ;;  %v22233_v42 = vld [vmem:[%s28130_s1 + $0x1930] sm:$0xff]  }
 0x31b   :  { %v20040_v50 = vpop.f32.mrb[71].mxu1  ;;  %20340 = vmatprep.subr.bf16.mxu1 %v22200_v45  ;;  %v22234_v44 = vld [vmem:[%s28130_s1 + $0x19b0] sm:$0xff]   ;;  %v22237_v48 = vld [vmem:[%s28130_s1 + $0x1938] sm:$0xff]  }
 0x31c   :  { %v25633_v52 = vadd.f32 %v20038_v47, %v15128_v46  ;;  %20319 = vmatpush3.bf16.msra.mxu0 %v22201_v49  ;;  %v22235_v46 = vld [vmem:[%s28130_s1 + $0x1978] sm:$0xff]   ;;  %v3767_v50 = vrot.slane %v25659_v0, %v23126_v41 }
 0x31d   :  { %20320 = vmatprep.subr.bf16.mxu0 %v22203_v51  ;;  %v22236_v47 = vld [vmem:[%s28130_s1 + $0x19f8] sm:$0xff]   ;;  %v22240_v51 = vld [vmem:[%s28130_s1 + $0x1a40] sm:$0xff]  }
 0x31e   :  { %20341 = vmatpush3.bf16.msra.mxu1 %v22202_v53  ;;  %v22238_v49 = vld [vmem:[%s28130_s1 + $0x19b8] sm:$0xff]   ;;  %v22242_v53 = vld [vmem:[%s28130_s1 + $0x1a00] sm:$0xff]  }
 0x31f   :  { %20342 = vmatprep.subr.bf16.mxu1 %v22204_v54  ;;  %v22243_v54 = vld [vmem:[%s28130_s1 + $0x1a80] sm:$0xff]   ;;  %v22252_v0 = vld [vmem:[%s28130_s1 + $0x1a58] sm:$0xff]  }
 0x320   :  { %20321 = vmatpush3.bf16.msra.mxu0 %v22205_v55  ;;  %v3783_v55 = vcombine.high %v3767_v50, %v3767_v50 }
 0x321   :  { %20350 = vmatprep.subr.bf16.mxu0 %v22207_v58  ;;  %v22246_v58 = vld [vmem:[%s28130_s1 + $0x1a08] sm:$0xff]  }
 0x322   :  { %20343 = vmatpush3.bf16.msra.mxu1 %v22206_v60  ;;  %v22248_v60 = vld [vmem:[%s28130_s1 + $0x1a50] sm:$0xff]  }
 0x323   :  { %20372 = vmatprep.subr.bf16.mxu1 %v22208_v63  ;;  %15686 = vmatmul.mubr.bf16.vlgmr.msra.gmra.mrb[96].mxu0 %v3760_v62  ;;  %v22250_v62 = vld [vmem:[%s28130_s1 + $0x1a10] sm:$0xff]  }
 0x324   :  { %20351 = vmatpush3.bf16.msra.mxu0 %v22209_v1  ;;  %15765 = vmatprep.mubr.bf16.mxu0 %v3781_v9  ;;  %v22251_v63 = vld [vmem:[%s28130_s1 + $0x1a90] sm:$0xff]   ;;  %v22253_v1 = vld [vmem:[%s28130_s1 + $0x1ad8] sm:$0xff]   ;;  %v22261_v9 = vld [vmem:[%s28130_s1 + $0x1ae8] sm:$0xff]  }
 0x325   :  { %15726 = vmatmul.mubr.bf16.vlgmr.msra.gmra.mrb[96].mxu1 %v3782_v5  ;;  %20352 = vmatprep.subr.bf16.mxu0 %v22211_v6  ;;  %v22257_v5 = vld [vmem:[%s28130_s1 + $0x1ae0] sm:$0xff]  }
 0x326   :  { %20373 = vmatpush3.bf16.msra.mxu1 %v22210_v3  ;;  %15805 = vmatprep.mubr.bf16.mxu1 %v3785_v12  ;;  %v22255_v3 = vld [vmem:[%s28130_s1 + $0x1a98] sm:$0xff]   ;;  %v22258_v6 = vld [vmem:[%s28130_s1 + $0x1a20] sm:$0xff]  }
 0x327   :  { %20374 = vmatprep.subr.bf16.mxu1 %v22212_v8  ;;  %v22260_v8 = vld [vmem:[%s28130_s1 + $0x1a68] sm:$0xff]  }
 0x328   :  { %20353 = vmatpush3.bf16.msra.mxu0 %v22213_v10 }
 0x329   :  { %20354 = vmatprep.subr.bf16.mxu0 %v22215_v13  ;;  %v22264_v13 = vld [vmem:[%s28130_s1 + $0x1a70] sm:$0xff]  }
 0x32a   :  { %20375 = vmatpush3.bf16.msra.mxu1 %v22214_v11  ;;  %v22262_v11 = vld [vmem:[%s28130_s1 + $0x1a28] sm:$0xff]  }
 0x32b   :  { %20376 = vmatprep.subr.bf16.mxu1 %v22216_v14 }
 0x32c   :  { %20355 = vmatpush3.bf16.msra.mxu0 %v22217_v15 }
 0x32d   :  { %20356 = vmatprep.subr.bf16.mxu0 %v22219_v17 }
 0x32e   :  { %20377 = vmatpush3.bf16.msra.mxu1 %v22218_v16 }
 0x32f   :  { %20378 = vmatprep.subr.bf16.mxu1 %v22220_v18  ;;  %v22263_v18 = vld [vmem:[%s28130_s1 + $0x1aa8] sm:$0xff]  }
 0x330   :  { %20357 = vmatpush3.bf16.msra.mxu0 %v22221_v19 }
 0x331   :  { %20358 = vmatprep.subr.bf16.mxu0 %v22223_v21 }
 0x332   :  { %20379 = vmatpush3.bf16.msra.mxu1 %v22222_v20  ;;  %v22265_v20 = vld [vmem:[%s28130_s1 + $0x1af0] sm:$0xff]  }
 0x333   :  { %20380 = vmatprep.subr.bf16.mxu1 %v22224_v22 }
 0x334   :  { %20359 = vmatpush3.bf16.msra.mxu0 %v22225_v23 }
 0x335   :  { %20360 = vmatprep.subr.bf16.mxu0 %v22227_v25 }
 0x336   :  { %v20058_v27 = vpop.f32.mrb[72].mxu0  ;;  %20381 = vmatpush3.bf16.msra.mxu1 %v22226_v24  ;;  %v22266_v24 = vld [vmem:[%s28130_s1 + $0x1a30] sm:$0xff]  }
 0x337   :  { %v20059_v29 = vpop.f32.mrb[73].mxu0  ;;  %20382 = vmatprep.subr.bf16.mxu1 %v22228_v26  ;;  %v22268_v26 = vld [vmem:[%s28130_s1 + $0x1a78] sm:$0xff]  }
 0x338   :  { %v20080_v31 = vpop.f32.mrb[72].mxu1  ;;  %v20060_v32 = vadd.f32 %v20059_v29, %v20058_v27  ;;  %v20061_v33 = vpop.f32.mrb[74].mxu0  ;;  %20361 = vmatpush3.bf16.msra.mxu0 %v22229_v28  ;;  %v22267_v28 = vld [vmem:[%s28130_s1 + $0x1ab0] sm:$0xff]   ;;  %v22269_v29 = vld [vmem:[%s28130_s1 + $0x1af8] sm:$0xff]  }
 0x339   :  { %v20081_v36 = vpop.f32.mrb[73].mxu1  ;;  %v20062_v37 = vpop.f32.mrb[75].mxu0  ;;  %20362 = vmatprep.subr.bf16.mxu0 %v22231_v34  ;;  %v22272_v33 = vld [vmem:[%s28130_s1 + $0x1b40] sm:$0xff]  }
 0x33a   :  { %v15208_v38 = vadd.f32 %v20060_v32, %v25633_v52  ;;  %v20082_v39 = vadd.f32 %v20081_v36, %v20080_v31  ;;  %v20083_v40 = vpop.f32.mrb[74].mxu1  ;;  %20383 = vmatpush3.bf16.msra.mxu1 %v22230_v30  ;;  %v22241_v52 = vld [vmem:[%s28130_s1 + $0x1ac0] sm:$0xff]   ;;  %v22270_v30 = vld [vmem:[%s28130_s1 + $0x1a38] sm:$0xff]   ;;  %v35_v31 = vld [vmem:[%s28129_s0 + $0x68] sm:$0xff] }
 0x33b   :  { %v20084_v43 = vpop.f32.mrb[75].mxu1  ;;  %20384 = vmatprep.subr.bf16.mxu1 %v22232_v35  ;;  %v3793_v32 = vrot.slane %v35_v31, %v23126_v41  ;;  %v3786_v34 = vcombine.high %v35_v31, %v35_v31  ;;  %v22271_v35 = vld [vmem:[%s28130_s1 + $0x1ab8] sm:$0xff]   ;;  %v22274_v40 = vld [vmem:[%s28130_s1 + $0x1b00] sm:$0xff]   ;;  %v22309_v31 = vld [vmem:[%s28130_s1 + $0x1c48] sm:$0xff]  }
 0x33c   :  { %v25744_v45 = vadd.f32 %v20082_v39, %v15208_v38  ;;  %20363 = vmatpush3.bf16.msra.mxu0 %v22233_v42  ;;  %v22273_v38 = vld [vmem:[%s28130_s1 + $0x1bc0] sm:$0xff]  }
 0x33d   :  { %20364 = vmatprep.subr.bf16.mxu0 %v22235_v46  ;;  %v3801_v36 = vcombine.high %v3793_v32, %v3793_v32  ;;  %v3809_v37 = vrot.slane %v3793_v32, %v23126_v41  ;;  %v25871_v39 = vrot.slane %v3786_v34, %v23126_v41  ;;  %v22275_v43 = vld [vmem:[%s28130_s1 + $0x1b80] sm:$0xff]   ;;  %v22276_v46 = vld [vmem:[%s28130_s1 + $0x1b48] sm:$0xff]  }
 0x33e   :  { %20385 = vmatpush3.bf16.msra.mxu1 %v22234_v44  ;;  %v22310_v32 = vld [vmem:[%s28130_s1 + $0x1cc8] sm:$0xff]  }
 0x33f   :  { %20386 = vmatprep.subr.bf16.mxu1 %v22236_v47  ;;  %v3823_v42 = vrot.slane %v3801_v36, %v23126_v41  ;;  %v3802_v44 = vcombine.high %v25871_v39, %v25871_v39  ;;  %v22312_v34 = vld [vmem:[%s28130_s1 + $0x1c88] sm:$0xff]   ;;  %v22314_v36 = vld [vmem:[%s28130_s1 + $0x1cd0] sm:$0xff]  }
 0x340   :  { %20365 = vmatpush3.bf16.msra.mxu0 %v22237_v48  ;;  %v22277_v48 = vld [vmem:[%s28130_s1 + $0x1bc8] sm:$0xff]  }
 0x341   :  { %20394 = vmatprep.subr.bf16.mxu0 %v22240_v51  ;;  %v3833_v47 = vcombine.high %v3823_v42, %v3823_v42  ;;  %v22279_v51 = vld [vmem:[%s28130_s1 + $0x1b88] sm:$0xff]  }
 0x342   :  { %20387 = vmatpush3.bf16.msra.mxu1 %v22238_v49  ;;  %v3830_v49 = vrot.slane %v3802_v44, %v23126_v41  ;;  %v22321_v44 = vld [vmem:[%s28130_s1 + $0x1c60] sm:$0xff]  }
 0x343   :  { %15766 = vmatmul.mubr.bf16.vlgmr.msra.gmra.mrb[100].mxu0 %v3767_v50  ;;  %20416 = vmatprep.subr.bf16.mxu1 %v22241_v52  ;;  %v22278_v50 = vld [vmem:[%s28130_s1 + $0x1b08] sm:$0xff]  }
 0x344   :  { %20395 = vmatpush3.bf16.msra.mxu0 %v22242_v53  ;;  %15845 = vmatprep.mubr.bf16.mxu0 %v3823_v42  ;;  %v3834_v52 = vcombine.high %v3830_v49, %v3830_v49  ;;  %v22280_v53 = vld [vmem:[%s28130_s1 + $0x1b50] sm:$0xff]   ;;  %v22319_v42 = vld [vmem:[%s28130_s1 + $0x1c18] sm:$0xff]  }
 0x345   :  { %15806 = vmatmul.mubr.bf16.vlgmr.msra.gmra.mrb[100].mxu1 %v3783_v55  ;;  %20396 = vmatprep.subr.bf16.mxu0 %v22244_v56  ;;  %v22282_v55 = vld [vmem:[%s28130_s1 + $0x1b10] sm:$0xff]  }
 0x346   :  { %20417 = vmatpush3.bf16.msra.mxu1 %v22243_v54  ;;  %15885 = vmatprep.mubr.bf16.mxu1 %v3833_v47  ;;  %v22281_v54 = vld [vmem:[%s28130_s1 + $0x1bd0] sm:$0xff]   ;;  %v22324_v47 = vld [vmem:[%s28130_s1 + $0x1ca0] sm:$0xff]  }
 0x347   :  { %20418 = vmatprep.subr.bf16.mxu1 %v22245_v57  ;;  %v22283_v56 = vld [vmem:[%s28130_s1 + $0x1b90] sm:$0xff]   ;;  %v22284_v57 = vld [vmem:[%s28130_s1 + $0x1b58] sm:$0xff]  }
 0x348   :  { %20397 = vmatpush3.bf16.msra.mxu0 %v22246_v58  ;;  %v22285_v58 = vld [vmem:[%s28130_s1 + $0x1bd8] sm:$0xff]  }
 0x349   :  { %20398 = vmatprep.subr.bf16.mxu0 %v22248_v60  ;;  %v22287_v60 = vld [vmem:[%s28130_s1 + $0x1b98] sm:$0xff]  }
 0x34a   :  { %20419 = vmatpush3.bf16.msra.mxu1 %v22247_v59  ;;  %v22286_v59 = vld [vmem:[%s28130_s1 + $0x1b18] sm:$0xff]  }
 0x34b   :  { %20420 = vmatprep.subr.bf16.mxu1 %v22249_v61  ;;  %v22288_v61 = vld [vmem:[%s28130_s1 + $0x1b60] sm:$0xff]  }
 0x34c   :  { %20399 = vmatpush3.bf16.msra.mxu0 %v22250_v62  ;;  %v22289_v62 = vld [vmem:[%s28130_s1 + $0x1be0] sm:$0xff]  }
 0x34d   :  { %20400 = vmatprep.subr.bf16.mxu0 %v22252_v0  ;;  %v22291_v0 = vld [vmem:[%s28130_s1 + $0x1ba0] sm:$0xff]  }
 0x34e   :  { %20421 = vmatpush3.bf16.msra.mxu1 %v22251_v63  ;;  %v22290_v63 = vld [vmem:[%s28130_s1 + $0x1b20] sm:$0xff]  }
 0x34f   :  { %20422 = vmatprep.subr.bf16.mxu1 %v22253_v1  ;;  %v22292_v1 = vld [vmem:[%s28130_s1 + $0x1b68] sm:$0xff]  }
 0x350   :  { %20401 = vmatpush3.bf16.msra.mxu0 %v22254_v2  ;;  %v22293_v2 = vld [vmem:[%s28130_s1 + $0x1be8] sm:$0xff]  }
 0x351   :  { %20402 = vmatprep.subr.bf16.mxu0 %v22256_v4  ;;  %v22294_v4 = vld [vmem:[%s28130_s1 + $0x1b28] sm:$0xff]  }
 0x352   :  { %20423 = vmatpush3.bf16.msra.mxu1 %v22255_v3 }
 0x353   :  { %20424 = vmatprep.subr.bf16.mxu1 %v22257_v5 }
 0x354   :  { %20403 = vmatpush3.bf16.msra.mxu0 %v22258_v6  ;;  %v22295_v6 = vld [vmem:[%s28130_s1 + $0x1ba8] sm:$0xff]  }
 0x355   :  { %20404 = vmatprep.subr.bf16.mxu0 %v22260_v8 }
 0x356   :  { %v20102_v10 = vpop.f32.mrb[76].mxu0  ;;  %20425 = vmatpush3.bf16.msra.mxu1 %v22259_v7 }
 0x357   :  { %v20103_v12 = vpop.f32.mrb[77].mxu0  ;;  %20426 = vmatprep.subr.bf16.mxu1 %v22261_v9 }
 0x358   :  { %v20124_v14 = vpop.f32.mrb[76].mxu1  ;;  %v20104_v15 = vadd.f32 %v20103_v12, %v20102_v10  ;;  %v20105_v16 = vpop.f32.mrb[78].mxu0  ;;  %20405 = vmatpush3.bf16.msra.mxu0 %v22262_v11  ;;  %v22296_v10 = vld [vmem:[%s28130_s1 + $0x1b70] sm:$0xff]  }
 0x359   :  { %v20125_v17 = vpop.f32.mrb[77].mxu1  ;;  %v20106_v19 = vpop.f32.mrb[79].mxu0  ;;  %20406 = vmatprep.subr.bf16.mxu0 %v22264_v13  ;;  %v22297_v11 = vld [vmem:[%s28130_s1 + $0x1bf0] sm:$0xff]  }
 0x35a   :  { %v15288_v21 = vadd.f32 %v20104_v15, %v25744_v45  ;;  %v20126_v22 = vadd.f32 %v20125_v17, %v20124_v14  ;;  %v20127_v23 = vpop.f32.mrb[78].mxu1  ;;  %20427 = vmatpush3.bf16.msra.mxu1 %v22263_v18  ;;  %v3831_v45 = vcombine.high %v3809_v37, %v3809_v37  ;;  %v22298_v17 = vld [vmem:[%s28130_s1 + $0x1b30] sm:$0xff]  }
 0x35b   :  { %v20128_v25 = vpop.f32.mrb[79].mxu1  ;;  %20428 = vmatprep.subr.bf16.mxu1 %v22265_v20  ;;  %v22299_v19 = vld [vmem:[%s28130_s1 + $0x1bb0] sm:$0xff]   ;;  %v22302_v23 = vld [vmem:[%s28130_s1 + $0x1b38] sm:$0xff]  }
 0x35c   :  { %v25845_v27 = vadd.f32 %v20126_v22, %v15288_v21  ;;  %20407 = vmatpush3.bf16.msra.mxu0 %v22266_v24  ;;  %v22300_v21 = vld [vmem:[%s28130_s1 + $0x1b78] sm:$0xff]   ;;  %v3816_v25 = vrot.slane %v25871_v39, %v23126_v41 }
 0x35d   :  { %20408 = vmatprep.subr.bf16.mxu0 %v22268_v26  ;;  %v22301_v22 = vld [vmem:[%s28130_s1 + $0x1bf8] sm:$0xff]   ;;  %v22305_v26 = vld [vmem:[%s28130_s1 + $0x1c40] sm:$0xff]  }
 0x35e   :  { %20429 = vmatpush3.bf16.msra.mxu1 %v22267_v28  ;;  %v22303_v24 = vld [vmem:[%s28130_s1 + $0x1bb8] sm:$0xff]   ;;  %v22307_v28 = vld [vmem:[%s28130_s1 + $0x1c00] sm:$0xff]  }
 0x35f   :  { %20430 = vmatprep.subr.bf16.mxu1 %v22269_v29  ;;  %v22308_v29 = vld [vmem:[%s28130_s1 + $0x1c80] sm:$0xff]   ;;  %v22317_v39 = vld [vmem:[%s28130_s1 + $0x1c58] sm:$0xff]  }
 0x360   :  { %20409 = vmatpush3.bf16.msra.mxu0 %v22270_v30  ;;  %v3832_v30 = vcombine.high %v3816_v25, %v3816_v25 }
 0x361   :  { %20438 = vmatprep.subr.bf16.mxu0 %v22272_v33  ;;  %v22311_v33 = vld [vmem:[%s28130_s1 + $0x1c08] sm:$0xff]  }
 0x362   :  { %20431 = vmatpush3.bf16.msra.mxu1 %v22271_v35  ;;  %v22313_v35 = vld [vmem:[%s28130_s1 + $0x1c50] sm:$0xff]  }
 0x363   :  { %20460 = vmatprep.subr.bf16.mxu1 %v22273_v38  ;;  %15846 = vmatmul.mubr.bf16.vlgmr.msra.gmra.mrb[104].mxu0 %v3809_v37  ;;  %v22315_v37 = vld [vmem:[%s28130_s1 + $0x1c10] sm:$0xff]  }
 0x364   :  { %20439 = vmatpush3.bf16.msra.mxu0 %v22274_v40  ;;  %15925 = vmatprep.mubr.bf16.mxu0 %v3830_v49  ;;  %v22316_v38 = vld [vmem:[%s28130_s1 + $0x1c90] sm:$0xff]   ;;  %v22318_v40 = vld [vmem:[%s28130_s1 + $0x1cd8] sm:$0xff]   ;;  %v22326_v49 = vld [vmem:[%s28130_s1 + $0x1ce8] sm:$0xff]  }
 0x365   :  { %15886 = vmatmul.mubr.bf16.vlgmr.msra.gmra.mrb[104].mxu1 %v3831_v45  ;;  %20440 = vmatprep.subr.bf16.mxu0 %v22276_v46  ;;  %v22322_v45 = vld [vmem:[%s28130_s1 + $0x1ce0] sm:$0xff]  }
 0x366   :  { %20461 = vmatpush3.bf16.msra.mxu1 %v22275_v43  ;;  %15965 = vmatprep.mubr.bf16.mxu1 %v3834_v52  ;;  %v22320_v43 = vld [vmem:[%s28130_s1 + $0x1c98] sm:$0xff]   ;;  %v22323_v46 = vld [vmem:[%s28130_s1 + $0x1c20] sm:$0xff]  }
 0x367   :  { %20462 = vmatprep.subr.bf16.mxu1 %v22277_v48  ;;  %v22325_v48 = vld [vmem:[%s28130_s1 + $0x1c68] sm:$0xff]  }
 0x368   :  { %20441 = vmatpush3.bf16.msra.mxu0 %v22278_v50 }
 0x369   :  { %20442 = vmatprep.subr.bf16.mxu0 %v22280_v53  ;;  %v22329_v53 = vld [vmem:[%s28130_s1 + $0x1c70] sm:$0xff]  }
 0x36a   :  { %20463 = vmatpush3.bf16.msra.mxu1 %v22279_v51  ;;  %v22327_v51 = vld [vmem:[%s28130_s1 + $0x1c28] sm:$0xff]  }
 0x36b   :  { %20464 = vmatprep.subr.bf16.mxu1 %v22281_v54 }
 0x36c   :  { %20443 = vmatpush3.bf16.msra.mxu0 %v22282_v55 }
 0x36d   :  { %20444 = vmatprep.subr.bf16.mxu0 %v22284_v57 }
 0x36e   :  { %20465 = vmatpush3.bf16.msra.mxu1 %v22283_v56 }
 0x36f   :  { %20466 = vmatprep.subr.bf16.mxu1 %v22285_v58  ;;  %v22328_v58 = vld [vmem:[%s28130_s1 + $0x1ca8] sm:$0xff]  }
 0x370   :  { %20445 = vmatpush3.bf16.msra.mxu0 %v22286_v59 }
 0x371   :  { %20446 = vmatprep.subr.bf16.mxu0 %v22288_v61 }
 0x372   :  { %20467 = vmatpush3.bf16.msra.mxu1 %v22287_v60  ;;  %v22330_v60 = vld [vmem:[%s28130_s1 + $0x1cf0] sm:$0xff]  }
 0x373   :  { %20468 = vmatprep.subr.bf16.mxu1 %v22289_v62 }
 0x374   :  { %20447 = vmatpush3.bf16.msra.mxu0 %v22290_v63 }
 0x375   :  { %20448 = vmatprep.subr.bf16.mxu0 %v22292_v1 }
 0x376   :  { %v20146_v3 = vpop.f32.mrb[80].mxu0  ;;  %20469 = vmatpush3.bf16.msra.mxu1 %v22291_v0  ;;  %v22331_v0 = vld [vmem:[%s28130_s1 + $0x1c30] sm:$0xff]  }
 0x377   :  { %v20147_v5 = vpop.f32.mrb[81].mxu0  ;;  %20470 = vmatprep.subr.bf16.mxu1 %v22293_v2  ;;  %v22333_v2 = vld [vmem:[%s28130_s1 + $0x1c78] sm:$0xff]  }
 0x378   :  { %v20168_v7 = vpop.f32.mrb[80].mxu1  ;;  %v20148_v8 = vadd.f32 %v20147_v5, %v20146_v3  ;;  %v20149_v9 = vpop.f32.mrb[82].mxu0  ;;  %20449 = vmatpush3.bf16.msra.mxu0 %v22294_v4  ;;  %v22332_v4 = vld [vmem:[%s28130_s1 + $0x1cb0] sm:$0xff]   ;;  %v22334_v5 = vld [vmem:[%s28130_s1 + $0x1cf8] sm:$0xff]  }
 0x379   :  { %v20169_v12 = vpop.f32.mrb[81].mxu1  ;;  %v20150_v13 = vpop.f32.mrb[83].mxu0  ;;  %20450 = vmatprep.subr.bf16.mxu0 %v22296_v10  ;;  %v22337_v9 = vld [vmem:[%s28130_s1 + $0x1d40] sm:$0xff]  }
 0x37a   :  { %v15368_v14 = vadd.f32 %v20148_v8, %v25845_v27  ;;  %v20170_v15 = vadd.f32 %v20169_v12, %v20168_v7  ;;  %v20171_v16 = vpop.f32.mrb[82].mxu1  ;;  %20471 = vmatpush3.bf16.msra.mxu1 %v22295_v6  ;;  %v22306_v27 = vld [vmem:[%s28130_s1 + $0x1cc0] sm:$0xff]   ;;  %v22335_v6 = vld [vmem:[%s28130_s1 + $0x1c38] sm:$0xff]   ;;  %v36_v7 = vld [vmem:[%s28129_s0 + $0x70] sm:$0xff] }
 0x37b   :  { %v20172_v18 = vpop.f32.mrb[83].mxu1  ;;  %20472 = vmatprep.subr.bf16.mxu1 %v22297_v11  ;;  %v3842_v8 = vrot.slane %v36_v7, %v23126_v41  ;;  %v3835_v10 = vcombine.high %v36_v7, %v36_v7  ;;  %v22336_v11 = vld [vmem:[%s28130_s1 + $0x1cb8] sm:$0xff]   ;;  %v22339_v16 = vld [vmem:[%s28130_s1 + $0x1d00] sm:$0xff]   ;;  %v22374_v7 = vld [vmem:[%s28130_s1 + $0x1e48] sm:$0xff]  }
 0x37c   :  { %v25956_v20 = vadd.f32 %v20170_v15, %v15368_v14  ;;  %20451 = vmatpush3.bf16.msra.mxu0 %v22298_v17  ;;  %v22338_v14 = vld [vmem:[%s28130_s1 + $0x1dc0] sm:$0xff]  }
 0x37d   :  { %20452 = vmatprep.subr.bf16.mxu0 %v22300_v21  ;;  %v3850_v12 = vcombine.high %v3842_v8, %v3842_v8  ;;  %v3858_v13 = vrot.slane %v3842_v8, %v23126_v41  ;;  %v26083_v15 = vrot.slane %v3835_v10, %v23126_v41  ;;  %v22340_v18 = vld [vmem:[%s28130_s1 + $0x1d80] sm:$0xff]   ;;  %v22341_v21 = vld [vmem:[%s28130_s1 + $0x1d48] sm:$0xff]  }
 0x37e   :  { %20473 = vmatpush3.bf16.msra.mxu1 %v22299_v19  ;;  %v22375_v8 = vld [vmem:[%s28130_s1 + $0x1ec8] sm:$0xff]  }
 0x37f   :  { %20474 = vmatprep.subr.bf16.mxu1 %v22301_v22  ;;  %v3872_v17 = vrot.slane %v3850_v12, %v23126_v41  ;;  %v3851_v19 = vcombine.high %v26083_v15, %v26083_v15  ;;  %v22377_v10 = vld [vmem:[%s28130_s1 + $0x1e88] sm:$0xff]   ;;  %v22379_v12 = vld [vmem:[%s28130_s1 + $0x1ed0] sm:$0xff]  }
 0x380   :  { %20453 = vmatpush3.bf16.msra.mxu0 %v22302_v23  ;;  %v22342_v23 = vld [vmem:[%s28130_s1 + $0x1dc8] sm:$0xff]  }
 0x381   :  { %20482 = vmatprep.subr.bf16.mxu0 %v22305_v26  ;;  %v3882_v22 = vcombine.high %v3872_v17, %v3872_v17  ;;  %v22344_v26 = vld [vmem:[%s28130_s1 + $0x1d88] sm:$0xff]  }
 0x382   :  { %20475 = vmatpush3.bf16.msra.mxu1 %v22303_v24  ;;  %v3879_v24 = vrot.slane %v3851_v19, %v23126_v41  ;;  %v22386_v19 = vld [vmem:[%s28130_s1 + $0x1e60] sm:$0xff]  }
 0x383   :  { %15926 = vmatmul.mubr.bf16.vlgmr.msra.gmra.mrb[108].mxu0 %v3816_v25  ;;  %20504 = vmatprep.subr.bf16.mxu1 %v22306_v27  ;;  %v22343_v25 = vld [vmem:[%s28130_s1 + $0x1d08] sm:$0xff]  }
 0x384   :  { %20483 = vmatpush3.bf16.msra.mxu0 %v22307_v28  ;;  %16005 = vmatprep.mubr.bf16.mxu0 %v3872_v17  ;;  %v3883_v27 = vcombine.high %v3879_v24, %v3879_v24  ;;  %v22345_v28 = vld [vmem:[%s28130_s1 + $0x1d50] sm:$0xff]   ;;  %v22384_v17 = vld [vmem:[%s28130_s1 + $0x1e18] sm:$0xff]  }
 0x385   :  { %15966 = vmatmul.mubr.bf16.vlgmr.msra.gmra.mrb[108].mxu1 %v3832_v30  ;;  %20484 = vmatprep.subr.bf16.mxu0 %v22309_v31  ;;  %v22347_v30 = vld [vmem:[%s28130_s1 + $0x1d10] sm:$0xff]  }
 0x386   :  { %20505 = vmatpush3.bf16.msra.mxu1 %v22308_v29  ;;  %16045 = vmatprep.mubr.bf16.mxu1 %v3882_v22  ;;  %v22346_v29 = vld [vmem:[%s28130_s1 + $0x1dd0] sm:$0xff]   ;;  %v22389_v22 = vld [vmem:[%s28130_s1 + $0x1ea0] sm:$0xff]  }
 0x387   :  { %20506 = vmatprep.subr.bf16.mxu1 %v22310_v32  ;;  %v22348_v31 = vld [vmem:[%s28130_s1 + $0x1d90] sm:$0xff]   ;;  %v22349_v32 = vld [vmem:[%s28130_s1 + $0x1d58] sm:$0xff]  }
 0x388   :  { %20485 = vmatpush3.bf16.msra.mxu0 %v22311_v33  ;;  %v22350_v33 = vld [vmem:[%s28130_s1 + $0x1dd8] sm:$0xff]  }
 0x389   :  { %20486 = vmatprep.subr.bf16.mxu0 %v22313_v35  ;;  %v22352_v35 = vld [vmem:[%s28130_s1 + $0x1d98] sm:$0xff]  }
 0x38a   :  { %20507 = vmatpush3.bf16.msra.mxu1 %v22312_v34  ;;  %v22351_v34 = vld [vmem:[%s28130_s1 + $0x1d18] sm:$0xff]  }
 0x38b   :  { %20508 = vmatprep.subr.bf16.mxu1 %v22314_v36  ;;  %v22353_v36 = vld [vmem:[%s28130_s1 + $0x1d60] sm:$0xff]  }
 0x38c   :  { %20487 = vmatpush3.bf16.msra.mxu0 %v22315_v37  ;;  %v22354_v37 = vld [vmem:[%s28130_s1 + $0x1de0] sm:$0xff]  }
 0x38d   :  { %20488 = vmatprep.subr.bf16.mxu0 %v22317_v39  ;;  %v22356_v39 = vld [vmem:[%s28130_s1 + $0x1da0] sm:$0xff]  }
 0x38e   :  { %20509 = vmatpush3.bf16.msra.mxu1 %v22316_v38  ;;  %v22355_v38 = vld [vmem:[%s28130_s1 + $0x1d20] sm:$0xff]  }
 0x38f   :  { %20510 = vmatprep.subr.bf16.mxu1 %v22318_v40  ;;  %v22357_v40 = vld [vmem:[%s28130_s1 + $0x1d68] sm:$0xff]  }
 0x390   :  { %20489 = vmatpush3.bf16.msra.mxu0 %v22319_v42  ;;  %v22358_v42 = vld [vmem:[%s28130_s1 + $0x1de8] sm:$0xff]  }
 0x391   :  { %20490 = vmatprep.subr.bf16.mxu0 %v22321_v44  ;;  %v22359_v44 = vld [vmem:[%s28130_s1 + $0x1d28] sm:$0xff]  }
 0x392   :  { %20511 = vmatpush3.bf16.msra.mxu1 %v22320_v43 }
 0x393   :  { %20512 = vmatprep.subr.bf16.mxu1 %v22322_v45 }
 0x394   :  { %20491 = vmatpush3.bf16.msra.mxu0 %v22323_v46  ;;  %v22360_v46 = vld [vmem:[%s28130_s1 + $0x1da8] sm:$0xff]  }
 0x395   :  { %20492 = vmatprep.subr.bf16.mxu0 %v22325_v48 }
 0x396   :  { %v20190_v50 = vpop.f32.mrb[84].mxu0  ;;  %20513 = vmatpush3.bf16.msra.mxu1 %v22324_v47 }
 0x397   :  { %v20191_v52 = vpop.f32.mrb[85].mxu0  ;;  %20514 = vmatprep.subr.bf16.mxu1 %v22326_v49 }
 0x398   :  { %v20212_v54 = vpop.f32.mrb[84].mxu1  ;;  %v20192_v55 = vadd.f32 %v20191_v52, %v20190_v50  ;;  %v20193_v56 = vpop.f32.mrb[86].mxu0  ;;  %20493 = vmatpush3.bf16.msra.mxu0 %v22327_v51  ;;  %v22361_v50 = vld [vmem:[%s28130_s1 + $0x1d70] sm:$0xff]  }
 0x399   :  { %v20213_v57 = vpop.f32.mrb[85].mxu1  ;;  %v20194_v59 = vpop.f32.mrb[87].mxu0  ;;  %20494 = vmatprep.subr.bf16.mxu0 %v22329_v53  ;;  %v22362_v51 = vld [vmem:[%s28130_s1 + $0x1df0] sm:$0xff]  }
 0x39a   :  { %v15448_v61 = vadd.f32 %v20192_v55, %v25956_v20  ;;  %v20214_v62 = vadd.f32 %v20213_v57, %v20212_v54  ;;  %v20215_v63 = vpop.f32.mrb[86].mxu1  ;;  %20515 = vmatpush3.bf16.msra.mxu1 %v22328_v58  ;;  %v3880_v20 = vcombine.high %v3858_v13, %v3858_v13  ;;  %v22363_v57 = vld [vmem:[%s28130_s1 + $0x1d30] sm:$0xff]  }
 0x39b   :  { %v20216_v1 = vpop.f32.mrb[87].mxu1  ;;  %20516 = vmatprep.subr.bf16.mxu1 %v22330_v60  ;;  %v22364_v59 = vld [vmem:[%s28130_s1 + $0x1db0] sm:$0xff]   ;;  %v22367_v63 = vld [vmem:[%s28130_s1 + $0x1d38] sm:$0xff]  }
 0x39c   :  { %v26057_v3 = vadd.f32 %v20214_v62, %v15448_v61  ;;  %20495 = vmatpush3.bf16.msra.mxu0 %v22331_v0  ;;  %v22365_v61 = vld [vmem:[%s28130_s1 + $0x1d78] sm:$0xff]   ;;  %v3865_v1 = vrot.slane %v26083_v15, %v23126_v41 }
 0x39d   :  { %20496 = vmatprep.subr.bf16.mxu0 %v22333_v2  ;;  %v22366_v62 = vld [vmem:[%s28130_s1 + $0x1df8] sm:$0xff]   ;;  %v22370_v2 = vld [vmem:[%s28130_s1 + $0x1e40] sm:$0xff]  }
 0x39e   :  { %20517 = vmatpush3.bf16.msra.mxu1 %v22332_v4  ;;  %v22368_v0 = vld [vmem:[%s28130_s1 + $0x1db8] sm:$0xff]   ;;  %v22372_v4 = vld [vmem:[%s28130_s1 + $0x1e00] sm:$0xff]  }
 0x39f   :  { %20518 = vmatprep.subr.bf16.mxu1 %v22334_v5  ;;  %v22373_v5 = vld [vmem:[%s28130_s1 + $0x1e80] sm:$0xff]   ;;  %v22382_v15 = vld [vmem:[%s28130_s1 + $0x1e58] sm:$0xff]  }
 0x3a0   :  { %20497 = vmatpush3.bf16.msra.mxu0 %v22335_v6  ;;  %v3881_v6 = vcombine.high %v3865_v1, %v3865_v1 }
 0x3a1   :  { %20526 = vmatprep.subr.bf16.mxu0 %v22337_v9  ;;  %v22376_v9 = vld [vmem:[%s28130_s1 + $0x1e08] sm:$0xff]  }
 0x3a2   :  { %20519 = vmatpush3.bf16.msra.mxu1 %v22336_v11  ;;  %v22378_v11 = vld [vmem:[%s28130_s1 + $0x1e50] sm:$0xff]  }
 0x3a3   :  { %20548 = vmatprep.subr.bf16.mxu1 %v22338_v14  ;;  %16006 = vmatmul.mubr.bf16.vlgmr.msra.gmra.mrb[112].mxu0 %v3858_v13  ;;  %v22380_v13 = vld [vmem:[%s28130_s1 + $0x1e10] sm:$0xff]  }
 0x3a4   :  { %20527 = vmatpush3.bf16.msra.mxu0 %v22339_v16  ;;  %16085 = vmatprep.mubr.bf16.mxu0 %v3879_v24  ;;  %v22381_v14 = vld [vmem:[%s28130_s1 + $0x1e90] sm:$0xff]   ;;  %v22383_v16 = vld [vmem:[%s28130_s1 + $0x1ed8] sm:$0xff]   ;;  %v22391_v24 = vld [vmem:[%s28130_s1 + $0x1ee8] sm:$0xff]  }
 0x3a5   :  { %16046 = vmatmul.mubr.bf16.vlgmr.msra.gmra.mrb[112].mxu1 %v3880_v20  ;;  %20528 = vmatprep.subr.bf16.mxu0 %v22341_v21  ;;  %v22387_v20 = vld [vmem:[%s28130_s1 + $0x1ee0] sm:$0xff]  }
 0x3a6   :  { %20549 = vmatpush3.bf16.msra.mxu1 %v22340_v18  ;;  %16125 = vmatprep.mubr.bf16.mxu1 %v3883_v27  ;;  %v22385_v18 = vld [vmem:[%s28130_s1 + $0x1e98] sm:$0xff]   ;;  %v22388_v21 = vld [vmem:[%s28130_s1 + $0x1e20] sm:$0xff]  }
 0x3a7   :  { %20550 = vmatprep.subr.bf16.mxu1 %v22342_v23  ;;  %v22390_v23 = vld [vmem:[%s28130_s1 + $0x1e68] sm:$0xff]  }
 0x3a8   :  { %20529 = vmatpush3.bf16.msra.mxu0 %v22343_v25 }
 0x3a9   :  { %20530 = vmatprep.subr.bf16.mxu0 %v22345_v28  ;;  %v22394_v28 = vld [vmem:[%s28130_s1 + $0x1e70] sm:$0xff]  }
 0x3aa   :  { %20551 = vmatpush3.bf16.msra.mxu1 %v22344_v26  ;;  %v22392_v26 = vld [vmem:[%s28130_s1 + $0x1e28] sm:$0xff]  }
 0x3ab   :  { %20552 = vmatprep.subr.bf16.mxu1 %v22346_v29 }
 0x3ac   :  { %20531 = vmatpush3.bf16.msra.mxu0 %v22347_v30 }
 0x3ad   :  { %20532 = vmatprep.subr.bf16.mxu0 %v22349_v32 }
 0x3ae   :  { %20553 = vmatpush3.bf16.msra.mxu1 %v22348_v31 }
 0x3af   :  { %20554 = vmatprep.subr.bf16.mxu1 %v22350_v33  ;;  %v22393_v33 = vld [vmem:[%s28130_s1 + $0x1ea8] sm:$0xff]  }
 0x3b0   :  { %20533 = vmatpush3.bf16.msra.mxu0 %v22351_v34 }
 0x3b1   :  { %20534 = vmatprep.subr.bf16.mxu0 %v22353_v36 }
 0x3b2   :  { %20555 = vmatpush3.bf16.msra.mxu1 %v22352_v35  ;;  %v22395_v35 = vld [vmem:[%s28130_s1 + $0x1ef0] sm:$0xff]  }
 0x3b3   :  { %20556 = vmatprep.subr.bf16.mxu1 %v22354_v37 }
 0x3b4   :  { %20535 = vmatpush3.bf16.msra.mxu0 %v22355_v38 }
 0x3b5   :  { %20536 = vmatprep.subr.bf16.mxu0 %v22357_v40 }
 0x3b6   :  { %v20234_v43 = vpop.f32.mrb[88].mxu0  ;;  %20557 = vmatpush3.bf16.msra.mxu1 %v22356_v39  ;;  %v22396_v39 = vld [vmem:[%s28130_s1 + $0x1e30] sm:$0xff]  }
 0x3b7   :  { %v20235_v45 = vpop.f32.mrb[89].mxu0  ;;  %20558 = vmatprep.subr.bf16.mxu1 %v22358_v42  ;;  %v22398_v42 = vld [vmem:[%s28130_s1 + $0x1e78] sm:$0xff]  }
 0x3b8   :  { %v20256_v47 = vpop.f32.mrb[88].mxu1  ;;  %v20236_v48 = vadd.f32 %v20235_v45, %v20234_v43  ;;  %v20237_v49 = vpop.f32.mrb[90].mxu0  ;;  %20537 = vmatpush3.bf16.msra.mxu0 %v22359_v44  ;;  %v22397_v44 = vld [vmem:[%s28130_s1 + $0x1eb0] sm:$0xff]   ;;  %v22399_v45 = vld [vmem:[%s28130_s1 + $0x1ef8] sm:$0xff]  }
 0x3b9   :  { %v20257_v52 = vpop.f32.mrb[89].mxu1  ;;  %v20238_v53 = vpop.f32.mrb[91].mxu0  ;;  %20538 = vmatprep.subr.bf16.mxu0 %v22361_v50  ;;  %v22402_v49 = vld [vmem:[%s28130_s1 + $0x1f40] sm:$0xff]  }
 0x3ba   :  { %v15528_v54 = vadd.f32 %v20236_v48, %v26057_v3  ;;  %v20258_v55 = vadd.f32 %v20257_v52, %v20256_v47  ;;  %v20259_v56 = vpop.f32.mrb[90].mxu1  ;;  %20559 = vmatpush3.bf16.msra.mxu1 %v22360_v46  ;;  %v22371_v3 = vld [vmem:[%s28130_s1 + $0x1ec0] sm:$0xff]   ;;  %v22400_v46 = vld [vmem:[%s28130_s1 + $0x1e38] sm:$0xff]  }
 0x3bb   :  { %v20260_v58 = vpop.f32.mrb[91].mxu1  ;;  %20560 = vmatprep.subr.bf16.mxu1 %v22362_v51  ;;  %v37_v47 = vld [vmem:[%s28129_s0 + $0x78] sm:$0xff]  ;;  %v22404_v56 = vld [vmem:[%s28130_s1 + $0x1f00] sm:$0xff]  }
 0x3bc   :  { %v26168_v60 = vadd.f32 %v20258_v55, %v15528_v54  ;;  %20539 = vmatpush3.bf16.msra.mxu0 %v22363_v57  ;;  %v3891_v48 = vrot.slane %v37_v47, %v23126_v41  ;;  %v3884_v50 = vcombine.high %v37_v47, %v37_v47  ;;  %v22401_v51 = vld [vmem:[%s28130_s1 + $0x1eb8] sm:$0xff]   ;;  %v22403_v54 = vld [vmem:[%s28130_s1 + $0x1fc0] sm:$0xff]   ;;  %v22439_v47 = vld [vmem:[%s28130_s1 + $0x2048] sm:$0xff]  }
 0x3bd   :  { %20540 = vmatprep.subr.bf16.mxu0 %v22365_v61  ;;  %v22405_v58 = vld [vmem:[%s28130_s1 + $0x1f80] sm:$0xff]   ;;  %v22406_v61 = vld [vmem:[%s28130_s1 + $0x1f48] sm:$0xff]  }
 0x3be   :  { %20561 = vmatpush3.bf16.msra.mxu1 %v22364_v59  ;;  %v3899_v52 = vcombine.high %v3891_v48, %v3891_v48  ;;  %v3907_v53 = vrot.slane %v3891_v48, %v23126_v41  ;;  %v26295_v55 = vrot.slane %v3884_v50, %v23126_v41  ;;  %v22440_v48 = vld [vmem:[%s28130_s1 + $0x20c8] sm:$0xff]  }
 0x3bf   :  { %20562 = vmatprep.subr.bf16.mxu1 %v22366_v62  ;;  %v22442_v50 = vld [vmem:[%s28130_s1 + $0x2088] sm:$0xff]  }
 0x3c0   :  { %20541 = vmatpush3.bf16.msra.mxu0 %v22367_v63  ;;  %v3921_v57 = vrot.slane %v3899_v52, %v23126_v41  ;;  %v3900_v59 = vcombine.high %v26295_v55, %v26295_v55  ;;  %v22407_v63 = vld [vmem:[%s28130_s1 + $0x1fc8] sm:$0xff]   ;;  %v22444_v52 = vld [vmem:[%s28130_s1 + $0x20d0] sm:$0xff]  }
 0x3c1   :  { %20570 = vmatprep.subr.bf16.mxu0 %v22370_v2  ;;  %v22409_v2 = vld [vmem:[%s28130_s1 + $0x1f88] sm:$0xff]  }
 0x3c2   :  { %20563 = vmatpush3.bf16.msra.mxu1 %v22368_v0  ;;  %v3931_v62 = vcombine.high %v3921_v57, %v3921_v57  ;;  %v3928_v0 = vrot.slane %v3900_v59, %v23126_v41  ;;  %v22451_v59 = vld [vmem:[%s28130_s1 + $0x2060] sm:$0xff]  }
 0x3c3   :  { %16086 = vmatmul.mubr.bf16.vlgmr.msra.gmra.mrb[116].mxu0 %v3865_v1  ;;  %20592 = vmatprep.subr.bf16.mxu1 %v22371_v3  ;;  %v22408_v1 = vld [vmem:[%s28130_s1 + $0x1f08] sm:$0xff]  }
 0x3c4   :  { %20571 = vmatpush3.bf16.msra.mxu0 %v22372_v4  ;;  %16165 = vmatprep.mubr.bf16.mxu0 %v3921_v57  ;;  %v3932_v3 = vcombine.high %v3928_v0, %v3928_v0  ;;  %v22410_v4 = vld [vmem:[%s28130_s1 + $0x1f50] sm:$0xff]   ;;  %v22449_v57 = vld [vmem:[%s28130_s1 + $0x2018] sm:$0xff]  }
 0x3c5   :  { %16126 = vmatmul.mubr.bf16.vlgmr.msra.gmra.mrb[116].mxu1 %v3881_v6  ;;  %20572 = vmatprep.subr.bf16.mxu0 %v22374_v7  ;;  %v22412_v6 = vld [vmem:[%s28130_s1 + $0x1f10] sm:$0xff]  }
 0x3c6   :  { %20593 = vmatpush3.bf16.msra.mxu1 %v22373_v5  ;;  %16205 = vmatprep.mubr.bf16.mxu1 %v3931_v62  ;;  %v22411_v5 = vld [vmem:[%s28130_s1 + $0x1fd0] sm:$0xff]   ;;  %v22454_v62 = vld [vmem:[%s28130_s1 + $0x20a0] sm:$0xff]  }
 0x3c7   :  { %20594 = vmatprep.subr.bf16.mxu1 %v22375_v8  ;;  %v22413_v7 = vld [vmem:[%s28130_s1 + $0x1f90] sm:$0xff]   ;;  %v22414_v8 = vld [vmem:[%s28130_s1 + $0x1f58] sm:$0xff]  }
 0x3c8   :  { %20573 = vmatpush3.bf16.msra.mxu0 %v22376_v9  ;;  %v22415_v9 = vld [vmem:[%s28130_s1 + $0x1fd8] sm:$0xff]  }
 0x3c9   :  { %20574 = vmatprep.subr.bf16.mxu0 %v22378_v11  ;;  %v22417_v11 = vld [vmem:[%s28130_s1 + $0x1f98] sm:$0xff]  }
 0x3ca   :  { %20595 = vmatpush3.bf16.msra.mxu1 %v22377_v10  ;;  %v22416_v10 = vld [vmem:[%s28130_s1 + $0x1f18] sm:$0xff]  }
 0x3cb   :  { %20596 = vmatprep.subr.bf16.mxu1 %v22379_v12  ;;  %v22418_v12 = vld [vmem:[%s28130_s1 + $0x1f60] sm:$0xff]  }
 0x3cc   :  { %20575 = vmatpush3.bf16.msra.mxu0 %v22380_v13  ;;  %v22419_v13 = vld [vmem:[%s28130_s1 + $0x1fe0] sm:$0xff]  }
 0x3cd   :  { %20576 = vmatprep.subr.bf16.mxu0 %v22382_v15  ;;  %v22421_v15 = vld [vmem:[%s28130_s1 + $0x1fa0] sm:$0xff]  }
 0x3ce   :  { %20597 = vmatpush3.bf16.msra.mxu1 %v22381_v14  ;;  %v22420_v14 = vld [vmem:[%s28130_s1 + $0x1f20] sm:$0xff]  }
 0x3cf   :  { %20598 = vmatprep.subr.bf16.mxu1 %v22383_v16  ;;  %v22422_v16 = vld [vmem:[%s28130_s1 + $0x1f68] sm:$0xff]  }
 0x3d0   :  { %20577 = vmatpush3.bf16.msra.mxu0 %v22384_v17  ;;  %v22423_v17 = vld [vmem:[%s28130_s1 + $0x1fe8] sm:$0xff]  }
 0x3d1   :  { %20578 = vmatprep.subr.bf16.mxu0 %v22386_v19  ;;  %v22424_v19 = vld [vmem:[%s28130_s1 + $0x1f28] sm:$0xff]  }
 0x3d2   :  { %20599 = vmatpush3.bf16.msra.mxu1 %v22385_v18 }
 0x3d3   :  { %20600 = vmatprep.subr.bf16.mxu1 %v22387_v20 }
 0x3d4   :  { %20579 = vmatpush3.bf16.msra.mxu0 %v22388_v21  ;;  %v22425_v21 = vld [vmem:[%s28130_s1 + $0x1fa8] sm:$0xff]  }
 0x3d5   :  { %20580 = vmatprep.subr.bf16.mxu0 %v22390_v23 }
 0x3d6   :  { %v20278_v25 = vpop.f32.mrb[92].mxu0  ;;  %20601 = vmatpush3.bf16.msra.mxu1 %v22389_v22 }
 0x3d7   :  { %v20279_v27 = vpop.f32.mrb[93].mxu0  ;;  %20602 = vmatprep.subr.bf16.mxu1 %v22391_v24 }
 0x3d8   :  { %v20300_v29 = vpop.f32.mrb[92].mxu1  ;;  %v20280_v30 = vadd.f32 %v20279_v27, %v20278_v25  ;;  %v20281_v31 = vpop.f32.mrb[94].mxu0  ;;  %20581 = vmatpush3.bf16.msra.mxu0 %v22392_v26  ;;  %v22426_v25 = vld [vmem:[%s28130_s1 + $0x1f70] sm:$0xff]  }
 0x3d9   :  { %v20301_v32 = vpop.f32.mrb[93].mxu1  ;;  %v20282_v34 = vpop.f32.mrb[95].mxu0  ;;  %20582 = vmatprep.subr.bf16.mxu0 %v22394_v28  ;;  %v22427_v26 = vld [vmem:[%s28130_s1 + $0x1ff0] sm:$0xff]  }
 0x3da   :  { %v15608_v36 = vadd.f32 %v20280_v30, %v26168_v60  ;;  %v20302_v37 = vadd.f32 %v20301_v32, %v20300_v29  ;;  %v20303_v38 = vpop.f32.mrb[94].mxu1  ;;  %20603 = vmatpush3.bf16.msra.mxu1 %v22393_v33  ;;  %v3929_v60 = vcombine.high %v3907_v53, %v3907_v53  ;;  %v22428_v32 = vld [vmem:[%s28130_s1 + $0x1f30] sm:$0xff]  }
 0x3db   :  { %v20304_v40 = vpop.f32.mrb[95].mxu1  ;;  %20604 = vmatprep.subr.bf16.mxu1 %v22395_v35  ;;  %v22429_v34 = vld [vmem:[%s28130_s1 + $0x1fb0] sm:$0xff]   ;;  %v22432_v38 = vld [vmem:[%s28130_s1 + $0x1f38] sm:$0xff]  }
 0x3dc   :  { %v26269_v43 = vadd.f32 %v20302_v37, %v15608_v36  ;;  %20583 = vmatpush3.bf16.msra.mxu0 %v22396_v39  ;;  %v22430_v36 = vld [vmem:[%s28130_s1 + $0x1f78] sm:$0xff]   ;;  %v3914_v40 = vrot.slane %v26295_v55, %v23126_v41 }
 0x3dd   :  { %20584 = vmatprep.subr.bf16.mxu0 %v22398_v42  ;;  %v22431_v37 = vld [vmem:[%s28130_s1 + $0x1ff8] sm:$0xff]   ;;  %v22435_v42 = vld [vmem:[%s28130_s1 + $0x2040] sm:$0xff]  }
 0x3de   :  { %20605 = vmatpush3.bf16.msra.mxu1 %v22397_v44  ;;  %v22433_v39 = vld [vmem:[%s28130_s1 + $0x1fb8] sm:$0xff]   ;;  %v22437_v44 = vld [vmem:[%s28130_s1 + $0x2000] sm:$0xff]  }
 0x3df   :  { %20606 = vmatprep.subr.bf16.mxu1 %v22399_v45  ;;  %v22438_v45 = vld [vmem:[%s28130_s1 + $0x2080] sm:$0xff]   ;;  %v22447_v55 = vld [vmem:[%s28130_s1 + $0x2058] sm:$0xff]  }
 0x3e0   :  { %20585 = vmatpush3.bf16.msra.mxu0 %v22400_v46  ;;  %v3930_v46 = vcombine.high %v3914_v40, %v3914_v40 }
 0x3e1   :  { %20614 = vmatprep.subr.bf16.mxu0 %v22402_v49  ;;  %v22441_v49 = vld [vmem:[%s28130_s1 + $0x2008] sm:$0xff]  }
 0x3e2   :  { %20607 = vmatpush3.bf16.msra.mxu1 %v22401_v51  ;;  %v22443_v51 = vld [vmem:[%s28130_s1 + $0x2050] sm:$0xff]  }
 0x3e3   :  { %20636 = vmatprep.subr.bf16.mxu1 %v22403_v54  ;;  %16166 = vmatmul.mubr.bf16.vlgmr.msra.gmra.mrb[120].mxu0 %v3907_v53  ;;  %v22445_v53 = vld [vmem:[%s28130_s1 + $0x2010] sm:$0xff]  }
 0x3e4   :  { %20615 = vmatpush3.bf16.msra.mxu0 %v22404_v56  ;;  %16245 = vmatprep.mubr.bf16.mxu0 %v3928_v0  ;;  %v22446_v54 = vld [vmem:[%s28130_s1 + $0x2090] sm:$0xff]   ;;  %v22448_v56 = vld [vmem:[%s28130_s1 + $0x20d8] sm:$0xff]   ;;  %v22456_v0 = vld [vmem:[%s28130_s1 + $0x20e8] sm:$0xff]  }
 0x3e5   :  { %16206 = vmatmul.mubr.bf16.vlgmr.msra.gmra.mrb[120].mxu1 %v3929_v60  ;;  %20616 = vmatprep.subr.bf16.mxu0 %v22406_v61  ;;  %v22452_v60 = vld [vmem:[%s28130_s1 + $0x20e0] sm:$0xff]  }
 0x3e6   :  { %20637 = vmatpush3.bf16.msra.mxu1 %v22405_v58  ;;  %16285 = vmatprep.mubr.bf16.mxu1 %v3932_v3  ;;  %v22450_v58 = vld [vmem:[%s28130_s1 + $0x2098] sm:$0xff]   ;;  %v22453_v61 = vld [vmem:[%s28130_s1 + $0x2020] sm:$0xff]  }
 0x3e7   :  { %20638 = vmatprep.subr.bf16.mxu1 %v22407_v63  ;;  %v22455_v63 = vld [vmem:[%s28130_s1 + $0x2068] sm:$0xff]  }
 0x3e8   :  { %20617 = vmatpush3.bf16.msra.mxu0 %v22408_v1 }
 0x3e9   :  { %20618 = vmatprep.subr.bf16.mxu0 %v22410_v4  ;;  %v22459_v4 = vld [vmem:[%s28130_s1 + $0x2070] sm:$0xff]  }
 0x3ea   :  { %20639 = vmatpush3.bf16.msra.mxu1 %v22409_v2  ;;  %v22457_v2 = vld [vmem:[%s28130_s1 + $0x2028] sm:$0xff]  }
 0x3eb   :  { %20640 = vmatprep.subr.bf16.mxu1 %v22411_v5 }
 0x3ec   :  { %20619 = vmatpush3.bf16.msra.mxu0 %v22412_v6 }
 0x3ed   :  { %20620 = vmatprep.subr.bf16.mxu0 %v22414_v8 }
 0x3ee   :  { %20641 = vmatpush3.bf16.msra.mxu1 %v22413_v7 }
 0x3ef   :  { %20642 = vmatprep.subr.bf16.mxu1 %v22415_v9  ;;  %v22458_v9 = vld [vmem:[%s28130_s1 + $0x20a8] sm:$0xff]  }
 0x3f0   :  { %20621 = vmatpush3.bf16.msra.mxu0 %v22416_v10 }
 0x3f1   :  { %20622 = vmatprep.subr.bf16.mxu0 %v22418_v12 }
 0x3f2   :  { %20643 = vmatpush3.bf16.msra.mxu1 %v22417_v11  ;;  %v22460_v11 = vld [vmem:[%s28130_s1 + $0x20f0] sm:$0xff]  }
 0x3f3   :  { %20644 = vmatprep.subr.bf16.mxu1 %v22419_v13 }
 0x3f4   :  { %20623 = vmatpush3.bf16.msra.mxu0 %v22420_v14 }
 0x3f5   :  { %20624 = vmatprep.subr.bf16.mxu0 %v22422_v16 }
 0x3f6   :  { %v20322_v18 = vpop.f32.mrb[96].mxu0  ;;  %20645 = vmatpush3.bf16.msra.mxu1 %v22421_v15  ;;  %v22461_v15 = vld [vmem:[%s28130_s1 + $0x2030] sm:$0xff]  }
 0x3f7   :  { %v20323_v20 = vpop.f32.mrb[97].mxu0  ;;  %20646 = vmatprep.subr.bf16.mxu1 %v22423_v17  ;;  %v22463_v17 = vld [vmem:[%s28130_s1 + $0x2078] sm:$0xff]  }
 0x3f8   :  { %v20344_v22 = vpop.f32.mrb[96].mxu1  ;;  %v20324_v23 = vadd.f32 %v20323_v20, %v20322_v18  ;;  %v20325_v24 = vpop.f32.mrb[98].mxu0  ;;  %20625 = vmatpush3.bf16.msra.mxu0 %v22424_v19  ;;  %v22462_v19 = vld [vmem:[%s28130_s1 + $0x20b0] sm:$0xff]   ;;  %v22464_v20 = vld [vmem:[%s28130_s1 + $0x20f8] sm:$0xff]  }
 0x3f9   :  { %v20345_v27 = vpop.f32.mrb[97].mxu1  ;;  %v20326_v28 = vpop.f32.mrb[99].mxu0  ;;  %20626 = vmatprep.subr.bf16.mxu0 %v22426_v25  ;;  %v22467_v24 = vld [vmem:[%s28130_s1 + $0x2140] sm:$0xff]  }
 0x3fa   :  { %v15688_v29 = vadd.f32 %v20324_v23, %v26269_v43  ;;  %v20346_v30 = vadd.f32 %v20345_v27, %v20344_v22  ;;  %v20347_v31 = vpop.f32.mrb[98].mxu1  ;;  %20647 = vmatpush3.bf16.msra.mxu1 %v22425_v21  ;;  %v22436_v43 = vld [vmem:[%s28130_s1 + $0x20c0] sm:$0xff]   ;;  %v22465_v21 = vld [vmem:[%s28130_s1 + $0x2038] sm:$0xff]  }
 0x3fb   :  { %v20348_v33 = vpop.f32.mrb[99].mxu1  ;;  %20648 = vmatprep.subr.bf16.mxu1 %v22427_v26  ;;  %v38_v22 = vld [vmem:[%s28129_s0 + $0x80] sm:$0xff]  ;;  %v22466_v26 = vld [vmem:[%s28130_s1 + $0x20b8] sm:$0xff]  }
 0x3fc   :  { %v26380_v35 = vadd.f32 %v20346_v30, %v15688_v29  ;;  %20627 = vmatpush3.bf16.msra.mxu0 %v22428_v32  ;;  %v3940_v23 = vrot.slane %v38_v22, %v23126_v41  ;;  %v3933_v25 = vcombine.high %v38_v22, %v38_v22  ;;  %v22468_v29 = vld [vmem:[%s28130_s1 + $0x21c0] sm:$0xff]   ;;  %v22504_v22 = vld [vmem:[%s28130_s1 + $0x2248] sm:$0xff]  }
 0x3fd   :  { %20628 = vmatprep.subr.bf16.mxu0 %v22430_v36  ;;  %v22469_v31 = vld [vmem:[%s28130_s1 + $0x2100] sm:$0xff]   ;;  %v22471_v36 = vld [vmem:[%s28130_s1 + $0x2148] sm:$0xff]  }
 0x3fe   :  { %20649 = vmatpush3.bf16.msra.mxu1 %v22429_v34  ;;  %v3948_v27 = vcombine.high %v3940_v23, %v3940_v23  ;;  %v3956_v28 = vrot.slane %v3940_v23, %v23126_v41  ;;  %v26507_v30 = vrot.slane %v3933_v25, %v23126_v41  ;;  %v22470_v33 = vld [vmem:[%s28130_s1 + $0x2180] sm:$0xff]   ;;  %v22505_v23 = vld [vmem:[%s28130_s1 + $0x22c8] sm:$0xff]  }
 0x3ff   :  { %20650 = vmatprep.subr.bf16.mxu1 %v22431_v37  ;;  %v22507_v25 = vld [vmem:[%s28130_s1 + $0x2288] sm:$0xff]  }
 0x400   :  { %20629 = vmatpush3.bf16.msra.mxu0 %v22432_v38  ;;  %v3970_v32 = vrot.slane %v3948_v27, %v23126_v41  ;;  %v3949_v34 = vcombine.high %v26507_v30, %v26507_v30  ;;  %v22472_v38 = vld [vmem:[%s28130_s1 + $0x21c8] sm:$0xff]   ;;  %v22509_v27 = vld [vmem:[%s28130_s1 + $0x22d0] sm:$0xff]  }
 0x401   :  { %20658 = vmatprep.subr.bf16.mxu0 %v22435_v42  ;;  %v22474_v42 = vld [vmem:[%s28130_s1 + $0x2188] sm:$0xff]  }
 0x402   :  { %20651 = vmatpush3.bf16.msra.mxu1 %v22433_v39  ;;  %v3980_v37 = vcombine.high %v3970_v32, %v3970_v32  ;;  %v3977_v39 = vrot.slane %v3949_v34, %v23126_v41  ;;  %v22516_v34 = vld [vmem:[%s28130_s1 + $0x2260] sm:$0xff]  }
 0x403   :  { %16246 = vmatmul.mubr.bf16.vlgmr.msra.gmra.mrb[124].mxu0 %v3914_v40  ;;  %20680 = vmatprep.subr.bf16.mxu1 %v22436_v43  ;;  %v22473_v40 = vld [vmem:[%s28130_s1 + $0x2108] sm:$0xff]  }
 0x404   :  { %20659 = vmatpush3.bf16.msra.mxu0 %v22437_v44  ;;  %16325 = vmatprep.mubr.bf16.mxu0 %v3970_v32  ;;  %v3981_v43 = vcombine.high %v3977_v39, %v3977_v39  ;;  %v22475_v44 = vld [vmem:[%s28130_s1 + $0x2150] sm:$0xff]   ;;  %v22514_v32 = vld [vmem:[%s28130_s1 + $0x2218] sm:$0xff]  }
 0x405   :  { %16286 = vmatmul.mubr.bf16.vlgmr.msra.gmra.mrb[124].mxu1 %v3930_v46  ;;  %20660 = vmatprep.subr.bf16.mxu0 %v22439_v47  ;;  %v22477_v46 = vld [vmem:[%s28130_s1 + $0x2110] sm:$0xff]  }
 0x406   :  { %20681 = vmatpush3.bf16.msra.mxu1 %v22438_v45  ;;  %16365 = vmatprep.mubr.bf16.mxu1 %v3980_v37  ;;  %v22476_v45 = vld [vmem:[%s28130_s1 + $0x21d0] sm:$0xff]   ;;  %v22519_v37 = vld [vmem:[%s28130_s1 + $0x22a0] sm:$0xff]  }
 0x407   :  { %20682 = vmatprep.subr.bf16.mxu1 %v22440_v48  ;;  %v22478_v47 = vld [vmem:[%s28130_s1 + $0x2190] sm:$0xff]   ;;  %v22479_v48 = vld [vmem:[%s28130_s1 + $0x2158] sm:$0xff]  }
 0x408   :  { %20661 = vmatpush3.bf16.msra.mxu0 %v22441_v49  ;;  %v22480_v49 = vld [vmem:[%s28130_s1 + $0x21d8] sm:$0xff]  }
 0x409   :  { %20662 = vmatprep.subr.bf16.mxu0 %v22443_v51  ;;  %v22482_v51 = vld [vmem:[%s28130_s1 + $0x2198] sm:$0xff]  }
 0x40a   :  { %20683 = vmatpush3.bf16.msra.mxu1 %v22442_v50  ;;  %v22481_v50 = vld [vmem:[%s28130_s1 + $0x2118] sm:$0xff]  }
 0x40b   :  { %20684 = vmatprep.subr.bf16.mxu1 %v22444_v52  ;;  %v22483_v52 = vld [vmem:[%s28130_s1 + $0x2160] sm:$0xff]  }
 0x40c   :  { %20663 = vmatpush3.bf16.msra.mxu0 %v22445_v53  ;;  %v22484_v53 = vld [vmem:[%s28130_s1 + $0x21e0] sm:$0xff]  }
 0x40d   :  { %20664 = vmatprep.subr.bf16.mxu0 %v22447_v55  ;;  %v22486_v55 = vld [vmem:[%s28130_s1 + $0x21a0] sm:$0xff]  }
 0x40e   :  { %20685 = vmatpush3.bf16.msra.mxu1 %v22446_v54  ;;  %v22485_v54 = vld [vmem:[%s28130_s1 + $0x2120] sm:$0xff]  }
 0x40f   :  { %20686 = vmatprep.subr.bf16.mxu1 %v22448_v56  ;;  %v22487_v56 = vld [vmem:[%s28130_s1 + $0x2168] sm:$0xff]  }
 0x410   :  { %20665 = vmatpush3.bf16.msra.mxu0 %v22449_v57  ;;  %v22488_v57 = vld [vmem:[%s28130_s1 + $0x21e8] sm:$0xff]  }
 0x411   :  { %20666 = vmatprep.subr.bf16.mxu0 %v22451_v59  ;;  %v22489_v59 = vld [vmem:[%s28130_s1 + $0x2128] sm:$0xff]  }
 0x412   :  { %20687 = vmatpush3.bf16.msra.mxu1 %v22450_v58 }
 0x413   :  { %20688 = vmatprep.subr.bf16.mxu1 %v22452_v60 }
 0x414   :  { %20667 = vmatpush3.bf16.msra.mxu0 %v22453_v61  ;;  %v22490_v61 = vld [vmem:[%s28130_s1 + $0x21a8] sm:$0xff]  }
 0x415   :  { %20668 = vmatprep.subr.bf16.mxu0 %v22455_v63 }
 0x416   :  { %v20366_v1 = vpop.f32.mrb[100].mxu0  ;;  %20689 = vmatpush3.bf16.msra.mxu1 %v22454_v62 }
 0x417   :  { %v20367_v3 = vpop.f32.mrb[101].mxu0  ;;  %20690 = vmatprep.subr.bf16.mxu1 %v22456_v0 }
 0x418   :  { %v20388_v5 = vpop.f32.mrb[100].mxu1  ;;  %v20368_v6 = vadd.f32 %v20367_v3, %v20366_v1  ;;  %v20369_v7 = vpop.f32.mrb[102].mxu0  ;;  %20669 = vmatpush3.bf16.msra.mxu0 %v22457_v2  ;;  %v22491_v1 = vld [vmem:[%s28130_s1 + $0x2170] sm:$0xff]  }
 0x419   :  { %v20389_v8 = vpop.f32.mrb[101].mxu1  ;;  %v20370_v10 = vpop.f32.mrb[103].mxu0  ;;  %20670 = vmatprep.subr.bf16.mxu0 %v22459_v4  ;;  %v22492_v2 = vld [vmem:[%s28130_s1 + $0x21f0] sm:$0xff]  }
 0x41a   :  { %v15768_v12 = vadd.f32 %v20368_v6, %v26380_v35  ;;  %v20390_v13 = vadd.f32 %v20389_v8, %v20388_v5  ;;  %v20391_v14 = vpop.f32.mrb[102].mxu1  ;;  %20691 = vmatpush3.bf16.msra.mxu1 %v22458_v9  ;;  %v3978_v35 = vcombine.high %v3956_v28, %v3956_v28  ;;  %v22493_v8 = vld [vmem:[%s28130_s1 + $0x2130] sm:$0xff]  }
 0x41b   :  { %v20392_v16 = vpop.f32.mrb[103].mxu1  ;;  %20692 = vmatprep.subr.bf16.mxu1 %v22460_v11  ;;  %v22494_v10 = vld [vmem:[%s28130_s1 + $0x21b0] sm:$0xff]   ;;  %v22497_v14 = vld [vmem:[%s28130_s1 + $0x2138] sm:$0xff]  }
 0x41c   :  { %v26481_v18 = vadd.f32 %v20390_v13, %v15768_v12  ;;  %20671 = vmatpush3.bf16.msra.mxu0 %v22461_v15  ;;  %v22495_v12 = vld [vmem:[%s28130_s1 + $0x2178] sm:$0xff]   ;;  %v3963_v16 = vrot.slane %v26507_v30, %v23126_v41 }
 0x41d   :  { %20672 = vmatprep.subr.bf16.mxu0 %v22463_v17  ;;  %v22496_v13 = vld [vmem:[%s28130_s1 + $0x21f8] sm:$0xff]   ;;  %v22500_v17 = vld [vmem:[%s28130_s1 + $0x2240] sm:$0xff]  }
 0x41e   :  { %20693 = vmatpush3.bf16.msra.mxu1 %v22462_v19  ;;  %v22498_v15 = vld [vmem:[%s28130_s1 + $0x21b8] sm:$0xff]   ;;  %v22502_v19 = vld [vmem:[%s28130_s1 + $0x2200] sm:$0xff]  }
 0x41f   :  { %20694 = vmatprep.subr.bf16.mxu1 %v22464_v20  ;;  %v22503_v20 = vld [vmem:[%s28130_s1 + $0x2280] sm:$0xff]   ;;  %v22512_v30 = vld [vmem:[%s28130_s1 + $0x2258] sm:$0xff]  }
 0x420   :  { %20673 = vmatpush3.bf16.msra.mxu0 %v22465_v21  ;;  %v3979_v21 = vcombine.high %v3963_v16, %v3963_v16 }
 0x421   :  { %20702 = vmatprep.subr.bf16.mxu0 %v22467_v24  ;;  %v22506_v24 = vld [vmem:[%s28130_s1 + $0x2208] sm:$0xff]  }
 0x422   :  { %20695 = vmatpush3.bf16.msra.mxu1 %v22466_v26  ;;  %v22508_v26 = vld [vmem:[%s28130_s1 + $0x2250] sm:$0xff]  }
 0x423   :  { %20724 = vmatprep.subr.bf16.mxu1 %v22468_v29  ;;  %16326 = vmatmul.mubr.bf16.vlgmr.msra.gmra.mrb[128].mxu0 %v3956_v28  ;;  %v22510_v28 = vld [vmem:[%s28130_s1 + $0x2210] sm:$0xff]  }
 0x424   :  { %20703 = vmatpush3.bf16.msra.mxu0 %v22469_v31  ;;  %16405 = vmatprep.mubr.bf16.mxu0 %v3977_v39  ;;  %v22511_v29 = vld [vmem:[%s28130_s1 + $0x2290] sm:$0xff]   ;;  %v22513_v31 = vld [vmem:[%s28130_s1 + $0x22d8] sm:$0xff]   ;;  %v22521_v39 = vld [vmem:[%s28130_s1 + $0x22e8] sm:$0xff]  }
 0x425   :  { %16366 = vmatmul.mubr.bf16.vlgmr.msra.gmra.mrb[128].mxu1 %v3978_v35  ;;  %20704 = vmatprep.subr.bf16.mxu0 %v22471_v36  ;;  %v22517_v35 = vld [vmem:[%s28130_s1 + $0x22e0] sm:$0xff]  }
 0x426   :  { %20725 = vmatpush3.bf16.msra.mxu1 %v22470_v33  ;;  %16445 = vmatprep.mubr.bf16.mxu1 %v3981_v43  ;;  %v22515_v33 = vld [vmem:[%s28130_s1 + $0x2298] sm:$0xff]   ;;  %v22518_v36 = vld [vmem:[%s28130_s1 + $0x2220] sm:$0xff]  }
 0x427   :  { %20726 = vmatprep.subr.bf16.mxu1 %v22472_v38  ;;  %v22520_v38 = vld [vmem:[%s28130_s1 + $0x2268] sm:$0xff]  }
 0x428   :  { %20705 = vmatpush3.bf16.msra.mxu0 %v22473_v40 }
 0x429   :  { %20706 = vmatprep.subr.bf16.mxu0 %v22475_v44  ;;  %v22524_v44 = vld [vmem:[%s28130_s1 + $0x2270] sm:$0xff]  }
 0x42a   :  { %20727 = vmatpush3.bf16.msra.mxu1 %v22474_v42  ;;  %v22522_v42 = vld [vmem:[%s28130_s1 + $0x2228] sm:$0xff]  }
 0x42b   :  { %20728 = vmatprep.subr.bf16.mxu1 %v22476_v45 }
 0x42c   :  { %20707 = vmatpush3.bf16.msra.mxu0 %v22477_v46 }
 0x42d   :  { %20708 = vmatprep.subr.bf16.mxu0 %v22479_v48 }
 0x42e   :  { %20729 = vmatpush3.bf16.msra.mxu1 %v22478_v47 }
 0x42f   :  { %20730 = vmatprep.subr.bf16.mxu1 %v22480_v49  ;;  %v22523_v49 = vld [vmem:[%s28130_s1 + $0x22a8] sm:$0xff]  }
 0x430   :  { %20709 = vmatpush3.bf16.msra.mxu0 %v22481_v50 }
 0x431   :  { %20710 = vmatprep.subr.bf16.mxu0 %v22483_v52 }
 0x432   :  { %20731 = vmatpush3.bf16.msra.mxu1 %v22482_v51  ;;  %v22525_v51 = vld [vmem:[%s28130_s1 + $0x22f0] sm:$0xff]  }
 0x433   :  { %20732 = vmatprep.subr.bf16.mxu1 %v22484_v53 }
 0x434   :  { %20711 = vmatpush3.bf16.msra.mxu0 %v22485_v54 }
 0x435   :  { %20712 = vmatprep.subr.bf16.mxu0 %v22487_v56 }
 0x436   :  { %v20410_v58 = vpop.f32.mrb[104].mxu0  ;;  %20733 = vmatpush3.bf16.msra.mxu1 %v22486_v55  ;;  %v22526_v55 = vld [vmem:[%s28130_s1 + $0x2230] sm:$0xff]  }
 0x437   :  { %v20411_v60 = vpop.f32.mrb[105].mxu0  ;;  %20734 = vmatprep.subr.bf16.mxu1 %v22488_v57  ;;  %v22528_v57 = vld [vmem:[%s28130_s1 + $0x2278] sm:$0xff]  }
 0x438   :  { %v20432_v62 = vpop.f32.mrb[104].mxu1  ;;  %v20412_v63 = vadd.f32 %v20411_v60, %v20410_v58  ;;  %v20413_v0 = vpop.f32.mrb[106].mxu0  ;;  %20713 = vmatpush3.bf16.msra.mxu0 %v22489_v59  ;;  %v22527_v59 = vld [vmem:[%s28130_s1 + $0x22b0] sm:$0xff]   ;;  %v22529_v60 = vld [vmem:[%s28130_s1 + $0x22f8] sm:$0xff]  }
 0x439   :  { %v20433_v3 = vpop.f32.mrb[105].mxu1  ;;  %v20414_v4 = vpop.f32.mrb[107].mxu0  ;;  %20714 = vmatprep.subr.bf16.mxu0 %v22491_v1  ;;  %v22532_v0 = vld [vmem:[%s28130_s1 + $0x2340] sm:$0xff]  }
 0x43a   :  { %v15848_v5 = vadd.f32 %v20412_v63, %v26481_v18  ;;  %v20434_v6 = vadd.f32 %v20433_v3, %v20432_v62  ;;  %v20435_v7 = vpop.f32.mrb[106].mxu1  ;;  %20735 = vmatpush3.bf16.msra.mxu1 %v22490_v61  ;;  %v22501_v18 = vld [vmem:[%s28130_s1 + $0x22c0] sm:$0xff]   ;;  %v22530_v61 = vld [vmem:[%s28130_s1 + $0x2238] sm:$0xff]   ;;  %v39_v62 = vld [vmem:[%s28129_s0 + $0x88] sm:$0xff] }
 0x43b   :  { %v20436_v9 = vpop.f32.mrb[107].mxu1  ;;  %20736 = vmatprep.subr.bf16.mxu1 %v22492_v2  ;;  %v3989_v63 = vrot.slane %v39_v62, %v23126_v41  ;;  %v3982_v1 = vcombine.high %v39_v62, %v39_v62  ;;  %v22531_v2 = vld [vmem:[%s28130_s1 + $0x22b8] sm:$0xff]   ;;  %v22534_v7 = vld [vmem:[%s28130_s1 + $0x2300] sm:$0xff]   ;;  %v22569_v62 = vld [vmem:[%s28130_s1 + $0x2448] sm:$0xff]  }
 0x43c   :  { %v26592_v11 = vadd.f32 %v20434_v6, %v15848_v5  ;;  %20715 = vmatpush3.bf16.msra.mxu0 %v22493_v8  ;;  %v22533_v5 = vld [vmem:[%s28130_s1 + $0x23c0] sm:$0xff]  }
 0x43d   :  { %20716 = vmatprep.subr.bf16.mxu0 %v22495_v12  ;;  %v3997_v3 = vcombine.high %v3989_v63, %v3989_v63  ;;  %v4005_v4 = vrot.slane %v3989_v63, %v23126_v41  ;;  %v26719_v6 = vrot.slane %v3982_v1, %v23126_v41  ;;  %v22535_v9 = vld [vmem:[%s28130_s1 + $0x2380] sm:$0xff]   ;;  %v22536_v12 = vld [vmem:[%s28130_s1 + $0x2348] sm:$0xff]  }
 0x43e   :  { %20737 = vmatpush3.bf16.msra.mxu1 %v22494_v10  ;;  %v22570_v63 = vld [vmem:[%s28130_s1 + $0x24c8] sm:$0xff]  }
 0x43f   :  { %20738 = vmatprep.subr.bf16.mxu1 %v22496_v13  ;;  %v4019_v8 = vrot.slane %v3997_v3, %v23126_v41  ;;  %v3998_v10 = vcombine.high %v26719_v6, %v26719_v6  ;;  %v22572_v1 = vld [vmem:[%s28130_s1 + $0x2488] sm:$0xff]   ;;  %v22574_v3 = vld [vmem:[%s28130_s1 + $0x24d0] sm:$0xff]  }
 0x440   :  { %20717 = vmatpush3.bf16.msra.mxu0 %v22497_v14  ;;  %v22537_v14 = vld [vmem:[%s28130_s1 + $0x23c8] sm:$0xff]  }
 0x441   :  { %20746 = vmatprep.subr.bf16.mxu0 %v22500_v17  ;;  %v4029_v13 = vcombine.high %v4019_v8, %v4019_v8  ;;  %v22539_v17 = vld [vmem:[%s28130_s1 + $0x2388] sm:$0xff]  }
 0x442   :  { %20739 = vmatpush3.bf16.msra.mxu1 %v22498_v15  ;;  %v4026_v15 = vrot.slane %v3998_v10, %v23126_v41  ;;  %v22581_v10 = vld [vmem:[%s28130_s1 + $0x2460] sm:$0xff]  }
 0x443   :  { %16406 = vmatmul.mubr.bf16.vlgmr.msra.gmra.mrb[132].mxu0 %v3963_v16  ;;  %20768 = vmatprep.subr.bf16.mxu1 %v22501_v18  ;;  %v22538_v16 = vld [vmem:[%s28130_s1 + $0x2308] sm:$0xff]  }
 0x444   :  { %20747 = vmatpush3.bf16.msra.mxu0 %v22502_v19  ;;  %16485 = vmatprep.mubr.bf16.mxu0 %v4019_v8  ;;  %v4030_v18 = vcombine.high %v4026_v15, %v4026_v15  ;;  %v22540_v19 = vld [vmem:[%s28130_s1 + $0x2350] sm:$0xff]   ;;  %v22579_v8 = vld [vmem:[%s28130_s1 + $0x2418] sm:$0xff]  }
 0x445   :  { %16446 = vmatmul.mubr.bf16.vlgmr.msra.gmra.mrb[132].mxu1 %v3979_v21  ;;  %20748 = vmatprep.subr.bf16.mxu0 %v22504_v22  ;;  %v22542_v21 = vld [vmem:[%s28130_s1 + $0x2310] sm:$0xff]  }
 0x446   :  { %20769 = vmatpush3.bf16.msra.mxu1 %v22503_v20  ;;  %16525 = vmatprep.mubr.bf16.mxu1 %v4029_v13  ;;  %v22541_v20 = vld [vmem:[%s28130_s1 + $0x23d0] sm:$0xff]   ;;  %v22584_v13 = vld [vmem:[%s28130_s1 + $0x24a0] sm:$0xff]  }
 0x447   :  { %20770 = vmatprep.subr.bf16.mxu1 %v22505_v23  ;;  %v22543_v22 = vld [vmem:[%s28130_s1 + $0x2390] sm:$0xff]   ;;  %v22544_v23 = vld [vmem:[%s28130_s1 + $0x2358] sm:$0xff]  }
 0x448   :  { %20749 = vmatpush3.bf16.msra.mxu0 %v22506_v24  ;;  %v22545_v24 = vld [vmem:[%s28130_s1 + $0x23d8] sm:$0xff]  }
 0x449   :  { %20750 = vmatprep.subr.bf16.mxu0 %v22508_v26  ;;  %v22547_v26 = vld [vmem:[%s28130_s1 + $0x2398] sm:$0xff]  }
 0x44a   :  { %20771 = vmatpush3.bf16.msra.mxu1 %v22507_v25  ;;  %v22546_v25 = vld [vmem:[%s28130_s1 + $0x2318] sm:$0xff]  }
 0x44b   :  { %20772 = vmatprep.subr.bf16.mxu1 %v22509_v27  ;;  %v22548_v27 = vld [vmem:[%s28130_s1 + $0x2360] sm:$0xff]  }
 0x44c   :  { %20751 = vmatpush3.bf16.msra.mxu0 %v22510_v28  ;;  %v22549_v28 = vld [vmem:[%s28130_s1 + $0x23e0] sm:$0xff]  }
 0x44d   :  { %20752 = vmatprep.subr.bf16.mxu0 %v22512_v30  ;;  %v22551_v30 = vld [vmem:[%s28130_s1 + $0x23a0] sm:$0xff]  }
 0x44e   :  { %20773 = vmatpush3.bf16.msra.mxu1 %v22511_v29  ;;  %v22550_v29 = vld [vmem:[%s28130_s1 + $0x2320] sm:$0xff]  }
 0x44f   :  { %20774 = vmatprep.subr.bf16.mxu1 %v22513_v31  ;;  %v22552_v31 = vld [vmem:[%s28130_s1 + $0x2368] sm:$0xff]  }
 0x450   :  { %20753 = vmatpush3.bf16.msra.mxu0 %v22514_v32  ;;  %v22553_v32 = vld [vmem:[%s28130_s1 + $0x23e8] sm:$0xff]  }
 0x451   :  { %20754 = vmatprep.subr.bf16.mxu0 %v22516_v34  ;;  %v22554_v34 = vld [vmem:[%s28130_s1 + $0x2328] sm:$0xff]  }
 0x452   :  { %20775 = vmatpush3.bf16.msra.mxu1 %v22515_v33 }
 0x453   :  { %20776 = vmatprep.subr.bf16.mxu1 %v22517_v35 }
 0x454   :  { %20755 = vmatpush3.bf16.msra.mxu0 %v22518_v36  ;;  %v22555_v36 = vld [vmem:[%s28130_s1 + $0x23a8] sm:$0xff]  }
 0x455   :  { %20756 = vmatprep.subr.bf16.mxu0 %v22520_v38 }
 0x456   :  { %v20454_v40 = vpop.f32.mrb[108].mxu0  ;;  %20777 = vmatpush3.bf16.msra.mxu1 %v22519_v37 }
 0x457   :  { %v20455_v43 = vpop.f32.mrb[109].mxu0  ;;  %20778 = vmatprep.subr.bf16.mxu1 %v22521_v39 }
 0x458   :  { %v20476_v45 = vpop.f32.mrb[108].mxu1  ;;  %v20456_v46 = vadd.f32 %v20455_v43, %v20454_v40  ;;  %v20457_v47 = vpop.f32.mrb[110].mxu0  ;;  %20757 = vmatpush3.bf16.msra.mxu0 %v22522_v42  ;;  %v22556_v40 = vld [vmem:[%s28130_s1 + $0x2370] sm:$0xff]  }
 0x459   :  { %v20477_v48 = vpop.f32.mrb[109].mxu1  ;;  %v20458_v50 = vpop.f32.mrb[111].mxu0  ;;  %20758 = vmatprep.subr.bf16.mxu0 %v22524_v44  ;;  %v22557_v42 = vld [vmem:[%s28130_s1 + $0x23f0] sm:$0xff]  }
 0x45a   :  { %v15928_v52 = vadd.f32 %v20456_v46, %v26592_v11  ;;  %v20478_v53 = vadd.f32 %v20477_v48, %v20476_v45  ;;  %v20479_v54 = vpop.f32.mrb[110].mxu1  ;;  %20779 = vmatpush3.bf16.msra.mxu1 %v22523_v49  ;;  %v4027_v11 = vcombine.high %v4005_v4, %v4005_v4  ;;  %v22558_v48 = vld [vmem:[%s28130_s1 + $0x2330] sm:$0xff]  }
 0x45b   :  { %v20480_v56 = vpop.f32.mrb[111].mxu1  ;;  %20780 = vmatprep.subr.bf16.mxu1 %v22525_v51  ;;  %v22559_v50 = vld [vmem:[%s28130_s1 + $0x23b0] sm:$0xff]   ;;  %v22562_v54 = vld [vmem:[%s28130_s1 + $0x2338] sm:$0xff]  }
 0x45c   :  { %v26693_v58 = vadd.f32 %v20478_v53, %v15928_v52  ;;  %20759 = vmatpush3.bf16.msra.mxu0 %v22526_v55  ;;  %v22560_v52 = vld [vmem:[%s28130_s1 + $0x2378] sm:$0xff]   ;;  %v4012_v56 = vrot.slane %v26719_v6, %v23126_v41 }
 0x45d   :  { %20760 = vmatprep.subr.bf16.mxu0 %v22528_v57  ;;  %v22561_v53 = vld [vmem:[%s28130_s1 + $0x23f8] sm:$0xff]   ;;  %v22565_v57 = vld [vmem:[%s28130_s1 + $0x2440] sm:$0xff]  }
 0x45e   :  { %20781 = vmatpush3.bf16.msra.mxu1 %v22527_v59  ;;  %v22563_v55 = vld [vmem:[%s28130_s1 + $0x23b8] sm:$0xff]   ;;  %v22567_v59 = vld [vmem:[%s28130_s1 + $0x2400] sm:$0xff]  }
 0x45f   :  { %20782 = vmatprep.subr.bf16.mxu1 %v22529_v60  ;;  %v22568_v60 = vld [vmem:[%s28130_s1 + $0x2480] sm:$0xff]   ;;  %v22577_v6 = vld [vmem:[%s28130_s1 + $0x2458] sm:$0xff]  }
 0x460   :  { %20761 = vmatpush3.bf16.msra.mxu0 %v22530_v61  ;;  %v4028_v61 = vcombine.high %v4012_v56, %v4012_v56 }
 0x461   :  { %20790 = vmatprep.subr.bf16.mxu0 %v22532_v0  ;;  %v22571_v0 = vld [vmem:[%s28130_s1 + $0x2408] sm:$0xff]  }
 0x462   :  { %20783 = vmatpush3.bf16.msra.mxu1 %v22531_v2  ;;  %v22573_v2 = vld [vmem:[%s28130_s1 + $0x2450] sm:$0xff]  }
 0x463   :  { %20812 = vmatprep.subr.bf16.mxu1 %v22533_v5  ;;  %16486 = vmatmul.mubr.bf16.vlgmr.msra.gmra.mrb[136].mxu0 %v4005_v4  ;;  %v22575_v4 = vld [vmem:[%s28130_s1 + $0x2410] sm:$0xff]  }
 0x464   :  { %20791 = vmatpush3.bf16.msra.mxu0 %v22534_v7  ;;  %16565 = vmatprep.mubr.bf16.mxu0 %v4026_v15  ;;  %v22576_v5 = vld [vmem:[%s28130_s1 + $0x2490] sm:$0xff]   ;;  %v22578_v7 = vld [vmem:[%s28130_s1 + $0x24d8] sm:$0xff]   ;;  %v22586_v15 = vld [vmem:[%s28130_s1 + $0x24e8] sm:$0xff]  }
 0x465   :  { %16526 = vmatmul.mubr.bf16.vlgmr.msra.gmra.mrb[136].mxu1 %v4027_v11  ;;  %20792 = vmatprep.subr.bf16.mxu0 %v22536_v12  ;;  %v22582_v11 = vld [vmem:[%s28130_s1 + $0x24e0] sm:$0xff]  }
 0x466   :  { %20813 = vmatpush3.bf16.msra.mxu1 %v22535_v9  ;;  %16605 = vmatprep.mubr.bf16.mxu1 %v4030_v18  ;;  %v22580_v9 = vld [vmem:[%s28130_s1 + $0x2498] sm:$0xff]   ;;  %v22583_v12 = vld [vmem:[%s28130_s1 + $0x2420] sm:$0xff]  }
 0x467   :  { %20814 = vmatprep.subr.bf16.mxu1 %v22537_v14  ;;  %v22585_v14 = vld [vmem:[%s28130_s1 + $0x2468] sm:$0xff]  }
 0x468   :  { %20793 = vmatpush3.bf16.msra.mxu0 %v22538_v16 }
 0x469   :  { %20794 = vmatprep.subr.bf16.mxu0 %v22540_v19  ;;  %v22589_v19 = vld [vmem:[%s28130_s1 + $0x2470] sm:$0xff]  }
 0x46a   :  { %20815 = vmatpush3.bf16.msra.mxu1 %v22539_v17  ;;  %v22587_v17 = vld [vmem:[%s28130_s1 + $0x2428] sm:$0xff]  }
 0x46b   :  { %20816 = vmatprep.subr.bf16.mxu1 %v22541_v20 }
 0x46c   :  { %20795 = vmatpush3.bf16.msra.mxu0 %v22542_v21 }
 0x46d   :  { %20796 = vmatprep.subr.bf16.mxu0 %v22544_v23 }
 0x46e   :  { %20817 = vmatpush3.bf16.msra.mxu1 %v22543_v22 }
 0x46f   :  { %20818 = vmatprep.subr.bf16.mxu1 %v22545_v24  ;;  %v22588_v24 = vld [vmem:[%s28130_s1 + $0x24a8] sm:$0xff]  }
 0x470   :  { %20797 = vmatpush3.bf16.msra.mxu0 %v22546_v25 }
 0x471   :  { %20798 = vmatprep.subr.bf16.mxu0 %v22548_v27 }
 0x472   :  { %20819 = vmatpush3.bf16.msra.mxu1 %v22547_v26  ;;  %v22590_v26 = vld [vmem:[%s28130_s1 + $0x24f0] sm:$0xff]  }
 0x473   :  { %20820 = vmatprep.subr.bf16.mxu1 %v22549_v28 }
 0x474   :  { %20799 = vmatpush3.bf16.msra.mxu0 %v22550_v29 }
 0x475   :  { %20800 = vmatprep.subr.bf16.mxu0 %v22552_v31 }
 0x476   :  { %v20498_v33 = vpop.f32.mrb[112].mxu0  ;;  %20821 = vmatpush3.bf16.msra.mxu1 %v22551_v30  ;;  %v22591_v30 = vld [vmem:[%s28130_s1 + $0x2430] sm:$0xff]  }
 0x477   :  { %v20499_v35 = vpop.f32.mrb[113].mxu0  ;;  %20822 = vmatprep.subr.bf16.mxu1 %v22553_v32  ;;  %v22593_v32 = vld [vmem:[%s28130_s1 + $0x2478] sm:$0xff]  }
 0x478   :  { %v20520_v37 = vpop.f32.mrb[112].mxu1  ;;  %v20500_v38 = vadd.f32 %v20499_v35, %v20498_v33  ;;  %v20501_v39 = vpop.f32.mrb[114].mxu0  ;;  %20801 = vmatpush3.bf16.msra.mxu0 %v22554_v34  ;;  %v22592_v34 = vld [vmem:[%s28130_s1 + $0x24b0] sm:$0xff]   ;;  %v22594_v35 = vld [vmem:[%s28130_s1 + $0x24f8] sm:$0xff]  }
 0x479   :  { %v20521_v43 = vpop.f32.mrb[113].mxu1  ;;  %v20502_v44 = vpop.f32.mrb[115].mxu0  ;;  %20802 = vmatprep.subr.bf16.mxu0 %v22556_v40  ;;  %v22597_v39 = vld [vmem:[%s28130_s1 + $0x2540] sm:$0xff]  }
 0x47a   :  { %v16008_v45 = vadd.f32 %v20500_v38, %v26693_v58  ;;  %v20522_v46 = vadd.f32 %v20521_v43, %v20520_v37  ;;  %v20523_v47 = vpop.f32.mrb[114].mxu1  ;;  %20823 = vmatpush3.bf16.msra.mxu1 %v22555_v36  ;;  %v22566_v58 = vld [vmem:[%s28130_s1 + $0x24c0] sm:$0xff]   ;;  %v22595_v36 = vld [vmem:[%s28130_s1 + $0x2438] sm:$0xff]   ;;  %v40_v37 = vld [vmem:[%s28129_s0 + $0x90] sm:$0xff] }
 0x47b   :  { %v20524_v49 = vpop.f32.mrb[115].mxu1  ;;  %20824 = vmatprep.subr.bf16.mxu1 %v22557_v42  ;;  %v4038_v38 = vrot.slane %v40_v37, %v23126_v41  ;;  %v4031_v40 = vcombine.high %v40_v37, %v40_v37  ;;  %v22596_v42 = vld [vmem:[%s28130_s1 + $0x24b8] sm:$0xff]   ;;  %v22599_v47 = vld [vmem:[%s28130_s1 + $0x2500] sm:$0xff]   ;;  %v22634_v37 = vld [vmem:[%s28130_s1 + $0x2648] sm:$0xff]  }
 0x47c   :  { %v26804_v51 = vadd.f32 %v20522_v46, %v16008_v45  ;;  %20803 = vmatpush3.bf16.msra.mxu0 %v22558_v48  ;;  %v22598_v45 = vld [vmem:[%s28130_s1 + $0x25c0] sm:$0xff]  }
 0x47d   :  { %20804 = vmatprep.subr.bf16.mxu0 %v22560_v52  ;;  %v4046_v43 = vcombine.high %v4038_v38, %v4038_v38  ;;  %v4054_v44 = vrot.slane %v4038_v38, %v23126_v41  ;;  %v26931_v46 = vrot.slane %v4031_v40, %v23126_v41  ;;  %v22600_v49 = vld [vmem:[%s28130_s1 + $0x2580] sm:$0xff]   ;;  %v22601_v52 = vld [vmem:[%s28130_s1 + $0x2548] sm:$0xff]  }
 0x47e   :  { %20825 = vmatpush3.bf16.msra.mxu1 %v22559_v50  ;;  %v22635_v38 = vld [vmem:[%s28130_s1 + $0x26c8] sm:$0xff]  }
 0x47f   :  { %20826 = vmatprep.subr.bf16.mxu1 %v22561_v53  ;;  %v4068_v48 = vrot.slane %v4046_v43, %v23126_v41  ;;  %v4047_v50 = vcombine.high %v26931_v46, %v26931_v46  ;;  %v22637_v40 = vld [vmem:[%s28130_s1 + $0x2688] sm:$0xff]   ;;  %v22639_v43 = vld [vmem:[%s28130_s1 + $0x26d0] sm:$0xff]  }
 0x480   :  { %20805 = vmatpush3.bf16.msra.mxu0 %v22562_v54  ;;  %v22602_v54 = vld [vmem:[%s28130_s1 + $0x25c8] sm:$0xff]  }
 0x481   :  { %20834 = vmatprep.subr.bf16.mxu0 %v22565_v57  ;;  %v4078_v53 = vcombine.high %v4068_v48, %v4068_v48  ;;  %v22604_v57 = vld [vmem:[%s28130_s1 + $0x2588] sm:$0xff]  }
 0x482   :  { %20827 = vmatpush3.bf16.msra.mxu1 %v22563_v55  ;;  %v4075_v55 = vrot.slane %v4047_v50, %v23126_v41  ;;  %v22646_v50 = vld [vmem:[%s28130_s1 + $0x2660] sm:$0xff]  }
 0x483   :  { %16566 = vmatmul.mubr.bf16.vlgmr.msra.gmra.mrb[140].mxu0 %v4012_v56  ;;  %20856 = vmatprep.subr.bf16.mxu1 %v22566_v58  ;;  %v22603_v56 = vld [vmem:[%s28130_s1 + $0x2508] sm:$0xff]  }
 0x484   :  { %20835 = vmatpush3.bf16.msra.mxu0 %v22567_v59  ;;  %16645 = vmatprep.mubr.bf16.mxu0 %v4068_v48  ;;  %v4079_v58 = vcombine.high %v4075_v55, %v4075_v55  ;;  %v22605_v59 = vld [vmem:[%s28130_s1 + $0x2550] sm:$0xff]   ;;  %v22644_v48 = vld [vmem:[%s28130_s1 + $0x2618] sm:$0xff]  }
 0x485   :  { %16606 = vmatmul.mubr.bf16.vlgmr.msra.gmra.mrb[140].mxu1 %v4028_v61  ;;  %20836 = vmatprep.subr.bf16.mxu0 %v22569_v62  ;;  %v22607_v61 = vld [vmem:[%s28130_s1 + $0x2510] sm:$0xff]  }
 0x486   :  { %20857 = vmatpush3.bf16.msra.mxu1 %v22568_v60  ;;  %16685 = vmatprep.mubr.bf16.mxu1 %v4078_v53  ;;  %v22606_v60 = vld [vmem:[%s28130_s1 + $0x25d0] sm:$0xff]   ;;  %v22649_v53 = vld [vmem:[%s28130_s1 + $0x26a0] sm:$0xff]  }
 0x487   :  { %20858 = vmatprep.subr.bf16.mxu1 %v22570_v63  ;;  %v22608_v62 = vld [vmem:[%s28130_s1 + $0x2590] sm:$0xff]   ;;  %v22609_v63 = vld [vmem:[%s28130_s1 + $0x2558] sm:$0xff]  }
 0x488   :  { %20837 = vmatpush3.bf16.msra.mxu0 %v22571_v0  ;;  %v22610_v0 = vld [vmem:[%s28130_s1 + $0x25d8] sm:$0xff]  }
 0x489   :  { %20838 = vmatprep.subr.bf16.mxu0 %v22573_v2  ;;  %v22612_v2 = vld [vmem:[%s28130_s1 + $0x2598] sm:$0xff]  }
 0x48a   :  { %20859 = vmatpush3.bf16.msra.mxu1 %v22572_v1  ;;  %v22611_v1 = vld [vmem:[%s28130_s1 + $0x2518] sm:$0xff]  }
 0x48b   :  { %20860 = vmatprep.subr.bf16.mxu1 %v22574_v3  ;;  %v22613_v3 = vld [vmem:[%s28130_s1 + $0x2560] sm:$0xff]  }
 0x48c   :  { %20839 = vmatpush3.bf16.msra.mxu0 %v22575_v4  ;;  %v22614_v4 = vld [vmem:[%s28130_s1 + $0x25e0] sm:$0xff]  }
 0x48d   :  { %20840 = vmatprep.subr.bf16.mxu0 %v22577_v6  ;;  %v22616_v6 = vld [vmem:[%s28130_s1 + $0x25a0] sm:$0xff]  }
 0x48e   :  { %20861 = vmatpush3.bf16.msra.mxu1 %v22576_v5  ;;  %v22615_v5 = vld [vmem:[%s28130_s1 + $0x2520] sm:$0xff]  }
 0x48f   :  { %20862 = vmatprep.subr.bf16.mxu1 %v22578_v7  ;;  %v22617_v7 = vld [vmem:[%s28130_s1 + $0x2568] sm:$0xff]  }
 0x490   :  { %20841 = vmatpush3.bf16.msra.mxu0 %v22579_v8  ;;  %v22618_v8 = vld [vmem:[%s28130_s1 + $0x25e8] sm:$0xff]  }
 0x491   :  { %20842 = vmatprep.subr.bf16.mxu0 %v22581_v10  ;;  %v22619_v10 = vld [vmem:[%s28130_s1 + $0x2528] sm:$0xff]  }
 0x492   :  { %20863 = vmatpush3.bf16.msra.mxu1 %v22580_v9 }
 0x493   :  { %20864 = vmatprep.subr.bf16.mxu1 %v22582_v11 }
 0x494   :  { %20843 = vmatpush3.bf16.msra.mxu0 %v22583_v12  ;;  %v22620_v12 = vld [vmem:[%s28130_s1 + $0x25a8] sm:$0xff]  }
 0x495   :  { %20844 = vmatprep.subr.bf16.mxu0 %v22585_v14 }
 0x496   :  { %v20542_v16 = vpop.f32.mrb[116].mxu0  ;;  %20865 = vmatpush3.bf16.msra.mxu1 %v22584_v13 }
 0x497   :  { %v20543_v18 = vpop.f32.mrb[117].mxu0  ;;  %20866 = vmatprep.subr.bf16.mxu1 %v22586_v15 }
 0x498   :  { %v20564_v20 = vpop.f32.mrb[116].mxu1  ;;  %v20544_v21 = vadd.f32 %v20543_v18, %v20542_v16  ;;  %v20545_v22 = vpop.f32.mrb[118].mxu0  ;;  %20845 = vmatpush3.bf16.msra.mxu0 %v22587_v17  ;;  %v22621_v16 = vld [vmem:[%s28130_s1 + $0x2570] sm:$0xff]  }
 0x499   :  { %v20565_v23 = vpop.f32.mrb[117].mxu1  ;;  %v20546_v25 = vpop.f32.mrb[119].mxu0  ;;  %20846 = vmatprep.subr.bf16.mxu0 %v22589_v19  ;;  %v22622_v17 = vld [vmem:[%s28130_s1 + $0x25f0] sm:$0xff]  }
 0x49a   :  { %v16088_v27 = vadd.f32 %v20544_v21, %v26804_v51  ;;  %v20566_v28 = vadd.f32 %v20565_v23, %v20564_v20  ;;  %v20567_v29 = vpop.f32.mrb[118].mxu1  ;;  %20867 = vmatpush3.bf16.msra.mxu1 %v22588_v24  ;;  %v4076_v51 = vcombine.high %v4054_v44, %v4054_v44  ;;  %v22623_v23 = vld [vmem:[%s28130_s1 + $0x2530] sm:$0xff]  }
 0x49b   :  { %v20568_v31 = vpop.f32.mrb[119].mxu1  ;;  %20868 = vmatprep.subr.bf16.mxu1 %v22590_v26  ;;  %v22624_v25 = vld [vmem:[%s28130_s1 + $0x25b0] sm:$0xff]   ;;  %v22627_v29 = vld [vmem:[%s28130_s1 + $0x2538] sm:$0xff]  }
 0x49c   :  { %v26905_v33 = vadd.f32 %v20566_v28, %v16088_v27  ;;  %20847 = vmatpush3.bf16.msra.mxu0 %v22591_v30  ;;  %v22625_v27 = vld [vmem:[%s28130_s1 + $0x2578] sm:$0xff]   ;;  %v4061_v31 = vrot.slane %v26931_v46, %v23126_v41 }
 0x49d   :  { %20848 = vmatprep.subr.bf16.mxu0 %v22593_v32  ;;  %v22626_v28 = vld [vmem:[%s28130_s1 + $0x25f8] sm:$0xff]   ;;  %v22630_v32 = vld [vmem:[%s28130_s1 + $0x2640] sm:$0xff]  }
 0x49e   :  { %20869 = vmatpush3.bf16.msra.mxu1 %v22592_v34  ;;  %v22628_v30 = vld [vmem:[%s28130_s1 + $0x25b8] sm:$0xff]   ;;  %v22632_v34 = vld [vmem:[%s28130_s1 + $0x2600] sm:$0xff]  }
 0x49f   :  { %20870 = vmatprep.subr.bf16.mxu1 %v22594_v35  ;;  %v22633_v35 = vld [vmem:[%s28130_s1 + $0x2680] sm:$0xff]   ;;  %v22642_v46 = vld [vmem:[%s28130_s1 + $0x2658] sm:$0xff]  }
 0x4a0   :  { %20849 = vmatpush3.bf16.msra.mxu0 %v22595_v36  ;;  %v4077_v36 = vcombine.high %v4061_v31, %v4061_v31 }
 0x4a1   :  { %20878 = vmatprep.subr.bf16.mxu0 %v22597_v39  ;;  %v22636_v39 = vld [vmem:[%s28130_s1 + $0x2608] sm:$0xff]  }
 0x4a2   :  { %20871 = vmatpush3.bf16.msra.mxu1 %v22596_v42  ;;  %v22638_v42 = vld [vmem:[%s28130_s1 + $0x2650] sm:$0xff]  }
 0x4a3   :  { %20900 = vmatprep.subr.bf16.mxu1 %v22598_v45  ;;  %16646 = vmatmul.mubr.bf16.vlgmr.msra.gmra.mrb[144].mxu0 %v4054_v44  ;;  %v22640_v44 = vld [vmem:[%s28130_s1 + $0x2610] sm:$0xff]  }
 0x4a4   :  { %20879 = vmatpush3.bf16.msra.mxu0 %v22599_v47  ;;  %16725 = vmatprep.mubr.bf16.mxu0 %v4075_v55  ;;  %v22641_v45 = vld [vmem:[%s28130_s1 + $0x2690] sm:$0xff]   ;;  %v22643_v47 = vld [vmem:[%s28130_s1 + $0x26d8] sm:$0xff]   ;;  %v22651_v55 = vld [vmem:[%s28130_s1 + $0x26e8] sm:$0xff]  }
 0x4a5   :  { %16686 = vmatmul.mubr.bf16.vlgmr.msra.gmra.mrb[144].mxu1 %v4076_v51  ;;  %20880 = vmatprep.subr.bf16.mxu0 %v22601_v52  ;;  %v22647_v51 = vld [vmem:[%s28130_s1 + $0x26e0] sm:$0xff]  }
 0x4a6   :  { %20901 = vmatpush3.bf16.msra.mxu1 %v22600_v49  ;;  %16765 = vmatprep.mubr.bf16.mxu1 %v4079_v58  ;;  %v22645_v49 = vld [vmem:[%s28130_s1 + $0x2698] sm:$0xff]   ;;  %v22648_v52 = vld [vmem:[%s28130_s1 + $0x2620] sm:$0xff]  }
 0x4a7   :  { %20902 = vmatprep.subr.bf16.mxu1 %v22602_v54  ;;  %v22650_v54 = vld [vmem:[%s28130_s1 + $0x2668] sm:$0xff]  }
 0x4a8   :  { %20881 = vmatpush3.bf16.msra.mxu0 %v22603_v56 }
 0x4a9   :  { %20882 = vmatprep.subr.bf16.mxu0 %v22605_v59  ;;  %v22654_v59 = vld [vmem:[%s28130_s1 + $0x2670] sm:$0xff]  }
 0x4aa   :  { %20903 = vmatpush3.bf16.msra.mxu1 %v22604_v57  ;;  %v22652_v57 = vld [vmem:[%s28130_s1 + $0x2628] sm:$0xff]  }
 0x4ab   :  { %20904 = vmatprep.subr.bf16.mxu1 %v22606_v60 }
 0x4ac   :  { %20883 = vmatpush3.bf16.msra.mxu0 %v22607_v61 }
 0x4ad   :  { %20884 = vmatprep.subr.bf16.mxu0 %v22609_v63 }
 0x4ae   :  { %20905 = vmatpush3.bf16.msra.mxu1 %v22608_v62 }
 0x4af   :  { %20906 = vmatprep.subr.bf16.mxu1 %v22610_v0  ;;  %v22653_v0 = vld [vmem:[%s28130_s1 + $0x26a8] sm:$0xff]  }
 0x4b0   :  { %20885 = vmatpush3.bf16.msra.mxu0 %v22611_v1 }
 0x4b1   :  { %20886 = vmatprep.subr.bf16.mxu0 %v22613_v3 }
 0x4b2   :  { %20907 = vmatpush3.bf16.msra.mxu1 %v22612_v2  ;;  %v22655_v2 = vld [vmem:[%s28130_s1 + $0x26f0] sm:$0xff]  }
 0x4b3   :  { %20908 = vmatprep.subr.bf16.mxu1 %v22614_v4 }
 0x4b4   :  { %20887 = vmatpush3.bf16.msra.mxu0 %v22615_v5 }
 0x4b5   :  { %20888 = vmatprep.subr.bf16.mxu0 %v22617_v7 }
 0x4b6   :  { %v20586_v9 = vpop.f32.mrb[120].mxu0  ;;  %20909 = vmatpush3.bf16.msra.mxu1 %v22616_v6  ;;  %v22656_v6 = vld [vmem:[%s28130_s1 + $0x2630] sm:$0xff]  }
 0x4b7   :  { %v20587_v11 = vpop.f32.mrb[121].mxu0  ;;  %20910 = vmatprep.subr.bf16.mxu1 %v22618_v8  ;;  %v22658_v8 = vld [vmem:[%s28130_s1 + $0x2678] sm:$0xff]  }
 0x4b8   :  { %v20608_v13 = vpop.f32.mrb[120].mxu1  ;;  %v20588_v14 = vadd.f32 %v20587_v11, %v20586_v9  ;;  %v20589_v15 = vpop.f32.mrb[122].mxu0  ;;  %20889 = vmatpush3.bf16.msra.mxu0 %v22619_v10  ;;  %v22657_v10 = vld [vmem:[%s28130_s1 + $0x26b0] sm:$0xff]   ;;  %v22659_v11 = vld [vmem:[%s28130_s1 + $0x26f8] sm:$0xff]  }
 0x4b9   :  { %v20609_v18 = vpop.f32.mrb[121].mxu1  ;;  %v20590_v19 = vpop.f32.mrb[123].mxu0  ;;  %20890 = vmatprep.subr.bf16.mxu0 %v22621_v16  ;;  %v22662_v15 = vld [vmem:[%s28130_s1 + $0x2740] sm:$0xff]  }
 0x4ba   :  { %v16168_v20 = vadd.f32 %v20588_v14, %v26905_v33  ;;  %v20610_v21 = vadd.f32 %v20609_v18, %v20608_v13  ;;  %v20611_v22 = vpop.f32.mrb[122].mxu1  ;;  %20911 = vmatpush3.bf16.msra.mxu1 %v22620_v12  ;;  %v22631_v33 = vld [vmem:[%s28130_s1 + $0x26c0] sm:$0xff]   ;;  %v22660_v12 = vld [vmem:[%s28130_s1 + $0x2638] sm:$0xff]  }
 0x4bb   :  { %v20612_v24 = vpop.f32.mrb[123].mxu1  ;;  %20912 = vmatprep.subr.bf16.mxu1 %v22622_v17  ;;  %v41_v13 = vld [vmem:[%s28129_s0 + $0x98] sm:$0xff]  ;;  %v22664_v22 = vld [vmem:[%s28130_s1 + $0x2700] sm:$0xff]  }
 0x4bc   :  { %v27016_v26 = vadd.f32 %v20610_v21, %v16168_v20  ;;  %20891 = vmatpush3.bf16.msra.mxu0 %v22623_v23  ;;  %v4087_v14 = vrot.slane %v41_v13, %v23126_v41  ;;  %v4080_v16 = vcombine.high %v41_v13, %v41_v13  ;;  %v22661_v17 = vld [vmem:[%s28130_s1 + $0x26b8] sm:$0xff]   ;;  %v22663_v20 = vld [vmem:[%s28130_s1 + $0x27c0] sm:$0xff]   ;;  %v22699_v13 = vld [vmem:[%s28130_s1 + $0x2848] sm:$0xff]  }
 0x4bd   :  { %20892 = vmatprep.subr.bf16.mxu0 %v22625_v27  ;;  %v22665_v24 = vld [vmem:[%s28130_s1 + $0x2780] sm:$0xff]   ;;  %v22666_v27 = vld [vmem:[%s28130_s1 + $0x2748] sm:$0xff]  }
 0x4be   :  { %20913 = vmatpush3.bf16.msra.mxu1 %v22624_v25  ;;  %v4095_v18 = vcombine.high %v4087_v14, %v4087_v14  ;;  %v4103_v19 = vrot.slane %v4087_v14, %v23126_v41  ;;  %v27143_v21 = vrot.slane %v4080_v16, %v23126_v41  ;;  %v22700_v14 = vld [vmem:[%s28130_s1 + $0x28c8] sm:$0xff]  }
 0x4bf   :  { %20914 = vmatprep.subr.bf16.mxu1 %v22626_v28  ;;  %v22702_v16 = vld [vmem:[%s28130_s1 + $0x2888] sm:$0xff]  }
 0x4c0   :  { %20893 = vmatpush3.bf16.msra.mxu0 %v22627_v29  ;;  %v4117_v23 = vrot.slane %v4095_v18, %v23126_v41  ;;  %v4096_v25 = vcombine.high %v27143_v21, %v27143_v21  ;;  %v22667_v29 = vld [vmem:[%s28130_s1 + $0x27c8] sm:$0xff]   ;;  %v22704_v18 = vld [vmem:[%s28130_s1 + $0x28d0] sm:$0xff]  }
 0x4c1   :  { %20922 = vmatprep.subr.bf16.mxu0 %v22630_v32  ;;  %v22669_v32 = vld [vmem:[%s28130_s1 + $0x2788] sm:$0xff]  }
 0x4c2   :  { %20915 = vmatpush3.bf16.msra.mxu1 %v22628_v30  ;;  %v4127_v28 = vcombine.high %v4117_v23, %v4117_v23  ;;  %v4124_v30 = vrot.slane %v4096_v25, %v23126_v41  ;;  %v22711_v25 = vld [vmem:[%s28130_s1 + $0x2860] sm:$0xff]  }
 0x4c3   :  { %16726 = vmatmul.mubr.bf16.vlgmr.msra.gmra.mrb[148].mxu0 %v4061_v31  ;;  %20944 = vmatprep.subr.bf16.mxu1 %v22631_v33  ;;  %v22668_v31 = vld [vmem:[%s28130_s1 + $0x2708] sm:$0xff]  }
 0x4c4   :  { %20923 = vmatpush3.bf16.msra.mxu0 %v22632_v34  ;;  %16805 = vmatprep.mubr.bf16.mxu0 %v4117_v23  ;;  %v4128_v33 = vcombine.high %v4124_v30, %v4124_v30  ;;  %v22670_v34 = vld [vmem:[%s28130_s1 + $0x2750] sm:$0xff]   ;;  %v22709_v23 = vld [vmem:[%s28130_s1 + $0x2818] sm:$0xff]  }
 0x4c5   :  { %16766 = vmatmul.mubr.bf16.vlgmr.msra.gmra.mrb[148].mxu1 %v4077_v36  ;;  %20924 = vmatprep.subr.bf16.mxu0 %v22634_v37  ;;  %v22672_v36 = vld [vmem:[%s28130_s1 + $0x2710] sm:$0xff]  }
 0x4c6   :  { %20945 = vmatpush3.bf16.msra.mxu1 %v22633_v35  ;;  %16845 = vmatprep.mubr.bf16.mxu1 %v4127_v28  ;;  %v22671_v35 = vld [vmem:[%s28130_s1 + $0x27d0] sm:$0xff]   ;;  %v22714_v28 = vld [vmem:[%s28130_s1 + $0x28a0] sm:$0xff]  }
 0x4c7   :  { %20946 = vmatprep.subr.bf16.mxu1 %v22635_v38  ;;  %v22673_v37 = vld [vmem:[%s28130_s1 + $0x2790] sm:$0xff]   ;;  %v22674_v38 = vld [vmem:[%s28130_s1 + $0x2758] sm:$0xff]  }
 0x4c8   :  { %20925 = vmatpush3.bf16.msra.mxu0 %v22636_v39  ;;  %v22675_v39 = vld [vmem:[%s28130_s1 + $0x27d8] sm:$0xff]  }
 0x4c9   :  { %20926 = vmatprep.subr.bf16.mxu0 %v22638_v42  ;;  %v22677_v42 = vld [vmem:[%s28130_s1 + $0x2798] sm:$0xff]  }
 0x4ca   :  { %20947 = vmatpush3.bf16.msra.mxu1 %v22637_v40  ;;  %v22676_v40 = vld [vmem:[%s28130_s1 + $0x2718] sm:$0xff]  }
 0x4cb   :  { %20948 = vmatprep.subr.bf16.mxu1 %v22639_v43  ;;  %v22678_v43 = vld [vmem:[%s28130_s1 + $0x2760] sm:$0xff]  }
 0x4cc   :  { %20927 = vmatpush3.bf16.msra.mxu0 %v22640_v44  ;;  %v22679_v44 = vld [vmem:[%s28130_s1 + $0x27e0] sm:$0xff]  }
 0x4cd   :  { %20928 = vmatprep.subr.bf16.mxu0 %v22642_v46  ;;  %v22681_v46 = vld [vmem:[%s28130_s1 + $0x27a0] sm:$0xff]  }
 0x4ce   :  { %20949 = vmatpush3.bf16.msra.mxu1 %v22641_v45  ;;  %v22680_v45 = vld [vmem:[%s28130_s1 + $0x2720] sm:$0xff]  }
 0x4cf   :  { %20950 = vmatprep.subr.bf16.mxu1 %v22643_v47  ;;  %v22682_v47 = vld [vmem:[%s28130_s1 + $0x2768] sm:$0xff]  }
 0x4d0   :  { %20929 = vmatpush3.bf16.msra.mxu0 %v22644_v48  ;;  %v22683_v48 = vld [vmem:[%s28130_s1 + $0x27e8] sm:$0xff]  }
 0x4d1   :  { %20930 = vmatprep.subr.bf16.mxu0 %v22646_v50  ;;  %v22684_v50 = vld [vmem:[%s28130_s1 + $0x2728] sm:$0xff]  }
 0x4d2   :  { %20951 = vmatpush3.bf16.msra.mxu1 %v22645_v49 }
 0x4d3   :  { %20952 = vmatprep.subr.bf16.mxu1 %v22647_v51 }
 0x4d4   :  { %20931 = vmatpush3.bf16.msra.mxu0 %v22648_v52  ;;  %v22685_v52 = vld [vmem:[%s28130_s1 + $0x27a8] sm:$0xff]  }
 0x4d5   :  { %20932 = vmatprep.subr.bf16.mxu0 %v22650_v54 }
 0x4d6   :  { %v20630_v56 = vpop.f32.mrb[124].mxu0  ;;  %20953 = vmatpush3.bf16.msra.mxu1 %v22649_v53 }
 0x4d7   :  { %v20631_v58 = vpop.f32.mrb[125].mxu0  ;;  %20954 = vmatprep.subr.bf16.mxu1 %v22651_v55 }
 0x4d8   :  { %v20652_v60 = vpop.f32.mrb[124].mxu1  ;;  %v20632_v61 = vadd.f32 %v20631_v58, %v20630_v56  ;;  %v20633_v62 = vpop.f32.mrb[126].mxu0  ;;  %20933 = vmatpush3.bf16.msra.mxu0 %v22652_v57  ;;  %v22686_v56 = vld [vmem:[%s28130_s1 + $0x2770] sm:$0xff]  }
 0x4d9   :  { %v20653_v63 = vpop.f32.mrb[125].mxu1  ;;  %v20634_v1 = vpop.f32.mrb[127].mxu0  ;;  %20934 = vmatprep.subr.bf16.mxu0 %v22654_v59  ;;  %v22687_v57 = vld [vmem:[%s28130_s1 + $0x27f0] sm:$0xff]  }
 0x4da   :  { %v16248_v3 = vadd.f32 %v20632_v61, %v27016_v26  ;;  %v20654_v4 = vadd.f32 %v20653_v63, %v20652_v60  ;;  %v20655_v5 = vpop.f32.mrb[126].mxu1  ;;  %20955 = vmatpush3.bf16.msra.mxu1 %v22653_v0  ;;  %v4125_v26 = vcombine.high %v4103_v19, %v4103_v19  ;;  %v22688_v63 = vld [vmem:[%s28130_s1 + $0x2730] sm:$0xff]  }
 0x4db   :  { %v20656_v7 = vpop.f32.mrb[127].mxu1  ;;  %20956 = vmatprep.subr.bf16.mxu1 %v22655_v2  ;;  %v22689_v1 = vld [vmem:[%s28130_s1 + $0x27b0] sm:$0xff]   ;;  %v22692_v5 = vld [vmem:[%s28130_s1 + $0x2738] sm:$0xff]  }
 0x4dc   :  { %v27117_v9 = vadd.f32 %v20654_v4, %v16248_v3  ;;  %20935 = vmatpush3.bf16.msra.mxu0 %v22656_v6  ;;  %v22690_v3 = vld [vmem:[%s28130_s1 + $0x2778] sm:$0xff]   ;;  %v4110_v7 = vrot.slane %v27143_v21, %v23126_v41 }
 0x4dd   :  { %20936 = vmatprep.subr.bf16.mxu0 %v22658_v8  ;;  %v22691_v4 = vld [vmem:[%s28130_s1 + $0x27f8] sm:$0xff]   ;;  %v22695_v8 = vld [vmem:[%s28130_s1 + $0x2840] sm:$0xff]  }
 0x4de   :  { %20957 = vmatpush3.bf16.msra.mxu1 %v22657_v10  ;;  %v22693_v6 = vld [vmem:[%s28130_s1 + $0x27b8] sm:$0xff]   ;;  %v22697_v10 = vld [vmem:[%s28130_s1 + $0x2800] sm:$0xff]  }
 0x4df   :  { %20958 = vmatprep.subr.bf16.mxu1 %v22659_v11  ;;  %v22698_v11 = vld [vmem:[%s28130_s1 + $0x2880] sm:$0xff]   ;;  %v22707_v21 = vld [vmem:[%s28130_s1 + $0x2858] sm:$0xff]  }
 0x4e0   :  { %20937 = vmatpush3.bf16.msra.mxu0 %v22660_v12  ;;  %v4126_v12 = vcombine.high %v4110_v7, %v4110_v7 }
 0x4e1   :  { %20966 = vmatprep.subr.bf16.mxu0 %v22662_v15  ;;  %v22701_v15 = vld [vmem:[%s28130_s1 + $0x2808] sm:$0xff]  }
 0x4e2   :  { %20959 = vmatpush3.bf16.msra.mxu1 %v22661_v17  ;;  %v22703_v17 = vld [vmem:[%s28130_s1 + $0x2850] sm:$0xff]  }
 0x4e3   :  { %20988 = vmatprep.subr.bf16.mxu1 %v22663_v20  ;;  %16806 = vmatmul.mubr.bf16.vlgmr.msra.gmra.mrb[152].mxu0 %v4103_v19  ;;  %v22705_v19 = vld [vmem:[%s28130_s1 + $0x2810] sm:$0xff]  }
 0x4e4   :  { %20967 = vmatpush3.bf16.msra.mxu0 %v22664_v22  ;;  %16885 = vmatprep.mubr.bf16.mxu0 %v4124_v30  ;;  %v22706_v20 = vld [vmem:[%s28130_s1 + $0x2890] sm:$0xff]   ;;  %v22708_v22 = vld [vmem:[%s28130_s1 + $0x28d8] sm:$0xff]   ;;  %v22716_v30 = vld [vmem:[%s28130_s1 + $0x28e8] sm:$0xff]  }
 0x4e5   :  { %16846 = vmatmul.mubr.bf16.vlgmr.msra.gmra.mrb[152].mxu1 %v4125_v26  ;;  %20968 = vmatprep.subr.bf16.mxu0 %v22666_v27  ;;  %v22712_v26 = vld [vmem:[%s28130_s1 + $0x28e0] sm:$0xff]  }
 0x4e6   :  { %20989 = vmatpush3.bf16.msra.mxu1 %v22665_v24  ;;  %16925 = vmatprep.mubr.bf16.mxu1 %v4128_v33  ;;  %v22710_v24 = vld [vmem:[%s28130_s1 + $0x2898] sm:$0xff]   ;;  %v22713_v27 = vld [vmem:[%s28130_s1 + $0x2820] sm:$0xff]  }
 0x4e7   :  { %20990 = vmatprep.subr.bf16.mxu1 %v22667_v29  ;;  %v22715_v29 = vld [vmem:[%s28130_s1 + $0x2868] sm:$0xff]  }
 0x4e8   :  { %20969 = vmatpush3.bf16.msra.mxu0 %v22668_v31 }
 0x4e9   :  { %20970 = vmatprep.subr.bf16.mxu0 %v22670_v34  ;;  %v22719_v34 = vld [vmem:[%s28130_s1 + $0x2870] sm:$0xff]  }
 0x4ea   :  { %20991 = vmatpush3.bf16.msra.mxu1 %v22669_v32  ;;  %v22717_v32 = vld [vmem:[%s28130_s1 + $0x2828] sm:$0xff]  }
 0x4eb   :  { %20992 = vmatprep.subr.bf16.mxu1 %v22671_v35 }
 0x4ec   :  { %20971 = vmatpush3.bf16.msra.mxu0 %v22672_v36 }
 0x4ed   :  { %20972 = vmatprep.subr.bf16.mxu0 %v22674_v38 }
 0x4ee   :  { %20993 = vmatpush3.bf16.msra.mxu1 %v22673_v37 }
 0x4ef   :  { %20994 = vmatprep.subr.bf16.mxu1 %v22675_v39  ;;  %v22718_v39 = vld [vmem:[%s28130_s1 + $0x28a8] sm:$0xff]  }
 0x4f0   :  { %20973 = vmatpush3.bf16.msra.mxu0 %v22676_v40 }
 0x4f1   :  { %20974 = vmatprep.subr.bf16.mxu0 %v22678_v43 }
 0x4f2   :  { %20995 = vmatpush3.bf16.msra.mxu1 %v22677_v42  ;;  %v22720_v42 = vld [vmem:[%s28130_s1 + $0x28f0] sm:$0xff]  }
 0x4f3   :  { %20996 = vmatprep.subr.bf16.mxu1 %v22679_v44 }
 0x4f4   :  { %20975 = vmatpush3.bf16.msra.mxu0 %v22680_v45 }
 0x4f5   :  { %20976 = vmatprep.subr.bf16.mxu0 %v22682_v47 }
 0x4f6   :  { %v20674_v49 = vpop.f32.mrb[128].mxu0  ;;  %20997 = vmatpush3.bf16.msra.mxu1 %v22681_v46  ;;  %v22721_v46 = vld [vmem:[%s28130_s1 + $0x2830] sm:$0xff]  }
 0x4f7   :  { %v20675_v51 = vpop.f32.mrb[129].mxu0  ;;  %20998 = vmatprep.subr.bf16.mxu1 %v22683_v48  ;;  %v22723_v48 = vld [vmem:[%s28130_s1 + $0x2878] sm:$0xff]  }
 0x4f8   :  { %v20696_v53 = vpop.f32.mrb[128].mxu1  ;;  %v20676_v54 = vadd.f32 %v20675_v51, %v20674_v49  ;;  %v20677_v55 = vpop.f32.mrb[130].mxu0  ;;  %20977 = vmatpush3.bf16.msra.mxu0 %v22684_v50  ;;  %v22722_v50 = vld [vmem:[%s28130_s1 + $0x28b0] sm:$0xff]   ;;  %v22724_v51 = vld [vmem:[%s28130_s1 + $0x28f8] sm:$0xff]  }
 0x4f9   :  { %v20697_v58 = vpop.f32.mrb[129].mxu1  ;;  %v20678_v59 = vpop.f32.mrb[131].mxu0  ;;  %20978 = vmatprep.subr.bf16.mxu0 %v22686_v56  ;;  %v22727_v55 = vld [vmem:[%s28130_s1 + $0x2940] sm:$0xff]  }
 0x4fa   :  { %v16328_v60 = vadd.f32 %v20676_v54, %v27117_v9  ;;  %v20698_v61 = vadd.f32 %v20697_v58, %v20696_v53  ;;  %v20699_v62 = vpop.f32.mrb[130].mxu1  ;;  %20999 = vmatpush3.bf16.msra.mxu1 %v22685_v52  ;;  %v22696_v9 = vld [vmem:[%s28130_s1 + $0x28c0] sm:$0xff]   ;;  %v22725_v52 = vld [vmem:[%s28130_s1 + $0x2838] sm:$0xff]  }
 0x4fb   :  { %v20700_v0 = vpop.f32.mrb[131].mxu1  ;;  %21000 = vmatprep.subr.bf16.mxu1 %v22687_v57  ;;  %v42_v53 = vld [vmem:[%s28129_s0 + $0xa0] sm:$0xff]  ;;  %v22726_v57 = vld [vmem:[%s28130_s1 + $0x28b8] sm:$0xff]  }
 0x4fc   :  { %v27228_v2 = vadd.f32 %v20698_v61, %v16328_v60  ;;  %20979 = vmatpush3.bf16.msra.mxu0 %v22688_v63  ;;  %v4136_v54 = vrot.slane %v42_v53, %v23126_v41  ;;  %v4129_v56 = vcombine.high %v42_v53, %v42_v53  ;;  %v22728_v60 = vld [vmem:[%s28130_s1 + $0x29c0] sm:$0xff]   ;;  %v22764_v53 = vld [vmem:[%s28130_s1 + $0x2a48] sm:$0xff]  }
 0x4fd   :  { %20980 = vmatprep.subr.bf16.mxu0 %v22690_v3  ;;  %v22729_v62 = vld [vmem:[%s28130_s1 + $0x2900] sm:$0xff]   ;;  %v22731_v3 = vld [vmem:[%s28130_s1 + $0x2948] sm:$0xff]  }
 0x4fe   :  { %21001 = vmatpush3.bf16.msra.mxu1 %v22689_v1  ;;  %v4144_v58 = vcombine.high %v4136_v54, %v4136_v54  ;;  %v4152_v59 = vrot.slane %v4136_v54, %v23126_v41  ;;  %v27355_v61 = vrot.slane %v4129_v56, %v23126_v41  ;;  %v22730_v0 = vld [vmem:[%s28130_s1 + $0x2980] sm:$0xff]   ;;  %v22765_v54 = vld [vmem:[%s28130_s1 + $0x2ac8] sm:$0xff]  }
 0x4ff   :  { %21002 = vmatprep.subr.bf16.mxu1 %v22691_v4  ;;  %v22767_v56 = vld [vmem:[%s28130_s1 + $0x2a88] sm:$0xff]  }
 0x500   :  { %20981 = vmatpush3.bf16.msra.mxu0 %v22692_v5  ;;  %v4166_v63 = vrot.slane %v4144_v58, %v23126_v41  ;;  %v4145_v1 = vcombine.high %v27355_v61, %v27355_v61  ;;  %v22732_v5 = vld [vmem:[%s28130_s1 + $0x29c8] sm:$0xff]   ;;  %v22769_v58 = vld [vmem:[%s28130_s1 + $0x2ad0] sm:$0xff]  }
 0x501   :  { %21010 = vmatprep.subr.bf16.mxu0 %v22695_v8  ;;  %v22734_v8 = vld [vmem:[%s28130_s1 + $0x2988] sm:$0xff]  }
 0x502   :  { %21003 = vmatpush3.bf16.msra.mxu1 %v22693_v6  ;;  %v4176_v4 = vcombine.high %v4166_v63, %v4166_v63  ;;  %v4173_v6 = vrot.slane %v4145_v1, %v23126_v41  ;;  %v22776_v1 = vld [vmem:[%s28130_s1 + $0x2a60] sm:$0xff]  }
 0x503   :  { %16886 = vmatmul.mubr.bf16.vlgmr.msra.gmra.mrb[156].mxu0 %v4110_v7  ;;  %21032 = vmatprep.subr.bf16.mxu1 %v22696_v9  ;;  %v22733_v7 = vld [vmem:[%s28130_s1 + $0x2908] sm:$0xff]  }
 0x504   :  { %21011 = vmatpush3.bf16.msra.mxu0 %v22697_v10  ;;  %16965 = vmatprep.mubr.bf16.mxu0 %v4166_v63  ;;  %v4177_v9 = vcombine.high %v4173_v6, %v4173_v6  ;;  %v22735_v10 = vld [vmem:[%s28130_s1 + $0x2950] sm:$0xff]   ;;  %v22774_v63 = vld [vmem:[%s28130_s1 + $0x2a18] sm:$0xff]  }
 0x505   :  { %16926 = vmatmul.mubr.bf16.vlgmr.msra.gmra.mrb[156].mxu1 %v4126_v12  ;;  %21012 = vmatprep.subr.bf16.mxu0 %v22699_v13  ;;  %v22737_v12 = vld [vmem:[%s28130_s1 + $0x2910] sm:$0xff]  }
 0x506   :  { %21033 = vmatpush3.bf16.msra.mxu1 %v22698_v11  ;;  %17005 = vmatprep.mubr.bf16.mxu1 %v4176_v4  ;;  %v22736_v11 = vld [vmem:[%s28130_s1 + $0x29d0] sm:$0xff]   ;;  %v22779_v4 = vld [vmem:[%s28130_s1 + $0x2aa0] sm:$0xff]  }
 0x507   :  { %21034 = vmatprep.subr.bf16.mxu1 %v22700_v14  ;;  %v22738_v13 = vld [vmem:[%s28130_s1 + $0x2990] sm:$0xff]   ;;  %v22739_v14 = vld [vmem:[%s28130_s1 + $0x2958] sm:$0xff]  }
 0x508   :  { %21013 = vmatpush3.bf16.msra.mxu0 %v22701_v15  ;;  %v22740_v15 = vld [vmem:[%s28130_s1 + $0x29d8] sm:$0xff]  }
 0x509   :  { %21014 = vmatprep.subr.bf16.mxu0 %v22703_v17  ;;  %v22742_v17 = vld [vmem:[%s28130_s1 + $0x2998] sm:$0xff]  }
 0x50a   :  { %21035 = vmatpush3.bf16.msra.mxu1 %v22702_v16  ;;  %v22741_v16 = vld [vmem:[%s28130_s1 + $0x2918] sm:$0xff]  }
 0x50b   :  { %21036 = vmatprep.subr.bf16.mxu1 %v22704_v18  ;;  %v22743_v18 = vld [vmem:[%s28130_s1 + $0x2960] sm:$0xff]  }
 0x50c   :  { %21015 = vmatpush3.bf16.msra.mxu0 %v22705_v19  ;;  %v22744_v19 = vld [vmem:[%s28130_s1 + $0x29e0] sm:$0xff]  }
 0x50d   :  { %21016 = vmatprep.subr.bf16.mxu0 %v22707_v21  ;;  %v22746_v21 = vld [vmem:[%s28130_s1 + $0x29a0] sm:$0xff]  }
 0x50e   :  { %21037 = vmatpush3.bf16.msra.mxu1 %v22706_v20  ;;  %v22745_v20 = vld [vmem:[%s28130_s1 + $0x2920] sm:$0xff]  }
 0x50f   :  { %21038 = vmatprep.subr.bf16.mxu1 %v22708_v22  ;;  %v22747_v22 = vld [vmem:[%s28130_s1 + $0x2968] sm:$0xff]  }
 0x510   :  { %21017 = vmatpush3.bf16.msra.mxu0 %v22709_v23  ;;  %v22748_v23 = vld [vmem:[%s28130_s1 + $0x29e8] sm:$0xff]  }
 0x511   :  { %21018 = vmatprep.subr.bf16.mxu0 %v22711_v25  ;;  %v22749_v25 = vld [vmem:[%s28130_s1 + $0x2928] sm:$0xff]  }
 0x512   :  { %21039 = vmatpush3.bf16.msra.mxu1 %v22710_v24 }
 0x513   :  { %21040 = vmatprep.subr.bf16.mxu1 %v22712_v26 }
 0x514   :  { %21019 = vmatpush3.bf16.msra.mxu0 %v22713_v27  ;;  %v22750_v27 = vld [vmem:[%s28130_s1 + $0x29a8] sm:$0xff]  }
 0x515   :  { %21020 = vmatprep.subr.bf16.mxu0 %v22715_v29 }
 0x516   :  { %v20718_v31 = vpop.f32.mrb[132].mxu0  ;;  %21041 = vmatpush3.bf16.msra.mxu1 %v22714_v28 }
 0x517   :  { %v20719_v33 = vpop.f32.mrb[133].mxu0  ;;  %21042 = vmatprep.subr.bf16.mxu1 %v22716_v30 }
 0x518   :  { %v20740_v35 = vpop.f32.mrb[132].mxu1  ;;  %v20720_v36 = vadd.f32 %v20719_v33, %v20718_v31  ;;  %v20721_v37 = vpop.f32.mrb[134].mxu0  ;;  %21021 = vmatpush3.bf16.msra.mxu0 %v22717_v32  ;;  %v22751_v31 = vld [vmem:[%s28130_s1 + $0x2970] sm:$0xff]  }
 0x519   :  { %v20741_v38 = vpop.f32.mrb[133].mxu1  ;;  %v20722_v40 = vpop.f32.mrb[135].mxu0  ;;  %21022 = vmatprep.subr.bf16.mxu0 %v22719_v34  ;;  %v22752_v32 = vld [vmem:[%s28130_s1 + $0x29f0] sm:$0xff]  }
 0x51a   :  { %v16408_v43 = vadd.f32 %v20720_v36, %v27228_v2  ;;  %v20742_v44 = vadd.f32 %v20741_v38, %v20740_v35  ;;  %v20743_v45 = vpop.f32.mrb[134].mxu1  ;;  %21043 = vmatpush3.bf16.msra.mxu1 %v22718_v39  ;;  %v4174_v2 = vcombine.high %v4152_v59, %v4152_v59  ;;  %v22753_v38 = vld [vmem:[%s28130_s1 + $0x2930] sm:$0xff]  }
 0x51b   :  { %v20744_v47 = vpop.f32.mrb[135].mxu1  ;;  %21044 = vmatprep.subr.bf16.mxu1 %v22720_v42  ;;  %v22754_v40 = vld [vmem:[%s28130_s1 + $0x29b0] sm:$0xff]   ;;  %v22757_v45 = vld [vmem:[%s28130_s1 + $0x2938] sm:$0xff]  }
 0x51c   :  { %v27329_v49 = vadd.f32 %v20742_v44, %v16408_v43  ;;  %21023 = vmatpush3.bf16.msra.mxu0 %v22721_v46  ;;  %v22755_v43 = vld [vmem:[%s28130_s1 + $0x2978] sm:$0xff]   ;;  %v4159_v47 = vrot.slane %v27355_v61, %v23126_v41 }
 0x51d   :  { %21024 = vmatprep.subr.bf16.mxu0 %v22723_v48  ;;  %v22756_v44 = vld [vmem:[%s28130_s1 + $0x29f8] sm:$0xff]   ;;  %v22760_v48 = vld [vmem:[%s28130_s1 + $0x2a40] sm:$0xff]  }
 0x51e   :  { %21045 = vmatpush3.bf16.msra.mxu1 %v22722_v50  ;;  %v22758_v46 = vld [vmem:[%s28130_s1 + $0x29b8] sm:$0xff]   ;;  %v22762_v50 = vld [vmem:[%s28130_s1 + $0x2a00] sm:$0xff]  }
 0x51f   :  { %21046 = vmatprep.subr.bf16.mxu1 %v22724_v51  ;;  %v22763_v51 = vld [vmem:[%s28130_s1 + $0x2a80] sm:$0xff]   ;;  %v22772_v61 = vld [vmem:[%s28130_s1 + $0x2a58] sm:$0xff]  }
 0x520   :  { %21025 = vmatpush3.bf16.msra.mxu0 %v22725_v52  ;;  %v4175_v52 = vcombine.high %v4159_v47, %v4159_v47 }
 0x521   :  { %21054 = vmatprep.subr.bf16.mxu0 %v22727_v55  ;;  %v22766_v55 = vld [vmem:[%s28130_s1 + $0x2a08] sm:$0xff]  }
 0x522   :  { %21047 = vmatpush3.bf16.msra.mxu1 %v22726_v57  ;;  %v22768_v57 = vld [vmem:[%s28130_s1 + $0x2a50] sm:$0xff]  }
 0x523   :  { %21076 = vmatprep.subr.bf16.mxu1 %v22728_v60  ;;  %16966 = vmatmul.mubr.bf16.vlgmr.msra.gmra.mrb[160].mxu0 %v4152_v59  ;;  %v22770_v59 = vld [vmem:[%s28130_s1 + $0x2a10] sm:$0xff]  }
 0x524   :  { %21055 = vmatpush3.bf16.msra.mxu0 %v22729_v62  ;;  %17045 = vmatprep.mubr.bf16.mxu0 %v4173_v6  ;;  %v22771_v60 = vld [vmem:[%s28130_s1 + $0x2a90] sm:$0xff]   ;;  %v22773_v62 = vld [vmem:[%s28130_s1 + $0x2ad8] sm:$0xff]   ;;  %v22781_v6 = vld [vmem:[%s28130_s1 + $0x2ae8] sm:$0xff]  }
 0x525   :  { %17006 = vmatmul.mubr.bf16.vlgmr.msra.gmra.mrb[160].mxu1 %v4174_v2  ;;  %21056 = vmatprep.subr.bf16.mxu0 %v22731_v3  ;;  %v22777_v2 = vld [vmem:[%s28130_s1 + $0x2ae0] sm:$0xff]  }
 0x526   :  { %21077 = vmatpush3.bf16.msra.mxu1 %v22730_v0  ;;  %17085 = vmatprep.mubr.bf16.mxu1 %v4177_v9  ;;  %v22775_v0 = vld [vmem:[%s28130_s1 + $0x2a98] sm:$0xff]   ;;  %v22778_v3 = vld [vmem:[%s28130_s1 + $0x2a20] sm:$0xff]  }
 0x527   :  { %21078 = vmatprep.subr.bf16.mxu1 %v22732_v5  ;;  %v22780_v5 = vld [vmem:[%s28130_s1 + $0x2a68] sm:$0xff]  }
 0x528   :  { %21057 = vmatpush3.bf16.msra.mxu0 %v22733_v7 }
 0x529   :  { %21058 = vmatprep.subr.bf16.mxu0 %v22735_v10  ;;  %v22784_v10 = vld [vmem:[%s28130_s1 + $0x2a70] sm:$0xff]  }
 0x52a   :  { %21079 = vmatpush3.bf16.msra.mxu1 %v22734_v8  ;;  %v22782_v8 = vld [vmem:[%s28130_s1 + $0x2a28] sm:$0xff]  }
 0x52b   :  { %21080 = vmatprep.subr.bf16.mxu1 %v22736_v11 }
 0x52c   :  { %21059 = vmatpush3.bf16.msra.mxu0 %v22737_v12 }
 0x52d   :  { %21060 = vmatprep.subr.bf16.mxu0 %v22739_v14 }
 0x52e   :  { %21081 = vmatpush3.bf16.msra.mxu1 %v22738_v13 }
 0x52f   :  { %21082 = vmatprep.subr.bf16.mxu1 %v22740_v15  ;;  %v22783_v15 = vld [vmem:[%s28130_s1 + $0x2aa8] sm:$0xff]  }
 0x530   :  { %21061 = vmatpush3.bf16.msra.mxu0 %v22741_v16 }
 0x531   :  { %21062 = vmatprep.subr.bf16.mxu0 %v22743_v18 }
 0x532   :  { %21083 = vmatpush3.bf16.msra.mxu1 %v22742_v17  ;;  %v22785_v17 = vld [vmem:[%s28130_s1 + $0x2af0] sm:$0xff]  }
 0x533   :  { %21084 = vmatprep.subr.bf16.mxu1 %v22744_v19 }
 0x534   :  { %21063 = vmatpush3.bf16.msra.mxu0 %v22745_v20 }
 0x535   :  { %21064 = vmatprep.subr.bf16.mxu0 %v22747_v22 }
 0x536   :  { %v20762_v24 = vpop.f32.mrb[136].mxu0  ;;  %21085 = vmatpush3.bf16.msra.mxu1 %v22746_v21  ;;  %v22786_v21 = vld [vmem:[%s28130_s1 + $0x2a30] sm:$0xff]  }
 0x537   :  { %v20763_v26 = vpop.f32.mrb[137].mxu0  ;;  %21086 = vmatprep.subr.bf16.mxu1 %v22748_v23  ;;  %v22788_v23 = vld [vmem:[%s28130_s1 + $0x2a78] sm:$0xff]  }
 0x538   :  { %v20784_v28 = vpop.f32.mrb[136].mxu1  ;;  %v20764_v29 = vadd.f32 %v20763_v26, %v20762_v24  ;;  %v20765_v30 = vpop.f32.mrb[138].mxu0  ;;  %21065 = vmatpush3.bf16.msra.mxu0 %v22749_v25  ;;  %v22787_v25 = vld [vmem:[%s28130_s1 + $0x2ab0] sm:$0xff]   ;;  %v22789_v26 = vld [vmem:[%s28130_s1 + $0x2af8] sm:$0xff]  }
 0x539   :  { %v20785_v33 = vpop.f32.mrb[137].mxu1  ;;  %v20766_v34 = vpop.f32.mrb[139].mxu0  ;;  %21066 = vmatprep.subr.bf16.mxu0 %v22751_v31  ;;  %v22792_v30 = vld [vmem:[%s28130_s1 + $0x2b40] sm:$0xff]  }
 0x53a   :  { %v16488_v35 = vadd.f32 %v20764_v29, %v27329_v49  ;;  %v20786_v36 = vadd.f32 %v20785_v33, %v20784_v28  ;;  %v20787_v37 = vpop.f32.mrb[138].mxu1  ;;  %21087 = vmatpush3.bf16.msra.mxu1 %v22750_v27  ;;  %v22761_v49 = vld [vmem:[%s28130_s1 + $0x2ac0] sm:$0xff]   ;;  %v22790_v27 = vld [vmem:[%s28130_s1 + $0x2a38] sm:$0xff]   ;;  %v43_v28 = vld [vmem:[%s28129_s0 + $0xa8] sm:$0xff] }
 0x53b   :  { %v20788_v39 = vpop.f32.mrb[139].mxu1  ;;  %21088 = vmatprep.subr.bf16.mxu1 %v22752_v32  ;;  %v4185_v29 = vrot.slane %v43_v28, %v23126_v41  ;;  %v4178_v31 = vcombine.high %v43_v28, %v43_v28  ;;  %v22791_v32 = vld [vmem:[%s28130_s1 + $0x2ab8] sm:$0xff]   ;;  %v22794_v37 = vld [vmem:[%s28130_s1 + $0x2b00] sm:$0xff]   ;;  %v22829_v28 = vld [vmem:[%s28130_s1 + $0x2c48] sm:$0xff]  }
 0x53c   :  { %v27440_v42 = vadd.f32 %v20786_v36, %v16488_v35  ;;  %21067 = vmatpush3.bf16.msra.mxu0 %v22753_v38  ;;  %v22793_v35 = vld [vmem:[%s28130_s1 + $0x2bc0] sm:$0xff]  }
 0x53d   :  { %21068 = vmatprep.subr.bf16.mxu0 %v22755_v43  ;;  %v4193_v33 = vcombine.high %v4185_v29, %v4185_v29  ;;  %v4201_v34 = vrot.slane %v4185_v29, %v23126_v41  ;;  %v27567_v36 = vrot.slane %v4178_v31, %v23126_v41  ;;  %v22795_v39 = vld [vmem:[%s28130_s1 + $0x2b80] sm:$0xff]   ;;  %v22796_v43 = vld [vmem:[%s28130_s1 + $0x2b48] sm:$0xff]  }
 0x53e   :  { %21089 = vmatpush3.bf16.msra.mxu1 %v22754_v40  ;;  %v22830_v29 = vld [vmem:[%s28130_s1 + $0x2cc8] sm:$0xff]  }
 0x53f   :  { %21090 = vmatprep.subr.bf16.mxu1 %v22756_v44  ;;  %v4215_v38 = vrot.slane %v4193_v33, %v23126_v41  ;;  %v4194_v40 = vcombine.high %v27567_v36, %v27567_v36  ;;  %v22832_v31 = vld [vmem:[%s28130_s1 + $0x2c88] sm:$0xff]   ;;  %v22834_v33 = vld [vmem:[%s28130_s1 + $0x2cd0] sm:$0xff]  }
 0x540   :  { %21069 = vmatpush3.bf16.msra.mxu0 %v22757_v45  ;;  %v22797_v45 = vld [vmem:[%s28130_s1 + $0x2bc8] sm:$0xff]  }
 0x541   :  { %21098 = vmatprep.subr.bf16.mxu0 %v22760_v48  ;;  %v4225_v44 = vcombine.high %v4215_v38, %v4215_v38  ;;  %v22799_v48 = vld [vmem:[%s28130_s1 + $0x2b88] sm:$0xff]  }
 0x542   :  { %21091 = vmatpush3.bf16.msra.mxu1 %v22758_v46  ;;  %v4222_v46 = vrot.slane %v4194_v40, %v23126_v41  ;;  %v22841_v40 = vld [vmem:[%s28130_s1 + $0x2c60] sm:$0xff]  }
 0x543   :  { %17046 = vmatmul.mubr.bf16.vlgmr.msra.gmra.mrb[164].mxu0 %v4159_v47  ;;  %21120 = vmatprep.subr.bf16.mxu1 %v22761_v49  ;;  %v22798_v47 = vld [vmem:[%s28130_s1 + $0x2b08] sm:$0xff]  }
 0x544   :  { %21099 = vmatpush3.bf16.msra.mxu0 %v22762_v50  ;;  %17125 = vmatprep.mubr.bf16.mxu0 %v4215_v38  ;;  %v4226_v49 = vcombine.high %v4222_v46, %v4222_v46  ;;  %v22800_v50 = vld [vmem:[%s28130_s1 + $0x2b50] sm:$0xff]   ;;  %v22839_v38 = vld [vmem:[%s28130_s1 + $0x2c18] sm:$0xff]  }
 0x545   :  { %17086 = vmatmul.mubr.bf16.vlgmr.msra.gmra.mrb[164].mxu1 %v4175_v52  ;;  %21100 = vmatprep.subr.bf16.mxu0 %v22764_v53  ;;  %v22802_v52 = vld [vmem:[%s28130_s1 + $0x2b10] sm:$0xff]  }
 0x546   :  { %21121 = vmatpush3.bf16.msra.mxu1 %v22763_v51  ;;  %17165 = vmatprep.mubr.bf16.mxu1 %v4225_v44  ;;  %v22801_v51 = vld [vmem:[%s28130_s1 + $0x2bd0] sm:$0xff]   ;;  %v22844_v44 = vld [vmem:[%s28130_s1 + $0x2ca0] sm:$0xff]  }
 0x547   :  { %21122 = vmatprep.subr.bf16.mxu1 %v22765_v54  ;;  %v22803_v53 = vld [vmem:[%s28130_s1 + $0x2b90] sm:$0xff]   ;;  %v22804_v54 = vld [vmem:[%s28130_s1 + $0x2b58] sm:$0xff]  }
 0x548   :  { %21101 = vmatpush3.bf16.msra.mxu0 %v22766_v55  ;;  %v22805_v55 = vld [vmem:[%s28130_s1 + $0x2bd8] sm:$0xff]  }
 0x549   :  { %21102 = vmatprep.subr.bf16.mxu0 %v22768_v57  ;;  %v22807_v57 = vld [vmem:[%s28130_s1 + $0x2b98] sm:$0xff]  }
 0x54a   :  { %21123 = vmatpush3.bf16.msra.mxu1 %v22767_v56  ;;  %v22806_v56 = vld [vmem:[%s28130_s1 + $0x2b18] sm:$0xff]  }
 0x54b   :  { %21124 = vmatprep.subr.bf16.mxu1 %v22769_v58  ;;  %v22808_v58 = vld [vmem:[%s28130_s1 + $0x2b60] sm:$0xff]  }
 0x54c   :  { %21103 = vmatpush3.bf16.msra.mxu0 %v22770_v59  ;;  %v22809_v59 = vld [vmem:[%s28130_s1 + $0x2be0] sm:$0xff]  }
 0x54d   :  { %21104 = vmatprep.subr.bf16.mxu0 %v22772_v61  ;;  %v22811_v61 = vld [vmem:[%s28130_s1 + $0x2ba0] sm:$0xff]  }
 0x54e   :  { %21125 = vmatpush3.bf16.msra.mxu1 %v22771_v60  ;;  %v22810_v60 = vld [vmem:[%s28130_s1 + $0x2b20] sm:$0xff]  }
 0x54f   :  { %21126 = vmatprep.subr.bf16.mxu1 %v22773_v62  ;;  %v22812_v62 = vld [vmem:[%s28130_s1 + $0x2b68] sm:$0xff]  }
 0x550   :  { %21105 = vmatpush3.bf16.msra.mxu0 %v22774_v63  ;;  %v22813_v63 = vld [vmem:[%s28130_s1 + $0x2be8] sm:$0xff]  }
 0x551   :  { %21106 = vmatprep.subr.bf16.mxu0 %v22776_v1  ;;  %v22814_v1 = vld [vmem:[%s28130_s1 + $0x2b28] sm:$0xff]  }
 0x552   :  { %21127 = vmatpush3.bf16.msra.mxu1 %v22775_v0 }
 0x553   :  { %21128 = vmatprep.subr.bf16.mxu1 %v22777_v2 }
 0x554   :  { %21107 = vmatpush3.bf16.msra.mxu0 %v22778_v3  ;;  %v22815_v3 = vld [vmem:[%s28130_s1 + $0x2ba8] sm:$0xff]  }
 0x555   :  { %21108 = vmatprep.subr.bf16.mxu0 %v22780_v5 }
 0x556   :  { %v20806_v7 = vpop.f32.mrb[140].mxu0  ;;  %21129 = vmatpush3.bf16.msra.mxu1 %v22779_v4 }
 0x557   :  { %v20807_v9 = vpop.f32.mrb[141].mxu0  ;;  %21130 = vmatprep.subr.bf16.mxu1 %v22781_v6 }
 0x558   :  { %v20828_v11 = vpop.f32.mrb[140].mxu1  ;;  %v20808_v12 = vadd.f32 %v20807_v9, %v20806_v7  ;;  %v20809_v13 = vpop.f32.mrb[142].mxu0  ;;  %21109 = vmatpush3.bf16.msra.mxu0 %v22782_v8  ;;  %v22816_v7 = vld [vmem:[%s28130_s1 + $0x2b70] sm:$0xff]  }
 0x559   :  { %v20829_v14 = vpop.f32.mrb[141].mxu1  ;;  %v20810_v16 = vpop.f32.mrb[143].mxu0  ;;  %21110 = vmatprep.subr.bf16.mxu0 %v22784_v10  ;;  %v22817_v8 = vld [vmem:[%s28130_s1 + $0x2bf0] sm:$0xff]  }
 0x55a   :  { %v16568_v18 = vadd.f32 %v20808_v12, %v27440_v42  ;;  %v20830_v19 = vadd.f32 %v20829_v14, %v20828_v11  ;;  %v20831_v20 = vpop.f32.mrb[142].mxu1  ;;  %21131 = vmatpush3.bf16.msra.mxu1 %v22783_v15  ;;  %v4223_v42 = vcombine.high %v4201_v34, %v4201_v34  ;;  %v22818_v14 = vld [vmem:[%s28130_s1 + $0x2b30] sm:$0xff]  }
 0x55b   :  { %v20832_v22 = vpop.f32.mrb[143].mxu1  ;;  %21132 = vmatprep.subr.bf16.mxu1 %v22785_v17  ;;  %v22819_v16 = vld [vmem:[%s28130_s1 + $0x2bb0] sm:$0xff]   ;;  %v22822_v20 = vld [vmem:[%s28130_s1 + $0x2b38] sm:$0xff]  }
 0x55c   :  { %v27541_v24 = vadd.f32 %v20830_v19, %v16568_v18  ;;  %21111 = vmatpush3.bf16.msra.mxu0 %v22786_v21  ;;  %v22820_v18 = vld [vmem:[%s28130_s1 + $0x2b78] sm:$0xff]   ;;  %v4208_v22 = vrot.slane %v27567_v36, %v23126_v41 }
 0x55d   :  { %21112 = vmatprep.subr.bf16.mxu0 %v22788_v23  ;;  %v22821_v19 = vld [vmem:[%s28130_s1 + $0x2bf8] sm:$0xff]   ;;  %v22825_v23 = vld [vmem:[%s28130_s1 + $0x2c40] sm:$0xff]  }
 0x55e   :  { %21133 = vmatpush3.bf16.msra.mxu1 %v22787_v25  ;;  %v22823_v21 = vld [vmem:[%s28130_s1 + $0x2bb8] sm:$0xff]   ;;  %v22827_v25 = vld [vmem:[%s28130_s1 + $0x2c00] sm:$0xff]  }
 0x55f   :  { %21134 = vmatprep.subr.bf16.mxu1 %v22789_v26  ;;  %v22828_v26 = vld [vmem:[%s28130_s1 + $0x2c80] sm:$0xff]   ;;  %v22837_v36 = vld [vmem:[%s28130_s1 + $0x2c58] sm:$0xff]  }
 0x560   :  { %21113 = vmatpush3.bf16.msra.mxu0 %v22790_v27  ;;  %v4224_v27 = vcombine.high %v4208_v22, %v4208_v22 }
 0x561   :  { %21142 = vmatprep.subr.bf16.mxu0 %v22792_v30  ;;  %v22831_v30 = vld [vmem:[%s28130_s1 + $0x2c08] sm:$0xff]  }
 0x562   :  { %21135 = vmatpush3.bf16.msra.mxu1 %v22791_v32  ;;  %v22833_v32 = vld [vmem:[%s28130_s1 + $0x2c50] sm:$0xff]  }
 0x563   :  { %21164 = vmatprep.subr.bf16.mxu1 %v22793_v35  ;;  %17126 = vmatmul.mubr.bf16.vlgmr.msra.gmra.mrb[168].mxu0 %v4201_v34  ;;  %v22835_v34 = vld [vmem:[%s28130_s1 + $0x2c10] sm:$0xff]  }
 0x564   :  { %21143 = vmatpush3.bf16.msra.mxu0 %v22794_v37  ;;  %17205 = vmatprep.mubr.bf16.mxu0 %v4222_v46  ;;  %v22836_v35 = vld [vmem:[%s28130_s1 + $0x2c90] sm:$0xff]   ;;  %v22838_v37 = vld [vmem:[%s28130_s1 + $0x2cd8] sm:$0xff]   ;;  %v22846_v46 = vld [vmem:[%s28130_s1 + $0x2ce8] sm:$0xff]  }
 0x565   :  { %17166 = vmatmul.mubr.bf16.vlgmr.msra.gmra.mrb[168].mxu1 %v4223_v42  ;;  %21144 = vmatprep.subr.bf16.mxu0 %v22796_v43  ;;  %v22842_v42 = vld [vmem:[%s28130_s1 + $0x2ce0] sm:$0xff]  }
 0x566   :  { %21165 = vmatpush3.bf16.msra.mxu1 %v22795_v39  ;;  %17245 = vmatprep.mubr.bf16.mxu1 %v4226_v49  ;;  %v22840_v39 = vld [vmem:[%s28130_s1 + $0x2c98] sm:$0xff]   ;;  %v22843_v43 = vld [vmem:[%s28130_s1 + $0x2c20] sm:$0xff]  }
 0x567   :  { %21166 = vmatprep.subr.bf16.mxu1 %v22797_v45  ;;  %v22845_v45 = vld [vmem:[%s28130_s1 + $0x2c68] sm:$0xff]  }
 0x568   :  { %21145 = vmatpush3.bf16.msra.mxu0 %v22798_v47 }
 0x569   :  { %21146 = vmatprep.subr.bf16.mxu0 %v22800_v50  ;;  %v22849_v50 = vld [vmem:[%s28130_s1 + $0x2c70] sm:$0xff]  }
 0x56a   :  { %21167 = vmatpush3.bf16.msra.mxu1 %v22799_v48  ;;  %v22847_v48 = vld [vmem:[%s28130_s1 + $0x2c28] sm:$0xff]  }
 0x56b   :  { %21168 = vmatprep.subr.bf16.mxu1 %v22801_v51 }
 0x56c   :  { %21147 = vmatpush3.bf16.msra.mxu0 %v22802_v52 }
 0x56d   :  { %21148 = vmatprep.subr.bf16.mxu0 %v22804_v54 }
 0x56e   :  { %21169 = vmatpush3.bf16.msra.mxu1 %v22803_v53 }
 0x56f   :  { %21170 = vmatprep.subr.bf16.mxu1 %v22805_v55  ;;  %v22848_v55 = vld [vmem:[%s28130_s1 + $0x2ca8] sm:$0xff]  }
 0x570   :  { %21149 = vmatpush3.bf16.msra.mxu0 %v22806_v56 }
 0x571   :  { %21150 = vmatprep.subr.bf16.mxu0 %v22808_v58 }
 0x572   :  { %21171 = vmatpush3.bf16.msra.mxu1 %v22807_v57  ;;  %v22850_v57 = vld [vmem:[%s28130_s1 + $0x2cf0] sm:$0xff]  }
 0x573   :  { %21172 = vmatprep.subr.bf16.mxu1 %v22809_v59 }
 0x574   :  { %21151 = vmatpush3.bf16.msra.mxu0 %v22810_v60 }
 0x575   :  { %21152 = vmatprep.subr.bf16.mxu0 %v22812_v62 }
 0x576   :  { %v20850_v0 = vpop.f32.mrb[144].mxu0  ;;  %21173 = vmatpush3.bf16.msra.mxu1 %v22811_v61  ;;  %v22851_v61 = vld [vmem:[%s28130_s1 + $0x2c30] sm:$0xff]  }
 0x577   :  { %v20851_v2 = vpop.f32.mrb[145].mxu0  ;;  %21174 = vmatprep.subr.bf16.mxu1 %v22813_v63  ;;  %v22853_v63 = vld [vmem:[%s28130_s1 + $0x2c78] sm:$0xff]  }
 0x578   :  { %v20872_v4 = vpop.f32.mrb[144].mxu1  ;;  %v20852_v5 = vadd.f32 %v20851_v2, %v20850_v0  ;;  %v20853_v6 = vpop.f32.mrb[146].mxu0  ;;  %21153 = vmatpush3.bf16.msra.mxu0 %v22814_v1  ;;  %v22852_v1 = vld [vmem:[%s28130_s1 + $0x2cb0] sm:$0xff]   ;;  %v22854_v2 = vld [vmem:[%s28130_s1 + $0x2cf8] sm:$0xff]  }
 0x579   :  { %v20873_v9 = vpop.f32.mrb[145].mxu1  ;;  %v20854_v10 = vpop.f32.mrb[147].mxu0  ;;  %21154 = vmatprep.subr.bf16.mxu0 %v22816_v7  ;;  %v22857_v6 = vld [vmem:[%s28130_s1 + $0x2d40] sm:$0xff]  }
 0x57a   :  { %v16648_v11 = vadd.f32 %v20852_v5, %v27541_v24  ;;  %v20874_v12 = vadd.f32 %v20873_v9, %v20872_v4  ;;  %v20875_v13 = vpop.f32.mrb[146].mxu1  ;;  %21175 = vmatpush3.bf16.msra.mxu1 %v22815_v3  ;;  %v22826_v24 = vld [vmem:[%s28130_s1 + $0x2cc0] sm:$0xff]   ;;  %v22855_v3 = vld [vmem:[%s28130_s1 + $0x2c38] sm:$0xff]   ;;  %v44_v4 = vld [vmem:[%s28129_s0 + $0xb0] sm:$0xff] }
 0x57b   :  { %v20876_v15 = vpop.f32.mrb[147].mxu1  ;;  %21176 = vmatprep.subr.bf16.mxu1 %v22817_v8  ;;  %v4234_v5 = vrot.slane %v44_v4, %v23126_v41  ;;  %v4227_v7 = vcombine.high %v44_v4, %v44_v4  ;;  %v22856_v8 = vld [vmem:[%s28130_s1 + $0x2cb8] sm:$0xff]   ;;  %v22859_v13 = vld [vmem:[%s28130_s1 + $0x2d00] sm:$0xff]   ;;  %v22894_v4 = vld [vmem:[%s28130_s1 + $0x2e48] sm:$0xff]  }
 0x57c   :  { %v27652_v17 = vadd.f32 %v20874_v12, %v16648_v11  ;;  %21155 = vmatpush3.bf16.msra.mxu0 %v22818_v14  ;;  %v22858_v11 = vld [vmem:[%s28130_s1 + $0x2dc0] sm:$0xff]  }
 0x57d   :  { %21156 = vmatprep.subr.bf16.mxu0 %v22820_v18  ;;  %v4242_v9 = vcombine.high %v4234_v5, %v4234_v5  ;;  %v4250_v10 = vrot.slane %v4234_v5, %v23126_v41  ;;  %v27779_v12 = vrot.slane %v4227_v7, %v23126_v41  ;;  %v22860_v15 = vld [vmem:[%s28130_s1 + $0x2d80] sm:$0xff]   ;;  %v22861_v18 = vld [vmem:[%s28130_s1 + $0x2d48] sm:$0xff]  }
 0x57e   :  { %21177 = vmatpush3.bf16.msra.mxu1 %v22819_v16  ;;  %v22895_v5 = vld [vmem:[%s28130_s1 + $0x2ec8] sm:$0xff]  }
 0x57f   :  { %21178 = vmatprep.subr.bf16.mxu1 %v22821_v19  ;;  %v4264_v14 = vrot.slane %v4242_v9, %v23126_v41  ;;  %v4243_v16 = vcombine.high %v27779_v12, %v27779_v12  ;;  %v22897_v7 = vld [vmem:[%s28130_s1 + $0x2e88] sm:$0xff]   ;;  %v22899_v9 = vld [vmem:[%s28130_s1 + $0x2ed0] sm:$0xff]  }
 0x580   :  { %21157 = vmatpush3.bf16.msra.mxu0 %v22822_v20  ;;  %v22862_v20 = vld [vmem:[%s28130_s1 + $0x2dc8] sm:$0xff]  }
 0x581   :  { %21186 = vmatprep.subr.bf16.mxu0 %v22825_v23  ;;  %v4274_v19 = vcombine.high %v4264_v14, %v4264_v14  ;;  %v22864_v23 = vld [vmem:[%s28130_s1 + $0x2d88] sm:$0xff]  }
 0x582   :  { %21179 = vmatpush3.bf16.msra.mxu1 %v22823_v21  ;;  %v4271_v21 = vrot.slane %v4243_v16, %v23126_v41  ;;  %v22906_v16 = vld [vmem:[%s28130_s1 + $0x2e60] sm:$0xff]  }
 0x583   :  { %17206 = vmatmul.mubr.bf16.vlgmr.msra.gmra.mrb[172].mxu0 %v4208_v22  ;;  %21208 = vmatprep.subr.bf16.mxu1 %v22826_v24  ;;  %v22863_v22 = vld [vmem:[%s28130_s1 + $0x2d08] sm:$0xff]  }
 0x584   :  { %21187 = vmatpush3.bf16.msra.mxu0 %v22827_v25  ;;  %17285 = vmatprep.mubr.bf16.mxu0 %v4264_v14  ;;  %v4275_v24 = vcombine.high %v4271_v21, %v4271_v21  ;;  %v22865_v25 = vld [vmem:[%s28130_s1 + $0x2d50] sm:$0xff]   ;;  %v22904_v14 = vld [vmem:[%s28130_s1 + $0x2e18] sm:$0xff]  }
 0x585   :  { %17246 = vmatmul.mubr.bf16.vlgmr.msra.gmra.mrb[172].mxu1 %v4224_v27  ;;  %21188 = vmatprep.subr.bf16.mxu0 %v22829_v28  ;;  %v22867_v27 = vld [vmem:[%s28130_s1 + $0x2d10] sm:$0xff]  }
 0x586   :  { %21209 = vmatpush3.bf16.msra.mxu1 %v22828_v26  ;;  %17325 = vmatprep.mubr.bf16.mxu1 %v4274_v19  ;;  %v22866_v26 = vld [vmem:[%s28130_s1 + $0x2dd0] sm:$0xff]   ;;  %v22909_v19 = vld [vmem:[%s28130_s1 + $0x2ea0] sm:$0xff]  }
 0x587   :  { %21210 = vmatprep.subr.bf16.mxu1 %v22830_v29  ;;  %v22868_v28 = vld [vmem:[%s28130_s1 + $0x2d90] sm:$0xff]   ;;  %v22869_v29 = vld [vmem:[%s28130_s1 + $0x2d58] sm:$0xff]  }
 0x588   :  { %21189 = vmatpush3.bf16.msra.mxu0 %v22831_v30  ;;  %v22870_v30 = vld [vmem:[%s28130_s1 + $0x2dd8] sm:$0xff]  }
 0x589   :  { %21190 = vmatprep.subr.bf16.mxu0 %v22833_v32  ;;  %v22872_v32 = vld [vmem:[%s28130_s1 + $0x2d98] sm:$0xff]  }
 0x58a   :  { %21211 = vmatpush3.bf16.msra.mxu1 %v22832_v31  ;;  %v22871_v31 = vld [vmem:[%s28130_s1 + $0x2d18] sm:$0xff]  }
 0x58b   :  { %21212 = vmatprep.subr.bf16.mxu1 %v22834_v33  ;;  %v22873_v33 = vld [vmem:[%s28130_s1 + $0x2d60] sm:$0xff]  }
 0x58c   :  { %21191 = vmatpush3.bf16.msra.mxu0 %v22835_v34  ;;  %v22874_v34 = vld [vmem:[%s28130_s1 + $0x2de0] sm:$0xff]  }
 0x58d   :  { %21192 = vmatprep.subr.bf16.mxu0 %v22837_v36  ;;  %v22876_v36 = vld [vmem:[%s28130_s1 + $0x2da0] sm:$0xff]  }
 0x58e   :  { %21213 = vmatpush3.bf16.msra.mxu1 %v22836_v35  ;;  %v22875_v35 = vld [vmem:[%s28130_s1 + $0x2d20] sm:$0xff]  }
 0x58f   :  { %21214 = vmatprep.subr.bf16.mxu1 %v22838_v37  ;;  %v22877_v37 = vld [vmem:[%s28130_s1 + $0x2d68] sm:$0xff]  }
 0x590   :  { %21193 = vmatpush3.bf16.msra.mxu0 %v22839_v38  ;;  %v22878_v38 = vld [vmem:[%s28130_s1 + $0x2de8] sm:$0xff]  }
 0x591   :  { %21194 = vmatprep.subr.bf16.mxu0 %v22841_v40  ;;  %v22879_v40 = vld [vmem:[%s28130_s1 + $0x2d28] sm:$0xff]  }
 0x592   :  { %21215 = vmatpush3.bf16.msra.mxu1 %v22840_v39 }
 0x593   :  { %21216 = vmatprep.subr.bf16.mxu1 %v22842_v42 }
 0x594   :  { %21195 = vmatpush3.bf16.msra.mxu0 %v22843_v43  ;;  %v22880_v43 = vld [vmem:[%s28130_s1 + $0x2da8] sm:$0xff]  }
 0x595   :  { %21196 = vmatprep.subr.bf16.mxu0 %v22845_v45 }
 0x596   :  { %v20894_v47 = vpop.f32.mrb[148].mxu0  ;;  %21217 = vmatpush3.bf16.msra.mxu1 %v22844_v44 }
 0x597   :  { %v20895_v49 = vpop.f32.mrb[149].mxu0  ;;  %21218 = vmatprep.subr.bf16.mxu1 %v22846_v46 }
 0x598   :  { %v20916_v51 = vpop.f32.mrb[148].mxu1  ;;  %v20896_v52 = vadd.f32 %v20895_v49, %v20894_v47  ;;  %v20897_v53 = vpop.f32.mrb[150].mxu0  ;;  %21197 = vmatpush3.bf16.msra.mxu0 %v22847_v48  ;;  %v22881_v47 = vld [vmem:[%s28130_s1 + $0x2d70] sm:$0xff]  }
 0x599   :  { %v20917_v54 = vpop.f32.mrb[149].mxu1  ;;  %v20898_v56 = vpop.f32.mrb[151].mxu0  ;;  %21198 = vmatprep.subr.bf16.mxu0 %v22849_v50  ;;  %v22882_v48 = vld [vmem:[%s28130_s1 + $0x2df0] sm:$0xff]  }
 0x59a   :  { %v16728_v58 = vadd.f32 %v20896_v52, %v27652_v17  ;;  %v20918_v59 = vadd.f32 %v20917_v54, %v20916_v51  ;;  %v20919_v60 = vpop.f32.mrb[150].mxu1  ;;  %21219 = vmatpush3.bf16.msra.mxu1 %v22848_v55  ;;  %v4272_v17 = vcombine.high %v4250_v10, %v4250_v10  ;;  %v22883_v54 = vld [vmem:[%s28130_s1 + $0x2d30] sm:$0xff]  }
 0x59b   :  { %v20920_v62 = vpop.f32.mrb[151].mxu1  ;;  %21220 = vmatprep.subr.bf16.mxu1 %v22850_v57  ;;  %v22884_v56 = vld [vmem:[%s28130_s1 + $0x2db0] sm:$0xff]   ;;  %v22887_v60 = vld [vmem:[%s28130_s1 + $0x2d38] sm:$0xff]  }
 0x59c   :  { %v27753_v0 = vadd.f32 %v20918_v59, %v16728_v58  ;;  %21199 = vmatpush3.bf16.msra.mxu0 %v22851_v61  ;;  %v22885_v58 = vld [vmem:[%s28130_s1 + $0x2d78] sm:$0xff]   ;;  %v4257_v62 = vrot.slane %v27779_v12, %v23126_v41 }
 0x59d   :  { %21200 = vmatprep.subr.bf16.mxu0 %v22853_v63  ;;  %v22886_v59 = vld [vmem:[%s28130_s1 + $0x2df8] sm:$0xff]   ;;  %v22890_v63 = vld [vmem:[%s28130_s1 + $0x2e40] sm:$0xff]  }
 0x59e   :  { %21221 = vmatpush3.bf16.msra.mxu1 %v22852_v1  ;;  %v22888_v61 = vld [vmem:[%s28130_s1 + $0x2db8] sm:$0xff]   ;;  %v22892_v1 = vld [vmem:[%s28130_s1 + $0x2e00] sm:$0xff]  }
 0x59f   :  { %21222 = vmatprep.subr.bf16.mxu1 %v22854_v2  ;;  %v22893_v2 = vld [vmem:[%s28130_s1 + $0x2e80] sm:$0xff]   ;;  %v22902_v12 = vld [vmem:[%s28130_s1 + $0x2e58] sm:$0xff]  }
 0x5a0   :  { %21201 = vmatpush3.bf16.msra.mxu0 %v22855_v3  ;;  %v4273_v3 = vcombine.high %v4257_v62, %v4257_v62 }
 0x5a1   :  { %21230 = vmatprep.subr.bf16.mxu0 %v22857_v6  ;;  %v22896_v6 = vld [vmem:[%s28130_s1 + $0x2e08] sm:$0xff]  }
 0x5a2   :  { %21223 = vmatpush3.bf16.msra.mxu1 %v22856_v8  ;;  %v22898_v8 = vld [vmem:[%s28130_s1 + $0x2e50] sm:$0xff]  }
 0x5a3   :  { %21252 = vmatprep.subr.bf16.mxu1 %v22858_v11  ;;  %17286 = vmatmul.mubr.bf16.vlgmr.msra.gmra.mrb[176].mxu0 %v4250_v10  ;;  %v22900_v10 = vld [vmem:[%s28130_s1 + $0x2e10] sm:$0xff]  }
 0x5a4   :  { %21231 = vmatpush3.bf16.msra.mxu0 %v22859_v13  ;;  %17365 = vmatprep.mubr.bf16.mxu0 %v4271_v21  ;;  %v22901_v11 = vld [vmem:[%s28130_s1 + $0x2e90] sm:$0xff]   ;;  %v22903_v13 = vld [vmem:[%s28130_s1 + $0x2ed8] sm:$0xff]   ;;  %v22911_v21 = vld [vmem:[%s28130_s1 + $0x2ee8] sm:$0xff]  }
 0x5a5   :  { %17326 = vmatmul.mubr.bf16.vlgmr.msra.gmra.mrb[176].mxu1 %v4272_v17  ;;  %21232 = vmatprep.subr.bf16.mxu0 %v22861_v18  ;;  %v22907_v17 = vld [vmem:[%s28130_s1 + $0x2ee0] sm:$0xff]  }
 0x5a6   :  { %21253 = vmatpush3.bf16.msra.mxu1 %v22860_v15  ;;  %17405 = vmatprep.mubr.bf16.mxu1 %v4275_v24  ;;  %v22905_v15 = vld [vmem:[%s28130_s1 + $0x2e98] sm:$0xff]   ;;  %v22908_v18 = vld [vmem:[%s28130_s1 + $0x2e20] sm:$0xff]  }
 0x5a7   :  { %21254 = vmatprep.subr.bf16.mxu1 %v22862_v20  ;;  %v22910_v20 = vld [vmem:[%s28130_s1 + $0x2e68] sm:$0xff]  }
 0x5a8   :  { %21233 = vmatpush3.bf16.msra.mxu0 %v22863_v22 }
 0x5a9   :  { %21234 = vmatprep.subr.bf16.mxu0 %v22865_v25  ;;  %v22914_v25 = vld [vmem:[%s28130_s1 + $0x2e70] sm:$0xff]  }
 0x5aa   :  { %21255 = vmatpush3.bf16.msra.mxu1 %v22864_v23  ;;  %v22912_v23 = vld [vmem:[%s28130_s1 + $0x2e28] sm:$0xff]  }
 0x5ab   :  { %21256 = vmatprep.subr.bf16.mxu1 %v22866_v26 }
 0x5ac   :  { %21235 = vmatpush3.bf16.msra.mxu0 %v22867_v27 }
 0x5ad   :  { %21236 = vmatprep.subr.bf16.mxu0 %v22869_v29 }
 0x5ae   :  { %21257 = vmatpush3.bf16.msra.mxu1 %v22868_v28 }
 0x5af   :  { %21258 = vmatprep.subr.bf16.mxu1 %v22870_v30  ;;  %v22913_v30 = vld [vmem:[%s28130_s1 + $0x2ea8] sm:$0xff]  }
 0x5b0   :  { %21237 = vmatpush3.bf16.msra.mxu0 %v22871_v31 }
 0x5b1   :  { %21238 = vmatprep.subr.bf16.mxu0 %v22873_v33 }
 0x5b2   :  { %21259 = vmatpush3.bf16.msra.mxu1 %v22872_v32  ;;  %v22915_v32 = vld [vmem:[%s28130_s1 + $0x2ef0] sm:$0xff]  }
 0x5b3   :  { %21260 = vmatprep.subr.bf16.mxu1 %v22874_v34 }
 0x5b4   :  { %21239 = vmatpush3.bf16.msra.mxu0 %v22875_v35 }
 0x5b5   :  { %21240 = vmatprep.subr.bf16.mxu0 %v22877_v37 }
 0x5b6   :  { %v20938_v39 = vpop.f32.mrb[152].mxu0  ;;  %21261 = vmatpush3.bf16.msra.mxu1 %v22876_v36  ;;  %v22916_v36 = vld [vmem:[%s28130_s1 + $0x2e30] sm:$0xff]  }
 0x5b7   :  { %v20939_v42 = vpop.f32.mrb[153].mxu0  ;;  %21262 = vmatprep.subr.bf16.mxu1 %v22878_v38  ;;  %v22918_v38 = vld [vmem:[%s28130_s1 + $0x2e78] sm:$0xff]  }
 0x5b8   :  { %v20960_v44 = vpop.f32.mrb[152].mxu1  ;;  %v20940_v45 = vadd.f32 %v20939_v42, %v20938_v39  ;;  %v20941_v46 = vpop.f32.mrb[154].mxu0  ;;  %21241 = vmatpush3.bf16.msra.mxu0 %v22879_v40  ;;  %v22917_v40 = vld [vmem:[%s28130_s1 + $0x2eb0] sm:$0xff]   ;;  %v22919_v42 = vld [vmem:[%s28130_s1 + $0x2ef8] sm:$0xff]  }
 0x5b9   :  { %v20961_v49 = vpop.f32.mrb[153].mxu1  ;;  %v20942_v50 = vpop.f32.mrb[155].mxu0  ;;  %21242 = vmatprep.subr.bf16.mxu0 %v22881_v47  ;;  %v22922_v46 = vld [vmem:[%s28130_s1 + $0x2f40] sm:$0xff]  }
 0x5ba   :  { %v16808_v51 = vadd.f32 %v20940_v45, %v27753_v0  ;;  %v20962_v52 = vadd.f32 %v20961_v49, %v20960_v44  ;;  %v20963_v53 = vpop.f32.mrb[154].mxu1  ;;  %21263 = vmatpush3.bf16.msra.mxu1 %v22880_v43  ;;  %v22891_v0 = vld [vmem:[%s28130_s1 + $0x2ec0] sm:$0xff]   ;;  %v22920_v43 = vld [vmem:[%s28130_s1 + $0x2e38] sm:$0xff]  }
 0x5bb   :  { %v20964_v55 = vpop.f32.mrb[155].mxu1  ;;  %21264 = vmatprep.subr.bf16.mxu1 %v22882_v48  ;;  %v45_v44 = vld [vmem:[%s28129_s0 + $0xb8] sm:$0xff]  ;;  %v22924_v53 = vld [vmem:[%s28130_s1 + $0x2f00] sm:$0xff]  }
 0x5bc   :  { %v27864_v57 = vadd.f32 %v20962_v52, %v16808_v51  ;;  %21243 = vmatpush3.bf16.msra.mxu0 %v22883_v54  ;;  %v4283_v45 = vrot.slane %v45_v44, %v23126_v41  ;;  %v4276_v47 = vcombine.high %v45_v44, %v45_v44  ;;  %v22921_v48 = vld [vmem:[%s28130_s1 + $0x2eb8] sm:$0xff]   ;;  %v22923_v51 = vld [vmem:[%s28130_s1 + $0x2fc0] sm:$0xff]  }
 0x5bd   :  { %21244 = vmatprep.subr.bf16.mxu0 %v22885_v58  ;;  %v22925_v55 = vld [vmem:[%s28130_s1 + $0x2f80] sm:$0xff]   ;;  %v22926_v58 = vld [vmem:[%s28130_s1 + $0x2f48] sm:$0xff]  }
 0x5be   :  { %21265 = vmatpush3.bf16.msra.mxu1 %v22884_v56  ;;  %v4291_v49 = vcombine.high %v4283_v45, %v4283_v45  ;;  %v4299_v50 = vrot.slane %v4283_v45, %v23126_v41  ;;  %v27991_v52 = vrot.slane %v4276_v47, %v23126_v41 }
 0x5bf   :  { %21266 = vmatprep.subr.bf16.mxu1 %v22886_v59 }
 0x5c0   :  { %21245 = vmatpush3.bf16.msra.mxu0 %v22887_v60  ;;  %v4313_v54 = vrot.slane %v4291_v49, %v23126_v41  ;;  %v4292_v56 = vcombine.high %v27991_v52, %v27991_v52  ;;  %v22927_v60 = vld [vmem:[%s28130_s1 + $0x2fc8] sm:$0xff]  }
 0x5c1   :  { %21274 = vmatprep.subr.bf16.mxu0 %v22890_v63  ;;  %v22929_v63 = vld [vmem:[%s28130_s1 + $0x2f88] sm:$0xff]  }
 0x5c2   :  { %21267 = vmatpush3.bf16.msra.mxu1 %v22888_v61  ;;  %v4323_v59 = vcombine.high %v4313_v54, %v4313_v54  ;;  %v4320_v61 = vrot.slane %v4292_v56, %v23126_v41 }
 0x5c3   :  { %17366 = vmatmul.mubr.bf16.vlgmr.msra.gmra.mrb[180].mxu0 %v4257_v62  ;;  %21296 = vmatprep.subr.bf16.mxu1 %v22891_v0  ;;  %v22928_v62 = vld [vmem:[%s28130_s1 + $0x2f08] sm:$0xff]  }
 0x5c4   :  { %21275 = vmatpush3.bf16.msra.mxu0 %v22892_v1  ;;  %17445 = vmatprep.mubr.bf16.mxu0 %v4313_v54  ;;  %v4324_v0 = vcombine.high %v4320_v61, %v4320_v61  ;;  %v22930_v1 = vld [vmem:[%s28130_s1 + $0x2f50] sm:$0xff]  }
 0x5c5   :  { %17406 = vmatmul.mubr.bf16.vlgmr.msra.gmra.mrb[180].mxu1 %v4273_v3  ;;  %21276 = vmatprep.subr.bf16.mxu0 %v22894_v4  ;;  %v22932_v3 = vld [vmem:[%s28130_s1 + $0x2f10] sm:$0xff]  }
 0x5c6   :  { %21297 = vmatpush3.bf16.msra.mxu1 %v22893_v2  ;;  %17485 = vmatprep.mubr.bf16.mxu1 %v4323_v59  ;;  %v22931_v2 = vld [vmem:[%s28130_s1 + $0x2fd0] sm:$0xff]  }
 0x5c7   :  { %21298 = vmatprep.subr.bf16.mxu1 %v22895_v5  ;;  %v22933_v4 = vld [vmem:[%s28130_s1 + $0x2f90] sm:$0xff]   ;;  %v22934_v5 = vld [vmem:[%s28130_s1 + $0x2f58] sm:$0xff]  }
 0x5c8   :  { %21277 = vmatpush3.bf16.msra.mxu0 %v22896_v6  ;;  %v22935_v6 = vld [vmem:[%s28130_s1 + $0x2fd8] sm:$0xff]  }
 0x5c9   :  { %21278 = vmatprep.subr.bf16.mxu0 %v22898_v8  ;;  %v22937_v8 = vld [vmem:[%s28130_s1 + $0x2f98] sm:$0xff]  }
 0x5ca   :  { %21299 = vmatpush3.bf16.msra.mxu1 %v22897_v7  ;;  %v22936_v7 = vld [vmem:[%s28130_s1 + $0x2f18] sm:$0xff]  }
 0x5cb   :  { %21300 = vmatprep.subr.bf16.mxu1 %v22899_v9  ;;  %v22938_v9 = vld [vmem:[%s28130_s1 + $0x2f60] sm:$0xff]  }
 0x5cc   :  { %21279 = vmatpush3.bf16.msra.mxu0 %v22900_v10  ;;  %v22939_v10 = vld [vmem:[%s28130_s1 + $0x2fe0] sm:$0xff]  }
 0x5cd   :  { %21280 = vmatprep.subr.bf16.mxu0 %v22902_v12  ;;  %v22941_v12 = vld [vmem:[%s28130_s1 + $0x2fa0] sm:$0xff]  }
 0x5ce   :  { %21301 = vmatpush3.bf16.msra.mxu1 %v22901_v11  ;;  %v22940_v11 = vld [vmem:[%s28130_s1 + $0x2f20] sm:$0xff]  }
 0x5cf   :  { %21302 = vmatprep.subr.bf16.mxu1 %v22903_v13  ;;  %v22942_v13 = vld [vmem:[%s28130_s1 + $0x2f68] sm:$0xff]  }
 0x5d0   :  { %21281 = vmatpush3.bf16.msra.mxu0 %v22904_v14  ;;  %v22943_v14 = vld [vmem:[%s28130_s1 + $0x2fe8] sm:$0xff]  }
 0x5d1   :  { %21282 = vmatprep.subr.bf16.mxu0 %v22906_v16  ;;  %v22944_v16 = vld [vmem:[%s28130_s1 + $0x2f28] sm:$0xff]  }
 0x5d2   :  { %21303 = vmatpush3.bf16.msra.mxu1 %v22905_v15 }
 0x5d3   :  { %21304 = vmatprep.subr.bf16.mxu1 %v22907_v17 }
 0x5d4   :  { %21283 = vmatpush3.bf16.msra.mxu0 %v22908_v18  ;;  %v22945_v18 = vld [vmem:[%s28130_s1 + $0x2fa8] sm:$0xff]  }
 0x5d5   :  { %21284 = vmatprep.subr.bf16.mxu0 %v22910_v20 }
 0x5d6   :  { %v20982_v22 = vpop.f32.mrb[156].mxu0  ;;  %21305 = vmatpush3.bf16.msra.mxu1 %v22909_v19 }
 0x5d7   :  { %v20983_v24 = vpop.f32.mrb[157].mxu0  ;;  %21306 = vmatprep.subr.bf16.mxu1 %v22911_v21 }
 0x5d8   :  { %v21004_v26 = vpop.f32.mrb[156].mxu1  ;;  %v20984_v27 = vadd.f32 %v20983_v24, %v20982_v22  ;;  %v20985_v28 = vpop.f32.mrb[158].mxu0  ;;  %21285 = vmatpush3.bf16.msra.mxu0 %v22912_v23  ;;  %v22946_v22 = vld [vmem:[%s28130_s1 + $0x2f70] sm:$0xff]  }
 0x5d9   :  { %v21005_v29 = vpop.f32.mrb[157].mxu1  ;;  %v20986_v31 = vpop.f32.mrb[159].mxu0  ;;  %21286 = vmatprep.subr.bf16.mxu0 %v22914_v25  ;;  %v22947_v23 = vld [vmem:[%s28130_s1 + $0x2ff0] sm:$0xff]  }
 0x5da   :  { %v16888_v33 = vadd.f32 %v20984_v27, %v27864_v57  ;;  %v21006_v34 = vadd.f32 %v21005_v29, %v21004_v26  ;;  %v21007_v35 = vpop.f32.mrb[158].mxu1  ;;  %21307 = vmatpush3.bf16.msra.mxu1 %v22913_v30  ;;  %v4321_v57 = vcombine.high %v4299_v50, %v4299_v50  ;;  %v22948_v29 = vld [vmem:[%s28130_s1 + $0x2f30] sm:$0xff]  }
 0x5db   :  { %v21008_v37 = vpop.f32.mrb[159].mxu1  ;;  %21308 = vmatprep.subr.bf16.mxu1 %v22915_v32  ;;  %v22949_v31 = vld [vmem:[%s28130_s1 + $0x2fb0] sm:$0xff]   ;;  %v22952_v35 = vld [vmem:[%s28130_s1 + $0x2f38] sm:$0xff]  }
 0x5dc   :  { %v27965_v39 = vadd.f32 %v21006_v34, %v16888_v33  ;;  %21287 = vmatpush3.bf16.msra.mxu0 %v22916_v36  ;;  %v22950_v33 = vld [vmem:[%s28130_s1 + $0x2f78] sm:$0xff]   ;;  %v4306_v37 = vrot.slane %v27991_v52, %v23126_v41 }
 0x5dd   :  { %21288 = vmatprep.subr.bf16.mxu0 %v22918_v38  ;;  %v22951_v34 = vld [vmem:[%s28130_s1 + $0x2ff8] sm:$0xff]  }
 0x5de   :  { %21309 = vmatpush3.bf16.msra.mxu1 %v22917_v40  ;;  %v22953_v36 = vld [vmem:[%s28130_s1 + $0x2fb8] sm:$0xff]   ;;  %v4322_v38 = vcombine.high %v4306_v37, %v4306_v37 }
 0x5df   :  { %21310 = vmatprep.subr.bf16.mxu1 %v22919_v42 }
 0x5e0   :  { %21289 = vmatpush3.bf16.msra.mxu0 %v22920_v43 }
 0x5e1   :  { %21318 = vmatprep.subr.bf16.mxu0 %v22922_v46 }
 0x5e2   :  { %21311 = vmatpush3.bf16.msra.mxu1 %v22921_v48 }
 0x5e3   :  { %21340 = vmatprep.subr.bf16.mxu1 %v22923_v51  ;;  %17446 = vmatmul.mubr.bf16.vlgmr.msra.gmra.mrb[184].mxu0 %v4299_v50 }
 0x5e4   :  { %21319 = vmatpush3.bf16.msra.mxu0 %v22924_v53  ;;  %17525 = vmatprep.mubr.bf16.mxu0 %v4320_v61 }
 0x5e5   :  { %17486 = vmatmul.mubr.bf16.vlgmr.msra.gmra.mrb[184].mxu1 %v4321_v57  ;;  %21320 = vmatprep.subr.bf16.mxu0 %v22926_v58 }
 0x5e6   :  { %21341 = vmatpush3.bf16.msra.mxu1 %v22925_v55  ;;  %17565 = vmatprep.mubr.bf16.mxu1 %v4324_v0 }
 0x5e7   :  { %21342 = vmatprep.subr.bf16.mxu1 %v22927_v60 }
 0x5e8   :  { %21321 = vmatpush3.bf16.msra.mxu0 %v22928_v62 }
 0x5e9   :  { %21322 = vmatprep.subr.bf16.mxu0 %v22930_v1 }
 0x5ea   :  { %21343 = vmatpush3.bf16.msra.mxu1 %v22929_v63 }
 0x5eb   :  { %21344 = vmatprep.subr.bf16.mxu1 %v22931_v2 }
 0x5ec   :  { %21323 = vmatpush3.bf16.msra.mxu0 %v22932_v3 }
 0x5ed   :  { %21324 = vmatprep.subr.bf16.mxu0 %v22934_v5 }
 0x5ee   :  { %21345 = vmatpush3.bf16.msra.mxu1 %v22933_v4 }
 0x5ef   :  { %21346 = vmatprep.subr.bf16.mxu1 %v22935_v6 }
 0x5f0   :  { %21325 = vmatpush3.bf16.msra.mxu0 %v22936_v7 }
 0x5f1   :  { %21326 = vmatprep.subr.bf16.mxu0 %v22938_v9 }
 0x5f2   :  { %21347 = vmatpush3.bf16.msra.mxu1 %v22937_v8 }
 0x5f3   :  { %21348 = vmatprep.subr.bf16.mxu1 %v22939_v10 }
 0x5f4   :  { %21327 = vmatpush3.bf16.msra.mxu0 %v22940_v11 }
 0x5f5   :  { %21328 = vmatprep.subr.bf16.mxu0 %v22942_v13 }
 0x5f6   :  { %v21026_v15 = vpop.f32.mrb[160].mxu0  ;;  %21349 = vmatpush3.bf16.msra.mxu1 %v22941_v12 }
 0x5f7   :  { %v21027_v17 = vpop.f32.mrb[161].mxu0  ;;  %21350 = vmatprep.subr.bf16.mxu1 %v22943_v14 }
 0x5f8   :  { %v21048_v19 = vpop.f32.mrb[160].mxu1  ;;  %v21028_v20 = vadd.f32 %v21027_v17, %v21026_v15  ;;  %v21029_v21 = vpop.f32.mrb[162].mxu0  ;;  %21329 = vmatpush3.bf16.msra.mxu0 %v22944_v16 }
 0x5f9   :  { %v21049_v24 = vpop.f32.mrb[161].mxu1  ;;  %v21030_v25 = vpop.f32.mrb[163].mxu0  ;;  %21330 = vmatprep.subr.bf16.mxu0 %v22946_v22 }
 0x5fa   :  { %v16968_v26 = vadd.f32 %v21028_v20, %v27965_v39  ;;  %v21050_v27 = vadd.f32 %v21049_v24, %v21048_v19  ;;  %v21051_v28 = vpop.f32.mrb[162].mxu1  ;;  %21351 = vmatpush3.bf16.msra.mxu1 %v22945_v18 }
 0x5fb   :  { %v21052_v30 = vpop.f32.mrb[163].mxu1  ;;  %21352 = vmatprep.subr.bf16.mxu1 %v22947_v23 }
 0x5fc   :  { %v17008_v32 = vadd.f32 %v21050_v27, %v16968_v26  ;;  %21331 = vmatpush3.bf16.msra.mxu0 %v22948_v29 }
 0x5fd   :  { %21332 = vmatprep.subr.bf16.mxu0 %v22950_v33 }
 0x5fe   :  { %21353 = vmatpush3.bf16.msra.mxu1 %v22949_v31 }
 0x5ff   :  { %21354 = vmatprep.subr.bf16.mxu1 %v22951_v34 }
 0x600   :  { %21333 = vmatpush3.bf16.msra.mxu0 %v22952_v35 }
 0x601   :  { %10 = vsyncpa [#allocation3], 0  ;;  %v22955_v63 = vld [vmem:[%s28132_s3] sm:$0xff]   ;;  %v22988_v0 = vmov 0.0   ;;  %v22956_v1 = vld [vmem:[%s28132_s3 + $0x8] sm:$0xff]   ;;  %vm22989_vm0 = vmmov 0  }
 0x602   :  { %21355 = vmatpush3.bf16.msra.mxu1 %v22953_v36  ;;  %21371 = vmatprep.subr.bf16.mxu0 %v22988_v0  ;;  %v22957_v2 = vld [vmem:[%s28132_s3 + $0x10] sm:$0xff]   ;;  %v22958_v3 = vld [vmem:[%s28132_s3 + $0x18] sm:$0xff]   ;;  %v22959_v4 = vld [vmem:[%s28132_s3 + $0x20] sm:$0xff]   ;;  %s22990_s27 = smov [#allocation2]   ;;  %vm17688_vm2 = vcmask 9216  }
 0x603   :  { %17526 = vmatmul.mubr.bf16.vlgmr.msra.gmra.mrb[188].mxu0 %v4306_v37  ;;  %v22960_v15 = vld [vmem:[%s28132_s3 + $0x28] sm:$0xff]   ;;  %v22961_v18 = vld [vmem:[%s28132_s3 + $0x30] sm:$0xff]   ;;  %v22962_v19 = vld [vmem:[%s28132_s3 + $0x38] sm:$0xff]   ;;  %s17696_s28 = sshll.u32 %s22990_s27, 4  ;;  %s17697_s28 = int_to_ptr.vmem [resolvable:$true] %s17696_s28 }
 0x604   :  { %21372 = vmatpush3.bf16.msra.mxu0 %v22955_v63  ;;  %21387 = vmatprep.mubr.msk.bf16.mxu0 %vm22989_vm0, %v22988_v0  ;;  %s22963_s29 = scalar_lea.vmem %s17697_s28, 32  ;;  %p22968_p1 = scmp.lt.s32.totalorder %s17697_s28, %s17697_s28 }
 0x605   :  { %17566 = vmatmul.mubr.bf16.vlgmr.msra.gmra.mrb[188].mxu1 %v4322_v38  ;;  %21373 = vmatprep.subr.bf16.mxu0 %v22988_v0  ;;  %p22964_p0 = scmp.ne.s32.totalorder %s17697_s28, %s22963_s29  ;;  %p22969_p2 = scmp.lt.s32.totalorder %s22963_s29, %s22963_s29 }
 0x607   :  { %p22970_p3 = por %p22969_p2, %p22968_p1 }
 0x608   :  { %21374 = vmatpush3.bf16.msra.mxu0 %v22956_v1 }
 0x609   :  { %21375 = vmatprep.subr.bf16.mxu0 %v22988_v0  ;;  %p22971_p4 = pnand %p22970_p3, %p22964_p0 }
 0x60c   :  { %21376 = vmatpush3.bf16.msra.mxu0 %v22957_v2 }
 0x60d   :  { %21377 = vmatprep.subr.bf16.mxu0 %v22988_v0 }
 0x610   :  { %21378 = vmatpush3.bf16.msra.mxu0 %v22958_v3 }
 0x611   :  { %21379 = vmatprep.subr.bf16.mxu0 %v22988_v0 }
 0x614   :  { %21380 = vmatpush3.bf16.msra.mxu0 %v22959_v4 }
 0x615   :  { %21381 = vmatprep.subr.bf16.mxu0 %v22988_v0 }
 0x616   :  { %v21070_v39 = vpop.f32.mrb[164].mxu0 }
 0x617   :  { %v21071_v40 = vpop.f32.mrb[165].mxu0 }
 0x618   :  { %v21092_v42 = vpop.f32.mrb[164].mxu1  ;;  %v21072_v43 = vadd.f32 %v21071_v40, %v21070_v39  ;;  %v21073_v44 = vpop.f32.mrb[166].mxu0  ;;  %21382 = vmatpush3.bf16.msra.mxu0 %v22960_v15 }
 0x619   :  { %v21093_v45 = vpop.f32.mrb[165].mxu1  ;;  %v21074_v46 = vpop.f32.mrb[167].mxu0  ;;  %21383 = vmatprep.subr.bf16.mxu0 %v22988_v0 }
 0x61a   :  { %v17048_v47 = vadd.f32 %v21072_v43, %v17008_v32  ;;  %v21094_v48 = vadd.f32 %v21093_v45, %v21092_v42  ;;  %v21095_v49 = vpop.f32.mrb[166].mxu1 }
 0x61b   :  { %v21096_v50 = vpop.f32.mrb[167].mxu1 }
 0x61c   :  { %v17088_v41 = vadd.f32 %v21094_v48, %v17048_v47  ;;  %21384 = vmatpush3.bf16.msra.mxu0 %v22961_v18 }
 0x61d   :  { %21385 = vmatprep.subr.bf16.mxu0 %v22988_v0 }
 0x620   :  { %21386 = vmatpush3.bf16.msra.mxu0 %v22962_v19 }
 0x636   :  { %v21114_v51 = vpop.f32.mrb[168].mxu0 }
 0x637   :  { %v21115_v52 = vpop.f32.mrb[169].mxu0 }
 0x638   :  { %v21136_v53 = vpop.f32.mrb[168].mxu1  ;;  %v21116_v54 = vadd.f32 %v21115_v52, %v21114_v51  ;;  %v21117_v55 = vpop.f32.mrb[170].mxu0 }
 0x639   :  { %v21137_v56 = vpop.f32.mrb[169].mxu1  ;;  %v21118_v57 = vpop.f32.mrb[171].mxu0 }
 0x63a   :  { %v17128_v58 = vadd.f32 %v21116_v54, %v17088_v41  ;;  %v21138_v59 = vadd.f32 %v21137_v56, %v21136_v53  ;;  %v21139_v60 = vpop.f32.mrb[170].mxu1 }
 0x63b   :  { %v21140_v61 = vpop.f32.mrb[171].mxu1 }
 0x63c   :  { %v17168_v62 = vadd.f32 %v21138_v59, %v17128_v58 }
 0x656   :  { %v21158_v5 = vpop.f32.mrb[172].mxu0 }
 0x657   :  { %v21159_v6 = vpop.f32.mrb[173].mxu0 }
 0x658   :  { %v21180_v7 = vpop.f32.mrb[172].mxu1  ;;  %v21160_v8 = vadd.f32 %v21159_v6, %v21158_v5  ;;  %v21161_v9 = vpop.f32.mrb[174].mxu0 }
 0x659   :  { %v21181_v10 = vpop.f32.mrb[173].mxu1  ;;  %v21162_v11 = vpop.f32.mrb[175].mxu0 }
 0x65a   :  { %v17208_v12 = vadd.f32 %v21160_v8, %v17168_v62  ;;  %v21182_v13 = vadd.f32 %v21181_v10, %v21180_v7  ;;  %v21183_v14 = vpop.f32.mrb[174].mxu1  ;;  %v19241_v7 = vld [vmem:[%s28133_s4] ss:$0 sm:$0xff] }
 0x65b   :  { %v21184_v16 = vpop.f32.mrb[175].mxu1 }
 0x65c   :  { %v17248_v17 = vadd.f32 %v21182_v13, %v17208_v12 }
 0x676   :  { %v21202_v20 = vpop.f32.mrb[176].mxu0 }
 0x677   :  { %v21203_v21 = vpop.f32.mrb[177].mxu0 }
 0x678   :  { %v21224_v22 = vpop.f32.mrb[176].mxu1  ;;  %v21204_v23 = vadd.f32 %v21203_v21, %v21202_v20  ;;  %v21205_v24 = vpop.f32.mrb[178].mxu0 }
 0x679   :  { %v21225_v25 = vpop.f32.mrb[177].mxu1  ;;  %v21206_v26 = vpop.f32.mrb[179].mxu0 }
 0x67a   :  { %v17288_v27 = vadd.f32 %v21204_v23, %v17248_v17  ;;  %v21226_v28 = vadd.f32 %v21225_v25, %v21224_v22  ;;  %v21227_v29 = vpop.f32.mrb[178].mxu1 }
 0x67b   :  { %v21228_v30 = vpop.f32.mrb[179].mxu1 }
 0x67c   :  { %v17328_v31 = vadd.f32 %v21226_v28, %v17288_v27 }
 0x696   :  { %v21246_v32 = vpop.f32.mrb[180].mxu0 }
 0x697   :  { %v21247_v33 = vpop.f32.mrb[181].mxu0 }
 0x698   :  { %v21268_v34 = vpop.f32.mrb[180].mxu1  ;;  %v21248_v35 = vadd.f32 %v21247_v33, %v21246_v32  ;;  %v21249_v36 = vpop.f32.mrb[182].mxu0 }
 0x699   :  { %v21269_v37 = vpop.f32.mrb[181].mxu1  ;;  %v21250_v38 = vpop.f32.mrb[183].mxu0 }
 0x69a   :  { %v17368_v39 = vadd.f32 %v21248_v35, %v17328_v31  ;;  %v21270_v40 = vadd.f32 %v21269_v37, %v21268_v34  ;;  %v21271_v42 = vpop.f32.mrb[182].mxu1 }
 0x69b   :  { %v21272_v43 = vpop.f32.mrb[183].mxu1 }
 0x69c   :  { %v17408_v44 = vadd.f32 %v21270_v40, %v17368_v39 }
 0x6b6   :  { %v21290_v45 = vpop.f32.mrb[184].mxu0 }
 0x6b7   :  { %v21291_v46 = vpop.f32.mrb[185].mxu0 }
 0x6b8   :  { %v21312_v47 = vpop.f32.mrb[184].mxu1  ;;  %v21292_v48 = vadd.f32 %v21291_v46, %v21290_v45  ;;  %v21293_v49 = vpop.f32.mrb[186].mxu0 }
 0x6b9   :  { %v21313_v50 = vpop.f32.mrb[185].mxu1  ;;  %v21294_v41 = vpop.f32.mrb[187].mxu0 }
 0x6ba   :  { %v17448_v51 = vadd.f32 %v21292_v48, %v17408_v44  ;;  %v21314_v52 = vadd.f32 %v21313_v50, %v21312_v47  ;;  %v21315_v53 = vpop.f32.mrb[186].mxu1 }
 0x6bb   :  { %v21316_v54 = vpop.f32.mrb[187].mxu1 }
 0x6bc   :  { %v17488_v55 = vadd.f32 %v21314_v52, %v17448_v51 }
 0x6d6   :  { %v21334_v56 = vpop.f32.mrb[188].mxu0 }
 0x6d7   :  { %v21335_v57 = vpop.f32.mrb[189].mxu0 }
 0x6d8   :  { %v21356_v58 = vpop.f32.mrb[188].mxu1  ;;  %v21336_v59 = vadd.f32 %v21335_v57, %v21334_v56  ;;  %v21337_v60 = vpop.f32.mrb[190].mxu0 }
 0x6d9   :  { %v21357_v61 = vpop.f32.mrb[189].mxu1  ;;  %v21338_v62 = vpop.f32.mrb[191].mxu0 }
 0x6da   :  { %v17528_v63 = vadd.f32 %v21336_v59, %v17488_v55  ;;  %v21358_v0 = vadd.f32 %v21357_v61, %v21356_v58  ;;  %v21359_v1 = vpop.f32.mrb[190].mxu1 }
 0x6db   :  { %v21360_v2 = vpop.f32.mrb[191].mxu1 }
 0x6dc   :  { %v17568_v3 = vadd.f32 %v21358_v0, %v17528_v63 }
 0x6de   :  { %vm17573_vm1 = vcmp.ge.f32.partialorder %v17568_v3, 0.0  ;;  %v17574_v4 = vmul.f32 0.1, %v17568_v3 }
 0x6e0   :  { %v17575_v5 = vsel %vm17573_vm1, %v17568_v3, %v17574_v4 }
 0x6e1   :  { %v17576_v6 = vpack.c.bf16 %v17575_v5, %v17575_v5 }
 0x6e3   :  { %21388 = vmatmul.mubr.bf16.vlgmr.msra.gmra.mrb[192].mxu0 %v17576_v6 }
 0x7b6   :  { %v17682_v8 = vpop.f32.mrb[192].mxu0 }
 0x7b7   :  { %v17683_v9 = vadd.f32 %v19241_v7, %v17682_v8  ;;  %v21389_v10 = vpop.f32.mrb[193].mxu0 }
 0x7b8   :  { %v17685_v11 = vpop.f32.mrb[194].mxu0 }
 0x7b9   :  { %v21390_v12 = vpop.f32.mrb[195].mxu0  ;;  %17689 = vst.msk [vmem:[#allocation2] sm:$0x3] %vm17688_vm2, %v17683_v9 }
 0x7ba   :  { %22974 = shalt.err (!%p22971_p4)
}
 0x7bb   :  { %s22975_s4 = scalar_lea.hbm %s28134_s5, 32 }
 0x7bc   :  { %p22976_p5 = scmp.ne.s32.totalorder %s28134_s5, %s22975_s4  ;;  %p22979_p6 = scmp.lt.u32.totalorder %s22975_s4, %s28134_s5 }
 0x7be   :  { %p22981_p7 = pnand %p22979_p6, %p22976_p5 }
 0x7c0   :  { %22984 = shalt.err (!%p22981_p7)
}
 0x7c1   :  { %17699 = dma.vmem_to_hbm [thread:$0]  %s17697_s28, 32, %s28134_s5, [#allocation3]  }
 0x7c2   :  { %22985 = dma.done.wait [#allocation3], 32  }
 0x7c3   :  { %22986 = vsyncadd [#allocation3], 4294967264 }
 0x7c4   :  { %17703 = vsyncpa [#allocation3], 1 }

</bundles_post_ra>
